<compile_context>
chip_gen: v7x
topology: tpu7x:2x2x1
jax: 0.10.0
libtpu: 0.0.40
codegen_flags: <defaults>
</compile_context>

<pallas_src>
import functools

import jax
import jax.numpy as jnp
from jax.experimental import pallas as pl
from jax.experimental.pallas import tpu as pltpu

# ----- scaled-down synthetic model sizes -----
BATCH = 2
SEQ = 16
VOCAB = 128
HIDDEN = 128          # stands in for HIDDEN_STATE_SIZE = 768
FFN = 256
NUM_LAYERS = 2
SPAN_EMB = 512        # span_embedding_size in SpanPairClassifier


# -------------------- fused encoder kernel --------------------

def _bert_encoder_kernel(x_ref, emb_g_ref, emb_b_ref,
                         wqkv_ref, bqkv_ref, wo_ref, bo_ref,
                         ln1g_ref, ln1b_ref, wff1_ref, bff1_ref,
                         wff2_ref, bff2_ref, ln2g_ref, ln2b_ref,
                         o_ref, *, scale, eps):
    H = x_ref.shape[-1]

    def ln(t, g, b):
        mu = jnp.mean(t, axis=-1, keepdims=True)
        var = jnp.mean(jnp.square(t - mu), axis=-1, keepdims=True)
        return (t - mu) * jax.lax.rsqrt(var + eps) * g + b

    def dot(a, b):
        return jnp.dot(a, b, preferred_element_type=jnp.float32)

    xf = ln(x_ref[0], emb_g_ref[...], emb_b_ref[...])            # [S, H]
    num_layers = wqkv_ref.shape[0]
    for l in range(num_layers):                                  # static unroll (L=2)
        # fused QKV projection: one [H, 3H] matmul
        qkv = dot(xf, wqkv_ref[l]) + bqkv_ref[l]                 # [S, 3H]
        q = qkv[:, :H]
        k = qkv[:, H:2 * H]
        v = qkv[:, 2 * H:]
        # scores without materializing k.T: contract last axes of q and k
        s = jax.lax.dot_general(q, k, (((1,), (1,)), ((), ())),
                                preferred_element_type=jnp.float32) * scale   # [S, S]
        m = jnp.max(s, axis=-1, keepdims=True)
        p = jnp.exp(s - m)
        p = p / jnp.sum(p, axis=-1, keepdims=True)
        attn = dot(p, v)                                         # [S, H]
        proj = dot(attn, wo_ref[l]) + bo_ref[l]
        xf = ln(xf + proj, ln1g_ref[l], ln1b_ref[l])
        ff = jnp.maximum(dot(xf, wff1_ref[l]) + bff1_ref[l], 0.0)
        ff = dot(ff, wff2_ref[l]) + bff2_ref[l]
        xf = ln(xf + ff, ln2g_ref[l], ln2b_ref[l])
    o_ref[0] = xf


def bert_encode(params, seq_ids):
    """Full BERT-style encoder in a single pallas_call, gridded over batch."""
    B, S = seq_ids.shape
    H, F, L = HIDDEN, FFN, NUM_LAYERS
    # embedding lookup stays in plain JAX (data-dependent gather)
    x = params["tok_emb"][seq_ids] + params["pos_emb"][None, :, :]    # [B, S, H] f32

    weight_names = ("emb_ln_g", "emb_ln_b", "wqkv", "bqkv", "wo", "bo",
                    "ln1_g", "ln1_b", "w_ff1", "b_ff1", "w_ff2", "b_ff2",
                    "ln2_g", "ln2_b")
    weights = [params[n] for n in weight_names]

    def full_spec(arr):
        nd = arr.ndim
        return pl.BlockSpec(arr.shape, lambda b: (0,) * nd)

    flops = 2 * B * L * (S * H * 3 * H + 2 * S * S * H + S * H * H + 2 * S * H * F)
    bytes_accessed = 4 * (2 * B * S * H + L * (3 * H * H + H * H + 2 * H * F))
    cost = pl.CostEstimate(flops=flops, transcendentals=B * L * S * S,
                           bytes_accessed=bytes_accessed)

    kernel = functools.partial(_bert_encoder_kernel,
                               scale=1.0 / float(H) ** 0.5, eps=1e-12)
    return pl.pallas_call(
        kernel,
        out_shape=jax.ShapeDtypeStruct((B, S, H), jnp.float32),
        grid=(B,),
        in_specs=[pl.BlockSpec((1, S, H), lambda b: (b, 0, 0))] +
                 [full_spec(w) for w in weights],
        out_specs=pl.BlockSpec((1, S, H), lambda b: (b, 0, 0)),
        compiler_params=pltpu.CompilerParams(dimension_semantics=("parallel",)),
        cost_estimate=cost,
    )(x, *weights)


# -------------------- fused LM-head + sentence-score kernel --------------------

def _lm_score_kernel(hid_ref, wlm_ref, blm_ref, ids_ref, o_ref):
    B, S, H = hid_ref.shape
    V = wlm_ref.shape[1]
    h2 = hid_ref[...].reshape(B * S, H)
    logits = (jnp.dot(h2, wlm_ref[...], preferred_element_type=jnp.float32)
              + blm_ref[...]).reshape(B, S, V)
    # torch: lm_output.log_softmax(1) -> normalize over the SEQUENCE axis (dim=1)
    m = jnp.max(logits, axis=1, keepdims=True)
    z = logits - m
    lse = jnp.log(jnp.sum(jnp.exp(z), axis=1, keepdims=True))    # [B, 1, V]
    log_lm = z - lse                                             # [B, S, V]
    # gather(dim=2) via one-hot select (toy V=128; at real vocab restructure as a gather)
    ids = ids_ref[...]                                           # [B, S] int32
    vocab_iota = jax.lax.broadcasted_iota(jnp.int32, (B, S, V), 2)
    onehot = vocab_iota == ids[:, :, None]
    token_scores = jnp.sum(jnp.where(onehot, log_lm, 0.0), axis=2)   # [B, S]
    score = jnp.sum(token_scores, axis=1, keepdims=True)             # [B, 1]
    # lane-dense store: broadcast score across all 128 lanes; wrapper slices col 0.
    o_ref[...] = jnp.broadcast_to(score, o_ref.shape)


def lm_sentence_score(params, hidden, sentence_ids):
    """LM head matmul + log_softmax(dim=1) + gather + sum, fused."""
    B = hidden.shape[0]
    out = pl.pallas_call(
        _lm_score_kernel,
        out_shape=jax.ShapeDtypeStruct((B, 128), jnp.float32),
    )(hidden, params["w_lm"], params["b_lm"], sentence_ids.astype(jnp.int32))
    return out[:, 0]


# -------------------- fused span-pair classifier kernel --------------------

def _span_pair_kernel(sfeat_ref, w0_ref, b0_ref, w1a_ref, w1b_ref, b1_ref,
                      w2_ref, b2_ref, w3_ref, b3_ref, w4_ref, b4_ref, o_ref):
    B2 = sfeat_ref.shape[0]
    B = B2 // 2
    relu = lambda t: jnp.maximum(t, 0.0)
    dot = lambda a, b: jnp.dot(a, b, preferred_element_type=jnp.float32)
    # shared span_embedding applied to the stacked [s1; s2] features in ONE matmul
    e = relu(dot(sfeat_ref[...], w0_ref[...]) + b0_ref[...])     # [2B, 512]
    e1 = e[:B]
    e2 = e[B:]
    # classifier layer 1 on concat([e1, e2]): split-weight trick -> no concat needed
    h = relu(dot(e1, w1a_ref[...]) + dot(e2, w1b_ref[...]) + b1_ref[...])   # [B, 256]
    # tail layers zero-padded to 128 lanes (padding is exact: extra cols stay 0)
    h = relu(dot(h, w2_ref[...]) + b2_ref[...])                  # [B, 128] (64 valid)
    h = relu(dot(h, w3_ref[...]) + b3_ref[...])                  # [B, 128] (16 valid)
    o_ref[...] = dot(h, w4_ref[...]) + b4_ref[...]               # [B, 128] (col 0 valid)


def span_pair_classifier(params, s1_feat, s2_feat):
    B = s1_feat.shape[0]
    s_feat = jnp.concatenate([s1_feat, s2_feat], axis=0)         # [2B, 3 + 2H]
    out = pl.pallas_call(
        _span_pair_kernel,
        out_shape=jax.ShapeDtypeStruct((B, 128), jnp.float32),
    )(s_feat,
      params["w_span"], params["b_span"],
      params["w_c1a"], params["w_c1b"], params["b_c1"],
      params["w_c2p"], params["b_c2p"],
      params["w_c3p"], params["b_c3p"],
      params["w_c4p"], params["b_c4p"])
    return out[:, :1]                                            # [B, 1]


# -------------------- synthetic BERT-style parameters --------------------

def init_params(key):
    keys = iter(jax.random.split(key, 64))
    rnd = lambda shape: 0.02 * jax.random.normal(next(keys), shape, jnp.float32)
    zeros2 = lambda n: jnp.zeros((1, n), jnp.float32)
    L, H = NUM_LAYERS, HIDDEN
    p = {
        "tok_emb": rnd((VOCAB, H)),
        "pos_emb": rnd((SEQ, H)),
        "emb_ln_g": jnp.ones((1, H), jnp.float32),
        "emb_ln_b": jnp.zeros((1, H), jnp.float32),
        # fused QKV weights, stacked over layers
        "wqkv": rnd((L, H, 3 * H)),
        "bqkv": jnp.zeros((L, 1, 3 * H), jnp.float32),
        "wo": rnd((L, H, H)),
        "bo": jnp.zeros((L, 1, H), jnp.float32),
        "ln1_g": jnp.ones((L, 1, H), jnp.float32),
        "ln1_b": jnp.zeros((L, 1, H), jnp.float32),
        "w_ff1": rnd((L, H, FFN)),
        "b_ff1": jnp.zeros((L, 1, FFN), jnp.float32),
        "w_ff2": rnd((L, FFN, H)),
        "b_ff2": jnp.zeros((L, 1, H), jnp.float32),
        "ln2_g": jnp.ones((L, 1, H), jnp.float32),
        "ln2_b": jnp.zeros((L, 1, H), jnp.float32),
        "w_lm": rnd((H, VOCAB)),
        "b_lm": zeros2(VOCAB),
    }
    # SpanPairClassifier weights (torch shapes, HIDDEN scaled down)
    feat = 3 + 2 * H
    p["w_span"] = rnd((feat, SPAN_EMB))
    p["b_span"] = zeros2(SPAN_EMB)
    p["w_c1a"] = rnd((SPAN_EMB, 256))       # first half of the [2*SPAN_EMB, 256] weight
    p["w_c1b"] = rnd((SPAN_EMB, 256))       # second half
    p["b_c1"] = zeros2(256)
    # tail weights zero-padded to 128 lanes for lane-dense MXU tiles (algebraically exact)
    w_c2 = rnd((256, 64))
    w_c3 = rnd((64, 16))
    w_c4 = rnd((16, 1))
    p["w_c2p"] = jnp.pad(w_c2, ((0, 0), (0, 128 - 64)))
    p["b_c2p"] = zeros2(128)
    p["w_c3p"] = jnp.pad(w_c3, ((0, 128 - 64), (0, 128 - 16)))
    p["b_c3p"] = zeros2(128)
    p["w_c4p"] = jnp.pad(w_c4, ((0, 128 - 16), (0, 128 - 1)))
    p["b_c4p"] = zeros2(128)
    return p
    # TODO(synk): at real BERT sizes (H=768, V~30k) N/K-tile the LM-head and FFN weights
    # with an explicit grid and cast MXU inputs to bf16; unnecessary at these toy shapes.


# -------------------- UnBiasedBert forward --------------------

def binary_bias_probe(params, original_sequence, swapped_sequence,
                      orig_label_sequence, swapped_label_sequence):
    B = original_sequence.shape[0]
    # batch the two probe passes through BERT: one encoder call with 2B sequences
    probe = jnp.concatenate([original_sequence, swapped_sequence], axis=0)       # [2B, S]
    labels = jnp.concatenate([orig_label_sequence, swapped_label_sequence], axis=0)
    hidden = bert_encode(params, probe)                                          # [2B, S, H]
    scores = lm_sentence_score(params, hidden, labels)                           # [2B]
    return scores[:B] - scores[B:]


@functools.partial(jax.jit, static_argnames=("use_orig_or_swap_only",))
def unbiased_bert_forward(params, orig_span1, orig_span2, original_probe_sequence,
                          original_label_sequence, swap_span1, swap_span2,
                          swapped_probe_sequence, swapped_label_sequence,
                          use_orig_or_swap_only=None):
    B = original_label_sequence.shape[0]
    if use_orig_or_swap_only is None:
        bias = binary_bias_probe(params, original_probe_sequence, swapped_probe_sequence,
                                 original_label_sequence, swapped_label_sequence)
        use_swapped = (bias > 0)[:, None]
        seq = jnp.where(use_swapped, swapped_label_sequence, original_label_sequence)
        span1 = jnp.where(use_swapped, swap_span1, orig_span1)
        span2 = jnp.where(use_swapped, swap_span2, orig_span2)
    elif use_orig_or_swap_only == "orig":
        bias = None
        seq, span1, span2 = original_label_sequence, orig_span1, orig_span2
    elif use_orig_or_swap_only == "swap":
        bias = None
        seq, span1, span2 = swapped_label_sequence, swap_span1, swap_span2
    else:
        raise ValueError(use_orig_or_swap_only)

    # torch.no_grad(): inference-only here, no gradient machinery needed.
    hidden_states = bert_encode(params, seq)                     # [B, S, H]
    batch_indices = jnp.arange(B)
    s1_start, s1_end = span1[:, 0], span1[:, 1]
    s2_start, s2_end = span2[:, 0], span2[:, 1]
    s1_len = s1_end - s1_start
    s2_len = s2_end - s2_start
    h_s1_start = hidden_states[batch_indices, s1_start]
    h_s1_end = hidden_states[batch_indices, s1_end]
    h_s2_start = hidden_states[batch_indices, s2_start]
    h_s2_end = hidden_states[batch_indices, s2_end]

    f32 = jnp.float32
    s1_feat = jnp.concatenate([s1_start.astype(f32)[:, None], s1_end.astype(f32)[:, None],
                               s1_len.astype(f32)[:, None], h_s1_start, h_s1_end], axis=1)
    s2_feat = jnp.concatenate([s2_start.astype(f32)[:, None], s2_end.astype(f32)[:, None],
                               s2_len.astype(f32)[:, None], h_s2_start, h_s2_end], axis=1)
    out = span_pair_classifier(params, s1_feat, s2_feat)         # [B, 1]
    return out, bias


# -------------------- driver --------------------

if __name__ == "__main__":
    key = jax.random.PRNGKey(0)
    k_params, k_ids1, k_ids2, k_ids3, k_ids4 = jax.random.split(key, 5)
    params = init_params(k_params)

    original_probe_sequence = jax.random.randint(k_ids1, (BATCH, SEQ), 0, VOCAB, jnp.int32)
    swapped_probe_sequence = jax.random.randint(k_ids2, (BATCH, SEQ), 0, VOCAB, jnp.int32)
    original_label_sequence = jax.random.randint(k_ids3, (BATCH, SEQ), 0, VOCAB, jnp.int32)
    swapped_label_sequence = jax.random.randint(k_ids4, (BATCH, SEQ), 0, VOCAB, jnp.int32)

    orig_span1 = jnp.array([[1, 3], [2, 5]], jnp.int32)
    orig_span2 = jnp.array([[6, 8], [7, 9]], jnp.int32)
    swap_span1 = jnp.array([[2, 4], [1, 6]], jnp.int32)
    swap_span2 = jnp.array([[5, 7], [8, 10]], jnp.int32)

    out, bias = unbiased_bert_forward(
        params, orig_span1, orig_span2, original_probe_sequence, original_label_sequence,
        swap_span1, swap_span2, swapped_probe_sequence, swapped_label_sequence,
        use_orig_or_swap_only=None)
    jax.block_until_ready(out)
    jax.block_until_ready(bias)
    assert out.shape == (BATCH, 1) and bias.shape == (BATCH,)
    print("KERNEL_OK")
</pallas_src>

<mosaic_0001>
module attributes {stable_mosaic.version = 11 : i64} {
  func.func @_lm_score_kernel(%arg0: memref<4x16x128xf32, #tpu.memory_space<vmem>>, %arg1: memref<128x128xf32, #tpu.memory_space<vmem>>, %arg2: memref<1x128xf32, #tpu.memory_space<vmem>>, %arg3: memref<4x16xi32, #tpu.memory_space<vmem>>, %arg4: memref<4x128xf32, #tpu.memory_space<vmem>>) attributes {dimension_semantics = [], scalar_prefetch = 0 : i64, scratch_operands = 0 : i64, tpu.core_type = #tpu.core_type<tc>} {
    %c0 = arith.constant 0 : index
    %c0_0 = arith.constant 0 : index
    %c0_1 = arith.constant 0 : index
    %0 = vector.load %arg0[%c0, %c0_0, %c0_1] : memref<4x16x128xf32, #tpu.memory_space<vmem>>, vector<4x16x128xf32>
    %1 = vector.shape_cast %0 : vector<4x16x128xf32> to vector<64x128xf32>
    %c0_2 = arith.constant 0 : index
    %c0_3 = arith.constant 0 : index
    %2 = vector.load %arg1[%c0_2, %c0_3] : memref<128x128xf32, #tpu.memory_space<vmem>>, vector<128x128xf32>
    %cst = arith.constant dense<0.000000e+00> : vector<64x128xf32>
    %3 = tpu.matmul %1, %2, %cst {dimension_numbers = #tpu.dot_dimension_numbers<[1], [0], [0], [1], [0, 0, 1, 1], [], []>} : vector<64x128xf32>, vector<128x128xf32>, vector<64x128xf32> -> vector<64x128xf32>
    %c0_4 = arith.constant 0 : index
    %c0_5 = arith.constant 0 : index
    %4 = vector.load %arg2[%c0_4, %c0_5] : memref<1x128xf32, #tpu.memory_space<vmem>>, vector<1x128xf32>
    %5 = vector.broadcast %4 : vector<1x128xf32> to vector<64x128xf32>
    %6 = arith.addf %3, %5 : vector<64x128xf32>
    %7 = vector.shape_cast %6 : vector<64x128xf32> to vector<4x16x128xf32>
    %cst_6 = arith.constant dense<0xFF800000> : vector<4x128xf32>
    %8 = vector.multi_reduction <maximumf>, %7, %cst_6 [1] : vector<4x16x128xf32> to vector<4x128xf32>
    %9 = vector.shape_cast %8 : vector<4x128xf32> to vector<4x1x128xf32>
    %10 = vector.broadcast %9 : vector<4x1x128xf32> to vector<4x16x128xf32>
    %11 = arith.subf %7, %10 : vector<4x16x128xf32>
    %12 = math.exp %11 : vector<4x16x128xf32>
    %cst_7 = arith.constant dense<0.000000e+00> : vector<4x128xf32>
    %13 = vector.multi_reduction <add>, %12, %cst_7 [1] : vector<4x16x128xf32> to vector<4x128xf32>
    %14 = vector.shape_cast %13 : vector<4x128xf32> to vector<4x1x128xf32>
    %15 = math.log %14 : vector<4x1x128xf32>
    %16 = vector.broadcast %15 : vector<4x1x128xf32> to vector<4x16x128xf32>
    %17 = arith.subf %11, %16 : vector<4x16x128xf32>
    %c0_8 = arith.constant 0 : index
    %c0_9 = arith.constant 0 : index
    %18 = vector.load %arg3[%c0_8, %c0_9] : memref<4x16xi32, #tpu.memory_space<vmem>>, vector<4x16xi32>
    %19 = tpu.iota {dimensions = array<i32: 2>} : vector<4x16x128xi32>
    %20 = vector.shape_cast %18 : vector<4x16xi32> to vector<4x16x1xi32>
    %21 = vector.broadcast %20 : vector<4x16x1xi32> to vector<4x16x128xi32>
    %22 = arith.cmpi eq, %19, %21 : vector<4x16x128xi32>
    %cst_10 = arith.constant 0.000000e+00 : f32
    %23 = vector.broadcast %cst_10 : f32 to vector<4x16x128xf32>
    %24 = arith.select %22, %17, %23 : vector<4x16x128xi1>, vector<4x16x128xf32>
    %cst_11 = arith.constant dense<0.000000e+00> : vector<4x16xf32>
    %25 = vector.multi_reduction <add>, %24, %cst_11 [2] : vector<4x16x128xf32> to vector<4x16xf32>
    %cst_12 = arith.constant dense<0.000000e+00> : vector<4xf32>
    %26 = vector.multi_reduction <add>, %25, %cst_12 [1] : vector<4x16xf32> to vector<4xf32>
    %27 = vector.shape_cast %26 : vector<4xf32> to vector<4x1xf32>
    %28 = vector.shape_cast %27 : vector<4x1xf32> to vector<4x1xf32>
    %29 = vector.broadcast %28 : vector<4x1xf32> to vector<4x128xf32>
    %c0_13 = arith.constant 0 : index
    %c0_14 = arith.constant 0 : index
    %30 = vector.load %arg4[%c0_13, %c0_14] : memref<4x128xf32, #tpu.memory_space<vmem>>, vector<4x128xf32>
    tpu.vector_store %arg4[%c0_13, %c0_14], %29 {strides = array<i32>} : memref<4x128xf32, #tpu.memory_space<vmem>>, vector<4x128xf32>,
    return
  }
}

module attributes {stable_mosaic.version = 11 : i64} {
  func.func @_bert_encoder_kernel(%arg0: i32, %arg1: memref<1x16x128xf32, #tpu.memory_space<vmem>>, %arg2: memref<1x128xf32, #tpu.memory_space<vmem>>, %arg3: memref<1x128xf32, #tpu.memory_space<vmem>>, %arg4: memref<2x128x384xf32, #tpu.memory_space<vmem>>, %arg5: memref<2x1x384xf32, #tpu.memory_space<vmem>>, %arg6: memref<2x128x128xf32, #tpu.memory_space<vmem>>, %arg7: memref<2x1x128xf32, #tpu.memory_space<vmem>>, %arg8: memref<2x1x128xf32, #tpu.memory_space<vmem>>, %arg9: memref<2x1x128xf32, #tpu.memory_space<vmem>>, %arg10: memref<2x128x256xf32, #tpu.memory_space<vmem>>, %arg11: memref<2x1x256xf32, #tpu.memory_space<vmem>>, %arg12: memref<2x256x128xf32, #tpu.memory_space<vmem>>, %arg13: memref<2x1x128xf32, #tpu.memory_space<vmem>>, %arg14: memref<2x1x128xf32, #tpu.memory_space<vmem>>, %arg15: memref<2x1x128xf32, #tpu.memory_space<vmem>>, %arg16: memref<1x16x128xf32, #tpu.memory_space<vmem>>) attributes {dimension_semantics = [#tpu.dimension_semantics<parallel>], iteration_bounds = array<i64: 4>, scalar_prefetch = 0 : i64, scratch_operands = 0 : i64, tpu.core_type = #tpu.core_type<tc>, window_params = [{transform_indices = @transform_0, window_bounds = array<i64: 1, 16, 128>}, {pipeline_mode = #tpu.pipeline_mode<synchronous>, transform_indices = @transform_1, window_bounds = array<i64: 1, 128>}, {pipeline_mode = #tpu.pipeline_mode<synchronous>, transform_indices = @transform_2, window_bounds = array<i64: 1, 128>}, {pipeline_mode = #tpu.pipeline_mode<synchronous>, transform_indices = @transform_3, window_bounds = array<i64: 2, 128, 384>}, {pipeline_mode = #tpu.pipeline_mode<synchronous>, transform_indices = @transform_4, window_bounds = array<i64: 2, 1, 384>}, {pipeline_mode = #tpu.pipeline_mode<synchronous>, transform_indices = @transform_5, window_bounds = array<i64: 2, 128, 128>}, {pipeline_mode = #tpu.pipeline_mode<synchronous>, transform_indices = @transform_6, window_bounds = array<i64: 2, 1, 128>}, {pipeline_mode = #tpu.pipeline_mode<synchronous>, transform_indices = @transform_7, window_bounds = array<i64: 2, 1, 128>}, {pipeline_mode = #tpu.pipeline_mode<synchronous>, transform_indices = @transform_8, window_bounds = array<i64: 2, 1, 128>}, {pipeline_mode = #tpu.pipeline_mode<synchronous>, transform_indices = @transform_9, window_bounds = array<i64: 2, 128, 256>}, {pipeline_mode = #tpu.pipeline_mode<synchronous>, transform_indices = @transform_10, window_bounds = array<i64: 2, 1, 256>}, {pipeline_mode = #tpu.pipeline_mode<synchronous>, transform_indices = @transform_11, window_bounds = array<i64: 2, 256, 128>}, {pipeline_mode = #tpu.pipeline_mode<synchronous>, transform_indices = @transform_12, window_bounds = array<i64: 2, 1, 128>}, {pipeline_mode = #tpu.pipeline_mode<synchronous>, transform_indices = @transform_13, window_bounds = array<i64: 2, 1, 128>}, {pipeline_mode = #tpu.pipeline_mode<synchronous>, transform_indices = @transform_14, window_bounds = array<i64: 2, 1, 128>}, {transform_indices = @transform_15, window_bounds = array<i64: 1, 16, 128>}]} {
    %c0 = arith.constant 0 : index
    %c0_0 = arith.constant 0 : index
    %c0_1 = arith.constant 0 : index
    %0 = vector.load %arg1[%c0, %c0_0, %c0_1] : memref<1x16x128xf32, #tpu.memory_space<vmem>>, vector<1x16x128xf32>
    %1 = vector.shape_cast %0 : vector<1x16x128xf32> to vector<16x128xf32>
    %c0_2 = arith.constant 0 : index
    %c0_3 = arith.constant 0 : index
    %2 = vector.load %arg2[%c0_2, %c0_3] : memref<1x128xf32, #tpu.memory_space<vmem>>, vector<1x128xf32>
    %c0_4 = arith.constant 0 : index
    %c0_5 = arith.constant 0 : index
    %3 = vector.load %arg3[%c0_4, %c0_5] : memref<1x128xf32, #tpu.memory_space<vmem>>, vector<1x128xf32>
    %cst = arith.constant dense<0.000000e+00> : vector<16xf32>
    %4 = vector.multi_reduction <add>, %1, %cst [1] : vector<16x128xf32> to vector<16xf32>
    %5 = vector.shape_cast %4 : vector<16xf32> to vector<16x1xf32>
    %cst_6 = arith.constant 1.280000e+02 : f32
    %6 = vector.broadcast %cst_6 : f32 to vector<16x1xf32>
    %7 = arith.divf %5, %6 : vector<16x1xf32>
    %8 = vector.broadcast %7 : vector<16x1xf32> to vector<16x128xf32>
    %9 = arith.subf %1, %8 : vector<16x128xf32>
    %10 = arith.mulf %9, %9 : vector<16x128xf32>
    %cst_7 = arith.constant dense<0.000000e+00> : vector<16xf32>
    %11 = vector.multi_reduction <add>, %10, %cst_7 [1] : vector<16x128xf32> to vector<16xf32>
    %12 = vector.shape_cast %11 : vector<16xf32> to vector<16x1xf32>
    %cst_8 = arith.constant 1.280000e+02 : f32
    %13 = vector.broadcast %cst_8 : f32 to vector<16x1xf32>
    %14 = arith.divf %12, %13 : vector<16x1xf32>
    %15 = vector.broadcast %7 : vector<16x1xf32> to vector<16x128xf32>
    %16 = arith.subf %1, %15 : vector<16x128xf32>
    %cst_9 = arith.constant 9.99999996E-13 : f32
    %17 = vector.broadcast %cst_9 : f32 to vector<16x1xf32>
    %18 = arith.addf %14, %17 : vector<16x1xf32>
    %19 = math.rsqrt %18 : vector<16x1xf32>
    %20 = vector.broadcast %19 : vector<16x1xf32> to vector<16x128xf32>
    %21 = arith.mulf %16, %20 : vector<16x128xf32>
    %22 = vector.broadcast %2 : vector<1x128xf32> to vector<16x128xf32>
    %23 = arith.mulf %21, %22 : vector<16x128xf32>
    %24 = vector.broadcast %3 : vector<1x128xf32> to vector<16x128xf32>
    %25 = arith.addf %23, %24 : vector<16x128xf32>
    %c0_10 = arith.constant 0 : index
    %c0_11 = arith.constant 0 : index
    %c0_12 = arith.constant 0 : index
    %26 = vector.load %arg4[%c0_10, %c0_11, %c0_12] : memref<2x128x384xf32, #tpu.memory_space<vmem>>, vector<1x128x384xf32>
    %27 = vector.shape_cast %26 : vector<1x128x384xf32> to vector<128x384xf32>
    %cst_13 = arith.constant dense<0.000000e+00> : vector<16x384xf32>
    %28 = tpu.matmul %25, %27, %cst_13 {dimension_numbers = #tpu.dot_dimension_numbers<[1], [0], [0], [1], [0, 0, 1, 1], [], []>} : vector<16x128xf32>, vector<128x384xf32>, vector<16x384xf32> -> vector<16x384xf32>
    %c0_14 = arith.constant 0 : index
    %c0_15 = arith.constant 0 : index
    %c0_16 = arith.constant 0 : index
    %29 = vector.load %arg5[%c0_14, %c0_15, %c0_16] : memref<2x1x384xf32, #tpu.memory_space<vmem>>, vector<1x1x384xf32>
    %30 = vector.shape_cast %29 : vector<1x1x384xf32> to vector<1x384xf32>
    %31 = vector.broadcast %30 : vector<1x384xf32> to vector<16x384xf32>
    %32 = arith.addf %28, %31 : vector<16x384xf32>
    %33 = vector.extract_strided_slice %32 {offsets = [0, 0], sizes = [16, 128], strides = [1, 1]} : vector<16x384xf32> to vector<16x128xf32>
    %34 = vector.extract_strided_slice %32 {offsets = [0, 128], sizes = [16, 128], strides = [1, 1]} : vector<16x384xf32> to vector<16x128xf32>
    %35 = vector.extract_strided_slice %32 {offsets = [0, 256], sizes = [16, 128], strides = [1, 1]} : vector<16x384xf32> to vector<16x128xf32>
    %cst_17 = arith.constant dense<0.000000e+00> : vector<16x16xf32>
    %36 = tpu.matmul %33, %34, %cst_17 {dimension_numbers = #tpu.dot_dimension_numbers<[1], [1], [0], [0], [0, 0, 1, 0], [], []>} : vector<16x128xf32>, vector<16x128xf32>, vector<16x16xf32> -> vector<16x16xf32>
    %cst_18 = arith.constant 0.0883883461 : f32
    %37 = vector.broadcast %cst_18 : f32 to vector<16x16xf32>
    %38 = arith.mulf %36, %37 : vector<16x16xf32>
    %cst_19 = arith.constant dense<0xFF800000> : vector<16xf32>
    %39 = vector.multi_reduction <maximumf>, %38, %cst_19 [1] : vector<16x16xf32> to vector<16xf32>
    %40 = vector.shape_cast %39 : vector<16xf32> to vector<16x1xf32>
    %41 = vector.broadcast %40 : vector<16x1xf32> to vector<16x16xf32>
    %42 = arith.subf %38, %41 : vector<16x16xf32>
    %43 = math.exp %42 : vector<16x16xf32>
    %cst_20 = arith.constant dense<0.000000e+00> : vector<16xf32>
    %44 = vector.multi_reduction <add>, %43, %cst_20 [1] : vector<16x16xf32> to vector<16xf32>
    %45 = vector.shape_cast %44 : vector<16xf32> to vector<16x1xf32>
    %46 = vector.broadcast %45 : vector<16x1xf32> to vector<16x16xf32>
    %47 = arith.divf %43, %46 : vector<16x16xf32>
    %cst_21 = arith.constant dense<0.000000e+00> : vector<16x128xf32>
    %48 = tpu.matmul %47, %35, %cst_21 {dimension_numbers = #tpu.dot_dimension_numbers<[1], [0], [0], [1], [0, 0, 1, 1], [], []>} : vector<16x16xf32>, vector<16x128xf32>, vector<16x128xf32> -> vector<16x128xf32>
    %c0_22 = arith.constant 0 : index
    %c0_23 = arith.constant 0 : index
    %c0_24 = arith.constant 0 : index
    %49 = vector.load %arg6[%c0_22, %c0_23, %c0_24] : memref<2x128x128xf32, #tpu.memory_space<vmem>>, vector<1x128x128xf32>
    %50 = vector.shape_cast %49 : vector<1x128x128xf32> to vector<128x128xf32>
    %cst_25 = arith.constant dense<0.000000e+00> : vector<16x128xf32>
    %51 = tpu.matmul %48, %50, %cst_25 {dimension_numbers = #tpu.dot_dimension_numbers<[1], [0], [0], [1], [0, 0, 1, 1], [], []>} : vector<16x128xf32>, vector<128x128xf32>, vector<16x128xf32> -> vector<16x128xf32>
    %c0_26 = arith.constant 0 : index
    %c0_27 = arith.constant 0 : index
    %c0_28 = arith.constant 0 : index
    %52 = vector.load %arg7[%c0_26, %c0_27, %c0_28] : memref<2x1x128xf32, #tpu.memory_space<vmem>>, vector<1x1x128xf32>
    %53 = vector.shape_cast %52 : vector<1x1x128xf32> to vector<1x128xf32>
    %54 = vector.broadcast %53 : vector<1x128xf32> to vector<16x128xf32>
    %55 = arith.addf %51, %54 : vector<16x128xf32>
    %56 = arith.addf %25, %55 : vector<16x128xf32>
    %c0_29 = arith.constant 0 : index
    %c0_30 = arith.constant 0 : index
    %c0_31 = arith.constant 0 : index
    %57 = vector.load %arg8[%c0_29, %c0_30, %c0_31] : memref<2x1x128xf32, #tpu.memory_space<vmem>>, vector<1x1x128xf32>
    %58 = vector.shape_cast %57 : vector<1x1x128xf32> to vector<1x128xf32>
    %c0_32 = arith.constant 0 : index
    %c0_33 = arith.constant 0 : index
    %c0_34 = arith.constant 0 : index
    %59 = vector.load %arg9[%c0_32, %c0_33, %c0_34] : memref<2x1x128xf32, #tpu.memory_space<vmem>>, vector<1x1x128xf32>
    %60 = vector.shape_cast %59 : vector<1x1x128xf32> to vector<1x128xf32>
    %cst_35 = arith.constant dense<0.000000e+00> : vector<16xf32>
    %61 = vector.multi_reduction <add>, %56, %cst_35 [1] : vector<16x128xf32> to vector<16xf32>
    %62 = vector.shape_cast %61 : vector<16xf32> to vector<16x1xf32>
    %cst_36 = arith.constant 1.280000e+02 : f32
    %63 = vector.broadcast %cst_36 : f32 to vector<16x1xf32>
    %64 = arith.divf %62, %63 : vector<16x1xf32>
    %65 = vector.broadcast %64 : vector<16x1xf32> to vector<16x128xf32>
    %66 = arith.subf %56, %65 : vector<16x128xf32>
    %67 = arith.mulf %66, %66 : vector<16x128xf32>
    %cst_37 = arith.constant dense<0.000000e+00> : vector<16xf32>
    %68 = vector.multi_reduction <add>, %67, %cst_37 [1] : vector<16x128xf32> to vector<16xf32>
    %69 = vector.shape_cast %68 : vector<16xf32> to vector<16x1xf32>
    %cst_38 = arith.constant 1.280000e+02 : f32
    %70 = vector.broadcast %cst_38 : f32 to vector<16x1xf32>
    %71 = arith.divf %69, %70 : vector<16x1xf32>
    %72 = vector.broadcast %64 : vector<16x1xf32> to vector<16x128xf32>
    %73 = arith.subf %56, %72 : vector<16x128xf32>
    %cst_39 = arith.constant 9.99999996E-13 : f32
    %74 = vector.broadcast %cst_39 : f32 to vector<16x1xf32>
    %75 = arith.addf %71, %74 : vector<16x1xf32>
    %76 = math.rsqrt %75 : vector<16x1xf32>
    %77 = vector.broadcast %76 : vector<16x1xf32> to vector<16x128xf32>
    %78 = arith.mulf %73, %77 : vector<16x128xf32>
    %79 = vector.broadcast %58 : vector<1x128xf32> to vector<16x128xf32>
    %80 = arith.mulf %78, %79 : vector<16x128xf32>
    %81 = vector.broadcast %60 : vector<1x128xf32> to vector<16x128xf32>
    %82 = arith.addf %80, %81 : vector<16x128xf32>
    %c0_40 = arith.constant 0 : index
    %c0_41 = arith.constant 0 : index
    %c0_42 = arith.constant 0 : index
    %83 = vector.load %arg10[%c0_40, %c0_41, %c0_42] : memref<2x128x256xf32, #tpu.memory_space<vmem>>, vector<1x128x256xf32>
    %84 = vector.shape_cast %83 : vector<1x128x256xf32> to vector<128x256xf32>
    %cst_43 = arith.constant dense<0.000000e+00> : vector<16x256xf32>
    %85 = tpu.matmul %82, %84, %cst_43 {dimension_numbers = #tpu.dot_dimension_numbers<[1], [0], [0], [1], [0, 0, 1, 1], [], []>} : vector<16x128xf32>, vector<128x256xf32>, vector<16x256xf32> -> vector<16x256xf32>
    %c0_44 = arith.constant 0 : index
    %c0_45 = arith.constant 0 : index
    %c0_46 = arith.constant 0 : index
    %86 = vector.load %arg11[%c0_44, %c0_45, %c0_46] : memref<2x1x256xf32, #tpu.memory_space<vmem>>, vector<1x1x256xf32>
    %87 = vector.shape_cast %86 : vector<1x1x256xf32> to vector<1x256xf32>
    %88 = vector.broadcast %87 : vector<1x256xf32> to vector<16x256xf32>
    %89 = arith.addf %85, %88 : vector<16x256xf32>
    %cst_47 = arith.constant 0.000000e+00 : f32
    %90 = vector.broadcast %cst_47 : f32 to vector<16x256xf32>
    %91 = arith.maximumf %89, %90 : vector<16x256xf32>
    %c0_48 = arith.constant 0 : index
    %c0_49 = arith.constant 0 : index
    %c0_50 = arith.constant 0 : index
    %92 = vector.load %arg12[%c0_48, %c0_49, %c0_50] : memref<2x256x128xf32, #tpu.memory_space<vmem>>, vector<1x256x128xf32>
    %93 = vector.shape_cast %92 : vector<1x256x128xf32> to vector<256x128xf32>
    %cst_51 = arith.constant dense<0.000000e+00> : vector<16x128xf32>
    %94 = tpu.matmul %91, %93, %cst_51 {dimension_numbers = #tpu.dot_dimension_numbers<[1], [0], [0], [1], [0, 0, 1, 1], [], []>} : vector<16x256xf32>, vector<256x128xf32>, vector<16x128xf32> -> vector<16x128xf32>
    %c0_52 = arith.constant 0 : index
    %c0_53 = arith.constant 0 : index
    %c0_54 = arith.constant 0 : index
    %95 = vector.load %arg13[%c0_52, %c0_53, %c0_54] : memref<2x1x128xf32, #tpu.memory_space<vmem>>, vector<1x1x128xf32>
    %96 = vector.shape_cast %95 : vector<1x1x128xf32> to vector<1x128xf32>
    %97 = vector.broadcast %96 : vector<1x128xf32> to vector<16x128xf32>
    %98 = arith.addf %94, %97 : vector<16x128xf32>
    %99 = arith.addf %82, %98 : vector<16x128xf32>
    %c0_55 = arith.constant 0 : index
    %c0_56 = arith.constant 0 : index
    %c0_57 = arith.constant 0 : index
    %100 = vector.load %arg14[%c0_55, %c0_56, %c0_57] : memref<2x1x128xf32, #tpu.memory_space<vmem>>, vector<1x1x128xf32>
    %101 = vector.shape_cast %100 : vector<1x1x128xf32> to vector<1x128xf32>
    %c0_58 = arith.constant 0 : index
    %c0_59 = arith.constant 0 : index
    %c0_60 = arith.constant 0 : index
    %102 = vector.load %arg15[%c0_58, %c0_59, %c0_60] : memref<2x1x128xf32, #tpu.memory_space<vmem>>, vector<1x1x128xf32>
    %103 = vector.shape_cast %102 : vector<1x1x128xf32> to vector<1x128xf32>
    %cst_61 = arith.constant dense<0.000000e+00> : vector<16xf32>
    %104 = vector.multi_reduction <add>, %99, %cst_61 [1] : vector<16x128xf32> to vector<16xf32>
    %105 = vector.shape_cast %104 : vector<16xf32> to vector<16x1xf32>
    %cst_62 = arith.constant 1.280000e+02 : f32
    %106 = vector.broadcast %cst_62 : f32 to vector<16x1xf32>
    %107 = arith.divf %105, %106 : vector<16x1xf32>
    %108 = vector.broadcast %107 : vector<16x1xf32> to vector<16x128xf32>
    %109 = arith.subf %99, %108 : vector<16x128xf32>
    %110 = arith.mulf %109, %109 : vector<16x128xf32>
    %cst_63 = arith.constant dense<0.000000e+00> : vector<16xf32>
    %111 = vector.multi_reduction <add>, %110, %cst_63 [1] : vector<16x128xf32> to vector<16xf32>
    %112 = vector.shape_cast %111 : vector<16xf32> to vector<16x1xf32>
    %cst_64 = arith.constant 1.280000e+02 : f32
    %113 = vector.broadcast %cst_64 : f32 to vector<16x1xf32>
    %114 = arith.divf %112, %113 : vector<16x1xf32>
    %115 = vector.broadcast %107 : vector<16x1xf32> to vector<16x128xf32>
    %116 = arith.subf %99, %115 : vector<16x128xf32>
    %cst_65 = arith.constant 9.99999996E-13 : f32
    %117 = vector.broadcast %cst_65 : f32 to vector<16x1xf32>
    %118 = arith.addf %114, %117 : vector<16x1xf32>
    %119 = math.rsqrt %118 : vector<16x1xf32>
    %120 = vector.broadcast %119 : vector<16x1xf32> to vector<16x128xf32>
    %121 = arith.mulf %116, %120 : vector<16x128xf32>
    %122 = vector.broadcast %101 : vector<1x128xf32> to vector<16x128xf32>
    %123 = arith.mulf %121, %122 : vector<16x128xf32>
    %124 = vector.broadcast %103 : vector<1x128xf32> to vector<16x128xf32>
    %125 = arith.addf %123, %124 : vector<16x128xf32>
    %c1 = arith.constant 1 : index
    %c0_66 = arith.constant 0 : index
    %c0_67 = arith.constant 0 : index
    %126 = vector.load %arg4[%c1, %c0_66, %c0_67] : memref<2x128x384xf32, #tpu.memory_space<vmem>>, vector<1x128x384xf32>
    %127 = vector.shape_cast %126 : vector<1x128x384xf32> to vector<128x384xf32>
    %cst_68 = arith.constant dense<0.000000e+00> : vector<16x384xf32>
    %128 = tpu.matmul %125, %127, %cst_68 {dimension_numbers = #tpu.dot_dimension_numbers<[1], [0], [0], [1], [0, 0, 1, 1], [], []>} : vector<16x128xf32>, vector<128x384xf32>, vector<16x384xf32> -> vector<16x384xf32>
    %c1_69 = arith.constant 1 : index
    %c0_70 = arith.constant 0 : index
    %c0_71 = arith.constant 0 : index
    %129 = vector.load %arg5[%c1_69, %c0_70, %c0_71] : memref<2x1x384xf32, #tpu.memory_space<vmem>>, vector<1x1x384xf32>
    %130 = vector.shape_cast %129 : vector<1x1x384xf32> to vector<1x384xf32>
    %131 = vector.broadcast %130 : vector<1x384xf32> to vector<16x384xf32>
    %132 = arith.addf %128, %131 : vector<16x384xf32>
    %133 = vector.extract_strided_slice %132 {offsets = [0, 0], sizes = [16, 128], strides = [1, 1]} : vector<16x384xf32> to vector<16x128xf32>
    %134 = vector.extract_strided_slice %132 {offsets = [0, 128], sizes = [16, 128], strides = [1, 1]} : vector<16x384xf32> to vector<16x128xf32>
    %135 = vector.extract_strided_slice %132 {offsets = [0, 256], sizes = [16, 128], strides = [1, 1]} : vector<16x384xf32> to vector<16x128xf32>
    %cst_72 = arith.constant dense<0.000000e+00> : vector<16x16xf32>
    %136 = tpu.matmul %133, %134, %cst_72 {dimension_numbers = #tpu.dot_dimension_numbers<[1], [1], [0], [0], [0, 0, 1, 0], [], []>} : vector<16x128xf32>, vector<16x128xf32>, vector<16x16xf32> -> vector<16x16xf32>
    %cst_73 = arith.constant 0.0883883461 : f32
    %137 = vector.broadcast %cst_73 : f32 to vector<16x16xf32>
    %138 = arith.mulf %136, %137 : vector<16x16xf32>
    %cst_74 = arith.constant dense<0xFF800000> : vector<16xf32>
    %139 = vector.multi_reduction <maximumf>, %138, %cst_74 [1] : vector<16x16xf32> to vector<16xf32>
    %140 = vector.shape_cast %139 : vector<16xf32> to vector<16x1xf32>
    %141 = vector.broadcast %140 : vector<16x1xf32> to vector<16x16xf32>
    %142 = arith.subf %138, %141 : vector<16x16xf32>
    %143 = math.exp %142 : vector<16x16xf32>
    %cst_75 = arith.constant dense<0.000000e+00> : vector<16xf32>
    %144 = vector.multi_reduction <add>, %143, %cst_75 [1] : vector<16x16xf32> to vector<16xf32>
    %145 = vector.shape_cast %144 : vector<16xf32> to vector<16x1xf32>
    %146 = vector.broadcast %145 : vector<16x1xf32> to vector<16x16xf32>
    %147 = arith.divf %143, %146 : vector<16x16xf32>
    %cst_76 = arith.constant dense<0.000000e+00> : vector<16x128xf32>
    %148 = tpu.matmul %147, %135, %cst_76 {dimension_numbers = #tpu.dot_dimension_numbers<[1], [0], [0], [1], [0, 0, 1, 1], [], []>} : vector<16x16xf32>, vector<16x128xf32>, vector<16x128xf32> -> vector<16x128xf32>
    %c1_77 = arith.constant 1 : index
    %c0_78 = arith.constant 0 : index
    %c0_79 = arith.constant 0 : index
    %149 = vector.load %arg6[%c1_77, %c0_78, %c0_79] : memref<2x128x128xf32, #tpu.memory_space<vmem>>, vector<1x128x128xf32>
    %150 = vector.shape_cast %149 : vector<1x128x128xf32> to vector<128x128xf32>
    %cst_80 = arith.constant dense<0.000000e+00> : vector<16x128xf32>
    %151 = tpu.matmul %148, %150, %cst_80 {dimension_numbers = #tpu.dot_dimension_numbers<[1], [0], [0], [1], [0, 0, 1, 1], [], []>} : vector<16x128xf32>, vector<128x128xf32>, vector<16x128xf32> -> vector<16x128xf32>
    %c1_81 = arith.constant 1 : index
    %c0_82 = arith.constant 0 : index
    %c0_83 = arith.constant 0 : index
    %152 = vector.load %arg7[%c1_81, %c0_82, %c0_83] : memref<2x1x128xf32, #tpu.memory_space<vmem>>, vector<1x1x128xf32>
    %153 = vector.shape_cast %152 : vector<1x1x128xf32> to vector<1x128xf32>
    %154 = vector.broadcast %153 : vector<1x128xf32> to vector<16x128xf32>
    %155 = arith.addf %151, %154 : vector<16x128xf32>
    %156 = arith.addf %125, %155 : vector<16x128xf32>
    %c1_84 = arith.constant 1 : index
    %c0_85 = arith.constant 0 : index
    %c0_86 = arith.constant 0 : index
    %157 = vector.load %arg8[%c1_84, %c0_85, %c0_86] : memref<2x1x128xf32, #tpu.memory_space<vmem>>, vector<1x1x128xf32>
    %158 = vector.shape_cast %157 : vector<1x1x128xf32> to vector<1x128xf32>
    %c1_87 = arith.constant 1 : index
    %c0_88 = arith.constant 0 : index
    %c0_89 = arith.constant 0 : index
    %159 = vector.load %arg9[%c1_87, %c0_88, %c0_89] : memref<2x1x128xf32, #tpu.memory_space<vmem>>, vector<1x1x128xf32>
    %160 = vector.shape_cast %159 : vector<1x1x128xf32> to vector<1x128xf32>
    %cst_90 = arith.constant dense<0.000000e+00> : vector<16xf32>
    %161 = vector.multi_reduction <add>, %156, %cst_90 [1] : vector<16x128xf32> to vector<16xf32>
    %162 = vector.shape_cast %161 : vector<16xf32> to vector<16x1xf32>
    %cst_91 = arith.constant 1.280000e+02 : f32
    %163 = vector.broadcast %cst_91 : f32 to vector<16x1xf32>
    %164 = arith.divf %162, %163 : vector<16x1xf32>
    %165 = vector.broadcast %164 : vector<16x1xf32> to vector<16x128xf32>
    %166 = arith.subf %156, %165 : vector<16x128xf32>
    %167 = arith.mulf %166, %166 : vector<16x128xf32>
    %cst_92 = arith.constant dense<0.000000e+00> : vector<16xf32>
    %168 = vector.multi_reduction <add>, %167, %cst_92 [1] : vector<16x128xf32> to vector<16xf32>
    %169 = vector.shape_cast %168 : vector<16xf32> to vector<16x1xf32>
    %cst_93 = arith.constant 1.280000e+02 : f32
    %170 = vector.broadcast %cst_93 : f32 to vector<16x1xf32>
    %171 = arith.divf %169, %170 : vector<16x1xf32>
    %172 = vector.broadcast %164 : vector<16x1xf32> to vector<16x128xf32>
    %173 = arith.subf %156, %172 : vector<16x128xf32>
    %cst_94 = arith.constant 9.99999996E-13 : f32
    %174 = vector.broadcast %cst_94 : f32 to vector<16x1xf32>
    %175 = arith.addf %171, %174 : vector<16x1xf32>
    %176 = math.rsqrt %175 : vector<16x1xf32>
    %177 = vector.broadcast %176 : vector<16x1xf32> to vector<16x128xf32>
    %178 = arith.mulf %173, %177 : vector<16x128xf32>
    %179 = vector.broadcast %158 : vector<1x128xf32> to vector<16x128xf32>
    %180 = arith.mulf %178, %179 : vector<16x128xf32>
    %181 = vector.broadcast %160 : vector<1x128xf32> to vector<16x128xf32>
    %182 = arith.addf %180, %181 : vector<16x128xf32>
    %c1_95 = arith.constant 1 : index
    %c0_96 = arith.constant 0 : index
    %c0_97 = arith.constant 0 : index
    %183 = vector.load %arg10[%c1_95, %c0_96, %c0_97] : memref<2x128x256xf32, #tpu.memory_space<vmem>>, vector<1x128x256xf32>
    %184 = vector.shape_cast %183 : vector<1x128x256xf32> to vector<128x256xf32>
    %cst_98 = arith.constant dense<0.000000e+00> : vector<16x256xf32>
    %185 = tpu.matmul %182, %184, %cst_98 {dimension_numbers = #tpu.dot_dimension_numbers<[1], [0], [0], [1], [0, 0, 1, 1], [], []>} : vector<16x128xf32>, vector<128x256xf32>, vector<16x256xf32> -> vector<16x256xf32>
    %c1_99 = arith.constant 1 : index
    %c0_100 = arith.constant 0 : index
    %c0_101 = arith.constant 0 : index
    %186 = vector.load %arg11[%c1_99, %c0_100, %c0_101] : memref<2x1x256xf32, #tpu.memory_space<vmem>>, vector<1x1x256xf32>
    %187 = vector.shape_cast %186 : vector<1x1x256xf32> to vector<1x256xf32>
    %188 = vector.broadcast %187 : vector<1x256xf32> to vector<16x256xf32>
    %189 = arith.addf %185, %188 : vector<16x256xf32>
    %cst_102 = arith.constant 0.000000e+00 : f32
    %190 = vector.broadcast %cst_102 : f32 to vector<16x256xf32>
    %191 = arith.maximumf %189, %190 : vector<16x256xf32>
    %c1_103 = arith.constant 1 : index
    %c0_104 = arith.constant 0 : index
    %c0_105 = arith.constant 0 : index
    %192 = vector.load %arg12[%c1_103, %c0_104, %c0_105] : memref<2x256x128xf32, #tpu.memory_space<vmem>>, vector<1x256x128xf32>
    %193 = vector.shape_cast %192 : vector<1x256x128xf32> to vector<256x128xf32>
    %cst_106 = arith.constant dense<0.000000e+00> : vector<16x128xf32>
    %194 = tpu.matmul %191, %193, %cst_106 {dimension_numbers = #tpu.dot_dimension_numbers<[1], [0], [0], [1], [0, 0, 1, 1], [], []>} : vector<16x256xf32>, vector<256x128xf32>, vector<16x128xf32> -> vector<16x128xf32>
    %c1_107 = arith.constant 1 : index
    %c0_108 = arith.constant 0 : index
    %c0_109 = arith.constant 0 : index
    %195 = vector.load %arg13[%c1_107, %c0_108, %c0_109] : memref<2x1x128xf32, #tpu.memory_space<vmem>>, vector<1x1x128xf32>
    %196 = vector.shape_cast %195 : vector<1x1x128xf32> to vector<1x128xf32>
    %197 = vector.broadcast %196 : vector<1x128xf32> to vector<16x128xf32>
    %198 = arith.addf %194, %197 : vector<16x128xf32>
    %199 = arith.addf %182, %198 : vector<16x128xf32>
    %c1_110 = arith.constant 1 : index
    %c0_111 = arith.constant 0 : index
    %c0_112 = arith.constant 0 : index
    %200 = vector.load %arg14[%c1_110, %c0_111, %c0_112] : memref<2x1x128xf32, #tpu.memory_space<vmem>>, vector<1x1x128xf32>
    %201 = vector.shape_cast %200 : vector<1x1x128xf32> to vector<1x128xf32>
    %c1_113 = arith.constant 1 : index
    %c0_114 = arith.constant 0 : index
    %c0_115 = arith.constant 0 : index
    %202 = vector.load %arg15[%c1_113, %c0_114, %c0_115] : memref<2x1x128xf32, #tpu.memory_space<vmem>>, vector<1x1x128xf32>
    %203 = vector.shape_cast %202 : vector<1x1x128xf32> to vector<1x128xf32>
    %cst_116 = arith.constant dense<0.000000e+00> : vector<16xf32>
    %204 = vector.multi_reduction <add>, %199, %cst_116 [1] : vector<16x128xf32> to vector<16xf32>
    %205 = vector.shape_cast %204 : vector<16xf32> to vector<16x1xf32>
    %cst_117 = arith.constant 1.280000e+02 : f32
    %206 = vector.broadcast %cst_117 : f32 to vector<16x1xf32>
    %207 = arith.divf %205, %206 : vector<16x1xf32>
    %208 = vector.broadcast %207 : vector<16x1xf32> to vector<16x128xf32>
    %209 = arith.subf %199, %208 : vector<16x128xf32>
    %210 = arith.mulf %209, %209 : vector<16x128xf32>
    %cst_118 = arith.constant dense<0.000000e+00> : vector<16xf32>
    %211 = vector.multi_reduction <add>, %210, %cst_118 [1] : vector<16x128xf32> to vector<16xf32>
    %212 = vector.shape_cast %211 : vector<16xf32> to vector<16x1xf32>
    %cst_119 = arith.constant 1.280000e+02 : f32
    %213 = vector.broadcast %cst_119 : f32 to vector<16x1xf32>
    %214 = arith.divf %212, %213 : vector<16x1xf32>
    %215 = vector.broadcast %207 : vector<16x1xf32> to vector<16x128xf32>
    %216 = arith.subf %199, %215 : vector<16x128xf32>
    %cst_120 = arith.constant 9.99999996E-13 : f32
    %217 = vector.broadcast %cst_120 : f32 to vector<16x1xf32>
    %218 = arith.addf %214, %217 : vector<16x1xf32>
    %219 = math.rsqrt %218 : vector<16x1xf32>
    %220 = vector.broadcast %219 : vector<16x1xf32> to vector<16x128xf32>
    %221 = arith.mulf %216, %220 : vector<16x128xf32>
    %222 = vector.broadcast %201 : vector<1x128xf32> to vector<16x128xf32>
    %223 = arith.mulf %221, %222 : vector<16x128xf32>
    %224 = vector.broadcast %203 : vector<1x128xf32> to vector<16x128xf32>
    %225 = arith.addf %223, %224 : vector<16x128xf32>
    %c0_121 = arith.constant 0 : index
    %c0_122 = arith.constant 0 : index
    %c0_123 = arith.constant 0 : index
    %226 = vector.load %arg16[%c0_121, %c0_122, %c0_123] : memref<1x16x128xf32, #tpu.memory_space<vmem>>, vector<1x16x128xf32>
    %227 = vector.shape_cast %226 : vector<1x16x128xf32> to vector<16x128xf32>
    %228 = vector.shape_cast %225 : vector<16x128xf32> to vector<1x16x128xf32>
    tpu.vector_store %arg16[%c0_121, %c0_122, %c0_123], %228 {strides = array<i32>} : memref<1x16x128xf32, #tpu.memory_space<vmem>>, vector<1x16x128xf32>,
    return
  }
  func.func @transform_0(%arg0: i32) -> (i32, i32, i32) {
    %c0_i32 = arith.constant 0 : i32
    %c0_i32_0 = arith.constant 0 : i32
    %c0_i32_1 = arith.constant 0 : i32
    return %arg0, %c0_i32, %c0_i32_0 : i32, i32, i32
  }
  func.func @transform_1(%arg0: i32) -> (i32, i32) {
    %c0_i32 = arith.constant 0 : i32
    %c0_i32_0 = arith.constant 0 : i32
    %c0_i32_1 = arith.constant 0 : i32
    return %c0_i32, %c0_i32_0 : i32, i32
  }
  func.func @transform_2(%arg0: i32) -> (i32, i32) {
    %c0_i32 = arith.constant 0 : i32
    %c0_i32_0 = arith.constant 0 : i32
    %c0_i32_1 = arith.constant 0 : i32
    return %c0_i32, %c0_i32_0 : i32, i32
  }
  func.func @transform_3(%arg0: i32) -> (i32, i32, i32) {
    %c0_i32 = arith.constant 0 : i32
    %c0_i32_0 = arith.constant 0 : i32
    %c0_i32_1 = arith.constant 0 : i32
    %c0_i32_2 = arith.constant 0 : i32
    return %c0_i32, %c0_i32_0, %c0_i32_1 : i32, i32, i32
  }
  func.func @transform_4(%arg0: i32) -> (i32, i32, i32) {
    %c0_i32 = arith.constant 0 : i32
    %c0_i32_0 = arith.constant 0 : i32
    %c0_i32_1 = arith.constant 0 : i32
    %c0_i32_2 = arith.constant 0 : i32
    return %c0_i32, %c0_i32_0, %c0_i32_1 : i32, i32, i32
  }
  func.func @transform_5(%arg0: i32) -> (i32, i32, i32) {
    %c0_i32 = arith.constant 0 : i32
    %c0_i32_0 = arith.constant 0 : i32
    %c0_i32_1 = arith.constant 0 : i32
    %c0_i32_2 = arith.constant 0 : i32
    return %c0_i32, %c0_i32_0, %c0_i32_1 : i32, i32, i32
  }
  func.func @transform_6(%arg0: i32) -> (i32, i32, i32) {
    %c0_i32 = arith.constant 0 : i32
    %c0_i32_0 = arith.constant 0 : i32
    %c0_i32_1 = arith.constant 0 : i32
    %c0_i32_2 = arith.constant 0 : i32
    return %c0_i32, %c0_i32_0, %c0_i32_1 : i32, i32, i32
  }
  func.func @transform_7(%arg0: i32) -> (i32, i32, i32) {
    %c0_i32 = arith.constant 0 : i32
    %c0_i32_0 = arith.constant 0 : i32
    %c0_i32_1 = arith.constant 0 : i32
    %c0_i32_2 = arith.constant 0 : i32
    return %c0_i32, %c0_i32_0, %c0_i32_1 : i32, i32, i32
  }
  func.func @transform_8(%arg0: i32) -> (i32, i32, i32) {
    %c0_i32 = arith.constant 0 : i32
    %c0_i32_0 = arith.constant 0 : i32
    %c0_i32_1 = arith.constant 0 : i32
    %c0_i32_2 = arith.constant 0 : i32
    return %c0_i32, %c0_i32_0, %c0_i32_1 : i32, i32, i32
  }
  func.func @transform_9(%arg0: i32) -> (i32, i32, i32) {
    %c0_i32 = arith.constant 0 : i32
    %c0_i32_0 = arith.constant 0 : i32
    %c0_i32_1 = arith.constant 0 : i32
    %c0_i32_2 = arith.constant 0 : i32
    return %c0_i32, %c0_i32_0, %c0_i32_1 : i32, i32, i32
  }
  func.func @transform_10(%arg0: i32) -> (i32, i32, i32) {
    %c0_i32 = arith.constant 0 : i32
    %c0_i32_0 = arith.constant 0 : i32
    %c0_i32_1 = arith.constant 0 : i32
    %c0_i32_2 = arith.constant 0 : i32
    return %c0_i32, %c0_i32_0, %c0_i32_1 : i32, i32, i32
  }
  func.func @transform_11(%arg0: i32) -> (i32, i32, i32) {
    %c0_i32 = arith.constant 0 : i32
    %c0_i32_0 = arith.constant 0 : i32
    %c0_i32_1 = arith.constant 0 : i32
    %c0_i32_2 = arith.constant 0 : i32
    return %c0_i32, %c0_i32_0, %c0_i32_1 : i32, i32, i32
  }
  func.func @transform_12(%arg0: i32) -> (i32, i32, i32) {
    %c0_i32 = arith.constant 0 : i32
    %c0_i32_0 = arith.constant 0 : i32
    %c0_i32_1 = arith.constant 0 : i32
    %c0_i32_2 = arith.constant 0 : i32
    return %c0_i32, %c0_i32_0, %c0_i32_1 : i32, i32, i32
  }
  func.func @transform_13(%arg0: i32) -> (i32, i32, i32) {
    %c0_i32 = arith.constant 0 : i32
    %c0_i32_0 = arith.constant 0 : i32
    %c0_i32_1 = arith.constant 0 : i32
    %c0_i32_2 = arith.constant 0 : i32
    return %c0_i32, %c0_i32_0, %c0_i32_1 : i32, i32, i32
  }
  func.func @transform_14(%arg0: i32) -> (i32, i32, i32) {
    %c0_i32 = arith.constant 0 : i32
    %c0_i32_0 = arith.constant 0 : i32
    %c0_i32_1 = arith.constant 0 : i32
    %c0_i32_2 = arith.constant 0 : i32
    return %c0_i32, %c0_i32_0, %c0_i32_1 : i32, i32, i32
  }
  func.func @transform_15(%arg0: i32) -> (i32, i32, i32) {
    %c0_i32 = arith.constant 0 : i32
    %c0_i32_0 = arith.constant 0 : i32
    %c0_i32_1 = arith.constant 0 : i32
    return %arg0, %c0_i32, %c0_i32_0 : i32, i32, i32
  }
}

module attributes {stable_mosaic.version = 11 : i64} {
  func.func @_bert_encoder_kernel(%arg0: i32, %arg1: memref<1x16x128xf32, #tpu.memory_space<vmem>>, %arg2: memref<1x128xf32, #tpu.memory_space<vmem>>, %arg3: memref<1x128xf32, #tpu.memory_space<vmem>>, %arg4: memref<2x128x384xf32, #tpu.memory_space<vmem>>, %arg5: memref<2x1x384xf32, #tpu.memory_space<vmem>>, %arg6: memref<2x128x128xf32, #tpu.memory_space<vmem>>, %arg7: memref<2x1x128xf32, #tpu.memory_space<vmem>>, %arg8: memref<2x1x128xf32, #tpu.memory_space<vmem>>, %arg9: memref<2x1x128xf32, #tpu.memory_space<vmem>>, %arg10: memref<2x128x256xf32, #tpu.memory_space<vmem>>, %arg11: memref<2x1x256xf32, #tpu.memory_space<vmem>>, %arg12: memref<2x256x128xf32, #tpu.memory_space<vmem>>, %arg13: memref<2x1x128xf32, #tpu.memory_space<vmem>>, %arg14: memref<2x1x128xf32, #tpu.memory_space<vmem>>, %arg15: memref<2x1x128xf32, #tpu.memory_space<vmem>>, %arg16: memref<1x16x128xf32, #tpu.memory_space<vmem>>) attributes {dimension_semantics = [#tpu.dimension_semantics<parallel>], iteration_bounds = array<i64: 2>, scalar_prefetch = 0 : i64, scratch_operands = 0 : i64, tpu.core_type = #tpu.core_type<tc>, window_params = [{transform_indices = @transform_0, window_bounds = array<i64: 1, 16, 128>}, {pipeline_mode = #tpu.pipeline_mode<synchronous>, transform_indices = @transform_1, window_bounds = array<i64: 1, 128>}, {pipeline_mode = #tpu.pipeline_mode<synchronous>, transform_indices = @transform_2, window_bounds = array<i64: 1, 128>}, {pipeline_mode = #tpu.pipeline_mode<synchronous>, transform_indices = @transform_3, window_bounds = array<i64: 2, 128, 384>}, {pipeline_mode = #tpu.pipeline_mode<synchronous>, transform_indices = @transform_4, window_bounds = array<i64: 2, 1, 384>}, {pipeline_mode = #tpu.pipeline_mode<synchronous>, transform_indices = @transform_5, window_bounds = array<i64: 2, 128, 128>}, {pipeline_mode = #tpu.pipeline_mode<synchronous>, transform_indices = @transform_6, window_bounds = array<i64: 2, 1, 128>}, {pipeline_mode = #tpu.pipeline_mode<synchronous>, transform_indices = @transform_7, window_bounds = array<i64: 2, 1, 128>}, {pipeline_mode = #tpu.pipeline_mode<synchronous>, transform_indices = @transform_8, window_bounds = array<i64: 2, 1, 128>}, {pipeline_mode = #tpu.pipeline_mode<synchronous>, transform_indices = @transform_9, window_bounds = array<i64: 2, 128, 256>}, {pipeline_mode = #tpu.pipeline_mode<synchronous>, transform_indices = @transform_10, window_bounds = array<i64: 2, 1, 256>}, {pipeline_mode = #tpu.pipeline_mode<synchronous>, transform_indices = @transform_11, window_bounds = array<i64: 2, 256, 128>}, {pipeline_mode = #tpu.pipeline_mode<synchronous>, transform_indices = @transform_12, window_bounds = array<i64: 2, 1, 128>}, {pipeline_mode = #tpu.pipeline_mode<synchronous>, transform_indices = @transform_13, window_bounds = array<i64: 2, 1, 128>}, {pipeline_mode = #tpu.pipeline_mode<synchronous>, transform_indices = @transform_14, window_bounds = array<i64: 2, 1, 128>}, {transform_indices = @transform_15, window_bounds = array<i64: 1, 16, 128>}]} {
    %c0 = arith.constant 0 : index
    %c0_0 = arith.constant 0 : index
    %c0_1 = arith.constant 0 : index
    %0 = vector.load %arg1[%c0, %c0_0, %c0_1] : memref<1x16x128xf32, #tpu.memory_space<vmem>>, vector<1x16x128xf32>
    %1 = vector.shape_cast %0 : vector<1x16x128xf32> to vector<16x128xf32>
    %c0_2 = arith.constant 0 : index
    %c0_3 = arith.constant 0 : index
    %2 = vector.load %arg2[%c0_2, %c0_3] : memref<1x128xf32, #tpu.memory_space<vmem>>, vector<1x128xf32>
    %c0_4 = arith.constant 0 : index
    %c0_5 = arith.constant 0 : index
    %3 = vector.load %arg3[%c0_4, %c0_5] : memref<1x128xf32, #tpu.memory_space<vmem>>, vector<1x128xf32>
    %cst = arith.constant dense<0.000000e+00> : vector<16xf32>
    %4 = vector.multi_reduction <add>, %1, %cst [1] : vector<16x128xf32> to vector<16xf32>
    %5 = vector.shape_cast %4 : vector<16xf32> to vector<16x1xf32>
    %cst_6 = arith.constant 1.280000e+02 : f32
    %6 = vector.broadcast %cst_6 : f32 to vector<16x1xf32>
    %7 = arith.divf %5, %6 : vector<16x1xf32>
    %8 = vector.broadcast %7 : vector<16x1xf32> to vector<16x128xf32>
    %9 = arith.subf %1, %8 : vector<16x128xf32>
    %10 = arith.mulf %9, %9 : vector<16x128xf32>
    %cst_7 = arith.constant dense<0.000000e+00> : vector<16xf32>
    %11 = vector.multi_reduction <add>, %10, %cst_7 [1] : vector<16x128xf32> to vector<16xf32>
    %12 = vector.shape_cast %11 : vector<16xf32> to vector<16x1xf32>
    %cst_8 = arith.constant 1.280000e+02 : f32
    %13 = vector.broadcast %cst_8 : f32 to vector<16x1xf32>
    %14 = arith.divf %12, %13 : vector<16x1xf32>
    %15 = vector.broadcast %7 : vector<16x1xf32> to vector<16x128xf32>
    %16 = arith.subf %1, %15 : vector<16x128xf32>
    %cst_9 = arith.constant 9.99999996E-13 : f32
    %17 = vector.broadcast %cst_9 : f32 to vector<16x1xf32>
    %18 = arith.addf %14, %17 : vector<16x1xf32>
    %19 = math.rsqrt %18 : vector<16x1xf32>
    %20 = vector.broadcast %19 : vector<16x1xf32> to vector<16x128xf32>
    %21 = arith.mulf %16, %20 : vector<16x128xf32>
    %22 = vector.broadcast %2 : vector<1x128xf32> to vector<16x128xf32>
    %23 = arith.mulf %21, %22 : vector<16x128xf32>
    %24 = vector.broadcast %3 : vector<1x128xf32> to vector<16x128xf32>
    %25 = arith.addf %23, %24 : vector<16x128xf32>
    %c0_10 = arith.constant 0 : index
    %c0_11 = arith.constant 0 : index
    %c0_12 = arith.constant 0 : index
    %26 = vector.load %arg4[%c0_10, %c0_11, %c0_12] : memref<2x128x384xf32, #tpu.memory_space<vmem>>, vector<1x128x384xf32>
    %27 = vector.shape_cast %26 : vector<1x128x384xf32> to vector<128x384xf32>
    %cst_13 = arith.constant dense<0.000000e+00> : vector<16x384xf32>
    %28 = tpu.matmul %25, %27, %cst_13 {dimension_numbers = #tpu.dot_dimension_numbers<[1], [0], [0], [1], [0, 0, 1, 1], [], []>} : vector<16x128xf32>, vector<128x384xf32>, vector<16x384xf32> -> vector<16x384xf32>
    %c0_14 = arith.constant 0 : index
    %c0_15 = arith.constant 0 : index
    %c0_16 = arith.constant 0 : index
    %29 = vector.load %arg5[%c0_14, %c0_15, %c0_16] : memref<2x1x384xf32, #tpu.memory_space<vmem>>, vector<1x1x384xf32>
    %30 = vector.shape_cast %29 : vector<1x1x384xf32> to vector<1x384xf32>
    %31 = vector.broadcast %30 : vector<1x384xf32> to vector<16x384xf32>
    %32 = arith.addf %28, %31 : vector<16x384xf32>
    %33 = vector.extract_strided_slice %32 {offsets = [0, 0], sizes = [16, 128], strides = [1, 1]} : vector<16x384xf32> to vector<16x128xf32>
    %34 = vector.extract_strided_slice %32 {offsets = [0, 128], sizes = [16, 128], strides = [1, 1]} : vector<16x384xf32> to vector<16x128xf32>
    %35 = vector.extract_strided_slice %32 {offsets = [0, 256], sizes = [16, 128], strides = [1, 1]} : vector<16x384xf32> to vector<16x128xf32>
    %cst_17 = arith.constant dense<0.000000e+00> : vector<16x16xf32>
    %36 = tpu.matmul %33, %34, %cst_17 {dimension_numbers = #tpu.dot_dimension_numbers<[1], [1], [0], [0], [0, 0, 1, 0], [], []>} : vector<16x128xf32>, vector<16x128xf32>, vector<16x16xf32> -> vector<16x16xf32>
    %cst_18 = arith.constant 0.0883883461 : f32
    %37 = vector.broadcast %cst_18 : f32 to vector<16x16xf32>
    %38 = arith.mulf %36, %37 : vector<16x16xf32>
    %cst_19 = arith.constant dense<0xFF800000> : vector<16xf32>
    %39 = vector.multi_reduction <maximumf>, %38, %cst_19 [1] : vector<16x16xf32> to vector<16xf32>
    %40 = vector.shape_cast %39 : vector<16xf32> to vector<16x1xf32>
    %41 = vector.broadcast %40 : vector<16x1xf32> to vector<16x16xf32>
    %42 = arith.subf %38, %41 : vector<16x16xf32>
    %43 = math.exp %42 : vector<16x16xf32>
    %cst_20 = arith.constant dense<0.000000e+00> : vector<16xf32>
    %44 = vector.multi_reduction <add>, %43, %cst_20 [1] : vector<16x16xf32> to vector<16xf32>
    %45 = vector.shape_cast %44 : vector<16xf32> to vector<16x1xf32>
    %46 = vector.broadcast %45 : vector<16x1xf32> to vector<16x16xf32>
    %47 = arith.divf %43, %46 : vector<16x16xf32>
    %cst_21 = arith.constant dense<0.000000e+00> : vector<16x128xf32>
    %48 = tpu.matmul %47, %35, %cst_21 {dimension_numbers = #tpu.dot_dimension_numbers<[1], [0], [0], [1], [0, 0, 1, 1], [], []>} : vector<16x16xf32>, vector<16x128xf32>, vector<16x128xf32> -> vector<16x128xf32>
    %c0_22 = arith.constant 0 : index
    %c0_23 = arith.constant 0 : index
    %c0_24 = arith.constant 0 : index
    %49 = vector.load %arg6[%c0_22, %c0_23, %c0_24] : memref<2x128x128xf32, #tpu.memory_space<vmem>>, vector<1x128x128xf32>
    %50 = vector.shape_cast %49 : vector<1x128x128xf32> to vector<128x128xf32>
    %cst_25 = arith.constant dense<0.000000e+00> : vector<16x128xf32>
    %51 = tpu.matmul %48, %50, %cst_25 {dimension_numbers = #tpu.dot_dimension_numbers<[1], [0], [0], [1], [0, 0, 1, 1], [], []>} : vector<16x128xf32>, vector<128x128xf32>, vector<16x128xf32> -> vector<16x128xf32>
    %c0_26 = arith.constant 0 : index
    %c0_27 = arith.constant 0 : index
    %c0_28 = arith.constant 0 : index
    %52 = vector.load %arg7[%c0_26, %c0_27, %c0_28] : memref<2x1x128xf32, #tpu.memory_space<vmem>>, vector<1x1x128xf32>
    %53 = vector.shape_cast %52 : vector<1x1x128xf32> to vector<1x128xf32>
    %54 = vector.broadcast %53 : vector<1x128xf32> to vector<16x128xf32>
    %55 = arith.addf %51, %54 : vector<16x128xf32>
    %56 = arith.addf %25, %55 : vector<16x128xf32>
    %c0_29 = arith.constant 0 : index
    %c0_30 = arith.constant 0 : index
    %c0_31 = arith.constant 0 : index
    %57 = vector.load %arg8[%c0_29, %c0_30, %c0_31] : memref<2x1x128xf32, #tpu.memory_space<vmem>>, vector<1x1x128xf32>
    %58 = vector.shape_cast %57 : vector<1x1x128xf32> to vector<1x128xf32>
    %c0_32 = arith.constant 0 : index
    %c0_33 = arith.constant 0 : index
    %c0_34 = arith.constant 0 : index
    %59 = vector.load %arg9[%c0_32, %c0_33, %c0_34] : memref<2x1x128xf32, #tpu.memory_space<vmem>>, vector<1x1x128xf32>
    %60 = vector.shape_cast %59 : vector<1x1x128xf32> to vector<1x128xf32>
    %cst_35 = arith.constant dense<0.000000e+00> : vector<16xf32>
    %61 = vector.multi_reduction <add>, %56, %cst_35 [1] : vector<16x128xf32> to vector<16xf32>
    %62 = vector.shape_cast %61 : vector<16xf32> to vector<16x1xf32>
    %cst_36 = arith.constant 1.280000e+02 : f32
    %63 = vector.broadcast %cst_36 : f32 to vector<16x1xf32>
    %64 = arith.divf %62, %63 : vector<16x1xf32>
    %65 = vector.broadcast %64 : vector<16x1xf32> to vector<16x128xf32>
    %66 = arith.subf %56, %65 : vector<16x128xf32>
    %67 = arith.mulf %66, %66 : vector<16x128xf32>
    %cst_37 = arith.constant dense<0.000000e+00> : vector<16xf32>
    %68 = vector.multi_reduction <add>, %67, %cst_37 [1] : vector<16x128xf32> to vector<16xf32>
    %69 = vector.shape_cast %68 : vector<16xf32> to vector<16x1xf32>
    %cst_38 = arith.constant 1.280000e+02 : f32
    %70 = vector.broadcast %cst_38 : f32 to vector<16x1xf32>
    %71 = arith.divf %69, %70 : vector<16x1xf32>
    %72 = vector.broadcast %64 : vector<16x1xf32> to vector<16x128xf32>
    %73 = arith.subf %56, %72 : vector<16x128xf32>
    %cst_39 = arith.constant 9.99999996E-13 : f32
    %74 = vector.broadcast %cst_39 : f32 to vector<16x1xf32>
    %75 = arith.addf %71, %74 : vector<16x1xf32>
    %76 = math.rsqrt %75 : vector<16x1xf32>
    %77 = vector.broadcast %76 : vector<16x1xf32> to vector<16x128xf32>
    %78 = arith.mulf %73, %77 : vector<16x128xf32>
    %79 = vector.broadcast %58 : vector<1x128xf32> to vector<16x128xf32>
    %80 = arith.mulf %78, %79 : vector<16x128xf32>
    %81 = vector.broadcast %60 : vector<1x128xf32> to vector<16x128xf32>
    %82 = arith.addf %80, %81 : vector<16x128xf32>
    %c0_40 = arith.constant 0 : index
    %c0_41 = arith.constant 0 : index
    %c0_42 = arith.constant 0 : index
    %83 = vector.load %arg10[%c0_40, %c0_41, %c0_42] : memref<2x128x256xf32, #tpu.memory_space<vmem>>, vector<1x128x256xf32>
    %84 = vector.shape_cast %83 : vector<1x128x256xf32> to vector<128x256xf32>
    %cst_43 = arith.constant dense<0.000000e+00> : vector<16x256xf32>
    %85 = tpu.matmul %82, %84, %cst_43 {dimension_numbers = #tpu.dot_dimension_numbers<[1], [0], [0], [1], [0, 0, 1, 1], [], []>} : vector<16x128xf32>, vector<128x256xf32>, vector<16x256xf32> -> vector<16x256xf32>
    %c0_44 = arith.constant 0 : index
    %c0_45 = arith.constant 0 : index
    %c0_46 = arith.constant 0 : index
    %86 = vector.load %arg11[%c0_44, %c0_45, %c0_46] : memref<2x1x256xf32, #tpu.memory_space<vmem>>, vector<1x1x256xf32>
    %87 = vector.shape_cast %86 : vector<1x1x256xf32> to vector<1x256xf32>
    %88 = vector.broadcast %87 : vector<1x256xf32> to vector<16x256xf32>
    %89 = arith.addf %85, %88 : vector<16x256xf32>
    %cst_47 = arith.constant 0.000000e+00 : f32
    %90 = vector.broadcast %cst_47 : f32 to vector<16x256xf32>
    %91 = arith.maximumf %89, %90 : vector<16x256xf32>
    %c0_48 = arith.constant 0 : index
    %c0_49 = arith.constant 0 : index
    %c0_50 = arith.constant 0 : index
    %92 = vector.load %arg12[%c0_48, %c0_49, %c0_50] : memref<2x256x128xf32, #tpu.memory_space<vmem>>, vector<1x256x128xf32>
    %93 = vector.shape_cast %92 : vector<1x256x128xf32> to vector<256x128xf32>
    %cst_51 = arith.constant dense<0.000000e+00> : vector<16x128xf32>
    %94 = tpu.matmul %91, %93, %cst_51 {dimension_numbers = #tpu.dot_dimension_numbers<[1], [0], [0], [1], [0, 0, 1, 1], [], []>} : vector<16x256xf32>, vector<256x128xf32>, vector<16x128xf32> -> vector<16x128xf32>
    %c0_52 = arith.constant 0 : index
    %c0_53 = arith.constant 0 : index
    %c0_54 = arith.constant 0 : index
    %95 = vector.load %arg13[%c0_52, %c0_53, %c0_54] : memref<2x1x128xf32, #tpu.memory_space<vmem>>, vector<1x1x128xf32>
    %96 = vector.shape_cast %95 : vector<1x1x128xf32> to vector<1x128xf32>
    %97 = vector.broadcast %96 : vector<1x128xf32> to vector<16x128xf32>
    %98 = arith.addf %94, %97 : vector<16x128xf32>
    %99 = arith.addf %82, %98 : vector<16x128xf32>
    %c0_55 = arith.constant 0 : index
    %c0_56 = arith.constant 0 : index
    %c0_57 = arith.constant 0 : index
    %100 = vector.load %arg14[%c0_55, %c0_56, %c0_57] : memref<2x1x128xf32, #tpu.memory_space<vmem>>, vector<1x1x128xf32>
    %101 = vector.shape_cast %100 : vector<1x1x128xf32> to vector<1x128xf32>
    %c0_58 = arith.constant 0 : index
    %c0_59 = arith.constant 0 : index
    %c0_60 = arith.constant 0 : index
    %102 = vector.load %arg15[%c0_58, %c0_59, %c0_60] : memref<2x1x128xf32, #tpu.memory_space<vmem>>, vector<1x1x128xf32>
    %103 = vector.shape_cast %102 : vector<1x1x128xf32> to vector<1x128xf32>
    %cst_61 = arith.constant dense<0.000000e+00> : vector<16xf32>
    %104 = vector.multi_reduction <add>, %99, %cst_61 [1] : vector<16x128xf32> to vector<16xf32>
    %105 = vector.shape_cast %104 : vector<16xf32> to vector<16x1xf32>
    %cst_62 = arith.constant 1.280000e+02 : f32
    %106 = vector.broadcast %cst_62 : f32 to vector<16x1xf32>
    %107 = arith.divf %105, %106 : vector<16x1xf32>
    %108 = vector.broadcast %107 : vector<16x1xf32> to vector<16x128xf32>
    %109 = arith.subf %99, %108 : vector<16x128xf32>
    %110 = arith.mulf %109, %109 : vector<16x128xf32>
    %cst_63 = arith.constant dense<0.000000e+00> : vector<16xf32>
    %111 = vector.multi_reduction <add>, %110, %cst_63 [1] : vector<16x128xf32> to vector<16xf32>
    %112 = vector.shape_cast %111 : vector<16xf32> to vector<16x1xf32>
    %cst_64 = arith.constant 1.280000e+02 : f32
    %113 = vector.broadcast %cst_64 : f32 to vector<16x1xf32>
    %114 = arith.divf %112, %113 : vector<16x1xf32>
    %115 = vector.broadcast %107 : vector<16x1xf32> to vector<16x128xf32>
    %116 = arith.subf %99, %115 : vector<16x128xf32>
    %cst_65 = arith.constant 9.99999996E-13 : f32
    %117 = vector.broadcast %cst_65 : f32 to vector<16x1xf32>
    %118 = arith.addf %114, %117 : vector<16x1xf32>
    %119 = math.rsqrt %118 : vector<16x1xf32>
    %120 = vector.broadcast %119 : vector<16x1xf32> to vector<16x128xf32>
    %121 = arith.mulf %116, %120 : vector<16x128xf32>
    %122 = vector.broadcast %101 : vector<1x128xf32> to vector<16x128xf32>
    %123 = arith.mulf %121, %122 : vector<16x128xf32>
    %124 = vector.broadcast %103 : vector<1x128xf32> to vector<16x128xf32>
    %125 = arith.addf %123, %124 : vector<16x128xf32>
    %c1 = arith.constant 1 : index
    %c0_66 = arith.constant 0 : index
    %c0_67 = arith.constant 0 : index
    %126 = vector.load %arg4[%c1, %c0_66, %c0_67] : memref<2x128x384xf32, #tpu.memory_space<vmem>>, vector<1x128x384xf32>
    %127 = vector.shape_cast %126 : vector<1x128x384xf32> to vector<128x384xf32>
    %cst_68 = arith.constant dense<0.000000e+00> : vector<16x384xf32>
    %128 = tpu.matmul %125, %127, %cst_68 {dimension_numbers = #tpu.dot_dimension_numbers<[1], [0], [0], [1], [0, 0, 1, 1], [], []>} : vector<16x128xf32>, vector<128x384xf32>, vector<16x384xf32> -> vector<16x384xf32>
    %c1_69 = arith.constant 1 : index
    %c0_70 = arith.constant 0 : index
    %c0_71 = arith.constant 0 : index
    %129 = vector.load %arg5[%c1_69, %c0_70, %c0_71] : memref<2x1x384xf32, #tpu.memory_space<vmem>>, vector<1x1x384xf32>
    %130 = vector.shape_cast %129 : vector<1x1x384xf32> to vector<1x384xf32>
    %131 = vector.broadcast %130 : vector<1x384xf32> to vector<16x384xf32>
    %132 = arith.addf %128, %131 : vector<16x384xf32>
    %133 = vector.extract_strided_slice %132 {offsets = [0, 0], sizes = [16, 128], strides = [1, 1]} : vector<16x384xf32> to vector<16x128xf32>
    %134 = vector.extract_strided_slice %132 {offsets = [0, 128], sizes = [16, 128], strides = [1, 1]} : vector<16x384xf32> to vector<16x128xf32>
    %135 = vector.extract_strided_slice %132 {offsets = [0, 256], sizes = [16, 128], strides = [1, 1]} : vector<16x384xf32> to vector<16x128xf32>
    %cst_72 = arith.constant dense<0.000000e+00> : vector<16x16xf32>
    %136 = tpu.matmul %133, %134, %cst_72 {dimension_numbers = #tpu.dot_dimension_numbers<[1], [1], [0], [0], [0, 0, 1, 0], [], []>} : vector<16x128xf32>, vector<16x128xf32>, vector<16x16xf32> -> vector<16x16xf32>
    %cst_73 = arith.constant 0.0883883461 : f32
    %137 = vector.broadcast %cst_73 : f32 to vector<16x16xf32>
    %138 = arith.mulf %136, %137 : vector<16x16xf32>
    %cst_74 = arith.constant dense<0xFF800000> : vector<16xf32>
    %139 = vector.multi_reduction <maximumf>, %138, %cst_74 [1] : vector<16x16xf32> to vector<16xf32>
    %140 = vector.shape_cast %139 : vector<16xf32> to vector<16x1xf32>
    %141 = vector.broadcast %140 : vector<16x1xf32> to vector<16x16xf32>
    %142 = arith.subf %138, %141 : vector<16x16xf32>
    %143 = math.exp %142 : vector<16x16xf32>
    %cst_75 = arith.constant dense<0.000000e+00> : vector<16xf32>
    %144 = vector.multi_reduction <add>, %143, %cst_75 [1] : vector<16x16xf32> to vector<16xf32>
    %145 = vector.shape_cast %144 : vector<16xf32> to vector<16x1xf32>
    %146 = vector.broadcast %145 : vector<16x1xf32> to vector<16x16xf32>
    %147 = arith.divf %143, %146 : vector<16x16xf32>
    %cst_76 = arith.constant dense<0.000000e+00> : vector<16x128xf32>
    %148 = tpu.matmul %147, %135, %cst_76 {dimension_numbers = #tpu.dot_dimension_numbers<[1], [0], [0], [1], [0, 0, 1, 1], [], []>} : vector<16x16xf32>, vector<16x128xf32>, vector<16x128xf32> -> vector<16x128xf32>
    %c1_77 = arith.constant 1 : index
    %c0_78 = arith.constant 0 : index
    %c0_79 = arith.constant 0 : index
    %149 = vector.load %arg6[%c1_77, %c0_78, %c0_79] : memref<2x128x128xf32, #tpu.memory_space<vmem>>, vector<1x128x128xf32>
    %150 = vector.shape_cast %149 : vector<1x128x128xf32> to vector<128x128xf32>
    %cst_80 = arith.constant dense<0.000000e+00> : vector<16x128xf32>
    %151 = tpu.matmul %148, %150, %cst_80 {dimension_numbers = #tpu.dot_dimension_numbers<[1], [0], [0], [1], [0, 0, 1, 1], [], []>} : vector<16x128xf32>, vector<128x128xf32>, vector<16x128xf32> -> vector<16x128xf32>
    %c1_81 = arith.constant 1 : index
    %c0_82 = arith.constant 0 : index
    %c0_83 = arith.constant 0 : index
    %152 = vector.load %arg7[%c1_81, %c0_82, %c0_83] : memref<2x1x128xf32, #tpu.memory_space<vmem>>, vector<1x1x128xf32>
    %153 = vector.shape_cast %152 : vector<1x1x128xf32> to vector<1x128xf32>
    %154 = vector.broadcast %153 : vector<1x128xf32> to vector<16x128xf32>
    %155 = arith.addf %151, %154 : vector<16x128xf32>
    %156 = arith.addf %125, %155 : vector<16x128xf32>
    %c1_84 = arith.constant 1 : index
    %c0_85 = arith.constant 0 : index
    %c0_86 = arith.constant 0 : index
    %157 = vector.load %arg8[%c1_84, %c0_85, %c0_86] : memref<2x1x128xf32, #tpu.memory_space<vmem>>, vector<1x1x128xf32>
    %158 = vector.shape_cast %157 : vector<1x1x128xf32> to vector<1x128xf32>
    %c1_87 = arith.constant 1 : index
    %c0_88 = arith.constant 0 : index
    %c0_89 = arith.constant 0 : index
    %159 = vector.load %arg9[%c1_87, %c0_88, %c0_89] : memref<2x1x128xf32, #tpu.memory_space<vmem>>, vector<1x1x128xf32>
    %160 = vector.shape_cast %159 : vector<1x1x128xf32> to vector<1x128xf32>
    %cst_90 = arith.constant dense<0.000000e+00> : vector<16xf32>
    %161 = vector.multi_reduction <add>, %156, %cst_90 [1] : vector<16x128xf32> to vector<16xf32>
    %162 = vector.shape_cast %161 : vector<16xf32> to vector<16x1xf32>
    %cst_91 = arith.constant 1.280000e+02 : f32
    %163 = vector.broadcast %cst_91 : f32 to vector<16x1xf32>
    %164 = arith.divf %162, %163 : vector<16x1xf32>
    %165 = vector.broadcast %164 : vector<16x1xf32> to vector<16x128xf32>
    %166 = arith.subf %156, %165 : vector<16x128xf32>
    %167 = arith.mulf %166, %166 : vector<16x128xf32>
    %cst_92 = arith.constant dense<0.000000e+00> : vector<16xf32>
    %168 = vector.multi_reduction <add>, %167, %cst_92 [1] : vector<16x128xf32> to vector<16xf32>
    %169 = vector.shape_cast %168 : vector<16xf32> to vector<16x1xf32>
    %cst_93 = arith.constant 1.280000e+02 : f32
    %170 = vector.broadcast %cst_93 : f32 to vector<16x1xf32>
    %171 = arith.divf %169, %170 : vector<16x1xf32>
    %172 = vector.broadcast %164 : vector<16x1xf32> to vector<16x128xf32>
    %173 = arith.subf %156, %172 : vector<16x128xf32>
    %cst_94 = arith.constant 9.99999996E-13 : f32
    %174 = vector.broadcast %cst_94 : f32 to vector<16x1xf32>
    %175 = arith.addf %171, %174 : vector<16x1xf32>
    %176 = math.rsqrt %175 : vector<16x1xf32>
    %177 = vector.broadcast %176 : vector<16x1xf32> to vector<16x128xf32>
    %178 = arith.mulf %173, %177 : vector<16x128xf32>
    %179 = vector.broadcast %158 : vector<1x128xf32> to vector<16x128xf32>
    %180 = arith.mulf %178, %179 : vector<16x128xf32>
    %181 = vector.broadcast %160 : vector<1x128xf32> to vector<16x128xf32>
    %182 = arith.addf %180, %181 : vector<16x128xf32>
    %c1_95 = arith.constant 1 : index
    %c0_96 = arith.constant 0 : index
    %c0_97 = arith.constant 0 : index
    %183 = vector.load %arg10[%c1_95, %c0_96, %c0_97] : memref<2x128x256xf32, #tpu.memory_space<vmem>>, vector<1x128x256xf32>
    %184 = vector.shape_cast %183 : vector<1x128x256xf32> to vector<128x256xf32>
    %cst_98 = arith.constant dense<0.000000e+00> : vector<16x256xf32>
    %185 = tpu.matmul %182, %184, %cst_98 {dimension_numbers = #tpu.dot_dimension_numbers<[1], [0], [0], [1], [0, 0, 1, 1], [], []>} : vector<16x128xf32>, vector<128x256xf32>, vector<16x256xf32> -> vector<16x256xf32>
    %c1_99 = arith.constant 1 : index
    %c0_100 = arith.constant 0 : index
    %c0_101 = arith.constant 0 : index
    %186 = vector.load %arg11[%c1_99, %c0_100, %c0_101] : memref<2x1x256xf32, #tpu.memory_space<vmem>>, vector<1x1x256xf32>
    %187 = vector.shape_cast %186 : vector<1x1x256xf32> to vector<1x256xf32>
    %188 = vector.broadcast %187 : vector<1x256xf32> to vector<16x256xf32>
    %189 = arith.addf %185, %188 : vector<16x256xf32>
    %cst_102 = arith.constant 0.000000e+00 : f32
    %190 = vector.broadcast %cst_102 : f32 to vector<16x256xf32>
    %191 = arith.maximumf %189, %190 : vector<16x256xf32>
    %c1_103 = arith.constant 1 : index
    %c0_104 = arith.constant 0 : index
    %c0_105 = arith.constant 0 : index
    %192 = vector.load %arg12[%c1_103, %c0_104, %c0_105] : memref<2x256x128xf32, #tpu.memory_space<vmem>>, vector<1x256x128xf32>
    %193 = vector.shape_cast %192 : vector<1x256x128xf32> to vector<256x128xf32>
    %cst_106 = arith.constant dense<0.000000e+00> : vector<16x128xf32>
    %194 = tpu.matmul %191, %193, %cst_106 {dimension_numbers = #tpu.dot_dimension_numbers<[1], [0], [0], [1], [0, 0, 1, 1], [], []>} : vector<16x256xf32>, vector<256x128xf32>, vector<16x128xf32> -> vector<16x128xf32>
    %c1_107 = arith.constant 1 : index
    %c0_108 = arith.constant 0 : index
    %c0_109 = arith.constant 0 : index
    %195 = vector.load %arg13[%c1_107, %c0_108, %c0_109] : memref<2x1x128xf32, #tpu.memory_space<vmem>>, vector<1x1x128xf32>
    %196 = vector.shape_cast %195 : vector<1x1x128xf32> to vector<1x128xf32>
    %197 = vector.broadcast %196 : vector<1x128xf32> to vector<16x128xf32>
    %198 = arith.addf %194, %197 : vector<16x128xf32>
    %199 = arith.addf %182, %198 : vector<16x128xf32>
    %c1_110 = arith.constant 1 : index
    %c0_111 = arith.constant 0 : index
    %c0_112 = arith.constant 0 : index
    %200 = vector.load %arg14[%c1_110, %c0_111, %c0_112] : memref<2x1x128xf32, #tpu.memory_space<vmem>>, vector<1x1x128xf32>
    %201 = vector.shape_cast %200 : vector<1x1x128xf32> to vector<1x128xf32>
    %c1_113 = arith.constant 1 : index
    %c0_114 = arith.constant 0 : index
    %c0_115 = arith.constant 0 : index
    %202 = vector.load %arg15[%c1_113, %c0_114, %c0_115] : memref<2x1x128xf32, #tpu.memory_space<vmem>>, vector<1x1x128xf32>
    %203 = vector.shape_cast %202 : vector<1x1x128xf32> to vector<1x128xf32>
    %cst_116 = arith.constant dense<0.000000e+00> : vector<16xf32>
    %204 = vector.multi_reduction <add>, %199, %cst_116 [1] : vector<16x128xf32> to vector<16xf32>
    %205 = vector.shape_cast %204 : vector<16xf32> to vector<16x1xf32>
    %cst_117 = arith.constant 1.280000e+02 : f32
    %206 = vector.broadcast %cst_117 : f32 to vector<16x1xf32>
    %207 = arith.divf %205, %206 : vector<16x1xf32>
    %208 = vector.broadcast %207 : vector<16x1xf32> to vector<16x128xf32>
    %209 = arith.subf %199, %208 : vector<16x128xf32>
    %210 = arith.mulf %209, %209 : vector<16x128xf32>
    %cst_118 = arith.constant dense<0.000000e+00> : vector<16xf32>
    %211 = vector.multi_reduction <add>, %210, %cst_118 [1] : vector<16x128xf32> to vector<16xf32>
    %212 = vector.shape_cast %211 : vector<16xf32> to vector<16x1xf32>
    %cst_119 = arith.constant 1.280000e+02 : f32
    %213 = vector.broadcast %cst_119 : f32 to vector<16x1xf32>
    %214 = arith.divf %212, %213 : vector<16x1xf32>
    %215 = vector.broadcast %207 : vector<16x1xf32> to vector<16x128xf32>
    %216 = arith.subf %199, %215 : vector<16x128xf32>
    %cst_120 = arith.constant 9.99999996E-13 : f32
    %217 = vector.broadcast %cst_120 : f32 to vector<16x1xf32>
    %218 = arith.addf %214, %217 : vector<16x1xf32>
    %219 = math.rsqrt %218 : vector<16x1xf32>
    %220 = vector.broadcast %219 : vector<16x1xf32> to vector<16x128xf32>
    %221 = arith.mulf %216, %220 : vector<16x128xf32>
    %222 = vector.broadcast %201 : vector<1x128xf32> to vector<16x128xf32>
    %223 = arith.mulf %221, %222 : vector<16x128xf32>
    %224 = vector.broadcast %203 : vector<1x128xf32> to vector<16x128xf32>
    %225 = arith.addf %223, %224 : vector<16x128xf32>
    %c0_121 = arith.constant 0 : index
    %c0_122 = arith.constant 0 : index
    %c0_123 = arith.constant 0 : index
    %226 = vector.load %arg16[%c0_121, %c0_122, %c0_123] : memref<1x16x128xf32, #tpu.memory_space<vmem>>, vector<1x16x128xf32>
    %227 = vector.shape_cast %226 : vector<1x16x128xf32> to vector<16x128xf32>
    %228 = vector.shape_cast %225 : vector<16x128xf32> to vector<1x16x128xf32>
    tpu.vector_store %arg16[%c0_121, %c0_122, %c0_123], %228 {strides = array<i32>} : memref<1x16x128xf32, #tpu.memory_space<vmem>>, vector<1x16x128xf32>,
    return
  }
  func.func @transform_0(%arg0: i32) -> (i32, i32, i32) {
    %c0_i32 = arith.constant 0 : i32
    %c0_i32_0 = arith.constant 0 : i32
    %c0_i32_1 = arith.constant 0 : i32
    return %arg0, %c0_i32, %c0_i32_0 : i32, i32, i32
  }
  func.func @transform_1(%arg0: i32) -> (i32, i32) {
    %c0_i32 = arith.constant 0 : i32
    %c0_i32_0 = arith.constant 0 : i32
    %c0_i32_1 = arith.constant 0 : i32
    return %c0_i32, %c0_i32_0 : i32, i32
  }
  func.func @transform_2(%arg0: i32) -> (i32, i32) {
    %c0_i32 = arith.constant 0 : i32
    %c0_i32_0 = arith.constant 0 : i32
    %c0_i32_1 = arith.constant 0 : i32
    return %c0_i32, %c0_i32_0 : i32, i32
  }
  func.func @transform_3(%arg0: i32) -> (i32, i32, i32) {
    %c0_i32 = arith.constant 0 : i32
    %c0_i32_0 = arith.constant 0 : i32
    %c0_i32_1 = arith.constant 0 : i32
    %c0_i32_2 = arith.constant 0 : i32
    return %c0_i32, %c0_i32_0, %c0_i32_1 : i32, i32, i32
  }
  func.func @transform_4(%arg0: i32) -> (i32, i32, i32) {
    %c0_i32 = arith.constant 0 : i32
    %c0_i32_0 = arith.constant 0 : i32
    %c0_i32_1 = arith.constant 0 : i32
    %c0_i32_2 = arith.constant 0 : i32
    return %c0_i32, %c0_i32_0, %c0_i32_1 : i32, i32, i32
  }
  func.func @transform_5(%arg0: i32) -> (i32, i32, i32) {
    %c0_i32 = arith.constant 0 : i32
    %c0_i32_0 = arith.constant 0 : i32
    %c0_i32_1 = arith.constant 0 : i32
    %c0_i32_2 = arith.constant 0 : i32
    return %c0_i32, %c0_i32_0, %c0_i32_1 : i32, i32, i32
  }
  func.func @transform_6(%arg0: i32) -> (i32, i32, i32) {
    %c0_i32 = arith.constant 0 : i32
    %c0_i32_0 = arith.constant 0 : i32
    %c0_i32_1 = arith.constant 0 : i32
    %c0_i32_2 = arith.constant 0 : i32
    return %c0_i32, %c0_i32_0, %c0_i32_1 : i32, i32, i32
  }
  func.func @transform_7(%arg0: i32) -> (i32, i32, i32) {
    %c0_i32 = arith.constant 0 : i32
    %c0_i32_0 = arith.constant 0 : i32
    %c0_i32_1 = arith.constant 0 : i32
    %c0_i32_2 = arith.constant 0 : i32
    return %c0_i32, %c0_i32_0, %c0_i32_1 : i32, i32, i32
  }
  func.func @transform_8(%arg0: i32) -> (i32, i32, i32) {
    %c0_i32 = arith.constant 0 : i32
    %c0_i32_0 = arith.constant 0 : i32
    %c0_i32_1 = arith.constant 0 : i32
    %c0_i32_2 = arith.constant 0 : i32
    return %c0_i32, %c0_i32_0, %c0_i32_1 : i32, i32, i32
  }
  func.func @transform_9(%arg0: i32) -> (i32, i32, i32) {
    %c0_i32 = arith.constant 0 : i32
    %c0_i32_0 = arith.constant 0 : i32
    %c0_i32_1 = arith.constant 0 : i32
    %c0_i32_2 = arith.constant 0 : i32
    return %c0_i32, %c0_i32_0, %c0_i32_1 : i32, i32, i32
  }
  func.func @transform_10(%arg0: i32) -> (i32, i32, i32) {
    %c0_i32 = arith.constant 0 : i32
    %c0_i32_0 = arith.constant 0 : i32
    %c0_i32_1 = arith.constant 0 : i32
    %c0_i32_2 = arith.constant 0 : i32
    return %c0_i32, %c0_i32_0, %c0_i32_1 : i32, i32, i32
  }
  func.func @transform_11(%arg0: i32) -> (i32, i32, i32) {
    %c0_i32 = arith.constant 0 : i32
    %c0_i32_0 = arith.constant 0 : i32
    %c0_i32_1 = arith.constant 0 : i32
    %c0_i32_2 = arith.constant 0 : i32
    return %c0_i32, %c0_i32_0, %c0_i32_1 : i32, i32, i32
  }
  func.func @transform_12(%arg0: i32) -> (i32, i32, i32) {
    %c0_i32 = arith.constant 0 : i32
    %c0_i32_0 = arith.constant 0 : i32
    %c0_i32_1 = arith.constant 0 : i32
    %c0_i32_2 = arith.constant 0 : i32
    return %c0_i32, %c0_i32_0, %c0_i32_1 : i32, i32, i32
  }
  func.func @transform_13(%arg0: i32) -> (i32, i32, i32) {
    %c0_i32 = arith.constant 0 : i32
    %c0_i32_0 = arith.constant 0 : i32
    %c0_i32_1 = arith.constant 0 : i32
    %c0_i32_2 = arith.constant 0 : i32
    return %c0_i32, %c0_i32_0, %c0_i32_1 : i32, i32, i32
  }
  func.func @transform_14(%arg0: i32) -> (i32, i32, i32) {
    %c0_i32 = arith.constant 0 : i32
    %c0_i32_0 = arith.constant 0 : i32
    %c0_i32_1 = arith.constant 0 : i32
    %c0_i32_2 = arith.constant 0 : i32
    return %c0_i32, %c0_i32_0, %c0_i32_1 : i32, i32, i32
  }
  func.func @transform_15(%arg0: i32) -> (i32, i32, i32) {
    %c0_i32 = arith.constant 0 : i32
    %c0_i32_0 = arith.constant 0 : i32
    %c0_i32_1 = arith.constant 0 : i32
    return %arg0, %c0_i32, %c0_i32_0 : i32, i32, i32
  }
}

module attributes {stable_mosaic.version = 11 : i64} {
  func.func @_span_pair_kernel(%arg0: memref<4x259xf32, #tpu.memory_space<vmem>>, %arg1: memref<259x512xf32, #tpu.memory_space<vmem>>, %arg2: memref<1x512xf32, #tpu.memory_space<vmem>>, %arg3: memref<512x256xf32, #tpu.memory_space<vmem>>, %arg4: memref<512x256xf32, #tpu.memory_space<vmem>>, %arg5: memref<1x256xf32, #tpu.memory_space<vmem>>, %arg6: memref<256x128xf32, #tpu.memory_space<vmem>>, %arg7: memref<1x128xf32, #tpu.memory_space<vmem>>, %arg8: memref<128x128xf32, #tpu.memory_space<vmem>>, %arg9: memref<1x128xf32, #tpu.memory_space<vmem>>, %arg10: memref<128x128xf32, #tpu.memory_space<vmem>>, %arg11: memref<1x128xf32, #tpu.memory_space<vmem>>, %arg12: memref<2x128xf32, #tpu.memory_space<vmem>>) attributes {dimension_semantics = [], scalar_prefetch = 0 : i64, scratch_operands = 0 : i64, tpu.core_type = #tpu.core_type<tc>} {
    %c0 = arith.constant 0 : index
    %c0_0 = arith.constant 0 : index
    %0 = vector.load %arg0[%c0, %c0_0] : memref<4x259xf32, #tpu.memory_space<vmem>>, vector<4x259xf32>
    %c0_1 = arith.constant 0 : index
    %c0_2 = arith.constant 0 : index
    %1 = vector.load %arg1[%c0_1, %c0_2] : memref<259x512xf32, #tpu.memory_space<vmem>>, vector<259x512xf32>
    %cst = arith.constant dense<0.000000e+00> : vector<4x512xf32>
    %2 = tpu.matmul %0, %1, %cst {dimension_numbers = #tpu.dot_dimension_numbers<[1], [0], [0], [1], [0, 0, 1, 1], [], []>} : vector<4x259xf32>, vector<259x512xf32>, vector<4x512xf32> -> vector<4x512xf32>
    %c0_3 = arith.constant 0 : index
    %c0_4 = arith.constant 0 : index
    %3 = vector.load %arg2[%c0_3, %c0_4] : memref<1x512xf32, #tpu.memory_space<vmem>>, vector<1x512xf32>
    %4 = vector.broadcast %3 : vector<1x512xf32> to vector<4x512xf32>
    %5 = arith.addf %2, %4 : vector<4x512xf32>
    %cst_5 = arith.constant 0.000000e+00 : f32
    %6 = vector.broadcast %cst_5 : f32 to vector<4x512xf32>
    %7 = arith.maximumf %5, %6 : vector<4x512xf32>
    %8 = vector.extract_strided_slice %7 {offsets = [0, 0], sizes = [2, 512], strides = [1, 1]} : vector<4x512xf32> to vector<2x512xf32>
    %9 = vector.extract_strided_slice %7 {offsets = [2, 0], sizes = [2, 512], strides = [1, 1]} : vector<4x512xf32> to vector<2x512xf32>
    %c0_6 = arith.constant 0 : index
    %c0_7 = arith.constant 0 : index
    %10 = vector.load %arg3[%c0_6, %c0_7] : memref<512x256xf32, #tpu.memory_space<vmem>>, vector<512x256xf32>
    %cst_8 = arith.constant dense<0.000000e+00> : vector<2x256xf32>
    %11 = tpu.matmul %8, %10, %cst_8 {dimension_numbers = #tpu.dot_dimension_numbers<[1], [0], [0], [1], [0, 0, 1, 1], [], []>} : vector<2x512xf32>, vector<512x256xf32>, vector<2x256xf32> -> vector<2x256xf32>
    %c0_9 = arith.constant 0 : index
    %c0_10 = arith.constant 0 : index
    %12 = vector.load %arg4[%c0_9, %c0_10] : memref<512x256xf32, #tpu.memory_space<vmem>>, vector<512x256xf32>
    %cst_11 = arith.constant dense<0.000000e+00> : vector<2x256xf32>
    %13 = tpu.matmul %9, %12, %cst_11 {dimension_numbers = #tpu.dot_dimension_numbers<[1], [0], [0], [1], [0, 0, 1, 1], [], []>} : vector<2x512xf32>, vector<512x256xf32>, vector<2x256xf32> -> vector<2x256xf32>
    %14 = arith.addf %11, %13 : vector<2x256xf32>
    %c0_12 = arith.constant 0 : index
    %c0_13 = arith.constant 0 : index
    %15 = vector.load %arg5[%c0_12, %c0_13] : memref<1x256xf32, #tpu.memory_space<vmem>>, vector<1x256xf32>
    %16 = vector.broadcast %15 : vector<1x256xf32> to vector<2x256xf32>
    %17 = arith.addf %14, %16 : vector<2x256xf32>
    %cst_14 = arith.constant 0.000000e+00 : f32
    %18 = vector.broadcast %cst_14 : f32 to vector<2x256xf32>
    %19 = arith.maximumf %17, %18 : vector<2x256xf32>
    %c0_15 = arith.constant 0 : index
    %c0_16 = arith.constant 0 : index
    %20 = vector.load %arg6[%c0_15, %c0_16] : memref<256x128xf32, #tpu.memory_space<vmem>>, vector<256x128xf32>
    %cst_17 = arith.constant dense<0.000000e+00> : vector<2x128xf32>
    %21 = tpu.matmul %19, %20, %cst_17 {dimension_numbers = #tpu.dot_dimension_numbers<[1], [0], [0], [1], [0, 0, 1, 1], [], []>} : vector<2x256xf32>, vector<256x128xf32>, vector<2x128xf32> -> vector<2x128xf32>
    %c0_18 = arith.constant 0 : index
    %c0_19 = arith.constant 0 : index
    %22 = vector.load %arg7[%c0_18, %c0_19] : memref<1x128xf32, #tpu.memory_space<vmem>>, vector<1x128xf32>
    %23 = vector.broadcast %22 : vector<1x128xf32> to vector<2x128xf32>
    %24 = arith.addf %21, %23 : vector<2x128xf32>
    %cst_20 = arith.constant 0.000000e+00 : f32
    %25 = vector.broadcast %cst_20 : f32 to vector<2x128xf32>
    %26 = arith.maximumf %24, %25 : vector<2x128xf32>
    %c0_21 = arith.constant 0 : index
    %c0_22 = arith.constant 0 : index
    %27 = vector.load %arg8[%c0_21, %c0_22] : memref<128x128xf32, #tpu.memory_space<vmem>>, vector<128x128xf32>
    %cst_23 = arith.constant dense<0.000000e+00> : vector<2x128xf32>
    %28 = tpu.matmul %26, %27, %cst_23 {dimension_numbers = #tpu.dot_dimension_numbers<[1], [0], [0], [1], [0, 0, 1, 1], [], []>} : vector<2x128xf32>, vector<128x128xf32>, vector<2x128xf32> -> vector<2x128xf32>
    %c0_24 = arith.constant 0 : index
    %c0_25 = arith.constant 0 : index
    %29 = vector.load %arg9[%c0_24, %c0_25] : memref<1x128xf32, #tpu.memory_space<vmem>>, vector<1x128xf32>
    %30 = vector.broadcast %29 : vector<1x128xf32> to vector<2x128xf32>
    %31 = arith.addf %28, %30 : vector<2x128xf32>
    %cst_26 = arith.constant 0.000000e+00 : f32
    %32 = vector.broadcast %cst_26 : f32 to vector<2x128xf32>
    %33 = arith.maximumf %31, %32 : vector<2x128xf32>
    %c0_27 = arith.constant 0 : index
    %c0_28 = arith.constant 0 : index
    %34 = vector.load %arg10[%c0_27, %c0_28] : memref<128x128xf32, #tpu.memory_space<vmem>>, vector<128x128xf32>
    %cst_29 = arith.constant dense<0.000000e+00> : vector<2x128xf32>
    %35 = tpu.matmul %33, %34, %cst_29 {dimension_numbers = #tpu.dot_dimension_numbers<[1], [0], [0], [1], [0, 0, 1, 1], [], []>} : vector<2x128xf32>, vector<128x128xf32>, vector<2x128xf32> -> vector<2x128xf32>
    %c0_30 = arith.constant 0 : index
    %c0_31 = arith.constant 0 : index
    %36 = vector.load %arg11[%c0_30, %c0_31] : memref<1x128xf32, #tpu.memory_space<vmem>>, vector<1x128xf32>
    %37 = vector.broadcast %36 : vector<1x128xf32> to vector<2x128xf32>
    %38 = arith.addf %35, %37 : vector<2x128xf32>
    %c0_32 = arith.constant 0 : index
    %c0_33 = arith.constant 0 : index
    %39 = vector.load %arg12[%c0_32, %c0_33] : memref<2x128xf32, #tpu.memory_space<vmem>>, vector<2x128xf32>
    tpu.vector_store %arg12[%c0_32, %c0_33], %38 {strides = array<i32>} : memref<2x128xf32, #tpu.memory_space<vmem>>, vector<2x128xf32>,
    return
  }
}

</mosaic_0001>

<bundles_post_ra>
// kernel: unbiased_bert_forward.5
= control target key start
LH: loop header
LB: loop body
LE: loop exit
PB: predicated region body
PF: predicated region fallthrough
CT: control target
= control target key end

     0   :  { %v250_v0 = vlaneseq  ;;  %vm345_vm8 = vcmask 130112   ;;  %vm374_vm9 = vcmask 1041409   ;;  %vm376_vm10 = vcmask 1042434   ;;  %s683_s1 = inlined_call_operand.vmem [shape: f32[128,128], index: 1, kind: input, shape index: {}]   ;;  %s684_s0 = inlined_call_operand.vmem [shape: f32[4,16,128], index: 0, kind: input, shape index: {}]   ;;  %s685_s3 = inlined_call_operand.vmem [shape: s32[4,16], index: 3, kind: input, shape index: {}]   ;;  %s686_s2 = inlined_call_operand.vmem [shape: f32[1,128], index: 2, kind: input, shape index: {}]   ;;  %s687_s4 = inlined_call_operand.vmem [shape: f32[4,128], index: 4, kind: output, shape index: {}]  }
   0x1   :  { %v25_v1 = vld [vmem:[%s683_s1] sm:$0xff]  ;;  %v26_v2 = vld [vmem:[%s683_s1 + $0x8] sm:$0xff]  ;;  %v27_v3 = vld [vmem:[%s683_s1 + $0x10] sm:$0xff]  ;;  %vm378_vm11 = vcmask 1043459   ;;  %vm381_vm12 = vcmask 125952  }
   0x2   :  { %v459_v4 = vpack.c.bf16 %v26_v2, %v25_v1  ;;  %v28_v5 = vld [vmem:[%s683_s1 + $0x18] sm:$0xff]  ;;  %v569_v6 = vshrl.u32 %v250_v0, 7  ;;  %v29_v8 = vld [vmem:[%s683_s1 + $0x20] sm:$0xff]  ;;  %v30_v9 = vld [vmem:[%s683_s1 + $0x28] sm:$0xff] }
   0x3   :  { %v463_v7 = vpack.c.bf16 %v28_v5, %v27_v3  ;;  %v467_v10 = vpack.c.bf16 %v30_v9, %v29_v8  ;;  %v17_v11 = vld [vmem:[%s684_s0] sm:$0xff]  ;;  %v31_v15 = vld [vmem:[%s683_s1 + $0x30] sm:$0xff]  ;;  %v32_v16 = vld [vmem:[%s683_s1 + $0x38] sm:$0xff] }
   0x4   :  { %460 = vmatprep.subr.bf16.mxu0 %v459_v4  ;;  %491 = vmatprep.subr.bf16.mxu1 %v459_v4  ;;  %v21_v12 = vld [vmem:[%s684_s0 + $0x20] sm:$0xff]  ;;  %v265_v13 = vsub.s32 1, %v569_v6  ;;  %v254_v14 = vsub.s32 0, %v569_v6  ;;  %v471_v18 = vpack.c.bf16 %v32_v16, %v31_v15  ;;  %v34_v22 = vld [vmem:[%s683_s1 + $0x48] sm:$0xff]  ;;  %v276_v23 = vsub.s32 2, %v569_v6  ;;  %v35_v25 = vld [vmem:[%s683_s1 + $0x50] sm:$0xff] }
   0x5   :  { %462 = vmatpush3.bf16.msra.mxu0 %v459_v4  ;;  %499 = vmatpush3.bf16.msra.mxu1 %v459_v4  ;;  %v249_v17 = vld [vmem:[%s685_s3] sm:$0xf]  ;;  %v36_v26 = vld [vmem:[%s683_s1 + $0x58] sm:$0xff]  ;;  %v287_v28 = vsub.s32 3, %v569_v6  ;;  %v38_v31 = vld [vmem:[%s683_s1 + $0x68] sm:$0xff] }
   0x6   :  { %464 = vmatprep.subr.bf16.mxu0 %v463_v7  ;;  %492 = vmatprep.subr.bf16.mxu1 %v463_v7  ;;  %v266_v19 = vrot.slane %v249_v17, %v265_v13  ;;  %v255_v20 = vrot.slane %v249_v17, %v254_v14  ;;  %v33_v21 = vld [vmem:[%s683_s1 + $0x40] sm:$0xff]  ;;  %v277_v27 = vrot.slane %v249_v17, %v276_v23  ;;  %v39_v34 = vld [vmem:[%s683_s1 + $0x70] sm:$0xff]  ;;  %v40_v35 = vld [vmem:[%s683_s1 + $0x78] sm:$0xff] }
   0x7   :  { %447 = vmatprep.mubr.f32.mxu0 %v17_v11  ;;  %453 = vmatprep.mubr.f32.mxu1 %v21_v12  ;;  %v475_v24 = vpack.c.bf16 %v34_v22, %v33_v21  ;;  %v479_v29 = vpack.c.bf16 %v36_v26, %v35_v25  ;;  %v37_v30 = vld [vmem:[%s683_s1 + $0x60] sm:$0xff]  ;;  %v288_v32 = vrot.slane %v249_v17, %v287_v28  ;;  %v18_v37 = vld [vmem:[%s684_s0 + $0x8] sm:$0xff]  ;;  %v19_v39 = vld [vmem:[%s684_s0 + $0x10] sm:$0xff] }
   0x8   :  { %268 = vbcast.lane.b32.xlu1 %v266_v19, 256  ;;  %257 = vbcast.lane.b32.xlu0 %v255_v20, 256  ;;  %v483_v33 = vpack.c.bf16 %v38_v31, %v37_v30  ;;  %v487_v36 = vpack.c.bf16 %v40_v35, %v39_v34  ;;  %v22_v38 = vld [vmem:[%s684_s0 + $0x28] sm:$0xff]  ;;  %v23_v40 = vld [vmem:[%s684_s0 + $0x30] sm:$0xff]  ;;  %v20_v41 = vld [vmem:[%s684_s0 + $0x18] sm:$0xff] }
   0x9   :  { %466 = vmatpush3.bf16.msra.mxu0 %v463_v7  ;;  %500 = vmatpush3.bf16.msra.mxu1 %v463_v7  ;;  %v24_v42 = vld [vmem:[%s684_s0 + $0x38] sm:$0xff]  ;;  %v390_v43 = vld [vmem:[%s686_s2] ss:$0 sm:$0xff] }
   0xa   :  { %468 = vmatprep.subr.bf16.mxu0 %v467_v10  ;;  %493 = vmatprep.subr.bf16.mxu1 %v467_v10 }
   0xc   :  { %272 = vbcast.lane.b32.xlu1 %v266_v19, 264  ;;  %261 = vbcast.lane.b32.xlu0 %v255_v20, 264 }
   0xd   :  { %470 = vmatpush3.bf16.msra.mxu0 %v467_v10  ;;  %501 = vmatpush3.bf16.msra.mxu1 %v467_v10 }
   0xe   :  { %472 = vmatprep.subr.bf16.mxu0 %v471_v18  ;;  %494 = vmatprep.subr.bf16.mxu1 %v471_v18 }
  0x10   :  { %283 = vbcast.lane.b32.xlu1 %v277_v27, 264  ;;  %279 = vbcast.lane.b32.xlu0 %v277_v27, 256 }
  0x11   :  { %474 = vmatpush3.bf16.msra.mxu0 %v471_v18  ;;  %502 = vmatpush3.bf16.msra.mxu1 %v471_v18 }
  0x12   :  { %476 = vmatprep.subr.bf16.mxu0 %v475_v24  ;;  %495 = vmatprep.subr.bf16.mxu1 %v475_v24 }
  0x14   :  { %294 = vbcast.lane.b32.xlu1 %v288_v32, 264  ;;  %290 = vbcast.lane.b32.xlu0 %v288_v32, 256 }
  0x15   :  { %478 = vmatpush3.bf16.msra.mxu0 %v475_v24  ;;  %503 = vmatpush3.bf16.msra.mxu1 %v475_v24 }
  0x16   :  { %480 = vmatprep.subr.bf16.mxu0 %v479_v29  ;;  %496 = vmatprep.subr.bf16.mxu1 %v479_v29 }
  0x19   :  { %482 = vmatpush3.bf16.msra.mxu0 %v479_v29  ;;  %504 = vmatpush3.bf16.msra.mxu1 %v479_v29 }
  0x1a   :  { %484 = vmatprep.subr.bf16.mxu0 %v483_v33  ;;  %497 = vmatprep.subr.bf16.mxu1 %v483_v33 }
  0x1d   :  { %486 = vmatpush3.bf16.msra.mxu0 %v483_v33  ;;  %505 = vmatpush3.bf16.msra.mxu1 %v483_v33 }
  0x1e   :  { %488 = vmatprep.subr.bf16.mxu0 %v487_v36  ;;  %498 = vmatprep.subr.bf16.mxu1 %v487_v36 }
  0x21   :  { %490 = vmatpush3.bf16.msra.mxu0 %v487_v36  ;;  %506 = vmatpush3.bf16.msra.mxu1 %v487_v36 }
  0x24   :  { %448 = vmatmul.mubr.f32.vlgmr.msra.gmra.mrb[0].mxu0 %v18_v37  ;;  %454 = vmatmul.mubr.f32.vlgmr.msra.gmra.mrb[0].mxu1 %v22_v38 }
  0x25   :  { %450 = vmatprep.mubr.f32.mxu0 %v19_v39  ;;  %456 = vmatprep.mubr.f32.mxu1 %v23_v40 }
  0x28   :  { %451 = vmatmul.mubr.f32.gmra.mrb[2].mxu0 %v20_v41  ;;  %457 = vmatmul.mubr.f32.gmra.mrb[2].mxu1 %v24_v42 }
  0xf7   :  { %v449_v44 = vpop.f32.mrb[0].mxu0  ;;  %v455_v45 = vpop.f32.mrb[0].mxu1 }
  0xf8   :  { %v120_v46 = vadd.f32 %v449_v44, %v390_v43  ;;  %v140_v47 = vadd.f32 %v455_v45, %v390_v43  ;;  %v114_v48 = vpop.f32.mrb[1].mxu0  ;;  %v134_v49 = vpop.f32.mrb[1].mxu1 }
  0xf9   :  { %v115_v50 = vadd.f32 %v390_v43, %v114_v48  ;;  %v135_v51 = vadd.f32 %v390_v43, %v134_v49 }
  0xfb   :  { %v153_v52 = vmax.f32 %v115_v50, %v120_v46  ;;  %v167_v53 = vmax.f32 %v135_v51, %v140_v47  ;;  %v452_v54 = vpop.f32.mrb[2].mxu0  ;;  %v458_v55 = vpop.f32.mrb[2].mxu1 }
  0xfc   :  { %v130_v56 = vadd.f32 %v452_v54, %v390_v43  ;;  %v150_v57 = vadd.f32 %v458_v55, %v390_v43  ;;  %v124_v58 = vpop.f32.mrb[3].mxu0  ;;  %v144_v59 = vpop.f32.mrb[3].mxu1 }
  0xfd   :  { %v154_v60 = vrot.slane %v153_v52, 4  ;;  %v168_v61 = vrot.slane %v167_v53, 4  ;;  %v125_v62 = vadd.f32 %v390_v43, %v124_v58  ;;  %v145_v63 = vadd.f32 %v390_v43, %v144_v59 }
  0xff   :  { %v155_v1 = vmax.f32 %v153_v52, %v154_v60  ;;  %v169_v2 = vmax.f32 %v167_v53, %v168_v61  ;;  %v160_v3 = vmax.f32 %v125_v62, %v130_v56  ;;  %v174_v4 = vmax.f32 %v145_v63, %v150_v57 }
 0x101   :  { %v156_v5 = vrot.slane %v155_v1, 2  ;;  %v170_v7 = vrot.slane %v169_v2, 2  ;;  %v161_v8 = vrot.slane %v160_v3, 4  ;;  %v175_v9 = vrot.slane %v174_v4, 4 }
 0x103   :  { %v157_v10 = vmax.f32 %v155_v1, %v156_v5  ;;  %v171_v11 = vmax.f32 %v169_v2, %v170_v7  ;;  %v162_v12 = vmax.f32 %v160_v3, %v161_v8  ;;  %v176_v13 = vmax.f32 %v174_v4, %v175_v9 }
 0x105   :  { %v158_v14 = vrot.slane %v157_v10, 1  ;;  %v172_v15 = vrot.slane %v171_v11, 1  ;;  %v163_v16 = vrot.slane %v162_v12, 2  ;;  %v177_v17 = vrot.slane %v176_v13, 2 }
 0x107   :  { %v159_v18 = vmax.f32 %v157_v10, %v158_v14  ;;  %v173_v19 = vmax.f32 %v171_v11, %v172_v15  ;;  %v164_v20 = vmax.f32 %v162_v12, %v163_v16  ;;  %v178_v21 = vmax.f32 %v176_v13, %v177_v17  ;;  %v258_v13 = vpop.permute.xlu0 %257  ;;  %v269_v16 = vpop.permute.xlu1 %268 }
 0x109   :  { %v641_v22 = vsub.f32 %v115_v50, %v159_v18  ;;  %v643_v23 = vsub.f32 %v135_v51, %v173_v19  ;;  %v645_v24 = vsub.f32 %v140_v47, %v173_v19  ;;  %v165_v25 = vrot.slane %v164_v20, 1 }
 0x10a   :  { %v179_v26 = vrot.slane %v178_v21, 1  ;;  %v647_v27 = vsub.f32 %v120_v46, %v159_v18 }
 0x10b   :  { %v189_v28 = vmul.f32 1.442695, %v641_v22  ;;  %v197_v29 = vmul.f32 1.442695, %v643_v23  ;;  %v199_v30 = vmul.f32 1.442695, %v645_v24  ;;  %v166_v31 = vmax.f32 %v164_v20, %v165_v25  ;;  %v262_v18 = vpop.permute.xlu0 %261  ;;  %v273_v19 = vpop.permute.xlu1 %272 }
 0x10c   :  { %v180_v32 = vmax.f32 %v178_v21, %v179_v26  ;;  %v191_v33 = vmul.f32 1.442695, %v647_v27  ;;  %v251_v25 = vand.u32 127, %v250_v0 }
 0x10d   :  { %507 = vpow2.f32 %v189_v28  ;;  %v653_v34 = vsub.f32 %v125_v62, %v166_v31  ;;  %v655_v35 = vsub.f32 %v130_v56, %v166_v31 }
 0x10e   :  { %509 = vpow2.f32 %v197_v29  ;;  %v657_v36 = vsub.f32 %v145_v63, %v180_v32  ;;  %v659_v37 = vsub.f32 %v150_v57, %v180_v32  ;;  %vm296_vm0 = vcmp.eq.s32.totalorder %v251_v25, %v258_v13 }
 0x10f   :  { %511 = vpow2.f32 %v199_v30  ;;  %v193_v38 = vmul.f32 1.442695, %v653_v34  ;;  %v195_v39 = vmul.f32 1.442695, %v655_v35  ;;  %v280_v28 = vpop.permute.xlu0 %279  ;;  %vm297_vm1 = vcmp.eq.s32.totalorder %v251_v25, %v262_v18 }
 0x110   :  { %v201_v40 = vmul.f32 1.442695, %v657_v36  ;;  %v203_v41 = vmul.f32 1.442695, %v659_v37  ;;  %513 = vpow2.f32 %v191_v33  ;;  %v284_v33 = vpop.permute.xlu1 %283  ;;  %vm300_vm3 = vcmp.eq.s32.totalorder %v251_v25, %v280_v28 }
 0x111   :  { %515 = vpow2.f32 %v193_v38  ;;  %vm301_vm2 = vcmp.eq.s32.totalorder %v251_v25, %v284_v33  ;;  %vm298_vm5 = vcmp.eq.s32.totalorder %v251_v25, %v269_v16  ;;  %vm299_vm6 = vcmp.eq.s32.totalorder %v251_v25, %v273_v19 }
 0x112   :  { %517 = vpow2.f32 %v195_v39 }
 0x113   :  { %519 = vpow2.f32 %v201_v40 }
 0x114   :  { %521 = vpow2.f32 %v203_v41 }
 0x117   :  { %v508_v42 = vpop.eup %507 }
 0x118   :  { %v510_v43 = vpop.eup %509 }
 0x119   :  { %v512_v44 = vpop.eup %511 }
 0x11a   :  { %v514_v45 = vpop.eup %513  ;;  %v219_v46 = vadd.f32 %v512_v44, %v510_v43 }
 0x11b   :  { %v516_v47 = vpop.eup %515  ;;  %v205_v48 = vadd.f32 %v514_v45, %v508_v42  ;;  %v291_v45 = vpop.permute.xlu0 %290 }
 0x11c   :  { %v518_v49 = vpop.eup %517  ;;  %v220_v50 = vrot.slane %v219_v46, 4  ;;  %vm302_vm4 = vcmp.eq.s32.totalorder %v251_v25, %v291_v45 }
 0x11d   :  { %v520_v51 = vpop.eup %519  ;;  %v206_v52 = vrot.slane %v205_v48, 4  ;;  %v212_v53 = vadd.f32 %v518_v49, %v516_v47 }
 0x11e   :  { %v522_v54 = vpop.eup %521  ;;  %v221_v55 = vadd.f32 %v220_v50, %v219_v46 }
 0x11f   :  { %v207_v56 = vadd.f32 %v206_v52, %v205_v48  ;;  %v226_v57 = vadd.f32 %v522_v54, %v520_v51  ;;  %v213_v58 = vrot.slane %v212_v53, 4 }
 0x120   :  { %v222_v59 = vrot.slane %v221_v55, 2 }
 0x121   :  { %v208_v60 = vrot.slane %v207_v56, 2  ;;  %v227_v61 = vrot.slane %v226_v57, 4  ;;  %v214_v62 = vadd.f32 %v213_v58, %v212_v53  ;;  %v338_v53 = vsub.s32 %v251_v25, %v569_v6 }
 0x122   :  { %v223_v63 = vadd.f32 %v222_v59, %v221_v55 }
 0x123   :  { %v209_v1 = vadd.f32 %v208_v60, %v207_v56  ;;  %v228_v2 = vadd.f32 %v227_v61, %v226_v57  ;;  %v215_v3 = vrot.slane %v214_v62, 2 }
 0x124   :  { %v224_v4 = vrot.slane %v223_v63, 1 }
 0x125   :  { %v210_v5 = vrot.slane %v209_v1, 1  ;;  %v229_v7 = vrot.slane %v228_v2, 2  ;;  %v216_v8 = vadd.f32 %v215_v3, %v214_v62 }
 0x126   :  { %v225_v9 = vadd.f32 %v224_v4, %v223_v63 }
 0x127   :  { %v211_v10 = vadd.f32 %v210_v5, %v209_v1  ;;  %v230_v11 = vadd.f32 %v229_v7, %v228_v2  ;;  %v217_v12 = vrot.slane %v216_v8, 1 }
 0x128   :  { %523 = vlog2.f32 %v225_v9 }
 0x129   :  { %525 = vlog2.f32 %v211_v10  ;;  %v231_v14 = vrot.slane %v230_v11, 1  ;;  %v218_v15 = vadd.f32 %v217_v12, %v216_v8 }
 0x12b   :  { %v232_v17 = vadd.f32 %v231_v14, %v230_v11  ;;  %527 = vlog2.f32 %v218_v15 }
 0x12d   :  { %529 = vlog2.f32 %v232_v17 }
 0x132   :  { %v524_v20 = vpop.eup %523 }
 0x133   :  { %v526_v21 = vpop.eup %525  ;;  %v238_v26 = vmul.f32 0.6931472, %v524_v20 }
 0x134   :  { %v234_v29 = vmul.f32 0.6931472, %v526_v21 }
 0x135   :  { %v528_v30 = vpop.eup %527  ;;  %v245_v31 = vsub.f32 %v643_v23, %v238_v26  ;;  %v246_v32 = vsub.f32 %v645_v24, %v238_v26 }
 0x136   :  { %v242_v38 = vsub.f32 %v647_v27, %v234_v29  ;;  %v241_v39 = vsub.f32 %v641_v22, %v234_v29  ;;  %v236_v40 = vmul.f32 0.6931472, %v528_v30 }
 0x137   :  { %v530_v41 = vpop.eup %529  ;;  %v308_v46 = vsel %vm300_vm3, %v245_v31, 0.0  ;;  %v309_v22 = vsel %vm301_vm2, %v246_v32, 0.0 }
 0x138   :  { %v305_v42 = vsel %vm297_vm1, %v242_v38, 0.0  ;;  %v304_v43 = vsel %vm296_vm0, %v241_v39, 0.0  ;;  %v240_v0 = vmul.f32 0.6931472, %v530_v41  ;;  %v243_v44 = vsub.f32 %v653_v34, %v236_v40  ;;  %v295_v34 = vpop.permute.xlu1 %294 }
 0x139   :  { %314 = vadd.xlane.f32.xlu1 %v305_v42  ;;  %312 = vadd.xlane.f32.xlu0 %v304_v43  ;;  %v244_v23 = vsub.f32 %v655_v35, %v236_v40  ;;  %vm303_vm7 = vcmp.eq.s32.totalorder %v251_v25, %v295_v34 }
 0x13a   :  { %v247_v24 = vsub.f32 %v657_v36, %v240_v0  ;;  %v248_v27 = vsub.f32 %v659_v37, %v240_v0  ;;  %v306_v48 = vsel %vm298_vm5, %v243_v44, 0.0  ;;  %v340_v37 = vadd.s32 4294967288, %v251_v25 }
 0x13b   :  { %v307_v49 = vsel %vm299_vm6, %v244_v23, 0.0 }
 0x13c   :  { %v310_v47 = vsel %vm302_vm4, %v247_v24, 0.0  ;;  %v311_v35 = vsel %vm303_vm7, %v248_v27, 0.0  ;;  %v343_v52 = vsub.s32 %v340_v37, %v569_v6 }
 0x13d   :  { %320 = vadd.xlane.f32.xlu1 %v308_v46  ;;  %322 = vadd.xlane.f32.xlu0 %v309_v22 }
 0x141   :  { %324 = vadd.xlane.f32.xlu1 %v310_v47  ;;  %316 = vadd.xlane.f32.xlu0 %v306_v48 }
 0x145   :  { %318 = vadd.xlane.f32.xlu0 %v307_v49 }
 0x149   :  { %326 = vadd.xlane.f32.xlu0 %v311_v35 }
 0x1c6   :  { %v313_v36 = vpop.xlane.xlu0 %312  ;;  %v315_v50 = vpop.xlane.xlu1 %314 }
 0x1c7   :  { %v344_v56 = vrot.slane %v315_v50, %v343_v52  ;;  %v339_v57 = vrot.slane %v313_v36, %v338_v53 }
 0x1c9   :  { %v346_v1 = vsel %vm345_vm8, %v344_v56, %v339_v57 }
 0x1ca   :  { %v323_v51 = vpop.xlane.xlu0 %322  ;;  %v321_v54 = vpop.xlane.xlu1 %320 }
 0x1cb   :  { %v359_v61 = vrot.slane %v321_v54, %v338_v53  ;;  %v363_v62 = vrot.slane %v323_v51, %v343_v52 }
 0x1cd   :  { %v364_v7 = vsel %vm345_vm8, %v363_v62, %v359_v61 }
 0x1ce   :  { %v317_v55 = vpop.xlane.xlu0 %316  ;;  %v325_v63 = vpop.xlane.xlu1 %324 }
 0x1cf   :  { %v350_v59 = vrot.slane %v317_v55, %v338_v53  ;;  %v368_v6 = vrot.slane %v325_v63, %v338_v53 }
 0x1d2   :  { %v319_v58 = vpop.xlane.xlu0 %318 }
 0x1d3   :  { %v354_v60 = vrot.slane %v319_v58, %v343_v52 }
 0x1d5   :  { %v355_v2 = vsel %vm345_vm8, %v354_v60, %v350_v59 }
 0x1d6   :  { %v327_v3 = vpop.xlane.xlu0 %326  ;;  %v375_v4 = vsel %vm374_vm9, %v355_v2, %v346_v1 }
 0x1d7   :  { %v372_v5 = vrot.slane %v327_v3, %v343_v52  ;;  %v377_v9 = vsel %vm376_vm10, %v364_v7, %v375_v4 }
 0x1d9   :  { %v373_v8 = vsel %vm345_vm8, %v372_v5, %v368_v6 }
 0x1da   :  { %v379_v10 = vsel %vm378_vm11, %v373_v8, %v377_v9 }
 0x1db   :  { %v382_v11 = vsel %vm381_vm12, %v379_v10, 0.0 }
 0x1dc   :  { %383 = vadd.xlane.f32.xlu1 %v382_v11 }
 0x269   :  { %v384_v12 = vpop.xlane.xlu1 %383 }
 0x26a   :  { %385 = vst [vmem:[%s687_s4] sm:$0xf] %v384_v12 }

// kernel: unbiased_bert_forward.6
= control target key start
LH: loop header
LB: loop body
LE: loop exit
PB: predicated region body
PF: predicated region fallthrough
CT: control target
= control target key end

     0   :  { %s3213_s18 = smov 0   ;;  %s4160_s0 = inlined_call_operand.vmem [shape: f32[2,16,128], index: 0, kind: input, shape index: {}]   ;;  %s4161_s1 = inlined_call_operand.vmem [shape: f32[1,128], index: 1, kind: input, shape index: {}]   ;;  %s4162_s2 = inlined_call_operand.vmem [shape: f32[1,128], index: 2, kind: input, shape index: {}]   ;;  %s4163_s3 = inlined_call_operand.vmem [shape: f32[2,128,384], index: 3, kind: input, shape index: {}]   ;;  %s4164_s4 = inlined_call_operand.vmem [shape: f32[2,1,384], index: 4, kind: input, shape index: {}]   ;;  %s4165_s5 = inlined_call_operand.vmem [shape: f32[2,128,128], index: 5, kind: input, shape index: {}]   ;;  %s4166_s6 = inlined_call_operand.vmem [shape: f32[2,1,128], index: 6, kind: input, shape index: {}]   ;;  %s4167_s7 = inlined_call_operand.vmem [shape: f32[2,1,128], index: 7, kind: input, shape index: {}]   ;;  %s4168_s8 = inlined_call_operand.vmem [shape: f32[2,1,128], index: 8, kind: input, shape index: {}]   ;;  %s4169_s9 = inlined_call_operand.vmem [shape: f32[2,128,256], index: 9, kind: input, shape index: {}]   ;;  %s4170_s10 = inlined_call_operand.vmem [shape: f32[2,1,256], index: 10, kind: input, shape index: {}]   ;;  %s4171_s11 = inlined_call_operand.vmem [shape: f32[2,256,128], index: 11, kind: input, shape index: {}]   ;;  %s4172_s12 = inlined_call_operand.vmem [shape: f32[2,1,128], index: 12, kind: input, shape index: {}]   ;;  %s4173_s13 = inlined_call_operand.vmem [shape: f32[2,1,128], index: 13, kind: input, shape index: {}]   ;;  %s4174_s14 = inlined_call_operand.vmem [shape: f32[2,1,128], index: 14, kind: input, shape index: {}]   ;;  %s4175_s15 = inlined_call_operand.vmem [shape: f32[2,16,128], index: 15, kind: output, shape index: {}]  }
   0x1 LB: > { %s2244_s19 = sadd.s32 4294967295, %s3130_s18   ;;  %p2248_p0 = scmp.ge.s32.totalorder %s3130_s18, 1  ;;  %s3130_s18 = sphi %s3213_s18, %s25_s18  }
   0x2   : > { %p437_p1 = scmp.lt.s32.totalorder %s3130_s18, 3 }
   0x4   : > { %p438_p2 = pnand %p2248_p0, %p437_p1 }
   0x5   : > { %p485_p3 = scmp.lt.s32.totalorder (!%p438_p2), %s2244_s19, 1  ;;  %v539_v2 = vld [vmem:[%s4163_s3 + $0x8] sm:$0xff] (!%p438_p2)  ;;  %v542_v3 = vld [vmem:[%s4163_s3 + $0x20] sm:$0xff] (!%p438_p2)  ;;  %v541_v6 = vld [vmem:[%s4163_s3 + $0x18] sm:$0xff] (!%p438_p2)  ;;  %vm832_vm0 = vcmask (!%p438_p2), 130048  }
   0x6   : > { %441 = sbr.rel (%p438_p2) target bundleno = 4831 (0x12df), region = 80  ;;  %v538_v4 = vld [vmem:[%s4163_s3] sm:$0xff] (!%p438_p2)  ;;  %v2743_v5 = vpack.c.bf16 (!%p438_p2), %v542_v3, %v539_v2  ;;  %v545_v7 = vld [vmem:[%s4163_s3 + $0x38] sm:$0xff] (!%p438_p2)  ;;  %v548_v8 = vld [vmem:[%s4163_s3 + $0x50] sm:$0xff] (!%p438_p2) }
   0x7   : > { %v2745_v9 = vpack.c.bf16 (!%p438_p2), %v541_v6, %v538_v4  ;;  %v2747_v10 = vpack.c.bf16 (!%p438_p2), %v548_v8, %v545_v7  ;;  %v540_v11 = vld [vmem:[%s4163_s3 + $0x10] sm:$0xff] (!%p438_p2)  ;;  %v543_v12 = vld [vmem:[%s4163_s3 + $0x28] sm:$0xff] (!%p438_p2)  ;;  %v554_v17 = vld [vmem:[%s4163_s3 + $0x80] sm:$0xff] (!%p438_p2)  ;;  %v3132_v4 = vmov (!%p438_p2), 0.0  }
   0x8   : > { %v544_v13 = vld [vmem:[%s4163_s3 + $0x30] sm:$0xff] (!%p438_p2)  ;;  %2744 = vmatprep.subr.bf16.mxu0 (!%p438_p2), %v2743_v5  ;;  %v2775_v14 = vpack.c.bf16 (!%p438_p2), %v543_v12, %v540_v11  ;;  %v547_v15 = vld [vmem:[%s4163_s3 + $0x48] sm:$0xff] (!%p438_p2)  ;;  %v546_v19 = vld [vmem:[%s4163_s3 + $0x40] sm:$0xff] (!%p438_p2)  ;;  %667 = vmatprep.mubr.f32.mxu0 (!%p438_p2), %v3132_v4 }
   0x9   : > { %v551_v16 = vld [vmem:[%s4163_s3 + $0x68] sm:$0xff] (!%p438_p2)  ;;  %2746 = vmatpush1.bf16.msra.mxu0 (!%p438_p2), %v2745_v9  ;;  %v2749_v18 = vpack.c.bf16 (!%p438_p2), %v547_v15, %v544_v13  ;;  %v549_v20 = vld [vmem:[%s4163_s3 + $0x58] sm:$0xff] (!%p438_p2)  ;;  %v550_v23 = vld [vmem:[%s4163_s3 + $0x60] sm:$0xff] (!%p438_p2) }
   0xa   : > { %2748 = vmatprep.subr.bf16.mxu0 (!%p438_p2), %v2747_v10  ;;  %2776 = vmatprep.subr.bf16.mxu1 (!%p438_p2), %v2775_v14  ;;  %v2751_v21 = vpack.c.bf16 (!%p438_p2), %v554_v17, %v551_v16  ;;  %v2779_v22 = vpack.c.bf16 (!%p438_p2), %v549_v20, %v546_v19  ;;  %v553_v24 = vld [vmem:[%s4163_s3 + $0x78] sm:$0xff] (!%p438_p2)  ;;  %v560_v35 = vld [vmem:[%s4163_s3 + $0xb0] sm:$0xff] (!%p438_p2)  ;;  %v555_v38 = vld [vmem:[%s4163_s3 + $0x88] sm:$0xff] (!%p438_p2) }
   0xb   : > { %2778 = vmatpush3.bf16.msra.mxu1 (!%p438_p2), %v2775_v14  ;;  %v2753_v25 = vpack.c.bf16 (!%p438_p2), %v553_v24, %v550_v23  ;;  %v557_v34 = vld [vmem:[%s4163_s3 + $0x98] sm:$0xff] (!%p438_p2)  ;;  %v552_v36 = vld [vmem:[%s4163_s3 + $0x70] sm:$0xff] (!%p438_p2)  ;;  %v559_v40 = vld [vmem:[%s4163_s3 + $0xa8] sm:$0xff] (!%p438_p2) }
   0xc   : > { %2780 = vmatprep.subr.bf16.mxu1 (!%p438_p2), %v2779_v22  ;;  %v2755_v37 = vpack.c.bf16 (!%p438_p2), %v560_v35, %v557_v34  ;;  %v556_v39 = vld [vmem:[%s4163_s3 + $0x90] sm:$0xff] (!%p438_p2)  ;;  %v2783_v41 = vpack.c.bf16 (!%p438_p2), %v555_v38, %v552_v36  ;;  %v563_v43 = vld [vmem:[%s4163_s3 + $0xc8] sm:$0xff] (!%p438_p2)  ;;  %v566_v44 = vld [vmem:[%s4163_s3 + $0xe0] sm:$0xff] (!%p438_p2) }
   0xd   : > { %s4177_s19 = smov (!%p485_p3, %s2244_s19), 1  ;;  %2750 = vmatpush1.bf16.msra.mxu0 %v2749_v18  ;;  %v2757_v42 = vpack.c.bf16 %v559_v40, %v556_v39  ;;  %v558_v45 = vld [vmem:[%s4163_s3 + $0xa0] sm:$0xff]  ;;  %v2759_v46 = vpack.c.bf16 %v566_v44, %v563_v43  ;;  %v561_v47 = vld [vmem:[%s4163_s3 + $0xb8] sm:$0xff]  ;;  %v572_v53 = vld [vmem:[%s4163_s3 + $0x110] sm:$0xff] }
   0xe   : > { %s2409_s20 = sshll.u32 %s4177_s19, 4  ;;  %2752 = vmatprep.subr.bf16.mxu0 %v2751_v21  ;;  %v562_v48 = vld [vmem:[%s4163_s3 + $0xc0] sm:$0xff]  ;;  %v565_v49 = vld [vmem:[%s4163_s3 + $0xd8] sm:$0xff]  ;;  %v2787_v50 = vpack.c.bf16 %v561_v47, %v558_v45  ;;  %v564_v54 = vld [vmem:[%s4163_s3 + $0xd0] sm:$0xff] }
   0xf   : > { %s489_s23 = scalar_lea.vmem %s4160_s0, %s2409_s20  ;;  %2782 = vmatpush3.bf16.msra.mxu1 %v2779_v22  ;;  %v2761_v51 = vpack.c.bf16 %v565_v49, %v562_v48  ;;  %v569_v52 = vld [vmem:[%s4163_s3 + $0xf8] sm:$0xff]  ;;  %v567_v56 = vld [vmem:[%s4163_s3 + $0xe8] sm:$0xff]  ;;  %v568_v57 = vld [vmem:[%s4163_s3 + $0xf0] sm:$0xff]  ;;  %s494_s22 = scalar_lea.vmem %s4175_s15, %s2409_s20 }
  0x10   : > { %v495_v0 = vld [vmem:[%s489_s23] sm:$0xff]  ;;  %v496_v1 = vld [vmem:[%s489_s23 + $0x8] sm:$0xff]  ;;  %2784 = vmatprep.subr.bf16.mxu1 %v2783_v41  ;;  %v2763_v55 = vpack.c.bf16 %v572_v53, %v569_v52  ;;  %v2791_v59 = vpack.c.bf16 %v567_v56, %v564_v54  ;;  %v577_v3 = vld [vmem:[%s4163_s3 + $0x138] sm:$0xff] }
  0x11   : > { %499 = vadd.xlane.f32.xlu0 %v495_v0  ;;  %2754 = vmatpush1.bf16.msra.mxu0 %v2753_v25  ;;  %v571_v58 = vld [vmem:[%s4163_s3 + $0x108] sm:$0xff]  ;;  %v578_v62 = vld [vmem:[%s4163_s3 + $0x140] sm:$0xff]  ;;  %v581_v7 = vld [vmem:[%s4163_s3 + $0x158] sm:$0xff] }
  0x12   : > { %2756 = vmatprep.subr.bf16.mxu0 %v2755_v37  ;;  %v2765_v60 = vpack.c.bf16 %v571_v58, %v568_v57  ;;  %v575_v61 = vld [vmem:[%s4163_s3 + $0x128] sm:$0xff]  ;;  %v570_v63 = vld [vmem:[%s4163_s3 + $0x100] sm:$0xff]  ;;  %v584_v8 = vld [vmem:[%s4163_s3 + $0x170] sm:$0xff] }
  0x13   : > { %2786 = vmatpush3.bf16.msra.mxu1 %v2783_v41  ;;  %v574_v2 = vld [vmem:[%s4163_s3 + $0x120] sm:$0xff]  ;;  %v576_v9 = vld [vmem:[%s4163_s3 + $0x130] sm:$0xff]  ;;  %v2771_v10 = vpack.c.bf16 %v584_v8, %v581_v7  ;;  %v579_v11 = vld [vmem:[%s4163_s3 + $0x148] sm:$0xff] }
  0x14   : > { %2788 = vmatprep.subr.bf16.mxu1 %v2787_v50  ;;  %v2769_v6 = vpack.c.bf16 %v577_v3, %v574_v2  ;;  %v580_v12 = vld [vmem:[%s4163_s3 + $0x150] sm:$0xff]  ;;  %v583_v13 = vld [vmem:[%s4163_s3 + $0x168] sm:$0xff]  ;;  %v2799_v14 = vpack.c.bf16 %v579_v11, %v576_v9  ;;  %v582_v16 = vld [vmem:[%s4163_s3 + $0x160] sm:$0xff] }
  0x15   : > { %501 = vadd.xlane.f32.xlu0 %v496_v1  ;;  %2758 = vmatpush1.bf16.msra.mxu0 %v2757_v42  ;;  %v2773_v15 = vpack.c.bf16 %v583_v13, %v580_v12  ;;  %v585_v17 = vld [vmem:[%s4163_s3 + $0x178] sm:$0xff]  ;;  %v586_v38 = vld [vmem:[%s4164_s4] sm:$0x7]  ;;  %v937_v12 = vld [vmem:[%s4165_s5 + $0x8] sm:$0xff] }
  0x16   : > { %2760 = vmatprep.subr.bf16.mxu0 %v2759_v46  ;;  %v2803_v18 = vpack.c.bf16 %v585_v17, %v582_v16  ;;  %v936_v11 = vld [vmem:[%s4165_s5] sm:$0xff]  ;;  %v938_v17 = vld [vmem:[%s4165_s5 + $0x10] sm:$0xff] }
  0x17   : > { %2790 = vmatpush3.bf16.msra.mxu1 %v2787_v50  ;;  %v2815_v13 = vpack.c.bf16 %v937_v12, %v936_v11 }
  0x18   : > { %2792 = vmatprep.subr.bf16.mxu1 %v2791_v59 }
  0x19   : > { %2762 = vmatpush1.bf16.msra.mxu0 %v2761_v51 }
  0x1a   : > { %2764 = vmatprep.subr.bf16.mxu0 %v2763_v55 }
  0x1b   : > { %2794 = vmatpush3.bf16.msra.mxu1 %v2791_v59 }
  0x1d   : > { %2766 = vmatpush1.bf16.msra.mxu0 %v2765_v60 }
  0x9e   : > { %v500_v26 = vpop.xlane.xlu0 %499 }
  0x9f   : > { %v504_v27 = vmul.f32 0.0078125, %v500_v26  ;;  %v2253_v26 = vld [vmem:[%s4161_s1] ss:$0 sm:$0xff] }
  0xa1   : > { %v3277_v28 = vsub.f32 %v495_v0, %v504_v27  ;;  %v2767_v0 = vpack.c.bf16 %v578_v62, %v575_v61 }
  0xa2   : > { %v502_v29 = vpop.xlane.xlu0 %501 }
  0xa3   : > { %v505_v30 = vmul.f32 0.0078125, %v502_v29  ;;  %v508_v31 = vmul.f32 %v3277_v28, %v3277_v28  ;;  %2768 = vmatprep.subr.bf16.mxu0 %v2767_v0  ;;  %v2254_v29 = vld [vmem:[%s4162_s2] ss:$0 sm:$0xff] }
  0xa4   : > { %2770 = vmatpush1.bf16.msra.mxu0 %v2769_v6 }
  0xa5   : > { %v3281_v32 = vsub.f32 %v496_v1, %v505_v30  ;;  %510 = vadd.xlane.f32.xlu1 %v508_v31  ;;  %v573_v1 = vld [vmem:[%s4163_s3 + $0x118] sm:$0xff]  ;;  %2772 = vmatprep.subr.bf16.mxu0 %v2771_v10 }
  0xa6   : > { %v2795_v5 = vpack.c.bf16 %v573_v1, %v570_v63 }
  0xa7   : > { %v509_v33 = vmul.f32 %v3281_v32, %v3281_v32 }
  0xa8   : > { %2796 = vmatprep.subr.bf16.mxu1 %v2795_v5  ;;  %2774 = vmatpush1.bf16.msra.mxu0 %v2773_v15 }
  0xa9   : > { %512 = vadd.xlane.f32.xlu1 %v509_v33  ;;  %2798 = vmatpush3.bf16.msra.mxu1 %v2795_v5 }
  0xaa   : > { %2800 = vmatprep.subr.bf16.mxu1 %v2799_v14 }
  0xad   : > { %2802 = vmatpush3.bf16.msra.mxu1 %v2799_v14 }
  0xae   : > { %2804 = vmatprep.subr.bf16.mxu1 %v2803_v18 }
  0xb1   : > { %2806 = vmatpush3.bf16.msra.mxu1 %v2803_v18  ;;  %v939_v18 = vld [vmem:[%s4165_s5 + $0x18] sm:$0xff] }
 0x132   : > { %v511_v19 = vpop.xlane.xlu1 %510 }
 0x133   : > { %v514_v20 = vmul.f32 0.0078125, %v511_v19 }
 0x135   : > { %v516_v21 = vadd.f32 1e-12, %v514_v20 }
 0x136   : > { %v513_v22 = vpop.xlane.xlu1 %512 }
 0x137   : > { %3088 = vrsqrt.f32 %v516_v21  ;;  %v515_v23 = vmul.f32 0.0078125, %v513_v22  ;;  %v2819_v22 = vpack.c.bf16 %v939_v18, %v938_v17  ;;  %v1089_v17 = vld [vmem:[%s4169_s9 + $0x68] sm:$0xff]  ;;  %v1091_v18 = vld [vmem:[%s4169_s9 + $0x78] sm:$0xff] }
 0x139   : > { %v517_v24 = vadd.f32 1e-12, %v515_v23  ;;  %v940_v23 = vld [vmem:[%s4165_s5 + $0x20] sm:$0xff] }
 0x13b   : > { %3090 = vrsqrt.f32 %v517_v24  ;;  %v941_v24 = vld [vmem:[%s4165_s5 + $0x28] sm:$0xff] }
 0x141   : > { %v3089_v25 = vpop.eup %3088 }
 0x142   : > { %v520_v27 = vmul.f32 %v3089_v25, %v3277_v28  ;;  %v588_v28 = vlaneseq  ;;  %v2823_v25 = vpack.c.bf16 %v941_v24, %v940_v23  ;;  %v1093_v23 = vld [vmem:[%s4169_s9 + $0x88] sm:$0xff]  ;;  %v1095_v24 = vld [vmem:[%s4169_s9 + $0x98] sm:$0xff] }
 0x144   : > { %v528_v30 = vmul.f32 %v2253_v26, %v520_v27  ;;  %v3400_v37 = vshrl.u32 %v588_v28, 7  ;;  %v943_v27 = vld [vmem:[%s4165_s5 + $0x38] sm:$0xff] }
 0x145   : > { %v3091_v31 = vpop.eup %3090  ;;  %v947_v28 = vld [vmem:[%s4165_s5 + $0x58] sm:$0xff] }
 0x146   : > { %v3389_v33 = vadd.f32 %v2254_v29, %v528_v30  ;;  %v521_v34 = vmul.f32 %v3091_v31, %v3281_v32  ;;  %v3403_v32 = vsub.s32 0, %v3400_v37  ;;  %v598_v40 = vsub.s32 2, %v3400_v37  ;;  %v944_v30 = vld [vmem:[%s4165_s5 + $0x40] sm:$0xff]  ;;  %v945_v31 = vld [vmem:[%s4165_s5 + $0x48] sm:$0xff] }
 0x147   : > { %v3411_v41 = vsub.s32 1, %v3400_v37 }
 0x148   : > { %668 = vmatmul.mubr.f32.vlgmr.msra.gmra.mrb[0].mxu0 %v3389_v33  ;;  %2607 = vmatprep.mubr.f32.mxu1 %v3389_v33  ;;  %v529_v35 = vmul.f32 %v2253_v26, %v521_v34  ;;  %v591_v39 = vrot.slane %v586_v38, %v3403_v32  ;;  %v599_v45 = vrot.slane %v586_v38, %v598_v40  ;;  %v942_v26 = vld [vmem:[%s4165_s5 + $0x30] sm:$0xff] }
 0x149   : > { %673 = vmatprep.mubr.f32.mxu0 %v3132_v4  ;;  %v595_v46 = vrot.slane %v586_v38, %v3411_v41  ;;  %v2831_v34 = vpack.c.bf16 %v945_v31, %v944_v30  ;;  %v1097_v30 = vld [vmem:[%s4169_s9 + $0xa8] sm:$0xff]  ;;  %v1099_v31 = vld [vmem:[%s4169_s9 + $0xb8] sm:$0xff] }
 0x14a   : > { %v3395_v36 = vadd.f32 %v2254_v29, %v529_v35  ;;  %v2827_v29 = vpack.c.bf16 %v943_v27, %v942_v26  ;;  %v946_v35 = vld [vmem:[%s4165_s5 + $0x50] sm:$0xff]  ;;  %v1092_v26 = vld [vmem:[%s4169_s9 + $0x80] sm:$0xff] }
 0x14b   : > { %v2835_v38 = vpack.c.bf16 %v947_v28, %v946_v35  ;;  %v1094_v27 = vld [vmem:[%s4169_s9 + $0x90] sm:$0xff]  ;;  %v1096_v35 = vld [vmem:[%s4169_s9 + $0xa0] sm:$0xff] }
 0x14c   : > { %674 = vmatmul.mubr.f32.gmra.mrb[2].mxu0 %v3395_v36  ;;  %2608 = vmatmul.mubr.f32.vlgmr.msra.gmra.mrb[0].mxu1 %v3395_v36  ;;  %v1098_v28 = vld [vmem:[%s4169_s9 + $0xb0] sm:$0xff] }
 0x14d   : > { %1184 = vmatprep.mubr.f32.mxu0 %v3132_v4 }
 0x21b   : > { %v669_v42 = vpop.f32.mrb[0].mxu0 }
 0x21c   : > { %v670_v43 = vadd.f32 %v669_v42, %v591_v39  ;;  %v671_v44 = vpop.f32.mrb[1].mxu0  ;;  %v949_v42 = vld [vmem:[%s4165_s5 + $0x68] sm:$0xff] }
 0x21d   : > { %v672_v52 = vadd.f32 %v671_v44, %v595_v46  ;;  %v950_v44 = vld [vmem:[%s4165_s5 + $0x70] sm:$0xff] }
 0x21e   : > { %2614 = vmatprep.mubr.f32.mxu1 %v670_v43 }
 0x21f   : > { %v675_v47 = vpop.f32.mrb[2].mxu0  ;;  %v2609_v48 = vpop.f32.mrb[0].mxu1 }
 0x220   : > { %v752_v49 = vadd.f32 %v2609_v48, %v599_v45  ;;  %v677_v50 = vpop.f32.mrb[3].mxu0  ;;  %v746_v51 = vpop.f32.mrb[1].mxu1  ;;  %v676_v57 = vadd.f32 %v675_v47, %v591_v39  ;;  %v948_v39 = vld [vmem:[%s4165_s5 + $0x60] sm:$0xff] }
 0x221   : > { %v678_v53 = vadd.f32 %v677_v50, %v595_v46  ;;  %v747_v54 = vadd.f32 %v746_v51, %v599_v45  ;;  %v2839_v43 = vpack.c.bf16 %v949_v42, %v948_v39  ;;  %v951_v45 = vld [vmem:[%s4165_s5 + $0x78] sm:$0xff]  ;;  %v1101_v39 = vld [vmem:[%s4169_s9 + $0xc8] sm:$0xff] }
 0x222   : > { %v2843_v46 = vpack.c.bf16 %v951_v45, %v950_v44  ;;  %v1103_v42 = vld [vmem:[%s4169_s9 + $0xd8] sm:$0xff]  ;;  %v1100_v44 = vld [vmem:[%s4169_s9 + $0xc0] sm:$0xff]  ;;  %v1102_v45 = vld [vmem:[%s4169_s9 + $0xd0] sm:$0xff] }
 0x223   : > { %v2807_v55 = vpack.c.bf16 %v678_v53, %v672_v52  ;;  %v2811_v56 = vpack.c.bf16 %v752_v49, %v747_v54  ;;  %v2257_v49 = vld [vmem:[%s4166_s6] ss:$0 sm:$0xff] }
 0x225   : > { %2808 = vmatprep.subr.bf16.mxu1 %v2807_v55 }
 0x226   : > { %2810 = vmatpush3.bf16.xpose.msra.mxu1 %v2807_v55 }
 0x227   : > { %2812 = vmatprep.subr.bf16.mxu1 %v2811_v56 }
 0x22d   : > { %2615 = vmatmul.mubr.f32.vlgmr.msra.gmra.mrb[2].mxu1 %v676_v57  ;;  %v1079_v57 = vld [vmem:[%s4169_s9 + $0x18] sm:$0xff] }
 0x22e   : > { %2814 = vmatpush3.bf16.msra.mxu1 %v2811_v56  ;;  %v1077_v56 = vld [vmem:[%s4169_s9 + $0x8] sm:$0xff] }
 0x22f   : > { %2816 = vmatprep.subr.bf16.mxu1 %v2815_v13 }
 0x300   : > { %v2616_v58 = vpop.f32.mrb[2].mxu1 }
 0x301   : > { %v831_v59 = vmul.f32 0.088388346, %v2616_v58  ;;  %v821_v60 = vpop.f32.mrb[3].mxu1  ;;  %v1076_v58 = vld [vmem:[%s4169_s9] sm:$0xff] }
 0x302   : > { %v830_v61 = vmul.f32 0.088388346, %v821_v60  ;;  %v1083_v60 = vld [vmem:[%s4169_s9 + $0x38] sm:$0xff] }
 0x303   : > { %v836_v62 = vsel %vm832_vm0, %v831_v59, -inf }
 0x304   : > { %837 = vmax.xlane.f32.xlu1 %v836_v62  ;;  %v833_v63 = vsel %vm832_vm0, %v830_v61, -inf }
 0x305   : > { %834 = vmax.xlane.f32.xlu0 %v833_v63  ;;  %v1080_v63 = vld [vmem:[%s4169_s9 + $0x20] sm:$0xff] }
 0x391   : > { %v838_v0 = vpop.xlane.xlu1 %837 }
 0x392   : > { %v840_v1 = vsub.f32 %v831_v59, %v838_v0  ;;  %v835_v2 = vpop.xlane.xlu0 %834  ;;  %v2847_v59 = vpack.c.bf16 %v1079_v57, %v1077_v56  ;;  %v1082_v0 = vld [vmem:[%s4169_s9 + $0x30] sm:$0xff]  ;;  %v1202_v57 = vld [vmem:[%s4171_s11 + $0x8] sm:$0xff] }
 0x393   : > { %v839_v3 = vsub.f32 %v830_v61, %v835_v2  ;;  %v1087_v2 = vld [vmem:[%s4169_s9 + $0x58] sm:$0xff] }
 0x394   : > { %v843_v5 = vmul.f32 1.442695, %v840_v1  ;;  %v1085_v1 = vld [vmem:[%s4169_s9 + $0x48] sm:$0xff]  ;;  %2848 = vmatprep.subr.bf16.mxu0 %v2847_v59  ;;  %v1220_v59 = vld [vmem:[%s4171_s11 + $0x98] sm:$0xff] }
 0x395   : > { %v841_v6 = vmul.f32 1.442695, %v839_v3  ;;  %v2853_v3 = vpack.c.bf16 %v1082_v0, %v1080_v63  ;;  %v1222_v63 = vld [vmem:[%s4171_s11 + $0xa8] sm:$0xff] }
 0x396   : > { %3092 = vpow2.f32 %v843_v5  ;;  %v2855_v5 = vpack.c.bf16 %v1087_v2, %v1085_v1  ;;  %v1205_v2 = vld [vmem:[%s4171_s11 + $0x20] sm:$0xff] }
 0x397   : > { %3094 = vpow2.f32 %v841_v6  ;;  %v1084_v6 = vld [vmem:[%s4169_s9 + $0x40] sm:$0xff] }
 0x3a0   : > { %v3093_v7 = vpop.eup %3092 }
 0x3a1   : > { %v3095_v8 = vpop.eup %3094  ;;  %v848_v9 = vsel %vm832_vm0, %v3093_v7, 0.0 }
 0x3a2   : > { %849 = vadd.xlane.f32.xlu1 %v848_v9  ;;  %v845_v10 = vsel %vm832_vm0, %v3095_v8, 0.0 }
 0x3a3   : > { %846 = vadd.xlane.f32.xlu0 %v845_v10 }
 0x42f   : > { %v850_v14 = vpop.xlane.xlu1 %849 }
 0x430   : > { %3096 = vrcp.f32 %v850_v14  ;;  %v847_v15 = vpop.xlane.xlu0 %846 }
 0x431   : > { %3098 = vrcp.f32 %v847_v15 }
 0x43a   : > { %v3097_v16 = vpop.eup %3096 }
 0x43b   : > { %v3099_v19 = vpop.eup %3098  ;;  %v854_v21 = vmul.f32 %v3097_v16, %v3093_v7  ;;  %v1086_v7 = vld [vmem:[%s4169_s9 + $0x50] sm:$0xff] }
 0x43c   : > { %v852_v20 = vmul.f32 %v3099_v19, %v3095_v8  ;;  %v2857_v8 = vpack.c.bf16 %v1086_v7, %v1084_v6  ;;  %v2859_v19 = vpack.c.bf16 %v1091_v18, %v1089_v17  ;;  %v1224_v6 = vld [vmem:[%s4171_s11 + $0xb8] sm:$0xff]  ;;  %v1209_v17 = vld [vmem:[%s4171_s11 + $0x40] sm:$0xff]  ;;  %v1210_v18 = vld [vmem:[%s4171_s11 + $0x48] sm:$0xff] }
 0x43e   : > { %2621 = vmatprep.mubr.msk.f32.mxu1 %vm832_vm0, %v852_v20  ;;  %v1088_v20 = vld [vmem:[%s4169_s9 + $0x60] sm:$0xff] }
 0x43f   : > { %2622 = vmatmul.mubr.msk.f32.vlgmr.msra.gmra.mrb[4].mxu1 %vm832_vm0, %v854_v21  ;;  %v1090_v21 = vld [vmem:[%s4169_s9 + $0x70] sm:$0xff] }
 0x440   : > { %2818 = vmatpush3.bf16.msra.mxu1 %v2815_v13 }
 0x441   : > { %2820 = vmatprep.subr.bf16.mxu1 %v2819_v22 }
 0x444   : > { %2822 = vmatpush3.bf16.msra.mxu1 %v2819_v22  ;;  %v2861_v22 = vpack.c.bf16 %v1090_v21, %v1088_v20  ;;  %v1228_v20 = vld [vmem:[%s4171_s11 + $0xd8] sm:$0xff]  ;;  %v2897_v21 = vpack.c.bf16 %v1210_v18, %v1209_v17 }
 0x445   : > { %2824 = vmatprep.subr.bf16.mxu1 %v2823_v25 }
 0x448   : > { %2826 = vmatpush3.bf16.msra.mxu1 %v2823_v25  ;;  %v2863_v25 = vpack.c.bf16 %v1095_v24, %v1093_v23  ;;  %v1211_v23 = vld [vmem:[%s4171_s11 + $0x50] sm:$0xff]  ;;  %v1212_v24 = vld [vmem:[%s4171_s11 + $0x58] sm:$0xff] }
 0x449   : > { %2828 = vmatprep.subr.bf16.mxu1 %v2827_v29 }
 0x44c   : > { %2830 = vmatpush3.bf16.msra.mxu1 %v2827_v29  ;;  %v2865_v29 = vpack.c.bf16 %v1094_v27, %v1092_v26  ;;  %v1230_v26 = vld [vmem:[%s4171_s11 + $0xe8] sm:$0xff]  ;;  %v2901_v27 = vpack.c.bf16 %v1212_v24, %v1211_v23  ;;  %v2263_v23 = vld [vmem:[%s4163_s3 + $0x180] sm:$0xff] }
 0x44d   : > { %2832 = vmatprep.subr.bf16.mxu1 %v2831_v34 }
 0x450   : > { %2834 = vmatpush3.bf16.msra.mxu1 %v2831_v34  ;;  %v2867_v34 = vpack.c.bf16 %v1099_v31, %v1097_v30 }
 0x451   : > { %2836 = vmatprep.subr.bf16.mxu1 %v2835_v38 }
 0x454   : > { %2838 = vmatpush3.bf16.msra.mxu1 %v2835_v38  ;;  %v2869_v38 = vpack.c.bf16 %v1098_v28, %v1096_v35 }
 0x455   : > { %2840 = vmatprep.subr.bf16.mxu1 %v2839_v43 }
 0x458   : > { %2842 = vmatpush3.bf16.msra.mxu1 %v2839_v43  ;;  %v2871_v43 = vpack.c.bf16 %v1103_v42, %v1101_v39 }
 0x459   : > { %2844 = vmatprep.subr.bf16.mxu1 %v2843_v46 }
 0x45c   : > { %2846 = vmatpush3.bf16.msra.mxu1 %v2843_v46  ;;  %v2873_v46 = vpack.c.bf16 %v1102_v45, %v1100_v44 }
 0x512   : > { %v2623_v47 = vpop.f32.mrb[4].mxu1 }
 0x513   : > { %v927_v48 = vpop.f32.mrb[5].mxu1 }
 0x514   : > { %2656 = vmatprep.mubr.f32.mxu1 %v927_v48  ;;  %v1107_v48 = vld [vmem:[%s4169_s9 + $0xf8] sm:$0xff] }
 0x515   : > { %2657 = vmatmul.mubr.f32.vlgmr.msra.gmra.mrb[6].mxu1 %v2623_v47  ;;  %v1105_v47 = vld [vmem:[%s4169_s9 + $0xe8] sm:$0xff] }
 0x5e8   : > { %v2658_v50 = vpop.f32.mrb[6].mxu1 }
 0x5e9   : > { %v1031_v51 = vadd.f32 %v2658_v50, %v2257_v49  ;;  %v1025_v52 = vpop.f32.mrb[7].mxu1  ;;  %v1104_v50 = vld [vmem:[%s4169_s9 + $0xe0] sm:$0xff] }
 0x5ea   : > { %v1026_v53 = vadd.f32 %v2257_v49, %v1025_v52  ;;  %v2875_v49 = vpack.c.bf16 %v1107_v48, %v1105_v47 }
 0x5eb   : > { %v1035_v54 = vadd.f32 %v1031_v51, %v3395_v36  ;;  %v1078_v36 = vld [vmem:[%s4169_s9 + $0x10] sm:$0xff] }
 0x5ec   : > { %v1034_v55 = vadd.f32 %v1026_v53, %v3389_v33  ;;  %v1081_v33 = vld [vmem:[%s4169_s9 + $0x28] sm:$0xff]  ;;  %v2849_v61 = vpack.c.bf16 %v1078_v36, %v1076_v58  ;;  %v1106_v51 = vld [vmem:[%s4169_s9 + $0xf0] sm:$0xff]  ;;  %v1217_v53 = vld [vmem:[%s4171_s11 + $0x80] sm:$0xff] }
 0x5ed   : > { %1040 = vadd.xlane.f32.xlu1 %v1035_v54  ;;  %v2851_v62 = vpack.c.bf16 %v1083_v60, %v1081_v33  ;;  %v2877_v52 = vpack.c.bf16 %v1106_v51, %v1104_v50  ;;  %v1219_v58 = vld [vmem:[%s4171_s11 + $0x90] sm:$0xff] }
 0x5ee   : > { %1038 = vadd.xlane.f32.xlu0 %v1034_v55  ;;  %2850 = vmatpush1.bf16.msra.mxu0 %v2849_v61  ;;  %v2883_v33 = vpack.c.bf16 %v1220_v59, %v1219_v58  ;;  %v1203_v60 = vld [vmem:[%s4171_s11 + $0x10] sm:$0xff]  ;;  %v1204_v61 = vld [vmem:[%s4171_s11 + $0x18] sm:$0xff]  ;;  %v1108_v58 = vld [vmem:[%s4170_s10] sm:$0x3] }
 0x5ef   : > { %2852 = vmatprep.subr.bf16.mxu0 %v2851_v62  ;;  %v1221_v62 = vld [vmem:[%s4171_s11 + $0xa0] sm:$0xff]  ;;  %v2885_v0 = vpack.c.bf16 %v1204_v61, %v1203_v60  ;;  %v1113_v59 = vrot.slane %v1108_v58, %v3403_v32 }
 0x5f0   : > { %v2887_v1 = vpack.c.bf16 %v1222_v63, %v1221_v62 }
 0x5f2   : > { %2854 = vmatpush1.bf16.msra.mxu0 %v2853_v3  ;;  %v1206_v3 = vld [vmem:[%s4171_s11 + $0x28] sm:$0xff] }
 0x5f3   : > { %2856 = vmatprep.subr.bf16.mxu0 %v2855_v5  ;;  %v1223_v5 = vld [vmem:[%s4171_s11 + $0xb0] sm:$0xff]  ;;  %v2889_v7 = vpack.c.bf16 %v1206_v3, %v1205_v2 }
 0x5f6   : > { %2858 = vmatpush1.bf16.msra.mxu0 %v2857_v8  ;;  %v2891_v8 = vpack.c.bf16 %v1224_v6, %v1223_v5 }
 0x5f7   : > { %2860 = vmatprep.subr.bf16.mxu0 %v2859_v19  ;;  %v1227_v19 = vld [vmem:[%s4171_s11 + $0xd0] sm:$0xff] }
 0x5fa   : > { %2862 = vmatpush1.bf16.msra.mxu0 %v2861_v22  ;;  %v2899_v22 = vpack.c.bf16 %v1228_v20, %v1227_v19 }
 0x5fb   : > { %2864 = vmatprep.subr.bf16.mxu0 %v2863_v25  ;;  %v1229_v25 = vld [vmem:[%s4171_s11 + $0xe0] sm:$0xff] }
 0x5fe   : > { %2866 = vmatpush1.bf16.msra.mxu0 %v2865_v29  ;;  %v2903_v29 = vpack.c.bf16 %v1230_v26, %v1229_v25  ;;  %v2266_v25 = vld [vmem:[%s4163_s3 + $0x198] sm:$0xff] }
 0x5ff   : > { %2868 = vmatprep.subr.bf16.mxu0 %v2867_v34  ;;  %v2270_v26 = vld [vmem:[%s4163_s3 + $0x1b8] sm:$0xff] }
 0x602   : > { %2870 = vmatpush1.bf16.msra.mxu0 %v2869_v38 }
 0x603   : > { %2872 = vmatprep.subr.bf16.mxu0 %v2871_v43  ;;  %v2258_v43 = vld [vmem:[%s4167_s7] ss:$0 sm:$0xff] }
 0x606   : > { %2874 = vmatpush1.bf16.msra.mxu0 %v2873_v46  ;;  %v2259_v46 = vld [vmem:[%s4168_s8] ss:$0 sm:$0xff] }
 0x607   : > { %2876 = vmatprep.subr.bf16.mxu0 %v2875_v49 }
 0x60a   : > { %2878 = vmatpush1.bf16.msra.mxu0 %v2877_v52  ;;  %v1231_v52 = vld [vmem:[%s4171_s11 + $0xf0] sm:$0xff] }
 0x67a   : > { %v1041_v9 = vpop.xlane.xlu1 %1040 }
 0x67b   : > { %v1043_v10 = vmul.f32 0.0078125, %v1041_v9  ;;  %v1039_v11 = vpop.xlane.xlu0 %1038  ;;  %v1207_v9 = vld [vmem:[%s4171_s11 + $0x30] sm:$0xff] }
 0x67c   : > { %v1042_v12 = vmul.f32 0.0078125, %v1039_v11  ;;  %v1225_v11 = vld [vmem:[%s4171_s11 + $0xc0] sm:$0xff] }
 0x67d   : > { %v3511_v13 = vsub.f32 %v1035_v54, %v1043_v10  ;;  %v1218_v54 = vld [vmem:[%s4171_s11 + $0x88] sm:$0xff]  ;;  %v1208_v10 = vld [vmem:[%s4171_s11 + $0x38] sm:$0xff] }
 0x67e   : > { %v3513_v14 = vsub.f32 %v1034_v55, %v1042_v12  ;;  %v1201_v55 = vld [vmem:[%s4171_s11] sm:$0xff]  ;;  %v2879_v56 = vpack.c.bf16 %v1218_v54, %v1217_v53  ;;  %v1226_v12 = vld [vmem:[%s4171_s11 + $0xc8] sm:$0xff]  ;;  %v1232_v53 = vld [vmem:[%s4171_s11 + $0xf8] sm:$0xff] }
 0x67f   : > { %v1047_v15 = vmul.f32 %v3511_v13, %v3511_v13  ;;  %v2881_v36 = vpack.c.bf16 %v1202_v57, %v1201_v55  ;;  %v2907_v54 = vpack.c.bf16 %v1232_v53, %v1231_v52  ;;  %v1215_v55 = vld [vmem:[%s4171_s11 + $0x70] sm:$0xff] }
 0x680   : > { %v1046_v16 = vmul.f32 %v3513_v14, %v3513_v14  ;;  %2880 = vmatprep.subr.bf16.mxu1 %v2879_v56  ;;  %v1216_v56 = vld [vmem:[%s4171_s11 + $0x78] sm:$0xff] }
 0x681   : > { %1050 = vadd.xlane.f32.xlu1 %v1047_v15  ;;  %2882 = vmatpush3.bf16.msra.mxu1 %v2881_v36  ;;  %v2893_v15 = vpack.c.bf16 %v1208_v10, %v1207_v9  ;;  %v2909_v57 = vpack.c.bf16 %v1216_v56, %v1215_v55  ;;  %v1117_v36 = vrot.slane %v1108_v58, %v3411_v41  ;;  %v2260_v9 = vld [vmem:[%s4172_s12] ss:$0 sm:$0xff]  ;;  %v2285_v58 = vld [vmem:[%s4163_s3 + $0x230] sm:$0xff] }
 0x682   : > { %1048 = vadd.xlane.f32.xlu0 %v1046_v16  ;;  %2884 = vmatprep.subr.bf16.mxu1 %v2883_v33  ;;  %v2895_v16 = vpack.c.bf16 %v1226_v12, %v1225_v11 }
 0x685   : > { %2886 = vmatpush3.bf16.msra.mxu1 %v2885_v0 }
 0x686   : > { %2888 = vmatprep.subr.bf16.mxu1 %v2887_v1 }
 0x689   : > { %2890 = vmatpush3.bf16.msra.mxu1 %v2889_v7 }
 0x68a   : > { %2892 = vmatprep.subr.bf16.mxu1 %v2891_v8 }
 0x68d   : > { %2894 = vmatpush3.bf16.msra.mxu1 %v2893_v15 }
 0x68e   : > { %2896 = vmatprep.subr.bf16.mxu1 %v2895_v16 }
 0x691   : > { %2898 = vmatpush3.bf16.msra.mxu1 %v2897_v21  ;;  %v2264_v21 = vld [vmem:[%s4163_s3 + $0x188] sm:$0xff] }
 0x692   : > { %2900 = vmatprep.subr.bf16.mxu1 %v2899_v22  ;;  %v2267_v22 = vld [vmem:[%s4163_s3 + $0x1a0] sm:$0xff] }
 0x693   : > { %v2911_v24 = vpack.c.bf16 %v2267_v22, %v2264_v21  ;;  %v2300_v21 = vld [vmem:[%s4163_s3 + $0x2a8] sm:$0xff]  ;;  %v2303_v22 = vld [vmem:[%s4163_s3 + $0x2c0] sm:$0xff] }
 0x695   : > { %2902 = vmatpush3.bf16.msra.mxu1 %v2901_v27  ;;  %v2273_v27 = vld [vmem:[%s4163_s3 + $0x1d0] sm:$0xff]  ;;  %2912 = vmatprep.subr.bf16.mxu0 %v2911_v24  ;;  %v2935_v24 = vpack.c.bf16 %v2303_v22, %v2300_v21 }
 0x696   : > { %2904 = vmatprep.subr.bf16.mxu1 %v2903_v29  ;;  %v2913_v29 = vpack.c.bf16 %v2266_v25, %v2263_v23  ;;  %v2295_v23 = vld [vmem:[%s4163_s3 + $0x280] sm:$0xff]  ;;  %v2298_v25 = vld [vmem:[%s4163_s3 + $0x298] sm:$0xff] }
 0x70e   : > { %v1051_v30 = vpop.xlane.xlu1 %1050 }
 0x70f   : > { %v1053_v31 = vmul.f32 0.0078125, %v1051_v30  ;;  %v1049_v34 = vpop.xlane.xlu0 %1048  ;;  %v2915_v30 = vpack.c.bf16 %v2273_v27, %v2270_v26  ;;  %v2299_v26 = vld [vmem:[%s4163_s3 + $0x2a0] sm:$0xff]  ;;  %v2302_v27 = vld [vmem:[%s4163_s3 + $0x2b8] sm:$0xff] }
 0x710   : > { %v1052_v35 = vmul.f32 0.0078125, %v1049_v34  ;;  %v2268_v34 = vld [vmem:[%s4163_s3 + $0x1a8] sm:$0xff] }
 0x711   : > { %v1055_v28 = vadd.f32 1e-12, %v1053_v31  ;;  %v2265_v31 = vld [vmem:[%s4163_s3 + $0x190] sm:$0xff] }
 0x712   : > { %v1054_v38 = vadd.f32 1e-12, %v1052_v35  ;;  %v2269_v35 = vld [vmem:[%s4163_s3 + $0x1b0] sm:$0xff] }
 0x713   : > { %3100 = vrsqrt.f32 %v1055_v28  ;;  %v2943_v28 = vpack.c.bf16 %v2268_v34, %v2265_v31  ;;  %v2306_v31 = vld [vmem:[%s4163_s3 + $0x2d8] sm:$0xff]  ;;  %v2309_v34 = vld [vmem:[%s4163_s3 + $0x2f0] sm:$0xff] }
 0x714   : > { %3102 = vrsqrt.f32 %v1054_v38  ;;  %v2272_v38 = vld [vmem:[%s4163_s3 + $0x1c8] sm:$0xff] }
 0x71d   : > { %v3101_v39 = vpop.eup %3100 }
 0x71e   : > { %v3103_v42 = vpop.eup %3102  ;;  %v1059_v45 = vmul.f32 %v3101_v39, %v3511_v13  ;;  %v1214_v13 = vld [vmem:[%s4171_s11 + $0x68] sm:$0xff] }
 0x71f   : > { %v1058_v44 = vmul.f32 %v3103_v42, %v3513_v14  ;;  %v1213_v14 = vld [vmem:[%s4171_s11 + $0x60] sm:$0xff]  ;;  %v2276_v39 = vld [vmem:[%s4163_s3 + $0x1e8] sm:$0xff] }
 0x720   : > { %v1067_v49 = vmul.f32 %v2258_v43, %v1059_v45  ;;  %v2905_v51 = vpack.c.bf16 %v1214_v13, %v1213_v14  ;;  %v2279_v42 = vld [vmem:[%s4163_s3 + $0x200] sm:$0xff]  ;;  %v2274_v45 = vld [vmem:[%s4163_s3 + $0x1d8] sm:$0xff] }
 0x721   : > { %v1066_v47 = vmul.f32 %v2258_v43, %v1058_v44  ;;  %v2917_v43 = vpack.c.bf16 %v2272_v38, %v2269_v35  ;;  %v2271_v44 = vld [vmem:[%s4163_s3 + $0x1c0] sm:$0xff]  ;;  %v2301_v35 = vld [vmem:[%s4163_s3 + $0x2b0] sm:$0xff]  ;;  %v2304_v38 = vld [vmem:[%s4163_s3 + $0x2c8] sm:$0xff] }
 0x722   : > { %v1075_v50 = vadd.f32 %v2259_v46, %v1067_v49  ;;  %2906 = vmatpush3.bf16.msra.mxu1 %v2905_v51  ;;  %v2278_v49 = vld [vmem:[%s4163_s3 + $0x1f8] sm:$0xff] }
 0x723   : > { %v1074_v48 = vadd.f32 %v2259_v46, %v1066_v47  ;;  %2908 = vmatprep.subr.bf16.mxu1 %v2907_v54  ;;  %v2919_v46 = vpack.c.bf16 %v2279_v42, %v2276_v39  ;;  %v2947_v47 = vpack.c.bf16 %v2274_v45, %v2271_v44  ;;  %v2305_v39 = vld [vmem:[%s4163_s3 + $0x2d0] sm:$0xff]  ;;  %v2308_v42 = vld [vmem:[%s4163_s3 + $0x2e8] sm:$0xff]  ;;  %v2307_v45 = vld [vmem:[%s4163_s3 + $0x2e0] sm:$0xff] }
 0x724   : > { %v2941_v44 = vpack.c.bf16 %v2308_v42, %v2305_v39 }
 0x725   : > { %1185 = vmatmul.mubr.f32.vlgmr.msra.gmra.mrb[4].mxu0 %v1074_v48 }
 0x726   : > { %1190 = vmatprep.mubr.f32.mxu0 %v3132_v4  ;;  %2910 = vmatpush3.bf16.msra.mxu1 %v2909_v57  ;;  %v2282_v57 = vld [vmem:[%s4163_s3 + $0x218] sm:$0xff] }
 0x727   : > { %2914 = vmatpush1.bf16.msra.mxu0 %v2913_v29  ;;  %2944 = vmatprep.subr.bf16.mxu1 %v2943_v28  ;;  %v2963_v29 = vpack.c.bf16 %v2298_v25, %v2295_v23 }
 0x728   : > { %2916 = vmatprep.subr.bf16.mxu0 %v2915_v30  ;;  %v2937_v30 = vpack.c.bf16 %v2302_v27, %v2299_v26 }
 0x729   : > { %1191 = vmatmul.mubr.f32.gmra.mrb[6].mxu0 %v1075_v50 }
 0x72a   : > { %1488 = vmatprep.mubr.f32.mxu0 %v3132_v4 }
 0x72b   : > { %2918 = vmatpush1.bf16.msra.mxu0 %v2917_v43  ;;  %v2967_v43 = vpack.c.bf16 %v2304_v38, %v2301_v35  ;;  %v2315_v35 = vld [vmem:[%s4165_s5 + $0x88] sm:$0xff] }
 0x72c   : > { %2920 = vmatprep.subr.bf16.mxu0 %v2919_v46  ;;  %v2310_v46 = vld [vmem:[%s4163_s3 + $0x2f8] sm:$0xff] }
 0x7f8   : > { %v1186_v33 = vpop.f32.mrb[4].mxu0 }
 0x7f9   : > { %v1187_v60 = vadd.f32 %v1186_v33, %v1113_v59  ;;  %v1188_v61 = vpop.f32.mrb[5].mxu0  ;;  %v2280_v33 = vld [vmem:[%s4163_s3 + $0x208] sm:$0xff] }
 0x7fa   : > { %v1189_v62 = vadd.f32 %v1188_v61, %v1117_v36  ;;  %v2284_v61 = vld [vmem:[%s4163_s3 + $0x228] sm:$0xff] }
 0x7fb   : > { %v1197_v1 = vmax.f32 %v1187_v60, 0.0  ;;  %v2281_v60 = vld [vmem:[%s4163_s3 + $0x210] sm:$0xff] }
 0x7fc   : > { %v1198_v63 = vmax.f32 %v1189_v62, 0.0  ;;  %v1192_v0 = vpop.f32.mrb[6].mxu0 }
 0x7fd   : > { %v1193_v2 = vadd.f32 %v1192_v0, %v1113_v59  ;;  %v1194_v3 = vpop.f32.mrb[7].mxu0  ;;  %v2277_v59 = vld [vmem:[%s4163_s3 + $0x1f0] sm:$0xff]  ;;  %v2288_v0 = vld [vmem:[%s4163_s3 + $0x248] sm:$0xff] }
 0x7fe   : > { %v1195_v5 = vadd.f32 %v1194_v3, %v1117_v36  ;;  %1304 = vmatprep.mubr.f32.mxu1 %v1198_v63  ;;  %v2923_v36 = vpack.c.bf16 %v2285_v58, %v2282_v57  ;;  %v2951_v62 = vpack.c.bf16 %v2280_v33, %v2277_v59  ;;  %v2925_v63 = vpack.c.bf16 %v2284_v61, %v2281_v60  ;;  %v2262_v57 = vld [vmem:[%s4174_s14] ss:$0 sm:$0xff] }
 0x7ff   : > { %1305 = vmatmul.mubr.f32.vlgmr.msra.gmra.mrb[8].mxu1 %v1197_v1  ;;  %v1199_v7 = vmax.f32 %v1193_v2, 0.0  ;;  %v2291_v1 = vld [vmem:[%s4163_s3 + $0x260] sm:$0xff] }
 0x800   : > { %v1200_v6 = vmax.f32 %v1195_v5, 0.0  ;;  %2946 = vmatpush3.bf16.msra.mxu1 %v2943_v28  ;;  %v2283_v2 = vld [vmem:[%s4163_s3 + $0x220] sm:$0xff]  ;;  %v2927_v3 = vpack.c.bf16 %v2291_v1, %v2288_v0  ;;  %v2286_v5 = vld [vmem:[%s4163_s3 + $0x238] sm:$0xff]  ;;  %v2939_v28 = vpack.c.bf16 %v2309_v34, %v2306_v31 }
 0x801   : > { %2948 = vmatprep.subr.bf16.mxu1 %v2947_v47  ;;  %v2314_v34 = vld [vmem:[%s4165_s5 + $0x80] sm:$0xff] }
 0x802   : > { %1309 = vmatprep.mubr.f32.mxu1 %v1200_v6  ;;  %v2287_v6 = vld [vmem:[%s4163_s3 + $0x240] sm:$0xff] }
 0x803   : > { %1310 = vmatmul.mubr.f32.gmra.mrb[10].mxu1 %v1199_v7  ;;  %v2290_v7 = vld [vmem:[%s4163_s3 + $0x258] sm:$0xff] }
 0x804   : > { %2950 = vmatpush3.bf16.msra.mxu1 %v2947_v47  ;;  %v2971_v47 = vpack.c.bf16 %v2310_v46, %v2307_v45 }
 0x805   : > { %2952 = vmatprep.subr.bf16.mxu1 %v2951_v62 }
 0x808   : > { %2954 = vmatpush3.bf16.msra.mxu1 %v2951_v62 }
 0x8d2   : > { %v2487_v8 = vpop.f32.mrb[8].mxu1 }
 0x8d3   : > { %v2488_v10 = vpop.f32.mrb[9].mxu1 }
 0x8d4   : > { %v2489_v11 = vadd.f32 %v2488_v10, %v2487_v8  ;;  %v2955_v8 = vpack.c.bf16 %v2286_v5, %v2283_v2  ;;  %v2294_v10 = vld [vmem:[%s4163_s3 + $0x278] sm:$0xff] }
 0x8d6   : > { %v1307_v12 = vadd.f32 %v2489_v11, %v2260_v9  ;;  %v2490_v15 = vpop.f32.mrb[10].mxu1  ;;  %2956 = vmatprep.subr.bf16.mxu1 %v2955_v8  ;;  %v2297_v11 = vld [vmem:[%s4163_s3 + $0x290] sm:$0xff] }
 0x8d7   : > { %v2491_v16 = vpop.f32.mrb[11].mxu1  ;;  %2958 = vmatpush3.bf16.msra.mxu1 %v2955_v8 }
 0x8d8   : > { %v2492_v17 = vadd.f32 %v2491_v16, %v2490_v15  ;;  %v1315_v18 = vadd.f32 %v1307_v12, %v1074_v48  ;;  %v2275_v48 = vld [vmem:[%s4163_s3 + $0x1e0] sm:$0xff]  ;;  %v2289_v12 = vld [vmem:[%s4163_s3 + $0x250] sm:$0xff]  ;;  %v2931_v15 = vpack.c.bf16 %v2297_v11, %v2294_v10  ;;  %v2292_v16 = vld [vmem:[%s4163_s3 + $0x268] sm:$0xff] }
 0x8da   : > { %v1312_v19 = vadd.f32 %v2492_v17, %v2260_v9  ;;  %1319 = vadd.xlane.f32.xlu0 %v1315_v18  ;;  %v2929_v9 = vpack.c.bf16 %v2290_v7, %v2287_v6  ;;  %v2293_v17 = vld [vmem:[%s4163_s3 + $0x270] sm:$0xff] }
 0x8dc   : > { %v1316_v20 = vadd.f32 %v1312_v19, %v1075_v50  ;;  %v2921_v50 = vpack.c.bf16 %v2278_v49, %v2275_v48  ;;  %v2959_v19 = vpack.c.bf16 %v2292_v16, %v2289_v12 }
 0x8de   : > { %1321 = vadd.xlane.f32.xlu1 %v1316_v20  ;;  %2922 = vmatpush1.bf16.msra.mxu0 %v2921_v50 }
 0x8df   : > { %2924 = vmatprep.subr.bf16.mxu0 %v2923_v36  ;;  %2960 = vmatprep.subr.bf16.mxu1 %v2959_v19 }
 0x8e0   : > { %2962 = vmatpush3.bf16.msra.mxu1 %v2959_v19 }
 0x8e1   : > { %2964 = vmatprep.subr.bf16.mxu1 %v2963_v29 }
 0x8e2   : > { %2926 = vmatpush1.bf16.msra.mxu0 %v2925_v63 }
 0x8e3   : > { %2928 = vmatprep.subr.bf16.mxu0 %v2927_v3 }
 0x8e4   : > { %2966 = vmatpush3.bf16.msra.mxu1 %v2963_v29 }
 0x8e5   : > { %2968 = vmatprep.subr.bf16.mxu1 %v2967_v43 }
 0x8e6   : > { %2930 = vmatpush1.bf16.msra.mxu0 %v2929_v9 }
 0x8e7   : > { %2932 = vmatprep.subr.bf16.mxu0 %v2931_v15 }
 0x8e8   : > { %2970 = vmatpush3.bf16.msra.mxu1 %v2967_v43  ;;  %v2316_v43 = vld [vmem:[%s4165_s5 + $0x90] sm:$0xff] }
 0x8e9   : > { %2972 = vmatprep.subr.bf16.mxu1 %v2971_v47 }
 0x8ec   : > { %2974 = vmatpush3.bf16.msra.mxu1 %v2971_v47 }
 0x967   : > { %v1320_v14 = vpop.xlane.xlu0 %1319 }
 0x968   : > { %v1323_v13 = vmul.f32 0.0078125, %v1320_v14 }
 0x96a   : > { %v3741_v51 = vsub.f32 %v1315_v18, %v1323_v13  ;;  %v2296_v18 = vld [vmem:[%s4163_s3 + $0x288] sm:$0xff] }
 0x96b   : > { %v1322_v52 = vpop.xlane.xlu1 %1321 }
 0x96c   : > { %v1324_v53 = vmul.f32 0.0078125, %v1322_v52  ;;  %v1327_v54 = vmul.f32 %v3741_v51, %v3741_v51 }
 0x96e   : > { %v3745_v55 = vsub.f32 %v1316_v20, %v1324_v53  ;;  %1329 = vadd.xlane.f32.xlu0 %v1327_v54  ;;  %v2933_v20 = vpack.c.bf16 %v2296_v18, %v2293_v17  ;;  %v2261_v54 = vld [vmem:[%s4173_s13] ss:$0 sm:$0xff] }
 0x970   : > { %v1328_v56 = vmul.f32 %v3745_v55, %v3745_v55  ;;  %2934 = vmatpush1.bf16.msra.mxu0 %v2933_v20 }
 0x971   : > { %2936 = vmatprep.subr.bf16.mxu0 %v2935_v24 }
 0x972   : > { %1331 = vadd.xlane.f32.xlu1 %v1328_v56 }
 0x974   : > { %2938 = vmatpush1.bf16.msra.mxu0 %v2937_v30 }
 0x975   : > { %2940 = vmatprep.subr.bf16.mxu0 %v2939_v28  ;;  %v2983_v28 = vpack.c.bf16 %v2315_v35, %v2314_v34 }
 0x978   : > { %2942 = vmatpush1.bf16.msra.mxu0 %v2941_v44  ;;  %v2317_v44 = vld [vmem:[%s4165_s5 + $0x98] sm:$0xff] }
 0x9fb   : > { %v1330_v48 = vpop.xlane.xlu0 %1329 }
 0x9fc   : > { %v1333_v49 = vmul.f32 0.0078125, %v1330_v48  ;;  %v2987_v48 = vpack.c.bf16 %v2317_v44, %v2316_v43  ;;  %v2348_v44 = vld [vmem:[%s4169_s9 + $0x160] sm:$0xff] }
 0x9fe   : > { %v1335_v50 = vadd.f32 1e-12, %v1333_v49  ;;  %v2318_v49 = vld [vmem:[%s4165_s5 + $0xa0] sm:$0xff] }
 0x9ff   : > { %v1332_v14 = vpop.xlane.xlu1 %1331 }
 0xa00   : > { %3104 = vrsqrt.f32 %v1335_v50  ;;  %v1334_v13 = vmul.f32 0.0078125, %v1332_v14  ;;  %v2319_v50 = vld [vmem:[%s4165_s5 + $0xa8] sm:$0xff] }
 0xa01   : > { %v2991_v14 = vpack.c.bf16 %v2319_v50, %v2318_v49  ;;  %v2352_v50 = vld [vmem:[%s4169_s9 + $0x180] sm:$0xff] }
 0xa02   : > { %v1336_v52 = vadd.f32 1e-12, %v1334_v13  ;;  %v2320_v13 = vld [vmem:[%s4165_s5 + $0xb0] sm:$0xff] }
 0xa04   : > { %3106 = vrsqrt.f32 %v1336_v52  ;;  %v2321_v52 = vld [vmem:[%s4165_s5 + $0xb8] sm:$0xff] }
 0xa0a   : > { %v3105_v53 = vpop.eup %3104 }
 0xa0b   : > { %v1339_v56 = vmul.f32 %v3105_v53, %v3741_v51  ;;  %v2311_v51 = vld [vmem:[%s4164_s4 + $0x3] sm:$0x7]  ;;  %v2995_v53 = vpack.c.bf16 %v2321_v52, %v2320_v13  ;;  %v2357_v52 = vld [vmem:[%s4169_s9 + $0x1a8] sm:$0xff] }
 0xa0c   : > { %v1420_v1 = vrot.slane %v2311_v51, %v598_v40  ;;  %v1416_v2 = vrot.slane %v2311_v51, %v3411_v41 }
 0xa0d   : > { %v1347_v58 = vmul.f32 %v2261_v54, %v1339_v56  ;;  %v2323_v56 = vld [vmem:[%s4165_s5 + $0xc8] sm:$0xff] }
 0xa0e   : > { %v3107_v59 = vpop.eup %3106 }
 0xa0f   : > { %v3852_v36 = vadd.f32 %v2262_v57, %v1347_v58  ;;  %v1340_v33 = vmul.f32 %v3107_v59, %v3745_v55  ;;  %v1412_v55 = vrot.slane %v2311_v51, %v3403_v32  ;;  %v2324_v58 = vld [vmem:[%s4165_s5 + $0xd0] sm:$0xff]  ;;  %v2325_v59 = vld [vmem:[%s4165_s5 + $0xd8] sm:$0xff]  ;;  %v2327_v51 = vld [vmem:[%s4165_s5 + $0xe8] sm:$0xff] }
 0xa11   : > { %1489 = vmatmul.mubr.f32.vlgmr.msra.gmra.mrb[8].mxu0 %v3852_v36  ;;  %2691 = vmatprep.mubr.f32.mxu1 %v3852_v36  ;;  %v1348_v60 = vmul.f32 %v2261_v54, %v1340_v33  ;;  %v2322_v54 = vld [vmem:[%s4165_s5 + $0xc0] sm:$0xff]  ;;  %v3003_v33 = vpack.c.bf16 %v2325_v59, %v2324_v58  ;;  %v2361_v58 = vld [vmem:[%s4169_s9 + $0x1c8] sm:$0xff]  ;;  %v2363_v59 = vld [vmem:[%s4169_s9 + $0x1d8] sm:$0xff] }
 0xa12   : > { %1494 = vmatprep.mubr.f32.mxu0 %v3132_v4 }
 0xa13   : > { %v3858_v61 = vadd.f32 %v2262_v57, %v1348_v60  ;;  %v2999_v57 = vpack.c.bf16 %v2323_v56, %v2322_v54  ;;  %v2326_v60 = vld [vmem:[%s4165_s5 + $0xe0] sm:$0xff] }
 0xa14   : > { %v2356_v54 = vld [vmem:[%s4169_s9 + $0x1a0] sm:$0xff] }
 0xa15   : > { %1495 = vmatmul.mubr.f32.gmra.mrb[10].mxu0 %v3858_v61  ;;  %2692 = vmatmul.mubr.f32.vlgmr.msra.gmra.mrb[12].mxu1 %v3858_v61 }
 0xa16   : > { %2010 = vmatprep.mubr.f32.mxu1 %v3132_v4 }
 0xae4   : > { %v1490_v62 = vpop.f32.mrb[8].mxu0 }
 0xae5   : > { %v1491_v63 = vadd.f32 %v1490_v62, %v1412_v55  ;;  %v1492_v0 = vpop.f32.mrb[9].mxu0  ;;  %v2328_v62 = vld [vmem:[%s4165_s5 + $0xf0] sm:$0xff] }
 0xae6   : > { %v1493_v9 = vadd.f32 %v1492_v0, %v1416_v2 }
 0xae7   : > { %2698 = vmatprep.mubr.f32.mxu0 %v1491_v63  ;;  %v2329_v63 = vld [vmem:[%s4165_s5 + $0xf8] sm:$0xff] }
 0xae8   : > { %v1496_v3 = vpop.f32.mrb[10].mxu0  ;;  %v2693_v5 = vpop.f32.mrb[12].mxu1  ;;  %v3011_v0 = vpack.c.bf16 %v2329_v63, %v2328_v62  ;;  %v2365_v62 = vld [vmem:[%s4169_s9 + $0x1e8] sm:$0xff]  ;;  %v2367_v63 = vld [vmem:[%s4169_s9 + $0x1f8] sm:$0xff] }
 0xae9   : > { %v1573_v6 = vadd.f32 %v2693_v5, %v1420_v1  ;;  %v1498_v7 = vpop.f32.mrb[11].mxu0  ;;  %v1567_v8 = vpop.f32.mrb[13].mxu1  ;;  %v1497_v16 = vadd.f32 %v1496_v3, %v1412_v55  ;;  %v3007_v55 = vpack.c.bf16 %v2327_v51, %v2326_v60  ;;  %v2331_v3 = vld [vmem:[%s4166_s6 + $0x1] ss:$0 sm:$0xff]  ;;  %v3039_v60 = vpack.c.bf16 %v2363_v59, %v2361_v58 }
 0xaea   : > { %v1499_v10 = vadd.f32 %v1498_v7, %v1416_v2  ;;  %v1568_v11 = vadd.f32 %v1567_v8, %v1420_v1  ;;  %v2360_v51 = vld [vmem:[%s4169_s9 + $0x1c0] sm:$0xff] }
 0xaeb   : > { %v2334_v59 = vld [vmem:[%s4167_s7 + $0x1] ss:$0 sm:$0xff] }
 0xaec   : > { %v2975_v12 = vpack.c.bf16 %v1499_v10, %v1493_v9  ;;  %v2979_v15 = vpack.c.bf16 %v1573_v6, %v1568_v11  ;;  %v2337_v11 = vld [vmem:[%s4169_s9 + $0x108] sm:$0xff] }
 0xaee   : > { %2976 = vmatprep.subr.bf16.mxu0 %v2975_v12 }
 0xaef   : > { %2978 = vmatpush3.bf16.xpose.msra.mxu0 %v2975_v12  ;;  %v2339_v12 = vld [vmem:[%s4169_s9 + $0x118] sm:$0xff] }
 0xaf0   : > { %2980 = vmatprep.subr.bf16.mxu0 %v2979_v15 }
 0xaf6   : > { %2699 = vmatmul.mubr.f32.vlgmr.msra.gmra.mrb[12].mxu0 %v1497_v16  ;;  %v3015_v16 = vpack.c.bf16 %v2339_v12, %v2337_v11  ;;  %v2387_v11 = vld [vmem:[%s4171_s11 + $0x190] sm:$0xff]  ;;  %v2388_v12 = vld [vmem:[%s4171_s11 + $0x198] sm:$0xff] }
 0xaf7   : > { %2982 = vmatpush3.bf16.msra.mxu0 %v2979_v15  ;;  %v2336_v15 = vld [vmem:[%s4169_s9 + $0x100] sm:$0xff] }
 0xaf8   : > { %2984 = vmatprep.subr.bf16.mxu0 %v2983_v28  ;;  %3016 = vmatprep.subr.bf16.mxu1 %v3015_v16  ;;  %v3051_v16 = vpack.c.bf16 %v2388_v12, %v2387_v11 }
 0xbc9   : > { %v2700_v37 = vpop.f32.mrb[12].mxu0 }
 0xbca   : > { %v1652_v40 = vmul.f32 0.088388346, %v2700_v37  ;;  %v1642_v17 = vpop.f32.mrb[13].mxu0  ;;  %v2343_v37 = vld [vmem:[%s4169_s9 + $0x138] sm:$0xff] }
 0xbcb   : > { %v1651_v18 = vmul.f32 0.088388346, %v1642_v17 }
 0xbcc   : > { %v1656_v19 = vsel %vm832_vm0, %v1652_v40, -inf }
 0xbcd   : > { %1657 = vmax.xlane.f32.xlu1 %v1656_v19  ;;  %v1653_v20 = vsel %vm832_vm0, %v1651_v18, -inf  ;;  %v2342_v19 = vld [vmem:[%s4169_s9 + $0x130] sm:$0xff] }
 0xbce   : > { %1654 = vmax.xlane.f32.xlu0 %v1653_v20  ;;  %v2345_v20 = vld [vmem:[%s4169_s9 + $0x148] sm:$0xff] }
 0xc5a   : > { %v1658_v21 = vpop.xlane.xlu1 %1657 }
 0xc5b   : > { %v1660_v22 = vsub.f32 %v1652_v40, %v1658_v21  ;;  %v1655_v23 = vpop.xlane.xlu0 %1654  ;;  %v2347_v21 = vld [vmem:[%s4169_s9 + $0x158] sm:$0xff] }
 0xc5c   : > { %v1659_v24 = vsub.f32 %v1651_v18, %v1655_v23  ;;  %v2340_v18 = vld [vmem:[%s4169_s9 + $0x120] sm:$0xff]  ;;  %v3023_v23 = vpack.c.bf16 %v2347_v21, %v2345_v20  ;;  %v2374_v20 = vld [vmem:[%s4171_s11 + $0x128] sm:$0xff]  ;;  %v2391_v21 = vld [vmem:[%s4171_s11 + $0x1b0] sm:$0xff] }
 0xc5d   : > { %v1663_v25 = vmul.f32 1.442695, %v1660_v22  ;;  %v3021_v22 = vpack.c.bf16 %v2342_v19, %v2340_v18  ;;  %v2373_v19 = vld [vmem:[%s4171_s11 + $0x120] sm:$0xff] }
 0xc5e   : > { %v1661_v26 = vmul.f32 1.442695, %v1659_v24  ;;  %v2344_v24 = vld [vmem:[%s4169_s9 + $0x140] sm:$0xff] }
 0xc5f   : > { %3108 = vpow2.f32 %v1663_v25  ;;  %v2346_v25 = vld [vmem:[%s4169_s9 + $0x150] sm:$0xff] }
 0xc60   : > { %3110 = vpow2.f32 %v1661_v26  ;;  %v3025_v26 = vpack.c.bf16 %v2346_v25, %v2344_v24  ;;  %v2375_v25 = vld [vmem:[%s4171_s11 + $0x130] sm:$0xff] }
 0xc69   : > { %v3109_v27 = vpop.eup %3108 }
 0xc6a   : > { %v3111_v29 = vpop.eup %3110  ;;  %v1668_v30 = vsel %vm832_vm0, %v3109_v27, 0.0 }
 0xc6b   : > { %1669 = vadd.xlane.f32.xlu1 %v1668_v30  ;;  %v1665_v31 = vsel %vm832_vm0, %v3111_v29, 0.0 }
 0xc6c   : > { %1666 = vadd.xlane.f32.xlu0 %v1665_v31 }
 0xcf8   : > { %v1670_v38 = vpop.xlane.xlu1 %1669 }
 0xcf9   : > { %3112 = vrcp.f32 %v1670_v38  ;;  %v1667_v39 = vpop.xlane.xlu0 %1666 }
 0xcfa   : > { %3114 = vrcp.f32 %v1667_v39  ;;  %v2349_v39 = vld [vmem:[%s4169_s9 + $0x168] sm:$0xff] }
 0xd03   : > { %v3113_v42 = vpop.eup %3112 }
 0xd04   : > { %v3115_v45 = vpop.eup %3114  ;;  %v1674_v47 = vmul.f32 %v3113_v42, %v3109_v27  ;;  %v2351_v42 = vld [vmem:[%s4169_s9 + $0x178] sm:$0xff] }
 0xd05   : > { %v1672_v46 = vmul.f32 %v3115_v45, %v3111_v29  ;;  %v3027_v43 = vpack.c.bf16 %v2351_v42, %v2349_v39  ;;  %v2350_v45 = vld [vmem:[%s4169_s9 + $0x170] sm:$0xff]  ;;  %v2396_v42 = vld [vmem:[%s4171_s11 + $0x1d8] sm:$0xff] }
 0xd06   : > { %v2395_v39 = vld [vmem:[%s4171_s11 + $0x1d0] sm:$0xff] }
 0xd07   : > { %2705 = vmatprep.mubr.msk.f32.mxu0 %vm832_vm0, %v1672_v46  ;;  %v3029_v46 = vpack.c.bf16 %v2350_v45, %v2348_v44  ;;  %v3067_v44 = vpack.c.bf16 %v2396_v42, %v2395_v39  ;;  %v2379_v45 = vld [vmem:[%s4171_s11 + $0x150] sm:$0xff] }
 0xd08   : > { %2706 = vmatmul.mubr.msk.f32.vlgmr.msra.gmra.mrb[14].mxu0 %vm832_vm0, %v1674_v47  ;;  %v2353_v47 = vld [vmem:[%s4169_s9 + $0x188] sm:$0xff] }
 0xd09   : > { %2986 = vmatpush3.bf16.msra.mxu0 %v2983_v28 }
 0xd0a   : > { %2988 = vmatprep.subr.bf16.mxu0 %v2987_v48 }
 0xd0d   : > { %2990 = vmatpush3.bf16.msra.mxu0 %v2987_v48  ;;  %v2355_v48 = vld [vmem:[%s4169_s9 + $0x198] sm:$0xff] }
 0xd0e   : > { %2992 = vmatprep.subr.bf16.mxu0 %v2991_v14  ;;  %v3031_v49 = vpack.c.bf16 %v2355_v48, %v2353_v47  ;;  %v2397_v47 = vld [vmem:[%s4171_s11 + $0x1e0] sm:$0xff]  ;;  %v2398_v48 = vld [vmem:[%s4171_s11 + $0x1e8] sm:$0xff] }
 0xd11   : > { %2994 = vmatpush3.bf16.msra.mxu0 %v2991_v14  ;;  %v2354_v14 = vld [vmem:[%s4169_s9 + $0x190] sm:$0xff] }
 0xd12   : > { %2996 = vmatprep.subr.bf16.mxu0 %v2995_v53  ;;  %v3033_v13 = vpack.c.bf16 %v2354_v14, %v2352_v50  ;;  %v3071_v50 = vpack.c.bf16 %v2398_v48, %v2397_v47 }
 0xd15   : > { %2998 = vmatpush3.bf16.msra.mxu0 %v2995_v53  ;;  %v2359_v53 = vld [vmem:[%s4169_s9 + $0x1b8] sm:$0xff] }
 0xd16   : > { %3000 = vmatprep.subr.bf16.mxu0 %v2999_v57  ;;  %v3035_v56 = vpack.c.bf16 %v2359_v53, %v2357_v52 }
 0xd19   : > { %3002 = vmatpush3.bf16.msra.mxu0 %v2999_v57  ;;  %v2358_v57 = vld [vmem:[%s4169_s9 + $0x1b0] sm:$0xff] }
 0xd1a   : > { %3004 = vmatprep.subr.bf16.mxu0 %v3003_v33 }
 0xd1d   : > { %3006 = vmatpush3.bf16.msra.mxu0 %v3003_v33  ;;  %v3037_v33 = vpack.c.bf16 %v2358_v57, %v2356_v54 }
 0xd1e   : > { %3008 = vmatprep.subr.bf16.mxu0 %v3007_v55 }
 0xd21   : > { %3010 = vmatpush3.bf16.msra.mxu0 %v3007_v55  ;;  %v2362_v55 = vld [vmem:[%s4169_s9 + $0x1d0] sm:$0xff] }
 0xd22   : > { %3012 = vmatprep.subr.bf16.mxu0 %v3011_v0 }
 0xd25   : > { %3014 = vmatpush3.bf16.msra.mxu0 %v3011_v0  ;;  %v3041_v0 = vpack.c.bf16 %v2362_v55, %v2360_v51  ;;  %v2335_v51 = vld [vmem:[%s4168_s8 + $0x1] ss:$0 sm:$0xff] }
 0xddb   : > { %v2707_v1 = vpop.f32.mrb[14].mxu0 }
 0xddc   : > { %v1747_v2 = vpop.f32.mrb[15].mxu0 }
 0xddd   : > { %2740 = vmatprep.mubr.f32.mxu0 %v1747_v2  ;;  %v2364_v2 = vld [vmem:[%s4169_s9 + $0x1e0] sm:$0xff] }
 0xdde   : > { %2741 = vmatmul.mubr.f32.vlgmr.msra.gmra.mrb[16].mxu0 %v2707_v1  ;;  %v3043_v1 = vpack.c.bf16 %v2367_v63, %v2365_v62 }
 0xeb1   : > { %v2742_v5 = vpop.f32.mrb[16].mxu0 }
 0xeb2   : > { %v1853_v6 = vadd.f32 %v2742_v5, %v2331_v3  ;;  %v1847_v7 = vpop.f32.mrb[17].mxu0 }
 0xeb3   : > { %v1848_v8 = vadd.f32 %v2331_v3, %v1847_v7  ;;  %v2366_v3 = vld [vmem:[%s4169_s9 + $0x1f0] sm:$0xff]  ;;  %v2386_v7 = vld [vmem:[%s4171_s11 + $0x188] sm:$0xff] }
 0xeb4   : > { %v1857_v9 = vadd.f32 %v1853_v6, %v3858_v61  ;;  %v2338_v61 = vld [vmem:[%s4169_s9 + $0x110] sm:$0xff]  ;;  %v3045_v5 = vpack.c.bf16 %v2366_v3, %v2364_v2  ;;  %v2385_v6 = vld [vmem:[%s4171_s11 + $0x180] sm:$0xff] }
 0xeb5   : > { %v1856_v10 = vadd.f32 %v1848_v8, %v3852_v36  ;;  %v2341_v36 = vld [vmem:[%s4169_s9 + $0x128] sm:$0xff]  ;;  %v3017_v40 = vpack.c.bf16 %v2338_v61, %v2336_v15  ;;  %v2369_v8 = vld [vmem:[%s4171_s11 + $0x100] sm:$0xff]  ;;  %v2371_v61 = vld [vmem:[%s4171_s11 + $0x110] sm:$0xff] }
 0xeb6   : > { %1864 = vadd.xlane.f32.xlu1 %v1857_v9  ;;  %v3019_v17 = vpack.c.bf16 %v2343_v37, %v2341_v36  ;;  %v2372_v36 = vld [vmem:[%s4171_s11 + $0x118] sm:$0xff]  ;;  %v2389_v37 = vld [vmem:[%s4171_s11 + $0x1a0] sm:$0xff]  ;;  %v2399_v2 = vld [vmem:[%s4171_s11 + $0x1f0] sm:$0xff] }
 0xeb7   : > { %1862 = vadd.xlane.f32.xlu0 %v1856_v10  ;;  %3018 = vmatpush1.bf16.msra.mxu1 %v3017_v40  ;;  %v2390_v40 = vld [vmem:[%s4171_s11 + $0x1a8] sm:$0xff] }
 0xeb8   : > { %3020 = vmatprep.subr.bf16.mxu1 %v3019_v17  ;;  %v3053_v17 = vpack.c.bf16 %v2372_v36, %v2371_v61  ;;  %v3055_v18 = vpack.c.bf16 %v2390_v40, %v2389_v37 }
 0xebb   : > { %3022 = vmatpush1.bf16.msra.mxu1 %v3021_v22  ;;  %v2392_v22 = vld [vmem:[%s4171_s11 + $0x1b8] sm:$0xff] }
 0xebc   : > { %3024 = vmatprep.subr.bf16.mxu1 %v3023_v23  ;;  %v3057_v23 = vpack.c.bf16 %v2374_v20, %v2373_v19  ;;  %v3059_v24 = vpack.c.bf16 %v2392_v22, %v2391_v21 }
 0xebf   : > { %3026 = vmatpush1.bf16.msra.mxu1 %v3025_v26  ;;  %v2376_v26 = vld [vmem:[%s4171_s11 + $0x138] sm:$0xff] }
 0xec0   : > { %3028 = vmatprep.subr.bf16.mxu1 %v3027_v43 }
 0xec3   : > { %3030 = vmatpush1.bf16.msra.mxu1 %v3029_v46  ;;  %v2380_v46 = vld [vmem:[%s4171_s11 + $0x158] sm:$0xff] }
 0xec4   : > { %3032 = vmatprep.subr.bf16.mxu1 %v3031_v49  ;;  %v3069_v49 = vpack.c.bf16 %v2380_v46, %v2379_v45 }
 0xec7   : > { %3034 = vmatpush1.bf16.msra.mxu1 %v3033_v13 }
 0xec8   : > { %3036 = vmatprep.subr.bf16.mxu1 %v3035_v56 }
 0xecb   : > { %3038 = vmatpush1.bf16.msra.mxu1 %v3037_v33 }
 0xecc   : > { %3040 = vmatprep.subr.bf16.mxu1 %v3039_v60 }
 0xecf   : > { %3042 = vmatpush1.bf16.msra.mxu1 %v3041_v0 }
 0xed0   : > { %3044 = vmatprep.subr.bf16.mxu1 %v3043_v1  ;;  %v2381_v1 = vld [vmem:[%s4171_s11 + $0x160] sm:$0xff] }
 0xed3   : > { %3046 = vmatpush1.bf16.msra.mxu1 %v3045_v5  ;;  %v2383_v5 = vld [vmem:[%s4171_s11 + $0x170] sm:$0xff] }
 0xf43   : > { %v1865_v27 = vpop.xlane.xlu1 %1864 }
 0xf44   : > { %v1867_v29 = vmul.f32 0.0078125, %v1865_v27  ;;  %v1863_v30 = vpop.xlane.xlu0 %1862  ;;  %v2393_v27 = vld [vmem:[%s4171_s11 + $0x1c0] sm:$0xff] }
 0xf45   : > { %v1866_v31 = vmul.f32 0.0078125, %v1863_v30  ;;  %v3061_v30 = vpack.c.bf16 %v2376_v26, %v2375_v25 }
 0xf46   : > { %v3965_v34 = vsub.f32 %v1857_v9, %v1867_v29  ;;  %v3047_v9 = vpack.c.bf16 %v2386_v7, %v2385_v6  ;;  %v2394_v29 = vld [vmem:[%s4171_s11 + $0x1c8] sm:$0xff]  ;;  %v2384_v6 = vld [vmem:[%s4171_s11 + $0x178] sm:$0xff] }
 0xf47   : > { %v3967_v35 = vsub.f32 %v1856_v10, %v1866_v31  ;;  %v2370_v10 = vld [vmem:[%s4171_s11 + $0x108] sm:$0xff]  ;;  %v3063_v31 = vpack.c.bf16 %v2394_v29, %v2393_v27  ;;  %v3077_v7 = vpack.c.bf16 %v2384_v6, %v2383_v5 }
 0xf48   : > { %v1871_v28 = vmul.f32 %v3965_v34, %v3965_v34  ;;  %v3049_v15 = vpack.c.bf16 %v2370_v10, %v2369_v8  ;;  %3048 = vmatprep.subr.bf16.mxu0 %v3047_v9  ;;  %v2368_v8 = vld [vmem:[%s4170_s10 + $0x2] sm:$0x3] }
 0xf49   : > { %v1870_v38 = vmul.f32 %v3967_v35, %v3967_v35  ;;  %v1939_v9 = vrot.slane %v2368_v8, %v3403_v32  ;;  %v1943_v10 = vrot.slane %v2368_v8, %v3411_v41  ;;  %v2402_v32 = vld [vmem:[%s4172_s12 + $0x1] ss:$0 sm:$0xff] }
 0xf4a   : > { %1874 = vadd.xlane.f32.xlu1 %v1871_v28  ;;  %3050 = vmatpush3.bf16.msra.mxu0 %v3049_v15  ;;  %v2377_v28 = vld [vmem:[%s4171_s11 + $0x140] sm:$0xff] }
 0xf4b   : > { %1872 = vadd.xlane.f32.xlu0 %v1870_v38  ;;  %3052 = vmatprep.subr.bf16.mxu0 %v3051_v16  ;;  %v2378_v38 = vld [vmem:[%s4171_s11 + $0x148] sm:$0xff] }
 0xf4c   : > { %v3065_v43 = vpack.c.bf16 %v2378_v38, %v2377_v28 }
 0xf4e   : > { %3054 = vmatpush3.bf16.msra.mxu0 %v3053_v17 }
 0xf4f   : > { %3056 = vmatprep.subr.bf16.mxu0 %v3055_v18 }
 0xf52   : > { %3058 = vmatpush3.bf16.msra.mxu0 %v3057_v23 }
 0xf53   : > { %3060 = vmatprep.subr.bf16.mxu0 %v3059_v24 }
 0xf56   : > { %3062 = vmatpush3.bf16.msra.mxu0 %v3061_v30 }
 0xf57   : > { %3064 = vmatprep.subr.bf16.mxu0 %v3063_v31 }
 0xf5a   : > { %3066 = vmatpush3.bf16.msra.mxu0 %v3065_v43 }
 0xf5b   : > { %3068 = vmatprep.subr.bf16.mxu0 %v3067_v44 }
 0xf5e   : > { %3070 = vmatpush3.bf16.msra.mxu0 %v3069_v49 }
 0xf5f   : > { %3072 = vmatprep.subr.bf16.mxu0 %v3071_v50 }
 0xfd7   : > { %v1875_v14 = vpop.xlane.xlu1 %1874 }
 0xfd8   : > { %v1877_v13 = vmul.f32 0.0078125, %v1875_v14  ;;  %v1873_v52 = vpop.xlane.xlu0 %1872 }
 0xfd9   : > { %v1876_v53 = vmul.f32 0.0078125, %v1873_v52  ;;  %v2405_v52 = vld [vmem:[%s4173_s13 + $0x1] ss:$0 sm:$0xff] }
 0xfda   : > { %v1879_v54 = vadd.f32 1e-12, %v1877_v13 }
 0xfdb   : > { %v1878_v56 = vadd.f32 1e-12, %v1876_v53 }
 0xfdc   : > { %3116 = vrsqrt.f32 %v1879_v54  ;;  %v2406_v54 = vld [vmem:[%s4174_s14 + $0x1] ss:$0 sm:$0xff] }
 0xfdd   : > { %3118 = vrsqrt.f32 %v1878_v56 }
 0xfe6   : > { %v3117_v57 = vpop.eup %3116 }
 0xfe7   : > { %v3119_v58 = vpop.eup %3118  ;;  %v1883_v60 = vmul.f32 %v3117_v57, %v3965_v34  ;;  %v2382_v34 = vld [vmem:[%s4171_s11 + $0x168] sm:$0xff] }
 0xfe8   : > { %v1882_v33 = vmul.f32 %v3119_v58, %v3967_v35  ;;  %v3073_v35 = vpack.c.bf16 %v2382_v34, %v2381_v1 }
 0xfe9   : > { %v1891_v63 = vmul.f32 %v2334_v59, %v1883_v60 }
 0xfea   : > { %v1890_v55 = vmul.f32 %v2334_v59, %v1882_v33  ;;  %3074 = vmatpush3.bf16.msra.mxu0 %v3073_v35 }
 0xfeb   : > { %v1899_v0 = vadd.f32 %v2335_v51, %v1891_v63 }
 0xfec   : > { %v1898_v62 = vadd.f32 %v2335_v51, %v1890_v55 }
 0xfee   : > { %2011 = vmatmul.mubr.f32.vlgmr.msra.gmra.mrb[14].mxu1 %v1898_v62 }
 0xfef   : > { %2016 = vmatprep.mubr.f32.mxu1 %v3132_v4  ;;  %v2400_v4 = vld [vmem:[%s4171_s11 + $0x1f8] sm:$0xff] }
 0xff0   : > { %v3075_v3 = vpack.c.bf16 %v2400_v4, %v2399_v2 }
 0xff2   : > { %2017 = vmatmul.mubr.f32.gmra.mrb[16].mxu1 %v1899_v0  ;;  %3076 = vmatprep.subr.bf16.mxu0 %v3075_v3 }
 0xff3   : > { %3078 = vmatpush3.bf16.msra.mxu0 %v3077_v7 }
0x10c1   : > { %v2012_v11 = vpop.f32.mrb[14].mxu1 }
0x10c2   : > { %v2013_v12 = vadd.f32 %v2012_v11, %v1939_v9  ;;  %v2014_v15 = vpop.f32.mrb[15].mxu1 }
0x10c3   : > { %v2015_v16 = vadd.f32 %v2014_v15, %v1943_v10 }
0x10c4   : > { %v2023_v37 = vmax.f32 %v2013_v12, 0.0 }
0x10c5   : > { %v2024_v61 = vmax.f32 %v2015_v16, 0.0  ;;  %v2018_v36 = vpop.f32.mrb[16].mxu1 }
0x10c6   : > { %v2019_v40 = vadd.f32 %v2018_v36, %v1939_v9  ;;  %v2020_v17 = vpop.f32.mrb[17].mxu1 }
0x10c7   : > { %v2021_v18 = vadd.f32 %v2020_v17, %v1943_v10  ;;  %2132 = vmatprep.mubr.f32.mxu0 %v2024_v61 }
0x10c8   : > { %2133 = vmatmul.mubr.f32.vlgmr.msra.gmra.mrb[18].mxu0 %v2023_v37  ;;  %v2025_v20 = vmax.f32 %v2019_v40, 0.0 }
0x10c9   : > { %v2026_v19 = vmax.f32 %v2021_v18, 0.0 }
0x10cb   : > { %2137 = vmatprep.mubr.f32.mxu0 %v2026_v19 }
0x10cc   : > { %2138 = vmatmul.mubr.f32.gmra.mrb[20].mxu0 %v2025_v20 }
0x119b   : > { %v2569_v21 = vpop.f32.mrb[18].mxu0 }
0x119c   : > { %v2570_v41 = vpop.f32.mrb[19].mxu0 }
0x119d   : > { %v2571_v22 = vadd.f32 %v2570_v41, %v2569_v21 }
0x119f   : > { %v2135_v23 = vadd.f32 %v2571_v22, %v2402_v32  ;;  %v2572_v24 = vpop.f32.mrb[20].mxu0 }
0x11a0   : > { %v2573_v25 = vpop.f32.mrb[21].mxu0 }
0x11a1   : > { %v2574_v26 = vadd.f32 %v2573_v25, %v2572_v24  ;;  %v2143_v27 = vadd.f32 %v2135_v23, %v1898_v62 }
0x11a3   : > { %v2140_v29 = vadd.f32 %v2574_v26, %v2402_v32  ;;  %2149 = vadd.xlane.f32.xlu0 %v2143_v27 }
0x11a5   : > { %v2144_v30 = vadd.f32 %v2140_v29, %v1899_v0 }
0x11a7   : > { %2151 = vadd.xlane.f32.xlu1 %v2144_v30 }
0x1230   : > { %v2150_v31 = vpop.xlane.xlu0 %2149 }
0x1231   : > { %v2153_v28 = vmul.f32 0.0078125, %v2150_v31 }
0x1233   : > { %v2155_v38 = vsub.f32 %v2143_v27, %v2153_v28 }
0x1234   : > { %v2152_v39 = vpop.xlane.xlu1 %2151 }
0x1235   : > { %v2154_v42 = vmul.f32 0.0078125, %v2152_v39  ;;  %v2157_v43 = vmul.f32 %v2155_v38, %v2155_v38 }
0x1237   : > { %v2156_v44 = vsub.f32 %v2144_v30, %v2154_v42  ;;  %2159 = vadd.xlane.f32.xlu0 %v2157_v43 }
0x1239   : > { %v2158_v45 = vmul.f32 %v2156_v44, %v2156_v44 }
0x123b   : > { %2161 = vadd.xlane.f32.xlu1 %v2158_v45 }
0x12c4   : > { %v2160_v46 = vpop.xlane.xlu0 %2159 }
0x12c5   : > { %v2163_v47 = vmul.f32 0.0078125, %v2160_v46 }
0x12c7   : > { %v2165_v48 = vadd.f32 1e-12, %v2163_v47 }
0x12c8   : > { %v2162_v49 = vpop.xlane.xlu1 %2161 }
0x12c9   : > { %3120 = vrsqrt.f32 %v2165_v48  ;;  %v2164_v50 = vmul.f32 0.0078125, %v2162_v49 }
0x12cb   : > { %v2166_v14 = vadd.f32 1e-12, %v2164_v50 }
0x12cd   : > { %3122 = vrsqrt.f32 %v2166_v14 }
0x12d3   : > { %v3121_v13 = vpop.eup %3120 }
0x12d4   : > { %v2169_v53 = vmul.f32 %v3121_v13, %v2155_v38 }
0x12d6   : > { %v2177_v56 = vmul.f32 %v2405_v52, %v2169_v53 }
0x12d7   : > { %v3123_v57 = vpop.eup %3122 }
0x12d8   : > { %v2185_v58 = vadd.f32 %v2406_v54, %v2177_v56  ;;  %v2170_v59 = vmul.f32 %v3123_v57, %v2156_v44 }
0x12da   : > { %2187 = vst [vmem:[%s494_s22] sm:$0xff] %v2185_v58  ;;  %v2178_v33 = vmul.f32 %v2405_v52, %v2170_v59 }
0x12dc   : > { %v2186_v60 = vadd.f32 %v2406_v54, %v2178_v33 }
0x12de   : > { %2188 = vst [vmem:[%s494_s22 + $0x8] sm:$0xff] %v2186_v60 }
0x12df PF: > { %s25_s18 = sadd.s32 1, %s3130_s18  }
0x12e0   : > { %p22_p4 = scmp.ge.s32.totalorder %s25_s18, 4  }
0x12e2   :  { %24 = sbr.rel (!%p22_p4) target bundleno = 1 (0x1), region = 122 }

// kernel: unbiased_bert_forward.4
= control target key start
LH: loop header
LB: loop body
LE: loop exit
PB: predicated region body
PF: predicated region fallthrough
CT: control target
= control target key end

     0   :  { %s3919_s0 = inlined_call_operand.vmem [shape: f32[4,16,128], index: 0, kind: input, shape index: {}]   ;;  %s3920_s1 = inlined_call_operand.vmem [shape: f32[1,128], index: 1, kind: input, shape index: {}]   ;;  %s3921_s2 = inlined_call_operand.vmem [shape: f32[1,128], index: 2, kind: input, shape index: {}]   ;;  %s3922_s3 = inlined_call_operand.vmem [shape: f32[2,128,384], index: 3, kind: input, shape index: {}]   ;;  %s3923_s4 = inlined_call_operand.vmem [shape: f32[2,1,384], index: 4, kind: input, shape index: {}]   ;;  %s3924_s5 = inlined_call_operand.hbm [shape: f32[2,128,128], index: 5, kind: input, shape index: {}]   ;;  %s3925_s6 = inlined_call_operand.vmem [shape: f32[2,1,128], index: 6, kind: input, shape index: {}]   ;;  %s3926_s7 = inlined_call_operand.vmem [shape: f32[2,1,128], index: 7, kind: input, shape index: {}]   ;;  %s3927_s8 = inlined_call_operand.vmem [shape: f32[2,1,128], index: 8, kind: input, shape index: {}]   ;;  %s3928_s9 = inlined_call_operand.hbm [shape: f32[2,128,256], index: 9, kind: input, shape index: {}]   ;;  %s3929_s10 = inlined_call_operand.vmem [shape: f32[2,1,256], index: 10, kind: input, shape index: {}]   ;;  %s3930_s11 = inlined_call_operand.hbm [shape: f32[2,256,128], index: 11, kind: input, shape index: {}]   ;;  %s3931_s12 = inlined_call_operand.vmem [shape: f32[2,1,128], index: 12, kind: input, shape index: {}]   ;;  %s3932_s13 = inlined_call_operand.vmem [shape: f32[2,1,128], index: 13, kind: input, shape index: {}]   ;;  %s3933_s14 = inlined_call_operand.vmem [shape: f32[2,1,128], index: 14, kind: input, shape index: {}]   ;;  %s3934_s15 = inlined_call_operand.vmem [shape: f32[4,16,128], index: 15, kind: output, shape index: {}]  }
   0x1   :  { %3940 = sst [smem:[#allocation10_spill]] %s3932_s13 }
   0x2   :  { %3941 = sst [smem:[#allocation11_spill]] %s3933_s14 }
   0x3   :  { %3942 = sst [smem:[#allocation12_spill]] %s3934_s15 }
   0x4   :  { %20 = vsyncpa [#allocation3], 0 }
   0x5   :  { %21 = vsyncpa [#allocation5], 0  ;;  %s3348_s18 = smov 0  }
   0x6 LB: > { %3943 = sst [smem:[#allocation9_spill]] %s3258_s18  ;;  %s3260_s19 = smov [#allocation4]   ;;  %s3258_s18 = sphi %s3348_s18, %s27_s18  }
   0x7   : > { %s424_s20 = sshll.u32 %s3260_s19, 4  ;;  %s3354_s21 = sadd.s32 4294967295, %s3258_s18   ;;  %s3363_s20 = int_to_ptr.vmem [resolvable:$true] %s424_s20 }
   0x8   : > { %p2321_p0 = scmp.ge.s32.totalorder %s3258_s18, 1  ;;  %p378_p1 = scmp.lt.s32.totalorder %s3258_s18, 5 }
   0x9   : > { %p3938_p2 = scmp.eq.s32.totalorder %s3354_s21, 0  ;;  %s3261_s23 = smov [#allocation2]  }
   0xa   : > { %p3359_p3 = pnand %p2321_p0, %p378_p1  ;;  %s402_s24 = sshll.u32 %s3261_s23, 4  ;;  %s3367_s24 = int_to_ptr.vmem [resolvable:$true] %s402_s24 }
   0xb   : > { %s3262_s26 = smov [#allocation6]   ;;  %s3160_s30 = scalar_lea.hbm %s3928_s9, 8192 }
   0xc   : > { %s3944_s22 = scalar_select %p3359_p3, 1, 0 }
   0xd   : > { %p3092_p4 = pneg %p3359_p3  ;;  %s3375_s27 = sshll.u32 %s3262_s26, 4  ;;  %s441_s27 = int_to_ptr.vmem [resolvable:$true] %s3375_s27 }
   0xe   : > { %p3161_p6 = scmp.ne.s32.totalorder %s3928_s9, %s3160_s30  ;;  %p3167_p10 = scmp.lt.u32.totalorder %s3160_s30, %s3928_s9 }
   0xf   : > { %p3371_p5 = pnand %p3938_p2, %p3092_p4 }
  0x11   : > { %p3385_p7 = pneg %p3371_p5 }
  0x13   : > { %p3163_p8 = pnand %p3385_p7, %p3161_p6 }
  0x15   : > { %p3164_p9 = pneg %p3163_p8 }
  0x17   : > { %p3169_p11 = pnand %p3167_p10, %p3164_p9 }
  0x19   : > { %3172 = shalt.err (!%p3169_p11)
}
  0x1a   : > { %s3173_s28 = scalar_lea.vmem %s3363_s20, 8192  ;;  %p3181_p1 = scmp.lt.s32.totalorder %s3363_s20, %s3363_s20 }
  0x1b   : > { %p3174_p12 = scmp.ne.s32.totalorder %s3363_s20, %s3173_s28  ;;  %p3182_p4 = scmp.lt.s32.totalorder %s3173_s28, %s3173_s28 }
  0x1d   : > { %p3176_p13 = pnand %p3174_p12, %p3385_p7  ;;  %p3183_p6 = por %p3182_p4, %p3181_p1 }
  0x1f   : > { %p3177_p0 = pneg %p3176_p13 }
  0x21   : > { %p3184_p8 = pnand %p3183_p6, %p3177_p0 }
  0x23   : > { %3187 = shalt.err (!%p3184_p8)
}
  0x24   : > { %s3263_s29 = smov 256   ;;  %s3264_s30 = smov 16  }
  0x25   : > { %3098 = dma.hbm_to_vmem [thread:$0]  (!%p3371_p5), %s3928_s9, 8192, %s3363_s20, [#allocation5], %s3263_s29, %s3263_s29, %s3264_s30  }
  0x26   : > { %s3188_s18 = scalar_lea.hbm %s3924_s5, 4096 }
  0x27   : > { %p3189_p9 = scmp.ne.s32.totalorder %s3924_s5, %s3188_s18  ;;  %p3195_p12 = scmp.lt.u32.totalorder %s3188_s18, %s3924_s5 }
  0x29   : > { %p3191_p10 = pnand %p3189_p9, %p3385_p7 }
  0x2b   : > { %p3192_p11 = pneg %p3191_p10 }
  0x2d   : > { %p3197_p13 = pnand %p3195_p12, %p3192_p11 }
  0x2f   : > { %3200 = shalt.err (!%p3197_p13)
}
  0x30   : > { %s3201_s20 = scalar_lea.vmem %s3367_s24, 4096  ;;  %p3209_p6 = scmp.lt.s32.totalorder %s3367_s24, %s3367_s24 }
  0x31   : > { %p3202_p0 = scmp.ne.s32.totalorder %s3367_s24, %s3201_s20  ;;  %p3210_p8 = scmp.lt.s32.totalorder %s3201_s20, %s3201_s20 }
  0x33   : > { %p3204_p1 = pnand %p3202_p0, %p3385_p7  ;;  %p3211_p9 = por %p3210_p8, %p3209_p6 }
  0x35   : > { %p3205_p4 = pneg %p3204_p1 }
  0x37   : > { %p3212_p10 = pnand %p3211_p9, %p3205_p4 }
  0x39   : > { %3215 = shalt.err (!%p3212_p10)
}
  0x3a   : > { %s3265_s14 = smov 128   ;;  %s3266_s13 = smov 8  }
  0x3b   : > { %3095 = dma.hbm_to_vmem [thread:$0]  (!%p3371_p5), %s3924_s5, 4096, %s3367_s24, [#allocation3], %s3265_s14, %s3265_s14, %s3266_s13  }
  0x3c   : > { %s3216_s16 = scalar_lea.hbm %s3930_s11, 8192 }
  0x3d   : > { %p3217_p11 = scmp.ne.s32.totalorder %s3930_s11, %s3216_s16  ;;  %p3223_p0 = scmp.lt.u32.totalorder %s3216_s16, %s3930_s11 }
  0x3f   : > { %p3219_p12 = pnand %p3217_p11, %p3385_p7 }
  0x41   : > { %p3220_p13 = pneg %p3219_p12 }
  0x43   : > { %p3225_p1 = pnand %p3223_p0, %p3220_p13 }
  0x45   : > { %3228 = shalt.err (!%p3225_p1)
}
  0x46   : > { %s3229_s20 = scalar_lea.vmem %s441_s27, 8192  ;;  %p3237_p9 = scmp.lt.s32.totalorder %s441_s27, %s441_s27 }
  0x47   : > { %p3230_p4 = scmp.ne.s32.totalorder %s441_s27, %s3229_s20  ;;  %p3238_p10 = scmp.lt.s32.totalorder %s3229_s20, %s3229_s20 }
  0x49   : > { %p3232_p6 = pnand %p3230_p4, %p3385_p7  ;;  %p3239_p2 = por %p3238_p10, %p3237_p9 }
  0x4b   : > { %p3233_p8 = pneg %p3232_p6 }
  0x4d   : > { %p3240_p3 = pnand %p3239_p2, %p3233_p8 }
  0x4f   : > { %3243 = shalt.err (!%p3240_p3)
}
  0x50   : > { %3101 = dma.hbm_to_vmem [thread:$0]  (!%p3371_p5), %s3930_s11, 8192, %s441_s27, [#allocation5], %s3265_s14, %s3265_s14, %s3266_s13  }
  0x51   : > { %p3947_p11 = scmp.ne.s32.totalorder %s3944_s22, 0 }
  0x52   : > { %p3948_p12 = scmp.eq.s32.totalorder (!%p3947_p11), %s3354_s21, 0 }
  0x53   : > { %473 = sbr.rel (%p3947_p11) target bundleno = 4915 (0x1333), region = 80 }
  0x5a   : > { %3249 = dma.done.wait (%p3948_p12), [#allocation3], 4096   ;;  %p3949_p7 = pmov %p3948_p12 }
  0x5c   : > { %3251 = vsyncadd (%p3949_p7), [#allocation3], 4294963200  ;;  %p3950_p13 = pmov %p3949_p7 }
  0x5d   : > { %p3951_p2 = pmov %p3949_p7 }
  0x5e   : > { %3253 = dma.done.wait (%p3950_p13), [#allocation5], 16384  }
  0x5f   : > { %3255 = vsyncadd (%p3951_p2), [#allocation5], 4294950912  ;;  %p529_p3 = scmp.lt.s32.totalorder %s3354_s21, 3  ;;  %v583_v2 = vld [vmem:[%s3922_s3 + $0x8] sm:$0xff]  ;;  %v586_v3 = vld [vmem:[%s3922_s3 + $0x20] sm:$0xff]  ;;  %vm876_vm0 = vcmask 130048  }
  0x60   : > { %v582_v4 = vld [vmem:[%s3922_s3] sm:$0xff]  ;;  %v2744_v5 = vpack.c.bf16 %v586_v3, %v583_v2  ;;  %v585_v6 = vld [vmem:[%s3922_s3 + $0x18] sm:$0xff]  ;;  %v592_v8 = vld [vmem:[%s3922_s3 + $0x50] sm:$0xff]  ;;  %s3952_s18 = sld [smem:[#allocation10_spill]]  ;;  %s3954_s17 = sld [smem:[#allocation11_spill]] }
  0x61   : > { %s3958_s21 = smov (!%p529_p3, %s3354_s21), 3  ;;  %v589_v7 = vld [vmem:[%s3922_s3 + $0x38] sm:$0xff]  ;;  %v2746_v9 = vpack.c.bf16 %v585_v6, %v582_v4  ;;  %v584_v11 = vld [vmem:[%s3922_s3 + $0x10] sm:$0xff]  ;;  %v587_v12 = vld [vmem:[%s3922_s3 + $0x28] sm:$0xff]  ;;  %v3267_v4 = vmov 0.0   ;;  %s3955_s24 = sld [smem:[#allocation12_spill]] }
  0x62   : > { %s2410_s22 = sshll.u32 %s3958_s21, 4  ;;  %v2748_v10 = vpack.c.bf16 %v592_v8, %v589_v7  ;;  %v588_v13 = vld [vmem:[%s3922_s3 + $0x30] sm:$0xff]  ;;  %2745 = vmatprep.subr.bf16.mxu0 %v2744_v5  ;;  %v2776_v14 = vpack.c.bf16 %v587_v12, %v584_v11  ;;  %v591_v15 = vld [vmem:[%s3922_s3 + $0x48] sm:$0xff]  ;;  %v598_v17 = vld [vmem:[%s3922_s3 + $0x80] sm:$0xff]  ;;  %711 = vmatprep.mubr.f32.mxu0 %v3267_v4 }
  0x63   : > { %s533_s19 = scalar_lea.vmem %s3919_s0, %s2410_s22  ;;  %v595_v16 = vld [vmem:[%s3922_s3 + $0x68] sm:$0xff]  ;;  %2747 = vmatpush1.bf16.msra.mxu0 %v2746_v9  ;;  %v2750_v18 = vpack.c.bf16 %v591_v15, %v588_v13  ;;  %v590_v19 = vld [vmem:[%s3922_s3 + $0x40] sm:$0xff]  ;;  %v593_v20 = vld [vmem:[%s3922_s3 + $0x58] sm:$0xff] }
  0x64   : > { %v539_v0 = vld [vmem:[%s533_s19] sm:$0xff]  ;;  %v540_v1 = vld [vmem:[%s533_s19 + $0x8] sm:$0xff]  ;;  %2749 = vmatprep.subr.bf16.mxu0 %v2748_v10  ;;  %2777 = vmatprep.subr.bf16.mxu1 %v2776_v14  ;;  %v2752_v21 = vpack.c.bf16 %v598_v17, %v595_v16  ;;  %v2780_v22 = vpack.c.bf16 %v593_v20, %v590_v19  ;;  %v597_v24 = vld [vmem:[%s3922_s3 + $0x78] sm:$0xff] }
  0x65   : > { %543 = vadd.xlane.f32.xlu0 %v539_v0  ;;  %v594_v23 = vld [vmem:[%s3922_s3 + $0x60] sm:$0xff]  ;;  %2779 = vmatpush3.bf16.msra.mxu1 %v2776_v14  ;;  %v601_v34 = vld [vmem:[%s3922_s3 + $0x98] sm:$0xff]  ;;  %v604_v35 = vld [vmem:[%s3922_s3 + $0xb0] sm:$0xff] }
  0x66   : > { %2781 = vmatprep.subr.bf16.mxu1 %v2780_v22  ;;  %v2754_v25 = vpack.c.bf16 %v597_v24, %v594_v23  ;;  %v596_v36 = vld [vmem:[%s3922_s3 + $0x70] sm:$0xff]  ;;  %v2756_v37 = vpack.c.bf16 %v604_v35, %v601_v34  ;;  %v599_v38 = vld [vmem:[%s3922_s3 + $0x88] sm:$0xff]  ;;  %v610_v44 = vld [vmem:[%s3922_s3 + $0xe0] sm:$0xff]  ;;  %s3953_s29 = smov %s3952_s18 }
  0x67   : > { %2751 = vmatpush1.bf16.msra.mxu0 %v2750_v18  ;;  %v600_v39 = vld [vmem:[%s3922_s3 + $0x90] sm:$0xff]  ;;  %v603_v40 = vld [vmem:[%s3922_s3 + $0xa8] sm:$0xff]  ;;  %v2784_v41 = vpack.c.bf16 %v599_v38, %v596_v36  ;;  %v602_v45 = vld [vmem:[%s3922_s3 + $0xa0] sm:$0xff]  ;;  %s538_s15 = scalar_lea.vmem %s3955_s24, %s2410_s22 }
  0x68   : > { %2753 = vmatprep.subr.bf16.mxu0 %v2752_v21  ;;  %v2758_v42 = vpack.c.bf16 %v603_v40, %v600_v39  ;;  %v607_v43 = vld [vmem:[%s3922_s3 + $0xc8] sm:$0xff]  ;;  %v605_v47 = vld [vmem:[%s3922_s3 + $0xb8] sm:$0xff]  ;;  %v606_v48 = vld [vmem:[%s3922_s3 + $0xc0] sm:$0xff] }
  0x69   : > { %545 = vadd.xlane.f32.xlu0 %v540_v1  ;;  %2783 = vmatpush3.bf16.msra.mxu1 %v2780_v22  ;;  %v2760_v46 = vpack.c.bf16 %v610_v44, %v607_v43  ;;  %v609_v49 = vld [vmem:[%s3922_s3 + $0xd8] sm:$0xff]  ;;  %v2788_v50 = vpack.c.bf16 %v605_v47, %v602_v45  ;;  %v616_v53 = vld [vmem:[%s3922_s3 + $0x110] sm:$0xff]  ;;  %v611_v56 = vld [vmem:[%s3922_s3 + $0xe8] sm:$0xff] }
  0x6a   : > { %2785 = vmatprep.subr.bf16.mxu1 %v2784_v41  ;;  %v2762_v51 = vpack.c.bf16 %v609_v49, %v606_v48  ;;  %v613_v52 = vld [vmem:[%s3922_s3 + $0xf8] sm:$0xff]  ;;  %v608_v54 = vld [vmem:[%s3922_s3 + $0xd0] sm:$0xff]  ;;  %v615_v58 = vld [vmem:[%s3922_s3 + $0x108] sm:$0xff] }
  0x6b   : > { %2755 = vmatpush1.bf16.msra.mxu0 %v2754_v25  ;;  %v2764_v55 = vpack.c.bf16 %v616_v53, %v613_v52  ;;  %v612_v57 = vld [vmem:[%s3922_s3 + $0xf0] sm:$0xff]  ;;  %v2792_v59 = vpack.c.bf16 %v611_v56, %v608_v54  ;;  %v619_v61 = vld [vmem:[%s3922_s3 + $0x128] sm:$0xff]  ;;  %v622_v62 = vld [vmem:[%s3922_s3 + $0x140] sm:$0xff] }
  0x6c   : > { %2757 = vmatprep.subr.bf16.mxu0 %v2756_v37  ;;  %v2766_v60 = vpack.c.bf16 %v615_v58, %v612_v57  ;;  %v614_v63 = vld [vmem:[%s3922_s3 + $0x100] sm:$0xff]  ;;  %v621_v3 = vld [vmem:[%s3922_s3 + $0x138] sm:$0xff]  ;;  %v628_v8 = vld [vmem:[%s3922_s3 + $0x170] sm:$0xff] }
  0x6d   : > { %2787 = vmatpush3.bf16.msra.mxu1 %v2784_v41  ;;  %v618_v2 = vld [vmem:[%s3922_s3 + $0x120] sm:$0xff]  ;;  %v625_v7 = vld [vmem:[%s3922_s3 + $0x158] sm:$0xff]  ;;  %v620_v9 = vld [vmem:[%s3922_s3 + $0x130] sm:$0xff] }
  0x6e   : > { %2789 = vmatprep.subr.bf16.mxu1 %v2788_v50  ;;  %v2770_v6 = vpack.c.bf16 %v621_v3, %v618_v2  ;;  %v2772_v10 = vpack.c.bf16 %v628_v8, %v625_v7  ;;  %v623_v11 = vld [vmem:[%s3922_s3 + $0x148] sm:$0xff]  ;;  %v624_v12 = vld [vmem:[%s3922_s3 + $0x150] sm:$0xff]  ;;  %v626_v16 = vld [vmem:[%s3922_s3 + $0x160] sm:$0xff] }
  0x6f   : > { %2759 = vmatpush1.bf16.msra.mxu0 %v2758_v42  ;;  %v627_v13 = vld [vmem:[%s3922_s3 + $0x168] sm:$0xff]  ;;  %v2800_v14 = vpack.c.bf16 %v623_v11, %v620_v9  ;;  %v629_v17 = vld [vmem:[%s3922_s3 + $0x178] sm:$0xff]  ;;  %v630_v38 = vld [vmem:[%s3923_s4] sm:$0x7] }
  0x70   : > { %2761 = vmatprep.subr.bf16.mxu0 %v2760_v46  ;;  %v2774_v15 = vpack.c.bf16 %v627_v13, %v624_v12  ;;  %v2804_v18 = vpack.c.bf16 %v629_v17, %v626_v16  ;;  %v980_v11 = vld [vmem:[#allocation2] sm:$0xff]  ;;  %v981_v12 = vld [vmem:[#allocation2 + $0x8] sm:$0xff]  ;;  %v982_v17 = vld [vmem:[#allocation2 + $0x10] sm:$0xff] }
  0x71   : > { %2791 = vmatpush3.bf16.msra.mxu1 %v2788_v50  ;;  %v2816_v13 = vpack.c.bf16 %v981_v12, %v980_v11 }
  0x72   : > { %2793 = vmatprep.subr.bf16.mxu1 %v2792_v59 }
  0x73   : > { %2763 = vmatpush1.bf16.msra.mxu0 %v2762_v51 }
  0x74   : > { %2765 = vmatprep.subr.bf16.mxu0 %v2764_v55 }
  0x75   : > { %2795 = vmatpush3.bf16.msra.mxu1 %v2792_v59 }
  0x77   : > { %2767 = vmatpush1.bf16.msra.mxu0 %v2766_v60 }
  0xf2   : > { %v544_v26 = vpop.xlane.xlu0 %543 }
  0xf3   : > { %v548_v27 = vmul.f32 0.0078125, %v544_v26  ;;  %v2334_v26 = vld [vmem:[%s3920_s1] ss:$0 sm:$0xff] }
  0xf5   : > { %v3516_v28 = vsub.f32 %v539_v0, %v548_v27  ;;  %v2768_v0 = vpack.c.bf16 %v622_v62, %v619_v61 }
  0xf6   : > { %v546_v29 = vpop.xlane.xlu0 %545 }
  0xf7   : > { %v549_v30 = vmul.f32 0.0078125, %v546_v29  ;;  %v552_v31 = vmul.f32 %v3516_v28, %v3516_v28  ;;  %2769 = vmatprep.subr.bf16.mxu0 %v2768_v0  ;;  %v2335_v29 = vld [vmem:[%s3921_s2] ss:$0 sm:$0xff] }
  0xf8   : > { %2771 = vmatpush1.bf16.msra.mxu0 %v2770_v6 }
  0xf9   : > { %v3520_v32 = vsub.f32 %v540_v1, %v549_v30  ;;  %554 = vadd.xlane.f32.xlu1 %v552_v31  ;;  %v617_v1 = vld [vmem:[%s3922_s3 + $0x118] sm:$0xff]  ;;  %2773 = vmatprep.subr.bf16.mxu0 %v2772_v10 }
  0xfa   : > { %v2796_v5 = vpack.c.bf16 %v617_v1, %v614_v63 }
  0xfb   : > { %v553_v33 = vmul.f32 %v3520_v32, %v3520_v32 }
  0xfc   : > { %2797 = vmatprep.subr.bf16.mxu1 %v2796_v5  ;;  %2775 = vmatpush1.bf16.msra.mxu0 %v2774_v15 }
  0xfd   : > { %556 = vadd.xlane.f32.xlu1 %v553_v33  ;;  %2799 = vmatpush3.bf16.msra.mxu1 %v2796_v5 }
  0xfe   : > { %2801 = vmatprep.subr.bf16.mxu1 %v2800_v14 }
 0x101   : > { %2803 = vmatpush3.bf16.msra.mxu1 %v2800_v14 }
 0x102   : > { %2805 = vmatprep.subr.bf16.mxu1 %v2804_v18 }
 0x105   : > { %2807 = vmatpush3.bf16.msra.mxu1 %v2804_v18  ;;  %v983_v18 = vld [vmem:[#allocation2 + $0x18] sm:$0xff] }
 0x186   : > { %v555_v19 = vpop.xlane.xlu1 %554 }
 0x187   : > { %v558_v20 = vmul.f32 0.0078125, %v555_v19 }
 0x189   : > { %v560_v21 = vadd.f32 1e-12, %v558_v20 }
 0x18a   : > { %v557_v22 = vpop.xlane.xlu1 %556 }
 0x18b   : > { %3124 = vrsqrt.f32 %v560_v21  ;;  %v559_v23 = vmul.f32 0.0078125, %v557_v22  ;;  %v2820_v22 = vpack.c.bf16 %v983_v18, %v982_v17  ;;  %v1133_v17 = vld [vmem:[#allocation4 + $0x68] sm:$0xff]  ;;  %v1135_v18 = vld [vmem:[#allocation4 + $0x78] sm:$0xff] }
 0x18d   : > { %v561_v24 = vadd.f32 1e-12, %v559_v23  ;;  %v984_v23 = vld [vmem:[#allocation2 + $0x20] sm:$0xff] }
 0x18f   : > { %3126 = vrsqrt.f32 %v561_v24  ;;  %v985_v24 = vld [vmem:[#allocation2 + $0x28] sm:$0xff] }
 0x195   : > { %v3125_v25 = vpop.eup %3124 }
 0x196   : > { %v564_v27 = vmul.f32 %v3125_v25, %v3516_v28  ;;  %v632_v28 = vlaneseq  ;;  %v2824_v25 = vpack.c.bf16 %v985_v24, %v984_v23  ;;  %v1137_v23 = vld [vmem:[#allocation4 + $0x88] sm:$0xff]  ;;  %v1139_v24 = vld [vmem:[#allocation4 + $0x98] sm:$0xff] }
 0x198   : > { %v572_v30 = vmul.f32 %v2334_v26, %v564_v27  ;;  %v3639_v37 = vshrl.u32 %v632_v28, 7  ;;  %v987_v27 = vld [vmem:[#allocation2 + $0x38] sm:$0xff] }
 0x199   : > { %v3127_v31 = vpop.eup %3126  ;;  %v991_v28 = vld [vmem:[#allocation2 + $0x58] sm:$0xff] }
 0x19a   : > { %v3628_v33 = vadd.f32 %v2335_v29, %v572_v30  ;;  %v565_v34 = vmul.f32 %v3127_v31, %v3520_v32  ;;  %v3642_v32 = vsub.s32 0, %v3639_v37  ;;  %v642_v40 = vsub.s32 2, %v3639_v37  ;;  %v988_v30 = vld [vmem:[#allocation2 + $0x40] sm:$0xff]  ;;  %v989_v31 = vld [vmem:[#allocation2 + $0x48] sm:$0xff] }
 0x19b   : > { %v3650_v41 = vsub.s32 1, %v3639_v37 }
 0x19c   : > { %712 = vmatmul.mubr.f32.vlgmr.msra.gmra.mrb[0].mxu0 %v3628_v33  ;;  %2608 = vmatprep.mubr.f32.mxu1 %v3628_v33  ;;  %v573_v35 = vmul.f32 %v2334_v26, %v565_v34  ;;  %v635_v39 = vrot.slane %v630_v38, %v3642_v32  ;;  %v643_v45 = vrot.slane %v630_v38, %v642_v40  ;;  %v986_v26 = vld [vmem:[#allocation2 + $0x30] sm:$0xff] }
 0x19d   : > { %717 = vmatprep.mubr.f32.mxu0 %v3267_v4  ;;  %v639_v46 = vrot.slane %v630_v38, %v3650_v41  ;;  %v2832_v34 = vpack.c.bf16 %v989_v31, %v988_v30  ;;  %v1141_v30 = vld [vmem:[#allocation4 + $0xa8] sm:$0xff]  ;;  %v1143_v31 = vld [vmem:[#allocation4 + $0xb8] sm:$0xff] }
 0x19e   : > { %v3634_v36 = vadd.f32 %v2335_v29, %v573_v35  ;;  %v2828_v29 = vpack.c.bf16 %v987_v27, %v986_v26  ;;  %v990_v35 = vld [vmem:[#allocation2 + $0x50] sm:$0xff]  ;;  %v1136_v26 = vld [vmem:[#allocation4 + $0x80] sm:$0xff] }
 0x19f   : > { %v2836_v38 = vpack.c.bf16 %v991_v28, %v990_v35  ;;  %v1138_v27 = vld [vmem:[#allocation4 + $0x90] sm:$0xff]  ;;  %v1140_v35 = vld [vmem:[#allocation4 + $0xa0] sm:$0xff] }
 0x1a0   : > { %718 = vmatmul.mubr.f32.gmra.mrb[2].mxu0 %v3634_v36  ;;  %2609 = vmatmul.mubr.f32.vlgmr.msra.gmra.mrb[0].mxu1 %v3634_v36  ;;  %v1142_v28 = vld [vmem:[#allocation4 + $0xb0] sm:$0xff] }
 0x1a1   : > { %1228 = vmatprep.mubr.f32.mxu0 %v3267_v4 }
 0x26f   : > { %v713_v42 = vpop.f32.mrb[0].mxu0 }
 0x270   : > { %v714_v43 = vadd.f32 %v713_v42, %v635_v39  ;;  %v715_v44 = vpop.f32.mrb[1].mxu0  ;;  %v993_v42 = vld [vmem:[#allocation2 + $0x68] sm:$0xff] }
 0x271   : > { %v716_v52 = vadd.f32 %v715_v44, %v639_v46  ;;  %v994_v44 = vld [vmem:[#allocation2 + $0x70] sm:$0xff] }
 0x272   : > { %2615 = vmatprep.mubr.f32.mxu1 %v714_v43 }
 0x273   : > { %v719_v47 = vpop.f32.mrb[2].mxu0  ;;  %v2610_v48 = vpop.f32.mrb[0].mxu1 }
 0x274   : > { %v796_v49 = vadd.f32 %v2610_v48, %v643_v45  ;;  %v721_v50 = vpop.f32.mrb[3].mxu0  ;;  %v790_v51 = vpop.f32.mrb[1].mxu1  ;;  %v720_v57 = vadd.f32 %v719_v47, %v635_v39  ;;  %v992_v39 = vld [vmem:[#allocation2 + $0x60] sm:$0xff] }
 0x275   : > { %v722_v53 = vadd.f32 %v721_v50, %v639_v46  ;;  %v791_v54 = vadd.f32 %v790_v51, %v643_v45  ;;  %v2840_v43 = vpack.c.bf16 %v993_v42, %v992_v39  ;;  %v995_v45 = vld [vmem:[#allocation2 + $0x78] sm:$0xff]  ;;  %v1145_v39 = vld [vmem:[#allocation4 + $0xc8] sm:$0xff] }
 0x276   : > { %v2844_v46 = vpack.c.bf16 %v995_v45, %v994_v44  ;;  %v1147_v42 = vld [vmem:[#allocation4 + $0xd8] sm:$0xff]  ;;  %v1144_v44 = vld [vmem:[#allocation4 + $0xc0] sm:$0xff]  ;;  %v1146_v45 = vld [vmem:[#allocation4 + $0xd0] sm:$0xff] }
 0x277   : > { %v2808_v55 = vpack.c.bf16 %v722_v53, %v716_v52  ;;  %v2812_v56 = vpack.c.bf16 %v796_v49, %v791_v54  ;;  %v2338_v49 = vld [vmem:[%s3925_s6] ss:$0 sm:$0xff] }
 0x279   : > { %2809 = vmatprep.subr.bf16.mxu1 %v2808_v55 }
 0x27a   : > { %2811 = vmatpush3.bf16.xpose.msra.mxu1 %v2808_v55 }
 0x27b   : > { %2813 = vmatprep.subr.bf16.mxu1 %v2812_v56 }
 0x281   : > { %2616 = vmatmul.mubr.f32.vlgmr.msra.gmra.mrb[2].mxu1 %v720_v57  ;;  %v1123_v57 = vld [vmem:[#allocation4 + $0x18] sm:$0xff] }
 0x282   : > { %2815 = vmatpush3.bf16.msra.mxu1 %v2812_v56  ;;  %v1121_v56 = vld [vmem:[#allocation4 + $0x8] sm:$0xff] }
 0x283   : > { %2817 = vmatprep.subr.bf16.mxu1 %v2816_v13 }
 0x354   : > { %v2617_v58 = vpop.f32.mrb[2].mxu1 }
 0x355   : > { %v875_v59 = vmul.f32 0.088388346, %v2617_v58  ;;  %v865_v60 = vpop.f32.mrb[3].mxu1  ;;  %v1120_v58 = vld [vmem:[#allocation4] sm:$0xff] }
 0x356   : > { %v874_v61 = vmul.f32 0.088388346, %v865_v60  ;;  %v1122_v60 = vld [vmem:[#allocation4 + $0x10] sm:$0xff] }
 0x357   : > { %v880_v62 = vsel %vm876_vm0, %v875_v59, -inf }
 0x358   : > { %881 = vmax.xlane.f32.xlu1 %v880_v62  ;;  %v877_v63 = vsel %vm876_vm0, %v874_v61, -inf  ;;  %v1127_v62 = vld [vmem:[#allocation4 + $0x38] sm:$0xff] }
 0x359   : > { %878 = vmax.xlane.f32.xlu0 %v877_v63  ;;  %v2850_v63 = vpack.c.bf16 %v1122_v60, %v1120_v58  ;;  %v1263_v58 = vld [vmem:[#allocation6 + $0x90] sm:$0xff] }
 0x3e5   : > { %v882_v0 = vpop.xlane.xlu1 %881 }
 0x3e6   : > { %v884_v1 = vsub.f32 %v875_v59, %v882_v0  ;;  %v879_v2 = vpop.xlane.xlu0 %878  ;;  %v2848_v59 = vpack.c.bf16 %v1123_v57, %v1121_v56  ;;  %v1246_v57 = vld [vmem:[#allocation6 + $0x8] sm:$0xff] }
 0x3e7   : > { %v883_v3 = vsub.f32 %v874_v61, %v879_v2  ;;  %v1125_v61 = vld [vmem:[#allocation4 + $0x28] sm:$0xff]  ;;  %v1126_v2 = vld [vmem:[#allocation4 + $0x30] sm:$0xff] }
 0x3e8   : > { %v887_v5 = vmul.f32 1.442695, %v884_v1  ;;  %v2852_v0 = vpack.c.bf16 %v1127_v62, %v1125_v61  ;;  %v1124_v1 = vld [vmem:[#allocation4 + $0x20] sm:$0xff]  ;;  %2849 = vmatprep.subr.bf16.mxu0 %v2848_v59  ;;  %v1264_v59 = vld [vmem:[#allocation6 + $0x98] sm:$0xff]  ;;  %v1247_v62 = vld [vmem:[#allocation6 + $0x10] sm:$0xff] }
 0x3e9   : > { %v885_v6 = vmul.f32 1.442695, %v883_v3  ;;  %v1129_v3 = vld [vmem:[#allocation4 + $0x48] sm:$0xff]  ;;  %2851 = vmatpush1.bf16.msra.mxu0 %v2850_v63  ;;  %v2884_v61 = vpack.c.bf16 %v1264_v59, %v1263_v58  ;;  %v1248_v63 = vld [vmem:[#allocation6 + $0x18] sm:$0xff]  ;;  %v1152_v58 = vld [vmem:[%s3929_s10] sm:$0x3] }
 0x3ea   : > { %3128 = vpow2.f32 %v887_v5  ;;  %v1131_v5 = vld [vmem:[#allocation4 + $0x58] sm:$0xff]  ;;  %2853 = vmatprep.subr.bf16.mxu0 %v2852_v0  ;;  %v1265_v0 = vld [vmem:[#allocation6 + $0xa0] sm:$0xff]  ;;  %v1157_v59 = vrot.slane %v1152_v58, %v3642_v32 }
 0x3eb   : > { %3130 = vpow2.f32 %v885_v6  ;;  %v1128_v6 = vld [vmem:[#allocation4 + $0x40] sm:$0xff] }
 0x3f4   : > { %v3129_v7 = vpop.eup %3128 }
 0x3f5   : > { %v3131_v8 = vpop.eup %3130  ;;  %v892_v9 = vsel %vm876_vm0, %v3129_v7, 0.0 }
 0x3f6   : > { %893 = vadd.xlane.f32.xlu1 %v892_v9  ;;  %v889_v10 = vsel %vm876_vm0, %v3131_v8, 0.0 }
 0x3f7   : > { %890 = vadd.xlane.f32.xlu0 %v889_v10 }
 0x483   : > { %v894_v14 = vpop.xlane.xlu1 %893 }
 0x484   : > { %3132 = vrcp.f32 %v894_v14  ;;  %v891_v15 = vpop.xlane.xlu0 %890 }
 0x485   : > { %3134 = vrcp.f32 %v891_v15 }
 0x48e   : > { %v3133_v16 = vpop.eup %3132 }
 0x48f   : > { %v3135_v19 = vpop.eup %3134  ;;  %v898_v21 = vmul.f32 %v3133_v16, %v3129_v7  ;;  %v1130_v7 = vld [vmem:[#allocation4 + $0x50] sm:$0xff] }
 0x490   : > { %v896_v20 = vmul.f32 %v3135_v19, %v3131_v8  ;;  %v2858_v8 = vpack.c.bf16 %v1130_v7, %v1128_v6  ;;  %v2860_v19 = vpack.c.bf16 %v1135_v18, %v1133_v17  ;;  %v1268_v6 = vld [vmem:[#allocation6 + $0xb8] sm:$0xff]  ;;  %v1253_v17 = vld [vmem:[#allocation6 + $0x40] sm:$0xff]  ;;  %v1254_v18 = vld [vmem:[#allocation6 + $0x48] sm:$0xff] }
 0x492   : > { %2622 = vmatprep.mubr.msk.f32.mxu1 %vm876_vm0, %v896_v20  ;;  %v1132_v20 = vld [vmem:[#allocation4 + $0x60] sm:$0xff] }
 0x493   : > { %2623 = vmatmul.mubr.msk.f32.vlgmr.msra.gmra.mrb[4].mxu1 %vm876_vm0, %v898_v21  ;;  %v1134_v21 = vld [vmem:[#allocation4 + $0x70] sm:$0xff] }
 0x494   : > { %2819 = vmatpush3.bf16.msra.mxu1 %v2816_v13 }
 0x495   : > { %2821 = vmatprep.subr.bf16.mxu1 %v2820_v22 }
 0x498   : > { %2823 = vmatpush3.bf16.msra.mxu1 %v2820_v22  ;;  %v2862_v22 = vpack.c.bf16 %v1134_v21, %v1132_v20  ;;  %v1272_v20 = vld [vmem:[#allocation6 + $0xd8] sm:$0xff]  ;;  %v2898_v21 = vpack.c.bf16 %v1254_v18, %v1253_v17 }
 0x499   : > { %2825 = vmatprep.subr.bf16.mxu1 %v2824_v25 }
 0x49c   : > { %2827 = vmatpush3.bf16.msra.mxu1 %v2824_v25  ;;  %v2864_v25 = vpack.c.bf16 %v1139_v24, %v1137_v23  ;;  %v1255_v23 = vld [vmem:[#allocation6 + $0x50] sm:$0xff]  ;;  %v1256_v24 = vld [vmem:[#allocation6 + $0x58] sm:$0xff] }
 0x49d   : > { %2829 = vmatprep.subr.bf16.mxu1 %v2828_v29 }
 0x4a0   : > { %2831 = vmatpush3.bf16.msra.mxu1 %v2828_v29  ;;  %v2866_v29 = vpack.c.bf16 %v1138_v27, %v1136_v26  ;;  %v1274_v26 = vld [vmem:[#allocation6 + $0xe8] sm:$0xff]  ;;  %v2902_v27 = vpack.c.bf16 %v1256_v24, %v1255_v23  ;;  %v2344_v23 = vld [vmem:[%s3922_s3 + $0x180] sm:$0xff] }
 0x4a1   : > { %2833 = vmatprep.subr.bf16.mxu1 %v2832_v34 }
 0x4a4   : > { %2835 = vmatpush3.bf16.msra.mxu1 %v2832_v34  ;;  %v2868_v34 = vpack.c.bf16 %v1143_v31, %v1141_v30 }
 0x4a5   : > { %2837 = vmatprep.subr.bf16.mxu1 %v2836_v38 }
 0x4a8   : > { %2839 = vmatpush3.bf16.msra.mxu1 %v2836_v38  ;;  %v2870_v38 = vpack.c.bf16 %v1142_v28, %v1140_v35 }
 0x4a9   : > { %2841 = vmatprep.subr.bf16.mxu1 %v2840_v43 }
 0x4ac   : > { %2843 = vmatpush3.bf16.msra.mxu1 %v2840_v43  ;;  %v2872_v43 = vpack.c.bf16 %v1147_v42, %v1145_v39 }
 0x4ad   : > { %2845 = vmatprep.subr.bf16.mxu1 %v2844_v46 }
 0x4b0   : > { %2847 = vmatpush3.bf16.msra.mxu1 %v2844_v46  ;;  %v2874_v46 = vpack.c.bf16 %v1146_v45, %v1144_v44 }
 0x566   : > { %v2624_v47 = vpop.f32.mrb[4].mxu1 }
 0x567   : > { %v971_v48 = vpop.f32.mrb[5].mxu1 }
 0x568   : > { %2657 = vmatprep.mubr.f32.mxu1 %v971_v48  ;;  %v1151_v48 = vld [vmem:[#allocation4 + $0xf8] sm:$0xff] }
 0x569   : > { %2658 = vmatmul.mubr.f32.vlgmr.msra.gmra.mrb[6].mxu1 %v2624_v47  ;;  %v1149_v47 = vld [vmem:[#allocation4 + $0xe8] sm:$0xff] }
 0x63c   : > { %v2659_v50 = vpop.f32.mrb[6].mxu1 }
 0x63d   : > { %v1075_v51 = vadd.f32 %v2659_v50, %v2338_v49  ;;  %v1069_v52 = vpop.f32.mrb[7].mxu1  ;;  %v1148_v50 = vld [vmem:[#allocation4 + $0xe0] sm:$0xff] }
 0x63e   : > { %v1070_v53 = vadd.f32 %v2338_v49, %v1069_v52  ;;  %v2876_v49 = vpack.c.bf16 %v1151_v48, %v1149_v47 }
 0x63f   : > { %v1079_v54 = vadd.f32 %v1075_v51, %v3634_v36  ;;  %v2854_v36 = vpack.c.bf16 %v1126_v2, %v1124_v1  ;;  %v1150_v51 = vld [vmem:[#allocation4 + $0xf0] sm:$0xff]  ;;  %v1266_v1 = vld [vmem:[#allocation6 + $0xa8] sm:$0xff]  ;;  %v2886_v2 = vpack.c.bf16 %v1248_v63, %v1247_v62 }
 0x640   : > { %v1078_v55 = vadd.f32 %v1070_v53, %v3628_v33  ;;  %v2856_v33 = vpack.c.bf16 %v1131_v5, %v1129_v3  ;;  %v2878_v52 = vpack.c.bf16 %v1150_v51, %v1148_v50  ;;  %v1261_v53 = vld [vmem:[#allocation6 + $0x80] sm:$0xff]  ;;  %v2888_v3 = vpack.c.bf16 %v1266_v1, %v1265_v0 }
 0x641   : > { %1084 = vadd.xlane.f32.xlu1 %v1079_v54  ;;  %2855 = vmatpush1.bf16.msra.mxu0 %v2854_v36  ;;  %v1249_v5 = vld [vmem:[#allocation6 + $0x20] sm:$0xff]  ;;  %v1250_v36 = vld [vmem:[#allocation6 + $0x28] sm:$0xff] }
 0x642   : > { %1082 = vadd.xlane.f32.xlu0 %v1078_v55  ;;  %2857 = vmatprep.subr.bf16.mxu0 %v2856_v33  ;;  %v1267_v33 = vld [vmem:[#allocation6 + $0xb0] sm:$0xff]  ;;  %v2890_v7 = vpack.c.bf16 %v1250_v36, %v1249_v5  ;;  %v1257_v51 = vld [vmem:[#allocation6 + $0x60] sm:$0xff] }
 0x645   : > { %2859 = vmatpush1.bf16.msra.mxu0 %v2858_v8  ;;  %v2892_v8 = vpack.c.bf16 %v1268_v6, %v1267_v33 }
 0x646   : > { %2861 = vmatprep.subr.bf16.mxu0 %v2860_v19  ;;  %v1271_v19 = vld [vmem:[#allocation6 + $0xd0] sm:$0xff] }
 0x649   : > { %2863 = vmatpush1.bf16.msra.mxu0 %v2862_v22  ;;  %v2900_v22 = vpack.c.bf16 %v1272_v20, %v1271_v19 }
 0x64a   : > { %2865 = vmatprep.subr.bf16.mxu0 %v2864_v25  ;;  %v1273_v25 = vld [vmem:[#allocation6 + $0xe0] sm:$0xff] }
 0x64d   : > { %2867 = vmatpush1.bf16.msra.mxu0 %v2866_v29  ;;  %v2904_v29 = vpack.c.bf16 %v1274_v26, %v1273_v25  ;;  %v2347_v25 = vld [vmem:[%s3922_s3 + $0x198] sm:$0xff] }
 0x64e   : > { %2869 = vmatprep.subr.bf16.mxu0 %v2868_v34  ;;  %v2351_v26 = vld [vmem:[%s3922_s3 + $0x1b8] sm:$0xff] }
 0x651   : > { %2871 = vmatpush1.bf16.msra.mxu0 %v2870_v38 }
 0x652   : > { %2873 = vmatprep.subr.bf16.mxu0 %v2872_v43  ;;  %v2339_v43 = vld [vmem:[%s3926_s7] ss:$0 sm:$0xff] }
 0x655   : > { %2875 = vmatpush1.bf16.msra.mxu0 %v2874_v46  ;;  %v2340_v46 = vld [vmem:[%s3927_s8] ss:$0 sm:$0xff] }
 0x656   : > { %2877 = vmatprep.subr.bf16.mxu0 %v2876_v49 }
 0x659   : > { %2879 = vmatpush1.bf16.msra.mxu0 %v2878_v52  ;;  %v1258_v52 = vld [vmem:[#allocation6 + $0x68] sm:$0xff] }
 0x6ce   : > { %v1085_v9 = vpop.xlane.xlu1 %1084 }
 0x6cf   : > { %v1087_v10 = vmul.f32 0.0078125, %v1085_v9  ;;  %v1083_v11 = vpop.xlane.xlu0 %1082  ;;  %v1251_v9 = vld [vmem:[#allocation6 + $0x30] sm:$0xff] }
 0x6d0   : > { %v1086_v12 = vmul.f32 0.0078125, %v1083_v11  ;;  %v1269_v11 = vld [vmem:[#allocation6 + $0xc0] sm:$0xff] }
 0x6d1   : > { %v3666_v13 = vsub.f32 %v1079_v54, %v1087_v10  ;;  %v1262_v54 = vld [vmem:[#allocation6 + $0x88] sm:$0xff]  ;;  %v1252_v10 = vld [vmem:[#allocation6 + $0x38] sm:$0xff] }
 0x6d2   : > { %v3668_v14 = vsub.f32 %v1078_v55, %v1086_v12  ;;  %v1245_v55 = vld [vmem:[#allocation6] sm:$0xff]  ;;  %v2880_v56 = vpack.c.bf16 %v1262_v54, %v1261_v53  ;;  %v1270_v12 = vld [vmem:[#allocation6 + $0xc8] sm:$0xff]  ;;  %v2906_v53 = vpack.c.bf16 %v1258_v52, %v1257_v51 }
 0x6d3   : > { %v1091_v15 = vmul.f32 %v3666_v13, %v3666_v13  ;;  %v2882_v60 = vpack.c.bf16 %v1246_v57, %v1245_v55  ;;  %v1259_v55 = vld [vmem:[#allocation6 + $0x70] sm:$0xff] }
 0x6d4   : > { %v1090_v16 = vmul.f32 %v3668_v14, %v3668_v14  ;;  %2881 = vmatprep.subr.bf16.mxu1 %v2880_v56  ;;  %v1260_v56 = vld [vmem:[#allocation6 + $0x78] sm:$0xff] }
 0x6d5   : > { %1094 = vadd.xlane.f32.xlu1 %v1091_v15  ;;  %2883 = vmatpush3.bf16.msra.mxu1 %v2882_v60  ;;  %v2894_v15 = vpack.c.bf16 %v1252_v10, %v1251_v9  ;;  %v2910_v57 = vpack.c.bf16 %v1260_v56, %v1259_v55  ;;  %v1161_v60 = vrot.slane %v1152_v58, %v3650_v41  ;;  %v2341_v9 = vld [vmem:[%s3931_s12] ss:$0 sm:$0xff]  ;;  %v2366_v58 = vld [vmem:[%s3922_s3 + $0x230] sm:$0xff] }
 0x6d6   : > { %1092 = vadd.xlane.f32.xlu0 %v1090_v16  ;;  %2885 = vmatprep.subr.bf16.mxu1 %v2884_v61  ;;  %v2896_v16 = vpack.c.bf16 %v1270_v12, %v1269_v11 }
 0x6d9   : > { %2887 = vmatpush3.bf16.msra.mxu1 %v2886_v2 }
 0x6da   : > { %2889 = vmatprep.subr.bf16.mxu1 %v2888_v3 }
 0x6dd   : > { %2891 = vmatpush3.bf16.msra.mxu1 %v2890_v7 }
 0x6de   : > { %2893 = vmatprep.subr.bf16.mxu1 %v2892_v8 }
 0x6e1   : > { %2895 = vmatpush3.bf16.msra.mxu1 %v2894_v15 }
 0x6e2   : > { %2897 = vmatprep.subr.bf16.mxu1 %v2896_v16 }
 0x6e5   : > { %2899 = vmatpush3.bf16.msra.mxu1 %v2898_v21  ;;  %v2345_v21 = vld [vmem:[%s3922_s3 + $0x188] sm:$0xff] }
 0x6e6   : > { %2901 = vmatprep.subr.bf16.mxu1 %v2900_v22  ;;  %v2348_v22 = vld [vmem:[%s3922_s3 + $0x1a0] sm:$0xff] }
 0x6e7   : > { %v2912_v24 = vpack.c.bf16 %v2348_v22, %v2345_v21  ;;  %v2381_v21 = vld [vmem:[%s3922_s3 + $0x2a8] sm:$0xff]  ;;  %v2384_v22 = vld [vmem:[%s3922_s3 + $0x2c0] sm:$0xff] }
 0x6e9   : > { %2903 = vmatpush3.bf16.msra.mxu1 %v2902_v27  ;;  %v2354_v27 = vld [vmem:[%s3922_s3 + $0x1d0] sm:$0xff]  ;;  %2913 = vmatprep.subr.bf16.mxu0 %v2912_v24  ;;  %v2936_v24 = vpack.c.bf16 %v2384_v22, %v2381_v21 }
 0x6ea   : > { %2905 = vmatprep.subr.bf16.mxu1 %v2904_v29  ;;  %v2914_v29 = vpack.c.bf16 %v2347_v25, %v2344_v23  ;;  %v2376_v23 = vld [vmem:[%s3922_s3 + $0x280] sm:$0xff]  ;;  %v2379_v25 = vld [vmem:[%s3922_s3 + $0x298] sm:$0xff] }
 0x6ed   : > { %2907 = vmatpush3.bf16.msra.mxu1 %v2906_v53 }
 0x762   : > { %v1095_v30 = vpop.xlane.xlu1 %1094 }
 0x763   : > { %v1097_v31 = vmul.f32 0.0078125, %v1095_v30  ;;  %v1093_v34 = vpop.xlane.xlu0 %1092  ;;  %v2916_v30 = vpack.c.bf16 %v2354_v27, %v2351_v26  ;;  %v2380_v26 = vld [vmem:[%s3922_s3 + $0x2a0] sm:$0xff]  ;;  %v2383_v27 = vld [vmem:[%s3922_s3 + $0x2b8] sm:$0xff] }
 0x764   : > { %v1096_v35 = vmul.f32 0.0078125, %v1093_v34  ;;  %v2349_v34 = vld [vmem:[%s3922_s3 + $0x1a8] sm:$0xff] }
 0x765   : > { %v1099_v28 = vadd.f32 1e-12, %v1097_v31  ;;  %v2346_v31 = vld [vmem:[%s3922_s3 + $0x190] sm:$0xff] }
 0x766   : > { %v1098_v38 = vadd.f32 1e-12, %v1096_v35  ;;  %v2350_v35 = vld [vmem:[%s3922_s3 + $0x1b0] sm:$0xff] }
 0x767   : > { %3136 = vrsqrt.f32 %v1099_v28  ;;  %v2944_v28 = vpack.c.bf16 %v2349_v34, %v2346_v31  ;;  %v2387_v31 = vld [vmem:[%s3922_s3 + $0x2d8] sm:$0xff]  ;;  %v2390_v34 = vld [vmem:[%s3922_s3 + $0x2f0] sm:$0xff] }
 0x768   : > { %3138 = vrsqrt.f32 %v1098_v38  ;;  %v2353_v38 = vld [vmem:[%s3922_s3 + $0x1c8] sm:$0xff] }
 0x771   : > { %v3137_v39 = vpop.eup %3136 }
 0x772   : > { %v3139_v42 = vpop.eup %3138  ;;  %v1103_v45 = vmul.f32 %v3137_v39, %v3666_v13  ;;  %v1276_v13 = vld [vmem:[#allocation6 + $0xf8] sm:$0xff]  ;;  %v2357_v39 = vld [vmem:[%s3922_s3 + $0x1e8] sm:$0xff] }
 0x773   : > { %v1102_v44 = vmul.f32 %v3139_v42, %v3668_v14  ;;  %v1275_v14 = vld [vmem:[#allocation6 + $0xf0] sm:$0xff]  ;;  %v2360_v42 = vld [vmem:[%s3922_s3 + $0x200] sm:$0xff] }
 0x774   : > { %v1111_v49 = vmul.f32 %v2339_v43, %v1103_v45  ;;  %v2908_v54 = vpack.c.bf16 %v1276_v13, %v1275_v14  ;;  %v2355_v45 = vld [vmem:[%s3922_s3 + $0x1d8] sm:$0xff] }
 0x775   : > { %v1110_v47 = vmul.f32 %v2339_v43, %v1102_v44  ;;  %v2918_v43 = vpack.c.bf16 %v2353_v38, %v2350_v35  ;;  %v2352_v44 = vld [vmem:[%s3922_s3 + $0x1c0] sm:$0xff]  ;;  %v2382_v35 = vld [vmem:[%s3922_s3 + $0x2b0] sm:$0xff]  ;;  %v2385_v38 = vld [vmem:[%s3922_s3 + $0x2c8] sm:$0xff] }
 0x776   : > { %v1119_v50 = vadd.f32 %v2340_v46, %v1111_v49  ;;  %2909 = vmatprep.subr.bf16.mxu1 %v2908_v54  ;;  %v2359_v49 = vld [vmem:[%s3922_s3 + $0x1f8] sm:$0xff] }
 0x777   : > { %v1118_v48 = vadd.f32 %v2340_v46, %v1110_v47  ;;  %2911 = vmatpush3.bf16.msra.mxu1 %v2910_v57  ;;  %v2920_v46 = vpack.c.bf16 %v2360_v42, %v2357_v39  ;;  %v2948_v47 = vpack.c.bf16 %v2355_v45, %v2352_v44  ;;  %v2363_v57 = vld [vmem:[%s3922_s3 + $0x218] sm:$0xff]  ;;  %v2386_v39 = vld [vmem:[%s3922_s3 + $0x2d0] sm:$0xff]  ;;  %v2389_v42 = vld [vmem:[%s3922_s3 + $0x2e8] sm:$0xff] }
 0x778   : > { %2945 = vmatprep.subr.bf16.mxu1 %v2944_v28  ;;  %v2942_v44 = vpack.c.bf16 %v2389_v42, %v2386_v39  ;;  %v2388_v45 = vld [vmem:[%s3922_s3 + $0x2e0] sm:$0xff] }
 0x779   : > { %1229 = vmatmul.mubr.f32.vlgmr.msra.gmra.mrb[4].mxu0 %v1118_v48 }
 0x77a   : > { %1234 = vmatprep.mubr.f32.mxu0 %v3267_v4  ;;  %2915 = vmatpush1.bf16.msra.mxu0 %v2914_v29  ;;  %v2964_v29 = vpack.c.bf16 %v2379_v25, %v2376_v23 }
 0x77b   : > { %2917 = vmatprep.subr.bf16.mxu0 %v2916_v30  ;;  %v2938_v30 = vpack.c.bf16 %v2383_v27, %v2380_v26 }
 0x77d   : > { %1235 = vmatmul.mubr.f32.gmra.mrb[6].mxu0 %v1119_v50 }
 0x77e   : > { %1532 = vmatprep.mubr.f32.mxu0 %v3267_v4  ;;  %2919 = vmatpush1.bf16.msra.mxu0 %v2918_v43  ;;  %v2968_v43 = vpack.c.bf16 %v2385_v38, %v2382_v35  ;;  %v1802_v35 = vld [vmem:[#allocation2 + $0x88] sm:$0xff] }
 0x77f   : > { %2921 = vmatprep.subr.bf16.mxu0 %v2920_v46  ;;  %v2391_v46 = vld [vmem:[%s3922_s3 + $0x2f8] sm:$0xff] }
 0x84c   : > { %v1230_v61 = vpop.f32.mrb[4].mxu0 }
 0x84d   : > { %v1231_v62 = vadd.f32 %v1230_v61, %v1157_v59  ;;  %v1232_v63 = vpop.f32.mrb[5].mxu0  ;;  %v2361_v61 = vld [vmem:[%s3922_s3 + $0x208] sm:$0xff] }
 0x84e   : > { %v1233_v0 = vadd.f32 %v1232_v63, %v1161_v60  ;;  %v2365_v63 = vld [vmem:[%s3922_s3 + $0x228] sm:$0xff] }
 0x84f   : > { %v1241_v3 = vmax.f32 %v1231_v62, 0.0  ;;  %v2362_v62 = vld [vmem:[%s3922_s3 + $0x210] sm:$0xff] }
 0x850   : > { %v1242_v1 = vmax.f32 %v1233_v0, 0.0  ;;  %v1236_v2 = vpop.f32.mrb[6].mxu0 }
 0x851   : > { %v1237_v5 = vadd.f32 %v1236_v2, %v1157_v59  ;;  %v1238_v36 = vpop.f32.mrb[7].mxu0  ;;  %v2358_v59 = vld [vmem:[%s3922_s3 + $0x1f0] sm:$0xff]  ;;  %v2369_v2 = vld [vmem:[%s3922_s3 + $0x248] sm:$0xff] }
 0x852   : > { %v1239_v33 = vadd.f32 %v1238_v36, %v1161_v60  ;;  %1348 = vmatprep.mubr.f32.mxu1 %v1242_v1  ;;  %v2924_v60 = vpack.c.bf16 %v2366_v58, %v2363_v57  ;;  %v2952_v0 = vpack.c.bf16 %v2361_v61, %v2358_v59  ;;  %v2926_v1 = vpack.c.bf16 %v2365_v63, %v2362_v62  ;;  %v2343_v57 = vld [vmem:[%s3954_s17] ss:$0 sm:$0xff] }
 0x853   : > { %1349 = vmatmul.mubr.f32.vlgmr.msra.gmra.mrb[8].mxu1 %v1241_v3  ;;  %v1243_v7 = vmax.f32 %v1237_v5, 0.0  ;;  %v2372_v3 = vld [vmem:[%s3922_s3 + $0x260] sm:$0xff] }
 0x854   : > { %v1244_v6 = vmax.f32 %v1239_v33, 0.0  ;;  %2947 = vmatpush3.bf16.msra.mxu1 %v2944_v28  ;;  %v2364_v5 = vld [vmem:[%s3922_s3 + $0x220] sm:$0xff]  ;;  %v2928_v36 = vpack.c.bf16 %v2372_v3, %v2369_v2  ;;  %v2367_v33 = vld [vmem:[%s3922_s3 + $0x238] sm:$0xff]  ;;  %v2940_v28 = vpack.c.bf16 %v2390_v34, %v2387_v31 }
 0x855   : > { %2949 = vmatprep.subr.bf16.mxu1 %v2948_v47  ;;  %v1801_v34 = vld [vmem:[#allocation2 + $0x80] sm:$0xff] }
 0x856   : > { %1353 = vmatprep.mubr.f32.mxu1 %v1244_v6  ;;  %v2368_v6 = vld [vmem:[%s3922_s3 + $0x240] sm:$0xff] }
 0x857   : > { %1354 = vmatmul.mubr.f32.gmra.mrb[10].mxu1 %v1243_v7  ;;  %v2371_v7 = vld [vmem:[%s3922_s3 + $0x258] sm:$0xff] }
 0x858   : > { %2951 = vmatpush3.bf16.msra.mxu1 %v2948_v47  ;;  %v2972_v47 = vpack.c.bf16 %v2391_v46, %v2388_v45 }
 0x859   : > { %2953 = vmatprep.subr.bf16.mxu1 %v2952_v0 }
 0x85c   : > { %2955 = vmatpush3.bf16.msra.mxu1 %v2952_v0 }
 0x926   : > { %v2488_v8 = vpop.f32.mrb[8].mxu1 }
 0x927   : > { %v2489_v10 = vpop.f32.mrb[9].mxu1 }
 0x928   : > { %v2490_v11 = vadd.f32 %v2489_v10, %v2488_v8  ;;  %v2956_v8 = vpack.c.bf16 %v2367_v33, %v2364_v5  ;;  %v2375_v10 = vld [vmem:[%s3922_s3 + $0x278] sm:$0xff] }
 0x92a   : > { %v1351_v12 = vadd.f32 %v2490_v11, %v2341_v9  ;;  %v2491_v15 = vpop.f32.mrb[10].mxu1  ;;  %2957 = vmatprep.subr.bf16.mxu1 %v2956_v8  ;;  %v2378_v11 = vld [vmem:[%s3922_s3 + $0x290] sm:$0xff] }
 0x92b   : > { %v2492_v16 = vpop.f32.mrb[11].mxu1  ;;  %2959 = vmatpush3.bf16.msra.mxu1 %v2956_v8 }
 0x92c   : > { %v2493_v17 = vadd.f32 %v2492_v16, %v2491_v15  ;;  %v1359_v18 = vadd.f32 %v1351_v12, %v1118_v48  ;;  %v2356_v48 = vld [vmem:[%s3922_s3 + $0x1e0] sm:$0xff]  ;;  %v2370_v12 = vld [vmem:[%s3922_s3 + $0x250] sm:$0xff]  ;;  %v2932_v15 = vpack.c.bf16 %v2378_v11, %v2375_v10  ;;  %v2373_v16 = vld [vmem:[%s3922_s3 + $0x268] sm:$0xff] }
 0x92e   : > { %v1356_v19 = vadd.f32 %v2493_v17, %v2341_v9  ;;  %1363 = vadd.xlane.f32.xlu0 %v1359_v18  ;;  %v2930_v9 = vpack.c.bf16 %v2371_v7, %v2368_v6  ;;  %v2374_v17 = vld [vmem:[%s3922_s3 + $0x270] sm:$0xff] }
 0x930   : > { %v1360_v20 = vadd.f32 %v1356_v19, %v1119_v50  ;;  %v2922_v50 = vpack.c.bf16 %v2359_v49, %v2356_v48  ;;  %v2960_v19 = vpack.c.bf16 %v2373_v16, %v2370_v12 }
 0x932   : > { %1365 = vadd.xlane.f32.xlu1 %v1360_v20  ;;  %2923 = vmatpush1.bf16.msra.mxu0 %v2922_v50 }
 0x933   : > { %2925 = vmatprep.subr.bf16.mxu0 %v2924_v60  ;;  %2961 = vmatprep.subr.bf16.mxu1 %v2960_v19 }
 0x934   : > { %2963 = vmatpush3.bf16.msra.mxu1 %v2960_v19 }
 0x935   : > { %2965 = vmatprep.subr.bf16.mxu1 %v2964_v29 }
 0x936   : > { %2927 = vmatpush1.bf16.msra.mxu0 %v2926_v1 }
 0x937   : > { %2929 = vmatprep.subr.bf16.mxu0 %v2928_v36 }
 0x938   : > { %2967 = vmatpush3.bf16.msra.mxu1 %v2964_v29 }
 0x939   : > { %2969 = vmatprep.subr.bf16.mxu1 %v2968_v43 }
 0x93a   : > { %2931 = vmatpush1.bf16.msra.mxu0 %v2930_v9 }
 0x93b   : > { %2933 = vmatprep.subr.bf16.mxu0 %v2932_v15 }
 0x93c   : > { %2971 = vmatpush3.bf16.msra.mxu1 %v2968_v43  ;;  %v1803_v43 = vld [vmem:[#allocation2 + $0x90] sm:$0xff] }
 0x93d   : > { %2973 = vmatprep.subr.bf16.mxu1 %v2972_v47 }
 0x940   : > { %2975 = vmatpush3.bf16.msra.mxu1 %v2972_v47 }
 0x9bb   : > { %v1364_v51 = vpop.xlane.xlu0 %1363 }
 0x9bc   : > { %v1367_v52 = vmul.f32 0.0078125, %v1364_v51 }
 0x9be   : > { %v3740_v53 = vsub.f32 %v1359_v18, %v1367_v52  ;;  %v2377_v18 = vld [vmem:[%s3922_s3 + $0x288] sm:$0xff] }
 0x9bf   : > { %v1366_v14 = vpop.xlane.xlu1 %1365 }
 0x9c0   : > { %v1368_v13 = vmul.f32 0.0078125, %v1366_v14  ;;  %v1371_v54 = vmul.f32 %v3740_v53, %v3740_v53 }
 0x9c2   : > { %v3744_v55 = vsub.f32 %v1360_v20, %v1368_v13  ;;  %1373 = vadd.xlane.f32.xlu0 %v1371_v54  ;;  %v2934_v20 = vpack.c.bf16 %v2377_v18, %v2374_v17  ;;  %v2342_v54 = vld [vmem:[%s3952_s18] ss:$0 sm:$0xff] }
 0x9c4   : > { %v1372_v56 = vmul.f32 %v3744_v55, %v3744_v55  ;;  %2935 = vmatpush1.bf16.msra.mxu0 %v2934_v20 }
 0x9c5   : > { %2937 = vmatprep.subr.bf16.mxu0 %v2936_v24 }
 0x9c6   : > { %1375 = vadd.xlane.f32.xlu1 %v1372_v56 }
 0x9c8   : > { %2939 = vmatpush1.bf16.msra.mxu0 %v2938_v30 }
 0x9c9   : > { %2941 = vmatprep.subr.bf16.mxu0 %v2940_v28  ;;  %v2984_v28 = vpack.c.bf16 %v1802_v35, %v1801_v34 }
 0x9cc   : > { %2943 = vmatpush1.bf16.msra.mxu0 %v2942_v44  ;;  %v1804_v44 = vld [vmem:[#allocation2 + $0x98] sm:$0xff] }
 0xa4f   : > { %v1374_v48 = vpop.xlane.xlu0 %1373 }
 0xa50   : > { %v1377_v49 = vmul.f32 0.0078125, %v1374_v48  ;;  %v2988_v48 = vpack.c.bf16 %v1804_v44, %v1803_v43  ;;  %v1957_v44 = vld [vmem:[#allocation4 + $0x160] sm:$0xff] }
 0xa52   : > { %v1379_v50 = vadd.f32 1e-12, %v1377_v49  ;;  %v1805_v49 = vld [vmem:[#allocation2 + $0xa0] sm:$0xff] }
 0xa53   : > { %v1376_v51 = vpop.xlane.xlu1 %1375 }
 0xa54   : > { %3140 = vrsqrt.f32 %v1379_v50  ;;  %v1378_v52 = vmul.f32 0.0078125, %v1376_v51  ;;  %v1806_v50 = vld [vmem:[#allocation2 + $0xa8] sm:$0xff] }
 0xa55   : > { %v2992_v51 = vpack.c.bf16 %v1806_v50, %v1805_v49  ;;  %v1961_v50 = vld [vmem:[#allocation4 + $0x180] sm:$0xff] }
 0xa56   : > { %v1380_v14 = vadd.f32 1e-12, %v1378_v52  ;;  %v1807_v52 = vld [vmem:[#allocation2 + $0xb0] sm:$0xff] }
 0xa58   : > { %3142 = vrsqrt.f32 %v1380_v14  ;;  %v1808_v14 = vld [vmem:[#allocation2 + $0xb8] sm:$0xff] }
 0xa5e   : > { %v3141_v13 = vpop.eup %3140 }
 0xa5f   : > { %v1383_v56 = vmul.f32 %v3141_v13, %v3740_v53  ;;  %v2392_v53 = vld [vmem:[%s3923_s4 + $0x3] sm:$0x7]  ;;  %v2996_v13 = vpack.c.bf16 %v1808_v14, %v1807_v52  ;;  %v1966_v14 = vld [vmem:[#allocation4 + $0x1a8] sm:$0xff] }
 0xa60   : > { %v1464_v3 = vrot.slane %v2392_v53, %v642_v40  ;;  %v1460_v5 = vrot.slane %v2392_v53, %v3650_v41 }
 0xa61   : > { %v1391_v58 = vmul.f32 %v2342_v54, %v1383_v56  ;;  %v1810_v56 = vld [vmem:[#allocation2 + $0xc8] sm:$0xff] }
 0xa62   : > { %v3143_v59 = vpop.eup %3142 }
 0xa63   : > { %v3851_v60 = vadd.f32 %v2343_v57, %v1391_v58  ;;  %v1384_v61 = vmul.f32 %v3143_v59, %v3744_v55  ;;  %v1456_v55 = vrot.slane %v2392_v53, %v3642_v32  ;;  %v1811_v58 = vld [vmem:[#allocation2 + $0xd0] sm:$0xff]  ;;  %v1812_v59 = vld [vmem:[#allocation2 + $0xd8] sm:$0xff]  ;;  %v1814_v53 = vld [vmem:[#allocation2 + $0xe8] sm:$0xff] }
 0xa65   : > { %1533 = vmatmul.mubr.f32.vlgmr.msra.gmra.mrb[8].mxu0 %v3851_v60  ;;  %2692 = vmatprep.mubr.f32.mxu1 %v3851_v60  ;;  %v1392_v62 = vmul.f32 %v2342_v54, %v1384_v61  ;;  %v1809_v54 = vld [vmem:[#allocation2 + $0xc0] sm:$0xff]  ;;  %v3004_v61 = vpack.c.bf16 %v1812_v59, %v1811_v58  ;;  %v1970_v58 = vld [vmem:[#allocation4 + $0x1c8] sm:$0xff]  ;;  %v1972_v59 = vld [vmem:[#allocation4 + $0x1d8] sm:$0xff] }
 0xa66   : > { %1538 = vmatprep.mubr.f32.mxu0 %v3267_v4 }
 0xa67   : > { %v3857_v63 = vadd.f32 %v2343_v57, %v1392_v62  ;;  %v3000_v57 = vpack.c.bf16 %v1810_v56, %v1809_v54  ;;  %v1813_v62 = vld [vmem:[#allocation2 + $0xe0] sm:$0xff] }
 0xa68   : > { %v1965_v54 = vld [vmem:[#allocation4 + $0x1a0] sm:$0xff] }
 0xa69   : > { %1539 = vmatmul.mubr.f32.gmra.mrb[10].mxu0 %v3857_v63  ;;  %2693 = vmatmul.mubr.f32.vlgmr.msra.gmra.mrb[12].mxu1 %v3857_v63 }
 0xa6a   : > { %2054 = vmatprep.mubr.f32.mxu1 %v3267_v4 }
 0xb38   : > { %v1534_v0 = vpop.f32.mrb[8].mxu0 }
 0xb39   : > { %v1535_v1 = vadd.f32 %v1534_v0, %v1456_v55  ;;  %v1536_v2 = vpop.f32.mrb[9].mxu0  ;;  %v1815_v0 = vld [vmem:[#allocation2 + $0xf0] sm:$0xff] }
 0xb3a   : > { %v1537_v9 = vadd.f32 %v1536_v2, %v1460_v5 }
 0xb3b   : > { %2699 = vmatprep.mubr.f32.mxu0 %v1535_v1  ;;  %v1816_v1 = vld [vmem:[#allocation2 + $0xf8] sm:$0xff] }
 0xb3c   : > { %v1540_v36 = vpop.f32.mrb[10].mxu0  ;;  %v2694_v33 = vpop.f32.mrb[12].mxu1  ;;  %v3012_v2 = vpack.c.bf16 %v1816_v1, %v1815_v0  ;;  %v1974_v0 = vld [vmem:[#allocation4 + $0x1e8] sm:$0xff]  ;;  %v1976_v1 = vld [vmem:[#allocation4 + $0x1f8] sm:$0xff] }
 0xb3d   : > { %v1617_v6 = vadd.f32 %v2694_v33, %v1464_v3  ;;  %v1542_v7 = vpop.f32.mrb[11].mxu0  ;;  %v1611_v8 = vpop.f32.mrb[13].mxu1  ;;  %v1541_v16 = vadd.f32 %v1540_v36, %v1456_v55  ;;  %v3008_v55 = vpack.c.bf16 %v1814_v53, %v1813_v62  ;;  %v2396_v36 = vld [vmem:[%s3925_s6 + $0x1] ss:$0 sm:$0xff]  ;;  %v3040_v62 = vpack.c.bf16 %v1972_v59, %v1970_v58 }
 0xb3e   : > { %v1543_v10 = vadd.f32 %v1542_v7, %v1460_v5  ;;  %v1612_v11 = vadd.f32 %v1611_v8, %v1464_v3  ;;  %v1969_v53 = vld [vmem:[#allocation4 + $0x1c0] sm:$0xff] }
 0xb3f   : > { %v2399_v59 = vld [vmem:[%s3926_s7 + $0x1] ss:$0 sm:$0xff] }
 0xb40   : > { %v2976_v12 = vpack.c.bf16 %v1543_v10, %v1537_v9  ;;  %v2980_v15 = vpack.c.bf16 %v1617_v6, %v1612_v11  ;;  %v1946_v11 = vld [vmem:[#allocation4 + $0x108] sm:$0xff] }
 0xb42   : > { %2977 = vmatprep.subr.bf16.mxu0 %v2976_v12 }
 0xb43   : > { %2979 = vmatpush3.bf16.xpose.msra.mxu0 %v2976_v12  ;;  %v1948_v12 = vld [vmem:[#allocation4 + $0x118] sm:$0xff] }
 0xb44   : > { %2981 = vmatprep.subr.bf16.mxu0 %v2980_v15 }
 0xb4a   : > { %2700 = vmatmul.mubr.f32.vlgmr.msra.gmra.mrb[12].mxu0 %v1541_v16  ;;  %v3016_v16 = vpack.c.bf16 %v1948_v12, %v1946_v11  ;;  %v2090_v11 = vld [vmem:[#allocation6 + $0x190] sm:$0xff]  ;;  %v2091_v12 = vld [vmem:[#allocation6 + $0x198] sm:$0xff] }
 0xb4b   : > { %2983 = vmatpush3.bf16.msra.mxu0 %v2980_v15  ;;  %v1945_v15 = vld [vmem:[#allocation4 + $0x100] sm:$0xff] }
 0xb4c   : > { %2985 = vmatprep.subr.bf16.mxu0 %v2984_v28  ;;  %3017 = vmatprep.subr.bf16.mxu1 %v3016_v16  ;;  %v3052_v16 = vpack.c.bf16 %v2091_v12, %v2090_v11 }
 0xc1d   : > { %v2701_v37 = vpop.f32.mrb[12].mxu0 }
 0xc1e   : > { %v1696_v40 = vmul.f32 0.088388346, %v2701_v37  ;;  %v1686_v17 = vpop.f32.mrb[13].mxu0  ;;  %v1947_v37 = vld [vmem:[#allocation4 + $0x110] sm:$0xff] }
 0xc1f   : > { %v1695_v18 = vmul.f32 0.088388346, %v1686_v17  ;;  %v1952_v17 = vld [vmem:[#allocation4 + $0x138] sm:$0xff] }
 0xc20   : > { %v1700_v19 = vsel %vm876_vm0, %v1696_v40, -inf }
 0xc21   : > { %1701 = vmax.xlane.f32.xlu1 %v1700_v19  ;;  %v1697_v20 = vsel %vm876_vm0, %v1695_v18, -inf }
 0xc22   : > { %1698 = vmax.xlane.f32.xlu0 %v1697_v20  ;;  %v1949_v20 = vld [vmem:[#allocation4 + $0x120] sm:$0xff] }
 0xcae   : > { %v1702_v21 = vpop.xlane.xlu1 %1701 }
 0xcaf   : > { %v1704_v22 = vsub.f32 %v1696_v40, %v1702_v21  ;;  %v1699_v23 = vpop.xlane.xlu0 %1698  ;;  %v1950_v40 = vld [vmem:[#allocation4 + $0x128] sm:$0xff]  ;;  %v1951_v21 = vld [vmem:[#allocation4 + $0x130] sm:$0xff] }
 0xcb0   : > { %v1703_v24 = vsub.f32 %v1695_v18, %v1699_v23  ;;  %v3018_v18 = vpack.c.bf16 %v1947_v37, %v1945_v15  ;;  %v3020_v19 = vpack.c.bf16 %v1952_v17, %v1950_v40  ;;  %v1956_v23 = vld [vmem:[#allocation4 + $0x158] sm:$0xff]  ;;  %v2074_v37 = vld [vmem:[#allocation6 + $0x110] sm:$0xff]  ;;  %v2092_v17 = vld [vmem:[#allocation6 + $0x1a0] sm:$0xff] }
 0xcb1   : > { %v1707_v25 = vmul.f32 1.442695, %v1704_v22  ;;  %v1954_v22 = vld [vmem:[#allocation4 + $0x148] sm:$0xff]  ;;  %v2075_v40 = vld [vmem:[#allocation6 + $0x118] sm:$0xff] }
 0xcb2   : > { %v1705_v26 = vmul.f32 1.442695, %v1703_v24  ;;  %3019 = vmatpush1.bf16.msra.mxu1 %v3018_v18  ;;  %v1953_v24 = vld [vmem:[#allocation4 + $0x140] sm:$0xff]  ;;  %v2093_v18 = vld [vmem:[#allocation6 + $0x1a8] sm:$0xff] }
 0xcb3   : > { %3144 = vpow2.f32 %v1707_v25  ;;  %3021 = vmatprep.subr.bf16.mxu1 %v3020_v19  ;;  %v1955_v25 = vld [vmem:[#allocation4 + $0x150] sm:$0xff]  ;;  %v3054_v19 = vpack.c.bf16 %v2075_v40, %v2074_v37 }
 0xcb4   : > { %3146 = vpow2.f32 %v1705_v26  ;;  %v3026_v26 = vpack.c.bf16 %v1955_v25, %v1953_v24  ;;  %v2078_v25 = vld [vmem:[#allocation6 + $0x130] sm:$0xff] }
 0xcbd   : > { %v3145_v27 = vpop.eup %3144 }
 0xcbe   : > { %v3147_v29 = vpop.eup %3146  ;;  %v1712_v30 = vsel %vm876_vm0, %v3145_v27, 0.0 }
 0xcbf   : > { %1713 = vadd.xlane.f32.xlu1 %v1712_v30  ;;  %v1709_v31 = vsel %vm876_vm0, %v3147_v29, 0.0 }
 0xcc0   : > { %1710 = vadd.xlane.f32.xlu0 %v1709_v31 }
 0xd4c   : > { %v1714_v38 = vpop.xlane.xlu1 %1713 }
 0xd4d   : > { %3148 = vrcp.f32 %v1714_v38  ;;  %v1711_v39 = vpop.xlane.xlu0 %1710 }
 0xd4e   : > { %3150 = vrcp.f32 %v1711_v39  ;;  %v1958_v39 = vld [vmem:[#allocation4 + $0x168] sm:$0xff] }
 0xd57   : > { %v3149_v42 = vpop.eup %3148 }
 0xd58   : > { %v3151_v45 = vpop.eup %3150  ;;  %v1718_v47 = vmul.f32 %v3149_v42, %v3145_v27  ;;  %v1960_v42 = vld [vmem:[#allocation4 + $0x178] sm:$0xff] }
 0xd59   : > { %v1716_v46 = vmul.f32 %v3151_v45, %v3147_v29  ;;  %v3028_v43 = vpack.c.bf16 %v1960_v42, %v1958_v39  ;;  %v1959_v45 = vld [vmem:[#allocation4 + $0x170] sm:$0xff]  ;;  %v2099_v42 = vld [vmem:[#allocation6 + $0x1d8] sm:$0xff] }
 0xd5a   : > { %v2098_v39 = vld [vmem:[#allocation6 + $0x1d0] sm:$0xff] }
 0xd5b   : > { %2706 = vmatprep.mubr.msk.f32.mxu0 %vm876_vm0, %v1716_v46  ;;  %v3030_v46 = vpack.c.bf16 %v1959_v45, %v1957_v44  ;;  %v3068_v44 = vpack.c.bf16 %v2099_v42, %v2098_v39  ;;  %v2082_v45 = vld [vmem:[#allocation6 + $0x150] sm:$0xff] }
 0xd5c   : > { %2707 = vmatmul.mubr.msk.f32.vlgmr.msra.gmra.mrb[14].mxu0 %vm876_vm0, %v1718_v47  ;;  %v1962_v47 = vld [vmem:[#allocation4 + $0x188] sm:$0xff] }
 0xd5d   : > { %2987 = vmatpush3.bf16.msra.mxu0 %v2984_v28 }
 0xd5e   : > { %2989 = vmatprep.subr.bf16.mxu0 %v2988_v48 }
 0xd61   : > { %2991 = vmatpush3.bf16.msra.mxu0 %v2988_v48  ;;  %v1964_v48 = vld [vmem:[#allocation4 + $0x198] sm:$0xff] }
 0xd62   : > { %2993 = vmatprep.subr.bf16.mxu0 %v2992_v51  ;;  %v3032_v49 = vpack.c.bf16 %v1964_v48, %v1962_v47  ;;  %v2100_v47 = vld [vmem:[#allocation6 + $0x1e0] sm:$0xff]  ;;  %v2101_v48 = vld [vmem:[#allocation6 + $0x1e8] sm:$0xff] }
 0xd65   : > { %2995 = vmatpush3.bf16.msra.mxu0 %v2992_v51  ;;  %v1963_v51 = vld [vmem:[#allocation4 + $0x190] sm:$0xff] }
 0xd66   : > { %2997 = vmatprep.subr.bf16.mxu0 %v2996_v13  ;;  %v3034_v52 = vpack.c.bf16 %v1963_v51, %v1961_v50  ;;  %v3072_v50 = vpack.c.bf16 %v2101_v48, %v2100_v47 }
 0xd69   : > { %2999 = vmatpush3.bf16.msra.mxu0 %v2996_v13  ;;  %v1968_v13 = vld [vmem:[#allocation4 + $0x1b8] sm:$0xff] }
 0xd6a   : > { %3001 = vmatprep.subr.bf16.mxu0 %v3000_v57  ;;  %v3036_v56 = vpack.c.bf16 %v1968_v13, %v1966_v14 }
 0xd6d   : > { %3003 = vmatpush3.bf16.msra.mxu0 %v3000_v57  ;;  %v1967_v57 = vld [vmem:[#allocation4 + $0x1b0] sm:$0xff] }
 0xd6e   : > { %3005 = vmatprep.subr.bf16.mxu0 %v3004_v61 }
 0xd71   : > { %3007 = vmatpush3.bf16.msra.mxu0 %v3004_v61  ;;  %v3038_v61 = vpack.c.bf16 %v1967_v57, %v1965_v54 }
 0xd72   : > { %3009 = vmatprep.subr.bf16.mxu0 %v3008_v55 }
 0xd75   : > { %3011 = vmatpush3.bf16.msra.mxu0 %v3008_v55  ;;  %v1971_v55 = vld [vmem:[#allocation4 + $0x1d0] sm:$0xff] }
 0xd76   : > { %3013 = vmatprep.subr.bf16.mxu0 %v3012_v2 }
 0xd79   : > { %3015 = vmatpush3.bf16.msra.mxu0 %v3012_v2  ;;  %v3042_v2 = vpack.c.bf16 %v1971_v55, %v1969_v53  ;;  %v2400_v53 = vld [vmem:[%s3927_s8 + $0x1] ss:$0 sm:$0xff] }
 0xe2f   : > { %v2708_v3 = vpop.f32.mrb[14].mxu0 }
 0xe30   : > { %v1791_v5 = vpop.f32.mrb[15].mxu0 }
 0xe31   : > { %2741 = vmatprep.mubr.f32.mxu0 %v1791_v5  ;;  %v1973_v5 = vld [vmem:[#allocation4 + $0x1e0] sm:$0xff] }
 0xe32   : > { %2742 = vmatmul.mubr.f32.vlgmr.msra.gmra.mrb[16].mxu0 %v2708_v3  ;;  %v3044_v3 = vpack.c.bf16 %v1976_v1, %v1974_v0 }
 0xf05   : > { %v2743_v33 = vpop.f32.mrb[16].mxu0 }
 0xf06   : > { %v1897_v6 = vadd.f32 %v2743_v33, %v2396_v36  ;;  %v1891_v7 = vpop.f32.mrb[17].mxu0 }
 0xf07   : > { %v1892_v8 = vadd.f32 %v2396_v36, %v1891_v7  ;;  %v1975_v36 = vld [vmem:[#allocation4 + $0x1f0] sm:$0xff]  ;;  %v2089_v7 = vld [vmem:[#allocation6 + $0x188] sm:$0xff] }
 0xf08   : > { %v1901_v9 = vadd.f32 %v1897_v6, %v3857_v63  ;;  %v3022_v63 = vpack.c.bf16 %v1951_v21, %v1949_v20  ;;  %v3046_v33 = vpack.c.bf16 %v1975_v36, %v1973_v5  ;;  %v2088_v6 = vld [vmem:[#allocation6 + $0x180] sm:$0xff]  ;;  %v3056_v20 = vpack.c.bf16 %v2093_v18, %v2092_v17  ;;  %v2085_v5 = vld [vmem:[#allocation6 + $0x168] sm:$0xff] }
 0xf09   : > { %v1900_v10 = vadd.f32 %v1892_v8, %v3851_v60  ;;  %v3024_v60 = vpack.c.bf16 %v1956_v23, %v1954_v22  ;;  %v2072_v8 = vld [vmem:[#allocation6 + $0x100] sm:$0xff]  ;;  %v2077_v22 = vld [vmem:[#allocation6 + $0x128] sm:$0xff]  ;;  %v2094_v23 = vld [vmem:[#allocation6 + $0x1b0] sm:$0xff] }
 0xf0a   : > { %1908 = vadd.xlane.f32.xlu1 %v1901_v9  ;;  %3023 = vmatpush1.bf16.msra.mxu1 %v3022_v63  ;;  %v2076_v21 = vld [vmem:[#allocation6 + $0x120] sm:$0xff]  ;;  %v2095_v63 = vld [vmem:[#allocation6 + $0x1b8] sm:$0xff] }
 0xf0b   : > { %1906 = vadd.xlane.f32.xlu0 %v1900_v10  ;;  %3025 = vmatprep.subr.bf16.mxu1 %v3024_v60  ;;  %v3058_v60 = vpack.c.bf16 %v2077_v22, %v2076_v21  ;;  %v3060_v24 = vpack.c.bf16 %v2095_v63, %v2094_v23 }
 0xf0e   : > { %3027 = vmatpush1.bf16.msra.mxu1 %v3026_v26  ;;  %v2079_v26 = vld [vmem:[#allocation6 + $0x138] sm:$0xff] }
 0xf0f   : > { %3029 = vmatprep.subr.bf16.mxu1 %v3028_v43 }
 0xf12   : > { %3031 = vmatpush1.bf16.msra.mxu1 %v3030_v46  ;;  %v2083_v46 = vld [vmem:[#allocation6 + $0x158] sm:$0xff] }
 0xf13   : > { %3033 = vmatprep.subr.bf16.mxu1 %v3032_v49  ;;  %v3070_v49 = vpack.c.bf16 %v2083_v46, %v2082_v45 }
 0xf16   : > { %3035 = vmatpush1.bf16.msra.mxu1 %v3034_v52 }
 0xf17   : > { %3037 = vmatprep.subr.bf16.mxu1 %v3036_v56 }
 0xf1a   : > { %3039 = vmatpush1.bf16.msra.mxu1 %v3038_v61 }
 0xf1b   : > { %3041 = vmatprep.subr.bf16.mxu1 %v3040_v62 }
 0xf1e   : > { %3043 = vmatpush1.bf16.msra.mxu1 %v3042_v2 }
 0xf1f   : > { %3045 = vmatprep.subr.bf16.mxu1 %v3044_v3  ;;  %v2084_v3 = vld [vmem:[#allocation6 + $0x160] sm:$0xff] }
 0xf20   : > { %v3074_v36 = vpack.c.bf16 %v2085_v5, %v2084_v3 }
 0xf22   : > { %3047 = vmatpush1.bf16.msra.mxu1 %v3046_v33  ;;  %v2102_v33 = vld [vmem:[#allocation6 + $0x1f0] sm:$0xff] }
 0xf97   : > { %v1909_v27 = vpop.xlane.xlu1 %1908 }
 0xf98   : > { %v1911_v29 = vmul.f32 0.0078125, %v1909_v27  ;;  %v1907_v30 = vpop.xlane.xlu0 %1906  ;;  %v2096_v27 = vld [vmem:[#allocation6 + $0x1c0] sm:$0xff] }
 0xf99   : > { %v1910_v31 = vmul.f32 0.0078125, %v1907_v30  ;;  %v3062_v30 = vpack.c.bf16 %v2079_v26, %v2078_v25 }
 0xf9a   : > { %v3880_v34 = vsub.f32 %v1901_v9, %v1911_v29  ;;  %v3048_v9 = vpack.c.bf16 %v2089_v7, %v2088_v6  ;;  %v2097_v29 = vld [vmem:[#allocation6 + $0x1c8] sm:$0xff]  ;;  %v2087_v7 = vld [vmem:[#allocation6 + $0x178] sm:$0xff] }
 0xf9b   : > { %v3882_v35 = vsub.f32 %v1900_v10, %v1910_v31  ;;  %v2073_v10 = vld [vmem:[#allocation6 + $0x108] sm:$0xff]  ;;  %v3064_v31 = vpack.c.bf16 %v2097_v29, %v2096_v27 }
 0xf9c   : > { %v1915_v28 = vmul.f32 %v3880_v34, %v3880_v34  ;;  %v3050_v15 = vpack.c.bf16 %v2073_v10, %v2072_v8  ;;  %3049 = vmatprep.subr.bf16.mxu0 %v3048_v9  ;;  %v2401_v9 = vld [vmem:[%s3929_s10 + $0x2] sm:$0x3] }
 0xf9d   : > { %v1914_v38 = vmul.f32 %v3882_v35, %v3882_v35  ;;  %v1987_v10 = vrot.slane %v2401_v9, %v3650_v41 }
 0xf9e   : > { %1918 = vadd.xlane.f32.xlu1 %v1915_v28  ;;  %3051 = vmatpush3.bf16.msra.mxu0 %v3050_v15  ;;  %v2080_v28 = vld [vmem:[#allocation6 + $0x140] sm:$0xff] }
 0xf9f   : > { %1916 = vadd.xlane.f32.xlu0 %v1914_v38  ;;  %3053 = vmatprep.subr.bf16.mxu0 %v3052_v16  ;;  %v2081_v38 = vld [vmem:[#allocation6 + $0x148] sm:$0xff] }
 0xfa0   : > { %v3066_v43 = vpack.c.bf16 %v2081_v38, %v2080_v28 }
 0xfa2   : > { %3055 = vmatpush3.bf16.msra.mxu0 %v3054_v19 }
 0xfa3   : > { %3057 = vmatprep.subr.bf16.mxu0 %v3056_v20 }
 0xfa6   : > { %3059 = vmatpush3.bf16.msra.mxu0 %v3058_v60 }
 0xfa7   : > { %3061 = vmatprep.subr.bf16.mxu0 %v3060_v24 }
 0xfaa   : > { %3063 = vmatpush3.bf16.msra.mxu0 %v3062_v30 }
 0xfab   : > { %3065 = vmatprep.subr.bf16.mxu0 %v3064_v31 }
 0xfae   : > { %3067 = vmatpush3.bf16.msra.mxu0 %v3066_v43 }
 0xfaf   : > { %3069 = vmatprep.subr.bf16.mxu0 %v3068_v44 }
 0xfb2   : > { %3071 = vmatpush3.bf16.msra.mxu0 %v3070_v49 }
 0xfb3   : > { %3073 = vmatprep.subr.bf16.mxu0 %v3072_v50 }
 0xfb6   : > { %3075 = vmatpush3.bf16.msra.mxu0 %v3074_v36 }
0x102b   : > { %v1919_v51 = vpop.xlane.xlu1 %1918 }
0x102c   : > { %v1921_v52 = vmul.f32 0.0078125, %v1919_v51  ;;  %v1917_v14 = vpop.xlane.xlu0 %1916 }
0x102d   : > { %v1920_v13 = vmul.f32 0.0078125, %v1917_v14  ;;  %v2406_v14 = vld [vmem:[%s3953_s29 + $0x1] ss:$0 sm:$0xff] }
0x102e   : > { %v1923_v54 = vadd.f32 1e-12, %v1921_v52 }
0x102f   : > { %v1922_v56 = vadd.f32 1e-12, %v1920_v13 }
0x1030   : > { %3152 = vrsqrt.f32 %v1923_v54  ;;  %v2407_v54 = vld [vmem:[%s3954_s17 + $0x1] ss:$0 sm:$0xff] }
0x1031   : > { %3154 = vrsqrt.f32 %v1922_v56 }
0x103a   : > { %v3153_v57 = vpop.eup %3152 }
0x103b   : > { %v3155_v58 = vpop.eup %3154  ;;  %v1927_v62 = vmul.f32 %v3153_v57, %v3880_v34  ;;  %v2086_v34 = vld [vmem:[#allocation6 + $0x170] sm:$0xff] }
0x103c   : > { %v1926_v61 = vmul.f32 %v3155_v58, %v3882_v35  ;;  %v2103_v35 = vld [vmem:[#allocation6 + $0x1f8] sm:$0xff]  ;;  %v3078_v8 = vpack.c.bf16 %v2087_v7, %v2086_v34 }
0x103d   : > { %v1935_v1 = vmul.f32 %v2399_v59, %v1927_v62  ;;  %v3076_v6 = vpack.c.bf16 %v2103_v35, %v2102_v33 }
0x103e   : > { %v1934_v55 = vmul.f32 %v2399_v59, %v1926_v61 }
0x103f   : > { %v1943_v2 = vadd.f32 %v2400_v53, %v1935_v1  ;;  %3077 = vmatprep.subr.bf16.mxu0 %v3076_v6 }
0x1040   : > { %v1942_v0 = vadd.f32 %v2400_v53, %v1934_v55  ;;  %3079 = vmatpush3.bf16.msra.mxu0 %v3078_v8 }
0x1042   : > { %2055 = vmatmul.mubr.f32.vlgmr.msra.gmra.mrb[14].mxu1 %v1942_v0 }
0x1043   : > { %2060 = vmatprep.mubr.f32.mxu1 %v3267_v4  ;;  %v1983_v4 = vrot.slane %v2401_v9, %v3642_v32  ;;  %v2403_v32 = vld [vmem:[%s3931_s12 + $0x1] ss:$0 sm:$0xff] }
0x1046   : > { %2061 = vmatmul.mubr.f32.gmra.mrb[16].mxu1 %v1943_v2 }
0x1115   : > { %v2056_v11 = vpop.f32.mrb[14].mxu1 }
0x1116   : > { %v2057_v12 = vadd.f32 %v2056_v11, %v1983_v4  ;;  %v2058_v15 = vpop.f32.mrb[15].mxu1 }
0x1117   : > { %v2059_v16 = vadd.f32 %v2058_v15, %v1987_v10 }
0x1118   : > { %v2067_v17 = vmax.f32 %v2057_v12, 0.0 }
0x1119   : > { %v2068_v37 = vmax.f32 %v2059_v16, 0.0  ;;  %v2062_v40 = vpop.f32.mrb[16].mxu1 }
0x111a   : > { %v2063_v18 = vadd.f32 %v2062_v40, %v1983_v4  ;;  %v2064_v19 = vpop.f32.mrb[17].mxu1 }
0x111b   : > { %v2065_v20 = vadd.f32 %v2064_v19, %v1987_v10  ;;  %2176 = vmatprep.mubr.f32.mxu0 %v2068_v37 }
0x111c   : > { %2177 = vmatmul.mubr.f32.vlgmr.msra.gmra.mrb[18].mxu0 %v2067_v17  ;;  %v2069_v22 = vmax.f32 %v2063_v18, 0.0 }
0x111d   : > { %v2070_v21 = vmax.f32 %v2065_v20, 0.0 }
0x111f   : > { %2181 = vmatprep.mubr.f32.mxu0 %v2070_v21 }
0x1120   : > { %2182 = vmatmul.mubr.f32.gmra.mrb[20].mxu0 %v2069_v22 }
0x11ef   : > { %v2570_v23 = vpop.f32.mrb[18].mxu0 }
0x11f0   : > { %v2571_v41 = vpop.f32.mrb[19].mxu0 }
0x11f1   : > { %v2572_v63 = vadd.f32 %v2571_v41, %v2570_v23 }
0x11f3   : > { %v2179_v60 = vadd.f32 %v2572_v63, %v2403_v32  ;;  %v2573_v24 = vpop.f32.mrb[20].mxu0 }
0x11f4   : > { %v2574_v25 = vpop.f32.mrb[21].mxu0 }
0x11f5   : > { %v2575_v26 = vadd.f32 %v2574_v25, %v2573_v24  ;;  %v2187_v27 = vadd.f32 %v2179_v60, %v1942_v0 }
0x11f7   : > { %v2184_v29 = vadd.f32 %v2575_v26, %v2403_v32  ;;  %2193 = vadd.xlane.f32.xlu0 %v2187_v27 }
0x11f9   : > { %v2188_v30 = vadd.f32 %v2184_v29, %v1943_v2 }
0x11fb   : > { %2195 = vadd.xlane.f32.xlu1 %v2188_v30 }
0x1284   : > { %v2194_v31 = vpop.xlane.xlu0 %2193 }
0x1285   : > { %v2197_v28 = vmul.f32 0.0078125, %v2194_v31 }
0x1287   : > { %v2199_v38 = vsub.f32 %v2187_v27, %v2197_v28 }
0x1288   : > { %v2196_v39 = vpop.xlane.xlu1 %2195 }
0x1289   : > { %v2198_v42 = vmul.f32 0.0078125, %v2196_v39  ;;  %v2201_v43 = vmul.f32 %v2199_v38, %v2199_v38 }
0x128b   : > { %v2200_v44 = vsub.f32 %v2188_v30, %v2198_v42  ;;  %2203 = vadd.xlane.f32.xlu0 %v2201_v43 }
0x128d   : > { %v2202_v45 = vmul.f32 %v2200_v44, %v2200_v44 }
0x128f   : > { %2205 = vadd.xlane.f32.xlu1 %v2202_v45 }
0x1318   : > { %v2204_v46 = vpop.xlane.xlu0 %2203 }
0x1319   : > { %v2207_v47 = vmul.f32 0.0078125, %v2204_v46 }
0x131b   : > { %v2209_v48 = vadd.f32 1e-12, %v2207_v47 }
0x131c   : > { %v2206_v49 = vpop.xlane.xlu1 %2205 }
0x131d   : > { %3156 = vrsqrt.f32 %v2209_v48  ;;  %v2208_v50 = vmul.f32 0.0078125, %v2206_v49 }
0x131f   : > { %v2210_v51 = vadd.f32 1e-12, %v2208_v50 }
0x1321   : > { %3158 = vrsqrt.f32 %v2210_v51 }
0x1327   : > { %v3157_v52 = vpop.eup %3156 }
0x1328   : > { %v2213_v13 = vmul.f32 %v3157_v52, %v2199_v38 }
0x132a   : > { %v2221_v56 = vmul.f32 %v2406_v14, %v2213_v13 }
0x132b   : > { %v3159_v57 = vpop.eup %3158 }
0x132c   : > { %v2229_v58 = vadd.f32 %v2407_v54, %v2221_v56  ;;  %v2214_v59 = vmul.f32 %v3159_v57, %v2200_v44 }
0x132e   : > { %2231 = vst [vmem:[%s538_s15] sm:$0xff] %v2229_v58  ;;  %v2222_v61 = vmul.f32 %v2406_v14, %v2214_v59 }
0x1330   : > { %v2230_v62 = vadd.f32 %v2407_v54, %v2222_v61 }
0x1332   : > { %2232 = vst [vmem:[%s538_s15 + $0x8] sm:$0xff] %v2230_v62 }
0x1333 PF: > { %s3956_s25 = sld [smem:[#allocation9_spill]] }
0x1339   : > { %s27_s18 = sadd.s32 1, %s3956_s25  }
0x133a   : > { %p24_p5 = scmp.ge.s32.totalorder %s27_s18, 6  }
0x133c   :  { %26 = sbr.rel (!%p24_p5) target bundleno = 6 (0x6), region = 135 }
0x1343   :  { %2254 = vsyncpa [#allocation3], 1 }
0x1344   :  { %2256 = vsyncpa [#allocation3 + $0x1], 1 }
0x1345   :  { %2257 = vsyncpa [#allocation5], 1 }

// kernel: unbiased_bert_forward.7
= control target key start
LH: loop header
LB: loop body
LE: loop exit
PB: predicated region body
PF: predicated region fallthrough
CT: control target
= control target key end

     0   :  { %vm204_vm0 = vcmask 1042432   ;;  %vm201_vm1 = vcmask 23552   ;;  %vm2007_vm2 = vmmov 0   ;;  %s3543_s1 = inlined_call_operand.vmem [shape: f32[259,512], index: 1, kind: input, shape index: {}]   ;;  %s3544_s0 = inlined_call_operand.vmem [shape: f32[4,259], index: 0, kind: input, shape index: {}]   ;;  %s3545_s4 = inlined_call_operand.vmem [shape: f32[512,256], index: 4, kind: input, shape index: {}]   ;;  %s3546_s2 = inlined_call_operand.vmem [shape: f32[1,512], index: 2, kind: input, shape index: {}]   ;;  %s3547_s3 = inlined_call_operand.vmem [shape: f32[512,256], index: 3, kind: input, shape index: {}]   ;;  %s3548_s6 = inlined_call_operand.vmem [shape: f32[256,128], index: 6, kind: input, shape index: {}]   ;;  %s3549_s5 = inlined_call_operand.vmem [shape: f32[1,256], index: 5, kind: input, shape index: {}]   ;;  %s3550_s8 = inlined_call_operand.vmem [shape: f32[128,128], index: 8, kind: input, shape index: {}]   ;;  %s3551_s7 = inlined_call_operand.vmem [shape: f32[1,128], index: 7, kind: input, shape index: {}]   ;;  %s3552_s10 = inlined_call_operand.vmem [shape: f32[128,128], index: 10, kind: input, shape index: {}]   ;;  %s3553_s9 = inlined_call_operand.vmem [shape: f32[1,128], index: 9, kind: input, shape index: {}]   ;;  %s3554_s11 = inlined_call_operand.vmem [shape: f32[1,128], index: 11, kind: input, shape index: {}]   ;;  %s3555_s12 = inlined_call_operand.vmem [shape: f32[2,128], index: 12, kind: output, shape index: {}]  }
   0x1   :  { %v44_v0 = vld [vmem:[%s3543_s1 + $0x8] sm:$0xff]  ;;  %v43_v2 = vld [vmem:[%s3543_s1] sm:$0xff] }
   0x2   :  { %v48_v1 = vld [vmem:[%s3543_s1 + $0x28] sm:$0xff]  ;;  %v47_v4 = vld [vmem:[%s3543_s1 + $0x20] sm:$0xff] }
   0x3   :  { %v1523_v3 = vpack.c.bf16 %v48_v1, %v44_v0  ;;  %v52_v5 = vld [vmem:[%s3543_s1 + $0x48] sm:$0xff]  ;;  %v1525_v7 = vpack.c.bf16 %v47_v4, %v43_v2  ;;  %v51_v9 = vld [vmem:[%s3543_s1 + $0x40] sm:$0xff] }
   0x4   :  { %v56_v6 = vld [vmem:[%s3543_s1 + $0x68] sm:$0xff]  ;;  %v55_v10 = vld [vmem:[%s3543_s1 + $0x60] sm:$0xff] }
   0x5   :  { %v1527_v8 = vpack.c.bf16 %v56_v6, %v52_v5  ;;  %v60_v11 = vld [vmem:[%s3543_s1 + $0x88] sm:$0xff]  ;;  %1524 = vmatprep.subr.bf16.mxu1 %v1523_v3  ;;  %v1529_v13 = vpack.c.bf16 %v55_v10, %v51_v9  ;;  %v59_v15 = vld [vmem:[%s3543_s1 + $0x80] sm:$0xff] }
   0x6   :  { %v64_v12 = vld [vmem:[%s3543_s1 + $0xa8] sm:$0xff]  ;;  %1526 = vmatpush1.bf16.msra.mxu1 %v1525_v7  ;;  %v63_v16 = vld [vmem:[%s3543_s1 + $0xa0] sm:$0xff] }
   0x7   :  { %1528 = vmatprep.subr.bf16.mxu1 %v1527_v8  ;;  %v1531_v14 = vpack.c.bf16 %v64_v12, %v60_v11  ;;  %v68_v17 = vld [vmem:[%s3543_s1 + $0xc8] sm:$0xff]  ;;  %v1533_v19 = vpack.c.bf16 %v63_v16, %v59_v15  ;;  %v67_v21 = vld [vmem:[%s3543_s1 + $0xc0] sm:$0xff] }
   0x8   :  { %v72_v18 = vld [vmem:[%s3543_s1 + $0xe8] sm:$0xff]  ;;  %v71_v22 = vld [vmem:[%s3543_s1 + $0xe0] sm:$0xff] }
   0x9   :  { %v1535_v20 = vpack.c.bf16 %v72_v18, %v68_v17  ;;  %v76_v23 = vld [vmem:[%s3543_s1 + $0x108] sm:$0xff]  ;;  %v1537_v25 = vpack.c.bf16 %v71_v22, %v67_v21  ;;  %v75_v27 = vld [vmem:[%s3543_s1 + $0x100] sm:$0xff]  ;;  %v636_v18 = vld [vmem:[%s3545_s4 + $0x18] sm:$0xff] }
   0xa   :  { %1530 = vmatpush1.bf16.msra.mxu1 %v1529_v13  ;;  %v80_v24 = vld [vmem:[%s3543_s1 + $0x128] sm:$0xff]  ;;  %v79_v28 = vld [vmem:[%s3543_s1 + $0x120] sm:$0xff] }
   0xb   :  { %1532 = vmatprep.subr.bf16.mxu1 %v1531_v14  ;;  %v1539_v26 = vpack.c.bf16 %v80_v24, %v76_v23  ;;  %v84_v29 = vld [vmem:[%s3543_s1 + $0x148] sm:$0xff]  ;;  %v1541_v31 = vpack.c.bf16 %v79_v28, %v75_v27  ;;  %v83_v33 = vld [vmem:[%s3543_s1 + $0x140] sm:$0xff]  ;;  %v640_v24 = vld [vmem:[%s3545_s4 + $0x38] sm:$0xff] }
   0xc   :  { %v88_v30 = vld [vmem:[%s3543_s1 + $0x168] sm:$0xff]  ;;  %v87_v34 = vld [vmem:[%s3543_s1 + $0x160] sm:$0xff]  ;;  %v639_v27 = vld [vmem:[%s3545_s4 + $0x30] sm:$0xff] }
   0xd   :  { %v1543_v32 = vpack.c.bf16 %v88_v30, %v84_v29  ;;  %v92_v35 = vld [vmem:[%s3543_s1 + $0x188] sm:$0xff]  ;;  %v1545_v37 = vpack.c.bf16 %v87_v34, %v83_v33  ;;  %v91_v39 = vld [vmem:[%s3543_s1 + $0x180] sm:$0xff]  ;;  %v644_v29 = vld [vmem:[%s3545_s4 + $0x58] sm:$0xff] }
   0xe   :  { %1534 = vmatpush1.bf16.msra.mxu1 %v1533_v19  ;;  %v96_v36 = vld [vmem:[%s3543_s1 + $0x1a8] sm:$0xff]  ;;  %v95_v40 = vld [vmem:[%s3543_s1 + $0x1a0] sm:$0xff] }
   0xf   :  { %1536 = vmatprep.subr.bf16.mxu1 %v1535_v20  ;;  %v1547_v38 = vpack.c.bf16 %v96_v36, %v92_v35  ;;  %v2160_v41 = vld [vmem:[%s3544_s0] sm:$0xff]  ;;  %v100_v42 = vld [vmem:[%s3543_s1 + $0x1c8] sm:$0xff]  ;;  %v1549_v45 = vpack.c.bf16 %v95_v40, %v91_v39  ;;  %v635_v20 = vld [vmem:[%s3545_s4 + $0x10] sm:$0xff] }
  0x10   :  { %v104_v43 = vld [vmem:[%s3543_s1 + $0x1e8] sm:$0xff]  ;;  %v2170_v44 = vcombine.high %v2160_v41, %v2160_v41  ;;  %v99_v47 = vld [vmem:[%s3543_s1 + $0x1c0] sm:$0xff]  ;;  %v643_v39 = vld [vmem:[%s3545_s4 + $0x50] sm:$0xff] }
  0x11   :  { %v1551_v46 = vpack.c.bf16 %v104_v43, %v100_v42  ;;  %v103_v48 = vld [vmem:[%s3543_s1 + $0x1e0] sm:$0xff]  ;;  %v108_v49 = vld [vmem:[%s3543_s1 + $0x208] sm:$0xff]  ;;  %v648_v42 = vld [vmem:[%s3545_s4 + $0x78] sm:$0xff] }
  0x12   :  { %1538 = vmatpush1.bf16.msra.mxu1 %v1537_v25  ;;  %281 = vmatprep.mubr.f32.mxu1 %v2170_v44  ;;  %v112_v50 = vld [vmem:[%s3543_s1 + $0x228] sm:$0xff]  ;;  %v1553_v51 = vpack.c.bf16 %v103_v48, %v99_v47  ;;  %v107_v53 = vld [vmem:[%s3543_s1 + $0x200] sm:$0xff] }
  0x13   :  { %1540 = vmatprep.subr.bf16.mxu1 %v1539_v26  ;;  %v1555_v52 = vpack.c.bf16 %v112_v50, %v108_v49  ;;  %v111_v54 = vld [vmem:[%s3543_s1 + $0x220] sm:$0xff]  ;;  %v116_v55 = vld [vmem:[%s3543_s1 + $0x248] sm:$0xff] }
  0x14   :  { %v120_v56 = vld [vmem:[%s3543_s1 + $0x268] sm:$0xff]  ;;  %v1557_v57 = vpack.c.bf16 %v111_v54, %v107_v53  ;;  %v115_v59 = vld [vmem:[%s3543_s1 + $0x240] sm:$0xff]  ;;  %v647_v53 = vld [vmem:[%s3545_s4 + $0x70] sm:$0xff] }
  0x15   :  { %v1559_v58 = vpack.c.bf16 %v120_v56, %v116_v55  ;;  %v119_v60 = vld [vmem:[%s3543_s1 + $0x260] sm:$0xff]  ;;  %v124_v61 = vld [vmem:[%s3543_s1 + $0x288] sm:$0xff]  ;;  %v652_v55 = vld [vmem:[%s3545_s4 + $0x98] sm:$0xff] }
  0x16   :  { %1542 = vmatpush1.bf16.msra.mxu1 %v1541_v31  ;;  %v128_v62 = vld [vmem:[%s3543_s1 + $0x2a8] sm:$0xff]  ;;  %v1561_v63 = vpack.c.bf16 %v119_v60, %v115_v59  ;;  %v123_v1 = vld [vmem:[%s3543_s1 + $0x280] sm:$0xff] }
  0x17   :  { %1544 = vmatprep.subr.bf16.mxu1 %v1543_v32  ;;  %v1563_v0 = vpack.c.bf16 %v128_v62, %v124_v61  ;;  %v127_v2 = vld [vmem:[%s3543_s1 + $0x2a0] sm:$0xff]  ;;  %v132_v3 = vld [vmem:[%s3543_s1 + $0x2c8] sm:$0xff] }
  0x18   :  { %v136_v4 = vld [vmem:[%s3543_s1 + $0x2e8] sm:$0xff]  ;;  %v1565_v5 = vpack.c.bf16 %v127_v2, %v123_v1  ;;  %v131_v7 = vld [vmem:[%s3543_s1 + $0x2c0] sm:$0xff]  ;;  %v656_v1 = vld [vmem:[%s3545_s4 + $0xb8] sm:$0xff] }
  0x19   :  { %v1567_v6 = vpack.c.bf16 %v136_v4, %v132_v3  ;;  %v135_v8 = vld [vmem:[%s3543_s1 + $0x2e0] sm:$0xff]  ;;  %v140_v9 = vld [vmem:[%s3543_s1 + $0x308] sm:$0xff]  ;;  %v46_v4 = vld [vmem:[%s3543_s1 + $0x18] sm:$0xff] }
  0x1a   :  { %1546 = vmatpush1.bf16.msra.mxu1 %v1545_v37  ;;  %v144_v10 = vld [vmem:[%s3543_s1 + $0x328] sm:$0xff]  ;;  %v139_v11 = vld [vmem:[%s3543_s1 + $0x300] sm:$0xff]  ;;  %v1569_v13 = vpack.c.bf16 %v135_v8, %v131_v7 }
  0x1b   :  { %1548 = vmatprep.subr.bf16.mxu1 %v1547_v38  ;;  %v143_v12 = vld [vmem:[%s3543_s1 + $0x320] sm:$0xff]  ;;  %v148_v14 = vld [vmem:[%s3543_s1 + $0x348] sm:$0xff]  ;;  %v1571_v17 = vpack.c.bf16 %v144_v10, %v140_v9  ;;  %v655_v9 = vld [vmem:[%s3545_s4 + $0xb0] sm:$0xff] }
  0x1c   :  { %v152_v15 = vld [vmem:[%s3543_s1 + $0x368] sm:$0xff]  ;;  %v633_v19 = vld [vmem:[%s3545_s4] sm:$0xff]  ;;  %v1573_v30 = vpack.c.bf16 %v143_v12, %v139_v11  ;;  %v660_v11 = vld [vmem:[%s3545_s4 + $0xd8] sm:$0xff] }
  0x1d   :  { %v634_v16 = vld [vmem:[%s3545_s4 + $0x8] sm:$0xff]  ;;  %v1653_v22 = vpack.c.bf16 %v635_v20, %v633_v19  ;;  %v637_v25 = vld [vmem:[%s3545_s4 + $0x20] sm:$0xff]  ;;  %v1575_v31 = vpack.c.bf16 %v152_v15, %v148_v14  ;;  %v664_v19 = vld [vmem:[%s3545_s4 + $0xf8] sm:$0xff]  ;;  %v2005_v20 = vmov 0.0  }
  0x1e   :  { %1550 = vmatpush1.bf16.msra.mxu1 %v1549_v45  ;;  %v1651_v21 = vpack.c.bf16 %v636_v18, %v634_v16  ;;  %v638_v23 = vld [vmem:[%s3545_s4 + $0x28] sm:$0xff]  ;;  %v147_v32 = vld [vmem:[%s3543_s1 + $0x340] sm:$0xff]  ;;  %v1657_v35 = vpack.c.bf16 %v639_v27, %v637_v25  ;;  %v58_v25 = vld [vmem:[%s3543_s1 + $0x78] sm:$0xff] }
  0x1f   :  { %1552 = vmatprep.subr.bf16.mxu1 %v1551_v46  ;;  %v1655_v26 = vpack.c.bf16 %v640_v24, %v638_v23  ;;  %v642_v28 = vld [vmem:[%s3545_s4 + $0x48] sm:$0xff]  ;;  %v151_v33 = vld [vmem:[%s3543_s1 + $0x360] sm:$0xff]  ;;  %v54_v23 = vld [vmem:[%s3543_s1 + $0x58] sm:$0xff] }
  0x20   :  { %1652 = vmatprep.subr.bf16.mxu0 %v1651_v21  ;;  %v156_v34 = vld [vmem:[%s3543_s1 + $0x388] sm:$0xff]  ;;  %v1659_v37 = vpack.c.bf16 %v644_v29, %v642_v28  ;;  %v641_v38 = vld [vmem:[%s3545_s4 + $0x40] sm:$0xff]  ;;  %v1577_v43 = vpack.c.bf16 %v151_v33, %v147_v32  ;;  %v45_v21 = vld [vmem:[%s3543_s1 + $0x10] sm:$0xff]  ;;  %v1591_v33 = vpack.c.bf16 %v58_v25, %v54_v23 }
  0x21   :  { %1654 = vmatpush1.bf16.msra.mxu0 %v1653_v22  ;;  %v160_v36 = vld [vmem:[%s3543_s1 + $0x3a8] sm:$0xff]  ;;  %v155_v46 = vld [vmem:[%s3543_s1 + $0x380] sm:$0xff]  ;;  %v1661_v49 = vpack.c.bf16 %v643_v39, %v641_v38  ;;  %v49_v22 = vld [vmem:[%s3543_s1 + $0x30] sm:$0xff] }
  0x22   :  { %1554 = vmatpush1.bf16.msra.mxu1 %v1553_v51  ;;  %1656 = vmatprep.subr.bf16.mxu0 %v1655_v26  ;;  %v646_v40 = vld [vmem:[%s3545_s4 + $0x68] sm:$0xff]  ;;  %v1579_v45 = vpack.c.bf16 %v160_v36, %v156_v34  ;;  %v159_v47 = vld [vmem:[%s3543_s1 + $0x3a0] sm:$0xff]  ;;  %v663_v28 = vld [vmem:[%s3545_s4 + $0xf0] sm:$0xff]  ;;  %v1589_v32 = vpack.c.bf16 %v49_v22, %v45_v21 }
  0x23   :  { %1556 = vmatprep.subr.bf16.mxu1 %v1555_v52  ;;  %v164_v48 = vld [vmem:[%s3543_s1 + $0x3c8] sm:$0xff]  ;;  %v1663_v51 = vpack.c.bf16 %v648_v42, %v646_v40  ;;  %v645_v52 = vld [vmem:[%s3545_s4 + $0x60] sm:$0xff]  ;;  %v1581_v56 = vpack.c.bf16 %v159_v47, %v155_v46  ;;  %v53_v34 = vld [vmem:[%s3543_s1 + $0x50] sm:$0xff] }
  0x24   :  { %v168_v50 = vld [vmem:[%s3543_s1 + $0x3e8] sm:$0xff]  ;;  %v167_v59 = vld [vmem:[%s3543_s1 + $0x3e0] sm:$0xff]  ;;  %v1665_v60 = vpack.c.bf16 %v647_v53, %v645_v52  ;;  %v62_v36 = vld [vmem:[%s3543_s1 + $0x98] sm:$0xff] }
  0x25   :  { %1658 = vmatpush1.bf16.msra.mxu0 %v1657_v35  ;;  %v650_v54 = vld [vmem:[%s3545_s4 + $0x88] sm:$0xff]  ;;  %v649_v62 = vld [vmem:[%s3545_s4 + $0x80] sm:$0xff]  ;;  %v57_v35 = vld [vmem:[%s3543_s1 + $0x70] sm:$0xff] }
  0x26   :  { %1558 = vmatpush1.bf16.msra.mxu1 %v1557_v57  ;;  %1660 = vmatprep.subr.bf16.mxu0 %v1659_v37  ;;  %v1583_v57 = vpack.c.bf16 %v168_v50, %v164_v48  ;;  %v1667_v61 = vpack.c.bf16 %v652_v55, %v650_v54  ;;  %v172_v3 = vld [vmem:[%s3543_s1 + $0x408] sm:$0x7]  ;;  %v653_v8 = vld [vmem:[%s3545_s4 + $0xa0] sm:$0xff]  ;;  %v66_v38 = vld [vmem:[%s3543_s1 + $0xb8] sm:$0xff]  ;;  %v1593_v46 = vpack.c.bf16 %v57_v35, %v53_v34 }
  0x27   :  { %1560 = vmatprep.subr.bf16.mxu1 %v1559_v58  ;;  %v163_v58 = vld [vmem:[%s3543_s1 + $0x3c0] sm:$0xff]  ;;  %v658_v10 = vld [vmem:[%s3545_s4 + $0xc8] sm:$0xff]  ;;  %v1673_v14 = vpack.c.bf16 %v655_v9, %v653_v8  ;;  %v667_v42 = vld [vmem:[%s3545_s4 + $0x110] sm:$0xff]  ;;  %v1595_v47 = vpack.c.bf16 %v66_v38, %v62_v36 }
  0x28   :  { %v1585_v2 = vpack.c.bf16 %v167_v59, %v163_v58  ;;  %v171_v12 = vld [vmem:[%s3543_s1 + $0x400] sm:$0x7]  ;;  %v1675_v15 = vpack.c.bf16 %v660_v11, %v658_v10  ;;  %v662_v18 = vld [vmem:[%s3545_s4 + $0xe8] sm:$0xff]  ;;  %v61_v48 = vld [vmem:[%s3543_s1 + $0x90] sm:$0xff] }
  0x29   :  { %1662 = vmatpush1.bf16.msra.mxu0 %v1661_v49  ;;  %v657_v16 = vld [vmem:[%s3545_s4 + $0xc0] sm:$0xff]  ;;  %v1679_v26 = vpack.c.bf16 %v664_v19, %v662_v18  ;;  %v666_v29 = vld [vmem:[%s3545_s4 + $0x108] sm:$0xff]  ;;  %v65_v49 = vld [vmem:[%s3543_s1 + $0xb0] sm:$0xff] }
  0x2a   :  { %1562 = vmatpush1.bf16.msra.mxu1 %v1561_v63  ;;  %1664 = vmatprep.subr.bf16.mxu0 %v1663_v51  ;;  %v651_v63 = vld [vmem:[%s3545_s4 + $0x90] sm:$0xff]  ;;  %v661_v27 = vld [vmem:[%s3545_s4 + $0xe0] sm:$0xff]  ;;  %v70_v50 = vld [vmem:[%s3543_s1 + $0xd8] sm:$0xff] }
  0x2b   :  { %1564 = vmatprep.subr.bf16.mxu1 %v1563_v0  ;;  %v654_v0 = vld [vmem:[%s3545_s4 + $0xa8] sm:$0xff]  ;;  %v1681_v37 = vpack.c.bf16 %v663_v28, %v661_v27  ;;  %v665_v40 = vld [vmem:[%s3545_s4 + $0x100] sm:$0xff]  ;;  %v671_v54 = vld [vmem:[%s3545_s4 + $0x130] sm:$0xff] }
  0x2c   :  { %v1671_v7 = vpack.c.bf16 %v656_v1, %v654_v0  ;;  %v1685_v51 = vpack.c.bf16 %v667_v42, %v665_v40  ;;  %v669_v53 = vld [vmem:[%s3545_s4 + $0x120] sm:$0xff]  ;;  %v674_v55 = vld [vmem:[%s3545_s4 + $0x148] sm:$0xff]  ;;  %v69_v59 = vld [vmem:[%s3543_s1 + $0xd0] sm:$0xff] }
  0x2d   :  { %1666 = vmatpush1.bf16.msra.mxu0 %v1665_v60  ;;  %v73_v60 = vld [vmem:[%s3543_s1 + $0xf0] sm:$0xff]  ;;  %v673_v1 = vld [vmem:[%s3545_s4 + $0x140] sm:$0xff]  ;;  %v86_v9 = vld [vmem:[%s3543_s1 + $0x158] sm:$0xff] }
  0x2e   :  { %1566 = vmatpush1.bf16.msra.mxu1 %v1565_v5  ;;  %v1669_v5 = vpack.c.bf16 %v651_v63, %v649_v62  ;;  %1668 = vmatprep.subr.bf16.mxu0 %v1667_v61  ;;  %v78_v61 = vld [vmem:[%s3543_s1 + $0x118] sm:$0xff]  ;;  %v1689_v62 = vpack.c.bf16 %v671_v54, %v669_v53  ;;  %v81_v8 = vld [vmem:[%s3543_s1 + $0x130] sm:$0xff]  ;;  %v686_v28 = vld [vmem:[%s3545_s4 + $0x1a8] sm:$0xff] }
  0x2f   :  { %1568 = vmatprep.subr.bf16.mxu1 %v1567_v6  ;;  %v50_v6 = vld [vmem:[%s3543_s1 + $0x38] sm:$0xff]  ;;  %v85_v19 = vld [vmem:[%s3543_s1 + $0x150] sm:$0xff] }
  0x30   :  { %v82_v63 = vld [vmem:[%s3543_s1 + $0x138] sm:$0xff]  ;;  %v89_v21 = vld [vmem:[%s3543_s1 + $0x170] sm:$0xff] }
  0x31   :  { %1670 = vmatpush1.bf16.msra.mxu0 %v1669_v5  ;;  %v1601_v5 = vpack.c.bf16 %v73_v60, %v69_v59  ;;  %v90_v11 = vld [vmem:[%s3543_s1 + $0x178] sm:$0xff]  ;;  %v683_v27 = vld [vmem:[%s3545_s4 + $0x190] sm:$0xff] }
  0x32   :  { %1570 = vmatpush1.bf16.msra.mxu1 %v1569_v13  ;;  %v1587_v13 = vpack.c.bf16 %v50_v6, %v46_v4  ;;  %1672 = vmatprep.subr.bf16.mxu0 %v1671_v7  ;;  %v680_v4 = vld [vmem:[%s3545_s4 + $0x178] sm:$0xff]  ;;  %v1603_v6 = vpack.c.bf16 %v82_v63, %v78_v61  ;;  %v77_v7 = vld [vmem:[%s3543_s1 + $0x110] sm:$0xff]  ;;  %v1607_v18 = vpack.c.bf16 %v90_v11, %v86_v9 }
  0x33   :  { %1572 = vmatprep.subr.bf16.mxu1 %v1571_v17  ;;  %v659_v17 = vld [vmem:[%s3545_s4 + $0xd0] sm:$0xff]  ;;  %v94_v22 = vld [vmem:[%s3543_s1 + $0x198] sm:$0xff] }
  0x34   :  { %v1677_v24 = vpack.c.bf16 %v659_v17, %v657_v16  ;;  %v684_v16 = vld [vmem:[%s3545_s4 + $0x198] sm:$0xff]  ;;  %v1605_v17 = vpack.c.bf16 %v81_v8, %v77_v7  ;;  %v97_v34 = vld [vmem:[%s3543_s1 + $0x1b0] sm:$0xff] }
  0x35   :  { %1674 = vmatpush1.bf16.msra.mxu0 %v1673_v14  ;;  %v679_v14 = vld [vmem:[%s3545_s4 + $0x170] sm:$0xff]  ;;  %v102_v35 = vld [vmem:[%s3543_s1 + $0x1d8] sm:$0xff] }
  0x36   :  { %1574 = vmatpush1.bf16.msra.mxu1 %v1573_v30  ;;  %1676 = vmatprep.subr.bf16.mxu0 %v1675_v15  ;;  %v668_v30 = vld [vmem:[%s3545_s4 + $0x118] sm:$0xff]  ;;  %v682_v15 = vld [vmem:[%s3545_s4 + $0x188] sm:$0xff]  ;;  %v687_v40 = vld [vmem:[%s3545_s4 + $0x1b0] sm:$0xff] }
  0x37   :  { %1576 = vmatprep.subr.bf16.mxu1 %v1575_v31  ;;  %v2408_v31 = vld [vmem:[%s3544_s0 + $0x8] sm:$0xf]  ;;  %v1683_v39 = vpack.c.bf16 %v668_v30, %v666_v29  ;;  %v1699_v25 = vpack.c.bf16 %v684_v16, %v682_v15  ;;  %v688_v29 = vld [vmem:[%s3545_s4 + $0x1b8] sm:$0xff]  ;;  %v1609_v30 = vpack.c.bf16 %v89_v21, %v85_v19  ;;  %v125_v63 = vld [vmem:[%s3543_s1 + $0x290] sm:$0xff] }
  0x38   :  { %v1703_v38 = vpack.c.bf16 %v688_v29, %v686_v28  ;;  %v118_v53 = vld [vmem:[%s3543_s1 + $0x258] sm:$0xff]  ;;  %v141_v11 = vld [vmem:[%s3543_s1 + $0x310] sm:$0xff] }
  0x39   :  { %1678 = vmatpush1.bf16.msra.mxu0 %v1677_v24  ;;  %v98_v24 = vld [vmem:[%s3543_s1 + $0x1b8] sm:$0xff] }
  0x3a   :  { %1578 = vmatpush1.bf16.msra.mxu1 %v1577_v43  ;;  %1680 = vmatprep.subr.bf16.mxu0 %v1679_v26  ;;  %v670_v43 = vld [vmem:[%s3545_s4 + $0x128] sm:$0xff]  ;;  %v681_v26 = vld [vmem:[%s3545_s4 + $0x180] sm:$0xff]  ;;  %v122_v54 = vld [vmem:[%s3543_s1 + $0x278] sm:$0xff] }
  0x3b   :  { %1580 = vmatprep.subr.bf16.mxu1 %v1579_v45  ;;  %v672_v45 = vld [vmem:[%s3545_s4 + $0x138] sm:$0xff]  ;;  %v1701_v36 = vpack.c.bf16 %v683_v27, %v681_v26 }
  0x3c   :  { %v1687_v52 = vpack.c.bf16 %v672_v45, %v670_v43  ;;  %v101_v45 = vld [vmem:[%s3543_s1 + $0x1d0] sm:$0xff]  ;;  %v126_v59 = vld [vmem:[%s3543_s1 + $0x298] sm:$0xff] }
  0x3d   :  { %1682 = vmatpush1.bf16.msra.mxu0 %v1681_v37  ;;  %v106_v37 = vld [vmem:[%s3543_s1 + $0x1f8] sm:$0xff] }
  0x3e   :  { %1582 = vmatpush1.bf16.msra.mxu1 %v1581_v56  ;;  %1684 = vmatprep.subr.bf16.mxu0 %v1683_v39  ;;  %v676_v56 = vld [vmem:[%s3545_s4 + $0x158] sm:$0xff]  ;;  %v685_v39 = vld [vmem:[%s3545_s4 + $0x1a0] sm:$0xff]  ;;  %v1615_v43 = vpack.c.bf16 %v106_v37, %v102_v35  ;;  %v173_v35 = vld [vmem:[%s3543_s1 + $0x410] sm:$0x7] }
  0x3f   :  { %1584 = vmatprep.subr.bf16.mxu1 %v1583_v57  ;;  %v1597_v57 = vpack.c.bf16 %v65_v49, %v61_v48  ;;  %v1691_v0 = vpack.c.bf16 %v676_v56, %v674_v55  ;;  %v110_v48 = vld [vmem:[%s3543_s1 + $0x218] sm:$0xff]  ;;  %v1623_v56 = vpack.c.bf16 %v122_v54, %v118_v53  ;;  %v2701_v53 = vld [vmem:[%s3546_s2] sm:$0xf] }
  0x40   :  { %v114_v49 = vld [vmem:[%s3543_s1 + $0x238] sm:$0xff] }
  0x41   :  { %1686 = vmatpush1.bf16.msra.mxu0 %v1685_v51  ;;  %v1619_v51 = vpack.c.bf16 %v114_v49, %v110_v48  ;;  %v130_v60 = vld [vmem:[%s3543_s1 + $0x2b8] sm:$0xff]  ;;  %v698_v48 = vld [vmem:[%s3545_s4 + $0x208] sm:$0xff] }
  0x42   :  { %1586 = vmatpush1.bf16.msra.mxu1 %v1585_v2  ;;  %1688 = vmatprep.subr.bf16.mxu0 %v1687_v52  ;;  %v675_v2 = vld [vmem:[%s3545_s4 + $0x150] sm:$0xff]  ;;  %v142_v7 = vld [vmem:[%s3543_s1 + $0x318] sm:$0xff] }
  0x43   :  { %1375 = vmatprep.subr.msk.mxu1 %vm204_vm0, %v172_v3  ;;  %v678_v3 = vld [vmem:[%s3545_s4 + $0x168] sm:$0xff]  ;;  %v1693_v10 = vpack.c.bf16 %v675_v2, %v673_v1  ;;  %v113_v52 = vld [vmem:[%s3543_s1 + $0x230] sm:$0xff]  ;;  %v134_v1 = vld [vmem:[%s3543_s1 + $0x2d8] sm:$0xff] }
  0x44   :  { %v138_v2 = vld [vmem:[%s3543_s1 + $0x2f8] sm:$0xff] }
  0x45   :  { %282 = vmatmul.mubr.f32.vlgmr.msra.gmra.mrb[0].mxu1 %v2160_v41  ;;  %1690 = vmatpush1.bf16.msra.mxu0 %v1689_v62  ;;  %v1627_v62 = vpack.c.bf16 %v130_v60, %v126_v59  ;;  %v146_v8 = vld [vmem:[%s3543_s1 + $0x338] sm:$0xff] }
  0x46   :  { %1376 = vmatpush1.msk.msra.mxu1 %vm204_vm0, %v171_v12  ;;  %352 = vmatprep.mubr.f32.mxu1 %v2005_v20  ;;  %v1695_v12 = vpack.c.bf16 %v680_v4, %v678_v3  ;;  %v1631_v4 = vpack.c.bf16 %v138_v2, %v134_v1  ;;  %v158_v19 = vld [vmem:[%s3543_s1 + $0x398] sm:$0xff]  ;;  %v702_v1 = vld [vmem:[%s3545_s4 + $0x228] sm:$0xff] }
  0x47   :  { %1588 = vmatprep.subr.bf16.mxu1 %v1587_v13  ;;  %1692 = vmatprep.subr.bf16.mxu0 %v1691_v0  ;;  %v677_v13 = vld [vmem:[%s3545_s4 + $0x160] sm:$0xff]  ;;  %v129_v0 = vld [vmem:[%s3543_s1 + $0x2b0] sm:$0xff]  ;;  %v162_v21 = vld [vmem:[%s3543_s1 + $0x3b8] sm:$0xff] }
  0x48   :  { %v1697_v23 = vpack.c.bf16 %v679_v14, %v677_v13  ;;  %v1629_v3 = vpack.c.bf16 %v129_v0, %v125_v63  ;;  %v150_v13 = vld [vmem:[%s3543_s1 + $0x358] sm:$0xff]  ;;  %v699_v63 = vld [vmem:[%s3545_s4 + $0x210] sm:$0xff] }
  0x49   :  { %1694 = vmatpush1.bf16.msra.mxu0 %v1693_v10  ;;  %v1635_v10 = vpack.c.bf16 %v146_v8, %v142_v7  ;;  %v154_v14 = vld [vmem:[%s3543_s1 + $0x378] sm:$0xff]  ;;  %v701_v7 = vld [vmem:[%s3545_s4 + $0x220] sm:$0xff]  ;;  %v703_v8 = vld [vmem:[%s3545_s4 + $0x230] sm:$0xff] }
  0x4a   :  { %1696 = vmatprep.subr.bf16.mxu0 %v1695_v12  ;;  %v145_v12 = vld [vmem:[%s3543_s1 + $0x330] sm:$0xff]  ;;  %v1639_v16 = vpack.c.bf16 %v154_v14, %v150_v13  ;;  %v166_v26 = vld [vmem:[%s3543_s1 + $0x3d8] sm:$0xff]  ;;  %v705_v13 = vld [vmem:[%s3545_s4 + $0x240] sm:$0xff] }
  0x4b   :  { %v1637_v15 = vpack.c.bf16 %v145_v12, %v141_v11  ;;  %v170_v27 = vld [vmem:[%s3543_s1 + $0x3f8] sm:$0xff]  ;;  %v1721_v11 = vpack.c.bf16 %v703_v8, %v701_v7  ;;  %v707_v14 = vld [vmem:[%s3545_s4 + $0x250] sm:$0xff]  ;;  %v742_v8 = vld [vmem:[%s3545_s4 + $0x368] sm:$0xff] }
  0x4c   :  { %v1647_v29 = vpack.c.bf16 %v170_v27, %v166_v26  ;;  %v692_v37 = vld [vmem:[%s3545_s4 + $0x1d8] sm:$0xff]  ;;  %v713_v26 = vld [vmem:[%s3545_s4 + $0x280] sm:$0xff]  ;;  %v715_v27 = vld [vmem:[%s3545_s4 + $0x290] sm:$0xff] }
  0x4d   :  { %1377 = vmatmul.mubr.msk.f32.vlgmr.msra.gmra.mrb[0].mxu1 %vm201_vm1, %v2408_v31  ;;  %1698 = vmatpush1.bf16.msra.mxu0 %v1697_v23  ;;  %v1643_v23 = vpack.c.bf16 %v162_v21, %v158_v19  ;;  %v700_v49 = vld [vmem:[%s3545_s4 + $0x218] sm:$0xff]  ;;  %v709_v19 = vld [vmem:[%s3545_s4 + $0x260] sm:$0xff]  ;;  %v711_v21 = vld [vmem:[%s3545_s4 + $0x270] sm:$0xff] }
  0x4e   :  { %1590 = vmatpush1.bf16.msra.mxu1 %v1589_v32  ;;  %423 = vmatprep.mubr.f32.mxu1 %v2170_v44  ;;  %v74_v44 = vld [vmem:[%s3543_s1 + $0xf8] sm:$0xff]  ;;  %v1611_v32 = vpack.c.bf16 %v98_v24, %v94_v22  ;;  %v157_v24 = vld [vmem:[%s3543_s1 + $0x390] sm:$0xff] }
  0x4f   :  { %1592 = vmatprep.subr.bf16.mxu1 %v1591_v33  ;;  %v1599_v58 = vpack.c.bf16 %v74_v44, %v70_v50  ;;  %v93_v33 = vld [vmem:[%s3543_s1 + $0x190] sm:$0xff]  ;;  %1700 = vmatprep.subr.bf16.mxu0 %v1699_v25  ;;  %v704_v2 = vld [vmem:[%s3545_s4 + $0x238] sm:$0xff] }
  0x50   :  { %v1613_v42 = vpack.c.bf16 %v97_v34, %v93_v33  ;;  %v109_v44 = vld [vmem:[%s3543_s1 + $0x210] sm:$0xff]  ;;  %v174_v34 = vld [vmem:[%s3543_s1 + $0x418] sm:$0x7] }
  0x51   :  { %1702 = vmatpush1.bf16.msra.mxu0 %v1701_v36  ;;  %v1621_v55 = vpack.c.bf16 %v113_v52, %v109_v44  ;;  %v161_v25 = vld [vmem:[%s3543_s1 + $0x3b0] sm:$0xff]  ;;  %v690_v36 = vld [vmem:[%s3545_s4 + $0x1c8] sm:$0xff] }
  0x52   :  { %1594 = vmatpush1.bf16.msra.mxu1 %v1593_v46  ;;  %v105_v46 = vld [vmem:[%s3543_s1 + $0x1f0] sm:$0xff]  ;;  %1704 = vmatprep.subr.bf16.mxu0 %v1703_v38  ;;  %v1645_v28 = vpack.c.bf16 %v161_v25, %v157_v24  ;;  %v1707_v38 = vpack.c.bf16 %v692_v37, %v690_v36  ;;  %v1729_v24 = vpack.c.bf16 %v711_v21, %v709_v19  ;;  %v724_v36 = vld [vmem:[%s3545_s4 + $0x2d8] sm:$0xff]  ;;  %v750_v21 = vld [vmem:[%s3545_s4 + $0x3a8] sm:$0xff] }
  0x53   :  { %1596 = vmatprep.subr.bf16.mxu1 %v1595_v47  ;;  %v1705_v47 = vpack.c.bf16 %v687_v40, %v685_v39  ;;  %v1617_v50 = vpack.c.bf16 %v105_v46, %v101_v45  ;;  %v691_v39 = vld [vmem:[%s3545_s4 + $0x1d0] sm:$0xff]  ;;  %v693_v45 = vld [vmem:[%s3545_s4 + $0x1e0] sm:$0xff] }
  0x54   :  { %v695_v46 = vld [vmem:[%s3545_s4 + $0x1f0] sm:$0xff] }
  0x55   :  { %1706 = vmatpush1.bf16.msra.mxu0 %v1705_v47  ;;  %v1713_v47 = vpack.c.bf16 %v695_v46, %v693_v45  ;;  %v725_v45 = vld [vmem:[%s3545_s4 + $0x2e0] sm:$0xff]  ;;  %v727_v46 = vld [vmem:[%s3545_s4 + $0x2f0] sm:$0xff] }
  0x56   :  { %1598 = vmatpush1.bf16.msra.mxu1 %v1597_v57  ;;  %v117_v57 = vld [vmem:[%s3543_s1 + $0x250] sm:$0xff]  ;;  %1708 = vmatprep.subr.bf16.mxu0 %v1707_v38 }
  0x57   :  { %1600 = vmatprep.subr.bf16.mxu1 %v1599_v58  ;;  %v121_v58 = vld [vmem:[%s3543_s1 + $0x270] sm:$0xff] }
  0x58   :  { %v1625_v61 = vpack.c.bf16 %v121_v58, %v117_v57  ;;  %v739_v7 = vld [vmem:[%s3545_s4 + $0x350] sm:$0xff] }
  0x59   :  { %v747_v19 = vld [vmem:[%s3545_s4 + $0x390] sm:$0xff] }
  0x5a   :  { %1602 = vmatpush1.bf16.msra.mxu1 %v1601_v5  ;;  %v133_v5 = vld [vmem:[%s3543_s1 + $0x2d0] sm:$0xff] }
  0x5b   :  { %1604 = vmatprep.subr.bf16.mxu1 %v1603_v6  ;;  %v137_v6 = vld [vmem:[%s3543_s1 + $0x2f0] sm:$0xff] }
  0x5c   :  { %v1633_v9 = vpack.c.bf16 %v137_v6, %v133_v5  ;;  %v1719_v6 = vpack.c.bf16 %v704_v2, %v702_v1  ;;  %v735_v1 = vld [vmem:[%s3545_s4 + $0x330] sm:$0xff]  ;;  %v738_v2 = vld [vmem:[%s3545_s4 + $0x348] sm:$0xff] }
  0x5e   :  { %1606 = vmatpush1.bf16.msra.mxu1 %v1605_v17  ;;  %v149_v17 = vld [vmem:[%s3543_s1 + $0x350] sm:$0xff] }
  0x5f   :  { %1608 = vmatprep.subr.bf16.mxu1 %v1607_v18  ;;  %v153_v18 = vld [vmem:[%s3543_s1 + $0x370] sm:$0xff] }
  0x60   :  { %v1641_v22 = vpack.c.bf16 %v153_v18, %v149_v17  ;;  %v1725_v17 = vpack.c.bf16 %v707_v14, %v705_v13  ;;  %v743_v13 = vld [vmem:[%s3545_s4 + $0x370] sm:$0xff]  ;;  %v746_v14 = vld [vmem:[%s3545_s4 + $0x388] sm:$0xff] }
  0x62   :  { %1610 = vmatpush1.bf16.msra.mxu1 %v1609_v30  ;;  %v165_v30 = vld [vmem:[%s3543_s1 + $0x3d0] sm:$0xff] }
  0x63   :  { %1612 = vmatprep.subr.bf16.mxu1 %v1611_v32  ;;  %v169_v32 = vld [vmem:[%s3543_s1 + $0x3f0] sm:$0xff] }
  0x64   :  { %v1649_v33 = vpack.c.bf16 %v169_v32, %v165_v30  ;;  %v1733_v30 = vpack.c.bf16 %v715_v27, %v713_v26  ;;  %v751_v26 = vld [vmem:[%s3545_s4 + $0x3b0] sm:$0xff]  ;;  %v754_v27 = vld [vmem:[%s3545_s4 + $0x3c8] sm:$0xff] }
  0x66   :  { %1614 = vmatpush1.bf16.msra.mxu1 %v1613_v42  ;;  %v696_v42 = vld [vmem:[%s3545_s4 + $0x1f8] sm:$0xff] }
  0x67   :  { %1616 = vmatprep.subr.bf16.mxu1 %v1615_v43 }
  0x6a   :  { %1618 = vmatpush1.bf16.msra.mxu1 %v1617_v50  ;;  %v1715_v50 = vpack.c.bf16 %v700_v49, %v698_v48  ;;  %v732_v48 = vld [vmem:[%s3545_s4 + $0x318] sm:$0xff]  ;;  %v1745_v49 = vpack.c.bf16 %v727_v46, %v725_v45 }
  0x6b   :  { %1620 = vmatprep.subr.bf16.mxu1 %v1619_v51  ;;  %v177_v51 = vlaneseq }
  0x6d   :  { %v2695_v44 = vshrl.u32 %v177_v51, 7  ;;  %v729_v51 = vld [vmem:[%s3545_s4 + $0x300] sm:$0xff] }
  0x6e   :  { %1622 = vmatpush1.bf16.msra.mxu1 %v1621_v55 }
  0x6f   :  { %1624 = vmatprep.subr.bf16.mxu1 %v1623_v56  ;;  %v179_v52 = vsub.s32 0, %v2695_v44  ;;  %v183_v54 = vsub.s32 1, %v2695_v44 }
  0x71   :  { %v180_v55 = vrot.slane %v2701_v53, %v179_v52  ;;  %v184_v56 = vrot.slane %v2701_v53, %v183_v54 }
  0x72   :  { %1626 = vmatpush1.bf16.msra.mxu1 %v1625_v61 }
  0x73   :  { %1628 = vmatprep.subr.bf16.mxu1 %v1627_v62  ;;  %v697_v62 = vld [vmem:[%s3545_s4 + $0x200] sm:$0xff] }
  0x76   :  { %1630 = vmatpush1.bf16.msra.mxu1 %v1629_v3 }
  0x77   :  { %1632 = vmatprep.subr.bf16.mxu1 %v1631_v4  ;;  %v1717_v4 = vpack.c.bf16 %v699_v63, %v697_v62  ;;  %v733_v63 = vld [vmem:[%s3545_s4 + $0x320] sm:$0xff] }
  0x7a   :  { %1634 = vmatpush1.bf16.msra.mxu1 %v1633_v9  ;;  %v706_v9 = vld [vmem:[%s3545_s4 + $0x248] sm:$0xff] }
  0x7b   :  { %1636 = vmatprep.subr.bf16.mxu1 %v1635_v10  ;;  %v708_v10 = vld [vmem:[%s3545_s4 + $0x258] sm:$0xff] }
  0x7c   :  { %v1723_v12 = vpack.c.bf16 %v708_v10, %v706_v9  ;;  %v744_v9 = vld [vmem:[%s3545_s4 + $0x378] sm:$0xff] }
  0x7e   :  { %1638 = vmatpush1.bf16.msra.mxu1 %v1637_v15  ;;  %v710_v15 = vld [vmem:[%s3545_s4 + $0x268] sm:$0xff] }
  0x7f   :  { %1640 = vmatprep.subr.bf16.mxu1 %v1639_v16  ;;  %v712_v16 = vld [vmem:[%s3545_s4 + $0x278] sm:$0xff] }
  0x80   :  { %v1727_v18 = vpack.c.bf16 %v712_v16, %v710_v15  ;;  %v748_v15 = vld [vmem:[%s3545_s4 + $0x398] sm:$0xff] }
  0x82   :  { %1642 = vmatpush1.bf16.msra.mxu1 %v1641_v22  ;;  %v714_v22 = vld [vmem:[%s3545_s4 + $0x288] sm:$0xff] }
  0x83   :  { %1644 = vmatprep.subr.bf16.mxu1 %v1643_v23  ;;  %v716_v23 = vld [vmem:[%s3545_s4 + $0x298] sm:$0xff] }
  0x84   :  { %v1731_v25 = vpack.c.bf16 %v716_v23, %v714_v22  ;;  %v752_v22 = vld [vmem:[%s3545_s4 + $0x3b8] sm:$0xff] }
  0x86   :  { %1646 = vmatpush1.bf16.msra.mxu1 %v1645_v28  ;;  %v718_v28 = vld [vmem:[%s3545_s4 + $0x2a8] sm:$0xff] }
  0x87   :  { %1648 = vmatprep.subr.bf16.mxu1 %v1647_v29  ;;  %v720_v29 = vld [vmem:[%s3545_s4 + $0x2b8] sm:$0xff] }
  0x88   :  { %v1735_v32 = vpack.c.bf16 %v720_v29, %v718_v28  ;;  %v756_v28 = vld [vmem:[%s3545_s4 + $0x3d8] sm:$0xff] }
  0x8a   :  { %1650 = vmatpush1.bf16.msra.mxu1 %v1649_v33  ;;  %v717_v33 = vld [vmem:[%s3545_s4 + $0x2a0] sm:$0xff] }
  0x8b   :  { %1378 = vmatprep.subr.msk.mxu1 %vm204_vm0, %v174_v34  ;;  %v719_v34 = vld [vmem:[%s3545_s4 + $0x2b0] sm:$0xff] }
  0x8c   :  { %v1737_v37 = vpack.c.bf16 %v719_v34, %v717_v33  ;;  %v755_v33 = vld [vmem:[%s3545_s4 + $0x3d0] sm:$0xff]  ;;  %v758_v34 = vld [vmem:[%s3545_s4 + $0x3e8] sm:$0xff] }
  0x8d   :  { %424 = vmatmul.mubr.f32.vlgmr.msra.gmra.mrb[2].mxu1 %v2160_v41  ;;  %v689_v41 = vld [vmem:[%s3545_s4 + $0x1c0] sm:$0xff] }
  0x8e   :  { %1379 = vmatpush1.msk.msra.mxu1 %vm204_vm0, %v173_v35  ;;  %494 = vmatprep.mubr.f32.mxu1 %v2005_v20  ;;  %v1709_v40 = vpack.c.bf16 %v691_v39, %v689_v41  ;;  %v722_v35 = vld [vmem:[%s3545_s4 + $0x2c8] sm:$0xff]  ;;  %v721_v41 = vld [vmem:[%s3545_s4 + $0x2c0] sm:$0xff]  ;;  %v723_v39 = vld [vmem:[%s3545_s4 + $0x2d0] sm:$0xff] }
  0x8f   :  { %v1739_v38 = vpack.c.bf16 %v724_v36, %v722_v35  ;;  %v760_v35 = vld [vmem:[%s3545_s4 + $0x3f8] sm:$0xff] }
  0x90   :  { %1710 = vmatpush1.bf16.msra.mxu0 %v1709_v40  ;;  %v726_v40 = vld [vmem:[%s3545_s4 + $0x2e8] sm:$0xff] }
  0x95   :  { %1380 = vmatmul.mubr.msk.f32.vlgmr.msra.gmra.mrb[2].mxu1 %vm201_vm1, %v2408_v31  ;;  %v694_v31 = vld [vmem:[%s3545_s4 + $0x1e8] sm:$0xff] }
  0x96   :  { %v1711_v43 = vpack.c.bf16 %v696_v42, %v694_v31  ;;  %v728_v31 = vld [vmem:[%s3545_s4 + $0x2f8] sm:$0xff]  ;;  %v1741_v42 = vpack.c.bf16 %v723_v39, %v721_v41  ;;  %v759_v41 = vld [vmem:[%s3545_s4 + $0x3f0] sm:$0xff]  ;;  %v506_v39 = vld [vmem:[%s3547_s3 + $0x8] sm:$0xff] }
  0x98   :  { %1712 = vmatprep.subr.bf16.mxu0 %v1711_v43  ;;  %v1743_v43 = vpack.c.bf16 %v728_v31, %v726_v40  ;;  %v508_v40 = vld [vmem:[%s3547_s3 + $0x18] sm:$0xff]  ;;  %v187_v31 = vsub.s32 2, %v2695_v44 }
  0x99   :  { %1714 = vmatpush1.bf16.msra.mxu0 %v1713_v47  ;;  %v730_v47 = vld [vmem:[%s3545_s4 + $0x308] sm:$0xff]  ;;  %v1779_v45 = vpack.c.bf16 %v508_v40, %v506_v39  ;;  %v521_v39 = vld [vmem:[%s3547_s3 + $0x80] sm:$0xff]  ;;  %v523_v40 = vld [vmem:[%s3547_s3 + $0x90] sm:$0xff] }
  0x9a   :  { %1716 = vmatprep.subr.bf16.mxu0 %v1715_v50  ;;  %v1747_v50 = vpack.c.bf16 %v732_v48, %v730_v47  ;;  %v188_v46 = vrot.slane %v2701_v53, %v187_v31 }
 0x120   :  { %v354_v57 = vpop.f32.mrb[0].mxu1 }
 0x121   :  { %v2710_v58 = vadd.f32 %v354_v57, %v180_v55  ;;  %v356_v59 = vpop.f32.mrb[1].mxu1  ;;  %v731_v55 = vld [vmem:[%s3545_s4 + $0x310] sm:$0xff]  ;;  %v736_v57 = vld [vmem:[%s3545_s4 + $0x338] sm:$0xff] }
 0x122   :  { %v2712_v60 = vadd.f32 %v356_v59, %v184_v56  ;;  %v734_v56 = vld [vmem:[%s3545_s4 + $0x328] sm:$0xff]  ;;  %v1749_v59 = vpack.c.bf16 %v731_v55, %v729_v51 }
 0x123   :  { %v501_v61 = vmax.f32 %v2710_v58, 0.0  ;;  %v1751_v62 = vpack.c.bf16 %v736_v57, %v734_v56  ;;  %v505_v56 = vld [vmem:[%s3547_s3] sm:$0xff]  ;;  %v507_v57 = vld [vmem:[%s3547_s3 + $0x10] sm:$0xff]  ;;  %v582_v58 = vld [vmem:[%s3547_s3 + $0x268] sm:$0xff] }
 0x124   :  { %v502_v0 = vmax.f32 %v2712_v60, 0.0  ;;  %v1073_v60 = vld [vmem:[%s3548_s6] sm:$0xff] }
 0x125   :  { %v765_v5 = vrot.slane %v501_v61, 2 }
 0x126   :  { %v766_v3 = vrot.slane %v502_v0, 2 }
 0x128   :  { %837 = vmatprep.mubr.f32.mxu0 %v766_v3  ;;  %v740_v3 = vld [vmem:[%s3545_s4 + $0x358] sm:$0xff] }
 0x129   :  { %838 = vmatmul.mubr.f32.vlgmr.msra.gmra.mrb[0].mxu0 %v765_v5  ;;  %v1755_v5 = vpack.c.bf16 %v740_v3, %v738_v2 }
 0x12a   :  { %1718 = vmatpush1.bf16.msra.mxu0 %v1717_v4  ;;  %v1753_v4 = vpack.c.bf16 %v735_v1, %v733_v63  ;;  %v1781_v1 = vpack.c.bf16 %v507_v57, %v505_v56  ;;  %v1098_v56 = vld [vmem:[%s3548_s6 + $0xc8] sm:$0xff]  ;;  %v1797_v57 = vpack.c.bf16 %v523_v40, %v521_v39  ;;  %v548_v39 = vld [vmem:[%s3547_s3 + $0x158] sm:$0xff] }
 0x12b   :  { %1720 = vmatprep.subr.bf16.mxu0 %v1719_v6  ;;  %v737_v6 = vld [vmem:[%s3545_s4 + $0x340] sm:$0xff] }
 0x12c   :  { %v1757_v10 = vpack.c.bf16 %v739_v7, %v737_v6  ;;  %v514_v6 = vld [vmem:[%s3547_s3 + $0x48] sm:$0xff]  ;;  %v516_v7 = vld [vmem:[%s3547_s3 + $0x58] sm:$0xff] }
 0x12e   :  { %1722 = vmatpush1.bf16.msra.mxu0 %v1721_v11  ;;  %v1759_v11 = vpack.c.bf16 %v744_v9, %v742_v8  ;;  %v513_v8 = vld [vmem:[%s3547_s3 + $0x40] sm:$0xff]  ;;  %v515_v9 = vld [vmem:[%s3547_s3 + $0x50] sm:$0xff] }
 0x12f   :  { %1724 = vmatprep.subr.bf16.mxu0 %v1723_v12  ;;  %v741_v12 = vld [vmem:[%s3545_s4 + $0x360] sm:$0xff] }
 0x130   :  { %v1761_v16 = vpack.c.bf16 %v743_v13, %v741_v12  ;;  %v520_v12 = vld [vmem:[%s3547_s3 + $0x78] sm:$0xff]  ;;  %v1089_v13 = vld [vmem:[%s3548_s6 + $0x80] sm:$0xff] }
 0x132   :  { %1726 = vmatpush1.bf16.msra.mxu0 %v1725_v17  ;;  %v1763_v17 = vpack.c.bf16 %v748_v15, %v746_v14  ;;  %v1090_v14 = vld [vmem:[%s3548_s6 + $0x88] sm:$0xff] }
 0x133   :  { %1728 = vmatprep.subr.bf16.mxu0 %v1727_v18  ;;  %v745_v18 = vld [vmem:[%s3545_s4 + $0x380] sm:$0xff]  ;;  %v1907_v15 = vpack.c.bf16 %v1090_v14, %v1089_v13  ;;  %v534_v14 = vld [vmem:[%s3547_s3 + $0xe8] sm:$0xff] }
 0x134   :  { %v1765_v23 = vpack.c.bf16 %v747_v19, %v745_v18  ;;  %v1092_v18 = vld [vmem:[%s3548_s6 + $0x98] sm:$0xff] }
 0x135   :  { %1908 = vmatprep.subr.bf16.mxu1 %v1907_v15  ;;  %v1084_v15 = vld [vmem:[%s3548_s6 + $0x58] sm:$0xff] }
 0x136   :  { %1730 = vmatpush1.bf16.msra.mxu0 %v1729_v24  ;;  %v1767_v24 = vpack.c.bf16 %v752_v22, %v750_v21  ;;  %v1075_v22 = vld [vmem:[%s3548_s6 + $0x10] sm:$0xff] }
 0x137   :  { %1732 = vmatprep.subr.bf16.mxu0 %v1731_v25  ;;  %v749_v25 = vld [vmem:[%s3545_s4 + $0x3a0] sm:$0xff] }
 0x138   :  { %v1769_v29 = vpack.c.bf16 %v751_v26, %v749_v25  ;;  %v1094_v25 = vld [vmem:[%s3548_s6 + $0xa8] sm:$0xff]  ;;  %v1789_v26 = vpack.c.bf16 %v515_v9, %v513_v8  ;;  %v1100_v8 = vld [vmem:[%s3548_s6 + $0xd8] sm:$0xff] }
 0x13a   :  { %1734 = vmatpush1.bf16.msra.mxu0 %v1733_v30  ;;  %v1771_v30 = vpack.c.bf16 %v756_v28, %v754_v27  ;;  %v517_v27 = vld [vmem:[%s3547_s3 + $0x60] sm:$0xff]  ;;  %v519_v28 = vld [vmem:[%s3547_s3 + $0x70] sm:$0xff] }
 0x13b   :  { %1736 = vmatprep.subr.bf16.mxu0 %v1735_v32  ;;  %v753_v32 = vld [vmem:[%s3545_s4 + $0x3c0] sm:$0xff] }
 0x13c   :  { %v1773_v36 = vpack.c.bf16 %v755_v33, %v753_v32  ;;  %v522_v32 = vld [vmem:[%s3547_s3 + $0x88] sm:$0xff] }
 0x13e   :  { %1738 = vmatpush1.bf16.msra.mxu0 %v1737_v37  ;;  %v1775_v37 = vpack.c.bf16 %v760_v35, %v758_v34  ;;  %v1077_v34 = vld [vmem:[%s3548_s6 + $0x20] sm:$0xff]  ;;  %v1078_v35 = vld [vmem:[%s3548_s6 + $0x28] sm:$0xff] }
 0x13f   :  { %1740 = vmatprep.subr.bf16.mxu0 %v1739_v38  ;;  %v757_v38 = vld [vmem:[%s3545_s4 + $0x3e0] sm:$0xff]  ;;  %v1917_v31 = vpack.c.bf16 %v1078_v35, %v1077_v34  ;;  %v544_v34 = vld [vmem:[%s3547_s3 + $0x138] sm:$0xff] }
 0x142   :  { %1742 = vmatpush1.bf16.msra.mxu0 %v1741_v42  ;;  %v191_v42 = vsub.s32 3, %v2695_v44  ;;  %v1185_v44 = vld [vmem:[%s3550_s8 + $0x10] sm:$0xff] }
 0x143   :  { %1744 = vmatprep.subr.bf16.mxu0 %v1743_v43  ;;  %v1777_v43 = vpack.c.bf16 %v759_v41, %v757_v38  ;;  %v1096_v38 = vld [vmem:[%s3548_s6 + $0xb8] sm:$0xff]  ;;  %v1793_v41 = vpack.c.bf16 %v519_v28, %v517_v27 }
 0x144   :  { %v192_v47 = vrot.slane %v2701_v53, %v191_v42  ;;  %v540_v27 = vld [vmem:[%s3547_s3 + $0x118] sm:$0xff] }
 0x146   :  { %1746 = vmatpush1.bf16.msra.mxu0 %v1745_v49 }
 0x147   :  { %1748 = vmatprep.subr.bf16.mxu0 %v1747_v50 }
 0x14a   :  { %1750 = vmatpush1.bf16.msra.mxu0 %v1749_v59  ;;  %v510_v59 = vld [vmem:[%s3547_s3 + $0x28] sm:$0xff] }
 0x14b   :  { %1752 = vmatprep.subr.bf16.mxu0 %v1751_v62  ;;  %v512_v62 = vld [vmem:[%s3547_s3 + $0x38] sm:$0xff] }
 0x14c   :  { %v1783_v3 = vpack.c.bf16 %v512_v62, %v510_v59  ;;  %v525_v59 = vld [vmem:[%s3547_s3 + $0xa0] sm:$0xff]  ;;  %v527_v62 = vld [vmem:[%s3547_s3 + $0xb0] sm:$0xff] }
 0x14d   :  { %v1801_v9 = vpack.c.bf16 %v527_v62, %v525_v59  ;;  %v556_v59 = vld [vmem:[%s3547_s3 + $0x198] sm:$0xff] }
 0x14e   :  { %1754 = vmatpush1.bf16.msra.mxu0 %v1753_v4  ;;  %v509_v4 = vld [vmem:[%s3547_s3 + $0x20] sm:$0xff] }
 0x14f   :  { %1756 = vmatprep.subr.bf16.mxu0 %v1755_v5  ;;  %v511_v5 = vld [vmem:[%s3547_s3 + $0x30] sm:$0xff] }
 0x152   :  { %1758 = vmatpush1.bf16.msra.mxu0 %v1757_v10  ;;  %v1785_v10 = vpack.c.bf16 %v511_v5, %v509_v4  ;;  %v1081_v4 = vld [vmem:[%s3548_s6 + $0x40] sm:$0xff]  ;;  %v1082_v5 = vld [vmem:[%s3548_s6 + $0x48] sm:$0xff] }
 0x153   :  { %1760 = vmatprep.subr.bf16.mxu0 %v1759_v11  ;;  %v518_v11 = vld [vmem:[%s3547_s3 + $0x68] sm:$0xff] }
 0x156   :  { %1762 = vmatpush1.bf16.msra.mxu0 %v1761_v16  ;;  %v1074_v16 = vld [vmem:[%s3548_s6 + $0x8] sm:$0xff] }
 0x157   :  { %1764 = vmatprep.subr.bf16.mxu0 %v1763_v17  ;;  %v1091_v17 = vld [vmem:[%s3548_s6 + $0x90] sm:$0xff]  ;;  %v1909_v19 = vpack.c.bf16 %v1074_v16, %v1073_v60  ;;  %v536_v16 = vld [vmem:[%s3547_s3 + $0xf8] sm:$0xff] }
 0x158   :  { %v1911_v21 = vpack.c.bf16 %v1092_v18, %v1091_v17  ;;  %v1101_v17 = vld [vmem:[%s3548_s6 + $0xe0] sm:$0xff]  ;;  %v1102_v18 = vld [vmem:[%s3548_s6 + $0xe8] sm:$0xff] }
 0x159   :  { %1910 = vmatpush3.bf16.msra.mxu1 %v1909_v19 }
 0x15a   :  { %1766 = vmatpush1.bf16.msra.mxu0 %v1765_v23  ;;  %v1076_v23 = vld [vmem:[%s3548_s6 + $0x18] sm:$0xff]  ;;  %1912 = vmatprep.subr.bf16.mxu1 %v1911_v21 }
 0x15b   :  { %1768 = vmatprep.subr.bf16.mxu0 %v1767_v24  ;;  %v1093_v24 = vld [vmem:[%s3548_s6 + $0xa0] sm:$0xff] }
 0x15c   :  { %v1915_v33 = vpack.c.bf16 %v1094_v25, %v1093_v24  ;;  %v535_v24 = vld [vmem:[%s3547_s3 + $0xf0] sm:$0xff]  ;;  %v1931_v25 = vpack.c.bf16 %v1102_v18, %v1101_v17  ;;  %v565_v17 = vld [vmem:[%s3547_s3 + $0x1e0] sm:$0xff] }
 0x15d   :  { %v567_v18 = vld [vmem:[%s3547_s3 + $0x1f0] sm:$0xff] }
 0x15e   :  { %1770 = vmatpush1.bf16.msra.mxu0 %v1769_v29  ;;  %v1913_v29 = vpack.c.bf16 %v1076_v23, %v1075_v22  ;;  %v1807_v22 = vpack.c.bf16 %v536_v16, %v534_v14  ;;  %v533_v23 = vld [vmem:[%s3547_s3 + $0xe0] sm:$0xff]  ;;  %v563_v14 = vld [vmem:[%s3547_s3 + $0x1d0] sm:$0xff] }
 0x15f   :  { %1772 = vmatprep.subr.bf16.mxu0 %v1771_v30  ;;  %v1791_v30 = vpack.c.bf16 %v520_v12, %v518_v11  ;;  %v531_v11 = vld [vmem:[%s3547_s3 + $0xd0] sm:$0xff]  ;;  %v1925_v12 = vpack.c.bf16 %v1082_v5, %v1081_v4  ;;  %v1809_v28 = vpack.c.bf16 %v535_v24, %v533_v23  ;;  %v560_v4 = vld [vmem:[%s3547_s3 + $0x1b8] sm:$0xff]  ;;  %v569_v24 = vld [vmem:[%s3547_s3 + $0x200] sm:$0xff] }
 0x160   :  { %1914 = vmatpush3.bf16.msra.mxu1 %v1913_v29 }
 0x161   :  { %1916 = vmatprep.subr.bf16.mxu1 %v1915_v33  ;;  %v542_v33 = vld [vmem:[%s3547_s3 + $0x128] sm:$0xff] }
 0x162   :  { %1774 = vmatpush1.bf16.msra.mxu0 %v1773_v36  ;;  %v524_v36 = vld [vmem:[%s3547_s3 + $0x98] sm:$0xff] }
 0x163   :  { %1776 = vmatprep.subr.bf16.mxu0 %v1775_v37  ;;  %v1095_v37 = vld [vmem:[%s3548_s6 + $0xb0] sm:$0xff]  ;;  %v1795_v42 = vpack.c.bf16 %v524_v36, %v522_v32  ;;  %v1815_v36 = vpack.c.bf16 %v544_v34, %v542_v33  ;;  %v578_v33 = vld [vmem:[%s3547_s3 + $0x248] sm:$0xff]  ;;  %v580_v34 = vld [vmem:[%s3547_s3 + $0x258] sm:$0xff] }
 0x164   :  { %1918 = vmatpush3.bf16.msra.mxu1 %v1917_v31  ;;  %v539_v32 = vld [vmem:[%s3547_s3 + $0x110] sm:$0xff] }
 0x166   :  { %1778 = vmatpush1.bf16.msra.mxu0 %v1777_v43  ;;  %v526_v43 = vld [vmem:[%s3547_s3 + $0xa8] sm:$0xff] }
 0x167   :  { %1780 = vmatprep.subr.bf16.mxu0 %v1779_v45  ;;  %v1919_v45 = vpack.c.bf16 %v1096_v38, %v1095_v37  ;;  %v541_v37 = vld [vmem:[%s3547_s3 + $0x120] sm:$0xff]  ;;  %v543_v38 = vld [vmem:[%s3547_s3 + $0x130] sm:$0xff] }
 0x168   :  { %v496_v48 = vpop.f32.mrb[2].mxu1  ;;  %v1817_v40 = vpack.c.bf16 %v543_v38, %v541_v37  ;;  %v577_v37 = vld [vmem:[%s3547_s3 + $0x240] sm:$0xff]  ;;  %v579_v38 = vld [vmem:[%s3547_s3 + $0x250] sm:$0xff] }
 0x169   :  { %v2916_v49 = vadd.f32 %v496_v48, %v188_v46  ;;  %v498_v50 = vpop.f32.mrb[3].mxu1  ;;  %v1079_v46 = vld [vmem:[%s3548_s6 + $0x30] sm:$0xff]  ;;  %v528_v48 = vld [vmem:[%s3547_s3 + $0xb8] sm:$0xff]  ;;  %1920 = vmatprep.subr.bf16.mxu1 %v1919_v45  ;;  %v550_v45 = vld [vmem:[%s3547_s3 + $0x168] sm:$0xff] }
 0x16a   :  { %v2918_v51 = vadd.f32 %v498_v50, %v192_v47  ;;  %v1080_v47 = vld [vmem:[%s3548_s6 + $0x38] sm:$0xff]  ;;  %v1097_v50 = vld [vmem:[%s3548_s6 + $0xc0] sm:$0xff] }
 0x16b   :  { %v503_v55 = vmax.f32 %v2916_v49, 0.0 }
 0x16c   :  { %v504_v53 = vmax.f32 %v2918_v51, 0.0  ;;  %v1853_v51 = vpack.c.bf16 %v579_v38, %v577_v37 }
 0x16d   :  { %v767_v2 = vrot.slane %v503_v55, 2 }
 0x16e   :  { %v768_v63 = vrot.slane %v504_v53, 2 }
 0x170   :  { %908 = vmatprep.mubr.f32.mxu0 %v768_v63  ;;  %v1921_v63 = vpack.c.bf16 %v1080_v47, %v1079_v46  ;;  %v552_v46 = vld [vmem:[%s3547_s3 + $0x178] sm:$0xff] }
 0x171   :  { %909 = vmatmul.mubr.f32.vlgmr.msra.gmra.mrb[0].mxu0 %v767_v2  ;;  %v530_v2 = vld [vmem:[%s3547_s3 + $0xc8] sm:$0xff] }
 0x172   :  { %1782 = vmatpush1.bf16.msra.mxu0 %v1781_v1  ;;  %979 = vmatprep.mubr.f32.mxu0 %v502_v0  ;;  %v1787_v0 = vpack.c.bf16 %v516_v7, %v514_v6  ;;  %v1799_v1 = vpack.c.bf16 %v528_v48, %v526_v43  ;;  %v532_v6 = vld [vmem:[%s3547_s3 + $0xd8] sm:$0xff]  ;;  %v1099_v7 = vld [vmem:[%s3548_s6 + $0xd0] sm:$0xff]  ;;  %v1823_v48 = vpack.c.bf16 %v552_v46, %v550_v45  ;;  %v585_v45 = vld [vmem:[%s3547_s3 + $0x280] sm:$0xff] }
 0x173   :  { %1784 = vmatprep.subr.bf16.mxu0 %v1783_v3  ;;  %v1923_v3 = vpack.c.bf16 %v1098_v56, %v1097_v50  ;;  %1922 = vmatpush3.bf16.msra.mxu1 %v1921_v63  ;;  %v1803_v13 = vpack.c.bf16 %v532_v6, %v530_v2  ;;  %v1927_v60 = vpack.c.bf16 %v1100_v8, %v1099_v7  ;;  %v547_v43 = vld [vmem:[%s3547_s3 + $0x150] sm:$0xff]  ;;  %v549_v50 = vld [vmem:[%s3547_s3 + $0x160] sm:$0xff] }
 0x174   :  { %v551_v56 = vld [vmem:[%s3547_s3 + $0x170] sm:$0xff]  ;;  %v557_v7 = vld [vmem:[%s3547_s3 + $0x1a0] sm:$0xff] }
 0x175   :  { %1924 = vmatprep.subr.bf16.mxu1 %v1923_v3  ;;  %v1825_v62 = vpack.c.bf16 %v551_v56, %v549_v50  ;;  %v555_v2 = vld [vmem:[%s3547_s3 + $0x190] sm:$0xff]  ;;  %v558_v3 = vld [vmem:[%s3547_s3 + $0x1a8] sm:$0xff] }
 0x176   :  { %1786 = vmatpush1.bf16.msra.mxu0 %v1785_v10  ;;  %v529_v10 = vld [vmem:[%s3547_s3 + $0xc0] sm:$0xff]  ;;  %v1831_v6 = vpack.c.bf16 %v560_v4, %v558_v3  ;;  %v559_v8 = vld [vmem:[%s3547_s3 + $0x1b0] sm:$0xff] }
 0x177   :  { %1788 = vmatprep.subr.bf16.mxu0 %v1787_v0  ;;  %v1083_v0 = vld [vmem:[%s3548_s6 + $0x50] sm:$0xff]  ;;  %v1805_v19 = vpack.c.bf16 %v531_v11, %v529_v10  ;;  %1926 = vmatpush3.bf16.msra.mxu1 %v1925_v12  ;;  %v564_v10 = vld [vmem:[%s3547_s3 + $0x1d8] sm:$0xff]  ;;  %v1833_v11 = vpack.c.bf16 %v559_v8, %v557_v7  ;;  %v593_v3 = vld [vmem:[%s3547_s3 + $0x2c0] sm:$0xff] }
 0x178   :  { %v1929_v21 = vpack.c.bf16 %v1084_v15, %v1083_v0  ;;  %1928 = vmatprep.subr.bf16.mxu1 %v1927_v60  ;;  %v566_v60 = vld [vmem:[%s3547_s3 + $0x1e8] sm:$0xff]  ;;  %v568_v0 = vld [vmem:[%s3547_s3 + $0x1f8] sm:$0xff]  ;;  %v587_v46 = vld [vmem:[%s3547_s3 + $0x290] sm:$0xff] }
 0x179   :  { %v1839_v16 = vpack.c.bf16 %v568_v0, %v566_v60  ;;  %v1861_v50 = vpack.c.bf16 %v587_v46, %v585_v45  ;;  %v595_v4 = vld [vmem:[%s3547_s3 + $0x2d0] sm:$0xff]  ;;  %v601_v60 = vld [vmem:[%s3547_s3 + $0x300] sm:$0xff] }
 0x17a   :  { %1790 = vmatpush1.bf16.msra.mxu0 %v1789_v26  ;;  %v538_v26 = vld [vmem:[%s3547_s3 + $0x108] sm:$0xff]  ;;  %v1869_v7 = vpack.c.bf16 %v595_v4, %v593_v3  ;;  %v603_v0 = vld [vmem:[%s3547_s3 + $0x310] sm:$0xff] }
 0x17b   :  { %1792 = vmatprep.subr.bf16.mxu0 %v1791_v30  ;;  %1930 = vmatpush3.bf16.msra.mxu1 %v1929_v21  ;;  %v1811_v29 = vpack.c.bf16 %v540_v27, %v538_v26  ;;  %v537_v30 = vld [vmem:[%s3547_s3 + $0x100] sm:$0xff]  ;;  %v572_v21 = vld [vmem:[%s3547_s3 + $0x218] sm:$0xff]  ;;  %v574_v26 = vld [vmem:[%s3547_s3 + $0x228] sm:$0xff] }
 0x17c   :  { %1932 = vmatprep.subr.bf16.mxu1 %v1931_v25  ;;  %v1813_v35 = vpack.c.bf16 %v539_v32, %v537_v30  ;;  %v571_v25 = vld [vmem:[%s3547_s3 + $0x210] sm:$0xff]  ;;  %v576_v27 = vld [vmem:[%s3547_s3 + $0x238] sm:$0xff]  ;;  %v573_v30 = vld [vmem:[%s3547_s3 + $0x220] sm:$0xff] }
 0x17d   :  { %v575_v32 = vld [vmem:[%s3547_s3 + $0x230] sm:$0xff]  ;;  %v1086_v3 = vld [vmem:[%s3548_s6 + $0x68] sm:$0xff] }
 0x17e   :  { %1794 = vmatpush1.bf16.msra.mxu0 %v1793_v41  ;;  %v546_v41 = vld [vmem:[%s3547_s3 + $0x148] sm:$0xff] }
 0x17f   :  { %1796 = vmatprep.subr.bf16.mxu0 %v1795_v42  ;;  %v1819_v31 = vpack.c.bf16 %v548_v39, %v546_v41  ;;  %v545_v42 = vld [vmem:[%s3547_s3 + $0x140] sm:$0xff]  ;;  %v583_v39 = vld [vmem:[%s3547_s3 + $0x270] sm:$0xff] }
 0x180   :  { %v1821_v47 = vpack.c.bf16 %v547_v43, %v545_v42  ;;  %v581_v41 = vld [vmem:[%s3547_s3 + $0x260] sm:$0xff] }
 0x181   :  { %v1857_v42 = vpack.c.bf16 %v583_v39, %v581_v41 }
 0x182   :  { %1798 = vmatpush1.bf16.msra.mxu0 %v1797_v57  ;;  %v554_v57 = vld [vmem:[%s3547_s3 + $0x188] sm:$0xff] }
 0x183   :  { %1800 = vmatprep.subr.bf16.mxu0 %v1799_v1  ;;  %v1827_v63 = vpack.c.bf16 %v556_v59, %v554_v57  ;;  %v553_v1 = vld [vmem:[%s3547_s3 + $0x180] sm:$0xff]  ;;  %v591_v59 = vld [vmem:[%s3547_s3 + $0x2b0] sm:$0xff] }
 0x184   :  { %v1829_v5 = vpack.c.bf16 %v555_v2, %v553_v1  ;;  %v589_v57 = vld [vmem:[%s3547_s3 + $0x2a0] sm:$0xff] }
 0x185   :  { %v1865_v1 = vpack.c.bf16 %v591_v59, %v589_v57 }
 0x186   :  { %1802 = vmatpush1.bf16.msra.mxu0 %v1801_v9  ;;  %v562_v9 = vld [vmem:[%s3547_s3 + $0x1c8] sm:$0xff] }
 0x187   :  { %1804 = vmatprep.subr.bf16.mxu0 %v1803_v13  ;;  %v1835_v12 = vpack.c.bf16 %v564_v10, %v562_v9  ;;  %v561_v13 = vld [vmem:[%s3547_s3 + $0x1c0] sm:$0xff]  ;;  %v599_v10 = vld [vmem:[%s3547_s3 + $0x2f0] sm:$0xff] }
 0x188   :  { %v1837_v15 = vpack.c.bf16 %v563_v14, %v561_v13  ;;  %v597_v9 = vld [vmem:[%s3547_s3 + $0x2e0] sm:$0xff] }
 0x189   :  { %v1873_v13 = vpack.c.bf16 %v599_v10, %v597_v9  ;;  %v2006_v9 = vmov 0.0|0.0   ;;  %v1057_v10 = vld [vmem:[%s3549_s5] sm:$0x3] }
 0x18a   :  { %1806 = vmatpush1.bf16.msra.mxu0 %v1805_v19  ;;  %v570_v19 = vld [vmem:[%s3547_s3 + $0x208] sm:$0xff] }
 0x18b   :  { %1808 = vmatprep.subr.bf16.mxu0 %v1807_v22  ;;  %v1841_v22 = vpack.c.bf16 %v567_v18, %v565_v17  ;;  %v1843_v23 = vpack.c.bf16 %v572_v21, %v570_v19  ;;  %v1877_v17 = vpack.c.bf16 %v603_v0, %v601_v60  ;;  %v605_v19 = vld [vmem:[%s3547_s3 + $0x320] sm:$0xff]  ;;  %v607_v21 = vld [vmem:[%s3547_s3 + $0x330] sm:$0xff] }
 0x18c   :  { %v1183_v0 = vld [vmem:[%s3550_s8] sm:$0xff] }
 0x18e   :  { %1810 = vmatpush1.bf16.msra.mxu0 %v1809_v28  ;;  %v1845_v28 = vpack.c.bf16 %v571_v25, %v569_v24  ;;  %v1881_v24 = vpack.c.bf16 %v607_v21, %v605_v19  ;;  %v1187_v21 = vld [vmem:[%s3550_s8 + $0x20] sm:$0xff] }
 0x18f   :  { %1812 = vmatprep.subr.bf16.mxu0 %v1811_v29  ;;  %v1847_v29 = vpack.c.bf16 %v576_v27, %v574_v26  ;;  %v609_v26 = vld [vmem:[%s3547_s3 + $0x340] sm:$0xff]  ;;  %v611_v27 = vld [vmem:[%s3547_s3 + $0x350] sm:$0xff] }
 0x192   :  { %1814 = vmatpush1.bf16.msra.mxu0 %v1813_v35  ;;  %v1849_v35 = vpack.c.bf16 %v575_v32, %v573_v30  ;;  %v1885_v30 = vpack.c.bf16 %v611_v27, %v609_v26  ;;  %v1191_v27 = vld [vmem:[%s3550_s8 + $0x40] sm:$0xff] }
 0x193   :  { %1816 = vmatprep.subr.bf16.mxu0 %v1815_v36  ;;  %v1851_v36 = vpack.c.bf16 %v580_v34, %v578_v33  ;;  %v613_v33 = vld [vmem:[%s3547_s3 + $0x360] sm:$0xff]  ;;  %v615_v34 = vld [vmem:[%s3547_s3 + $0x370] sm:$0xff] }
 0x194   :  { %v1889_v37 = vpack.c.bf16 %v615_v34, %v613_v33  ;;  %v1195_v34 = vld [vmem:[%s3550_s8 + $0x60] sm:$0xff] }
 0x196   :  { %1818 = vmatpush1.bf16.msra.mxu0 %v1817_v40  ;;  %v586_v40 = vld [vmem:[%s3547_s3 + $0x288] sm:$0xff] }
 0x197   :  { %1820 = vmatprep.subr.bf16.mxu0 %v1819_v31  ;;  %v588_v31 = vld [vmem:[%s3547_s3 + $0x298] sm:$0xff] }
 0x198   :  { %v1859_v43 = vpack.c.bf16 %v588_v31, %v586_v40  ;;  %v621_v40 = vld [vmem:[%s3547_s3 + $0x3a0] sm:$0xff]  ;;  %v623_v31 = vld [vmem:[%s3547_s3 + $0x3b0] sm:$0xff] }
 0x199   :  { %v1897_v45 = vpack.c.bf16 %v623_v31, %v621_v40  ;;  %v1278_v40 = vld [vmem:[%s3552_s10 + $0x8] sm:$0xff] }
 0x19a   :  { %1822 = vmatpush1.bf16.msra.mxu0 %v1821_v47  ;;  %v590_v47 = vld [vmem:[%s3547_s3 + $0x2a8] sm:$0xff] }
 0x19b   :  { %1824 = vmatprep.subr.bf16.mxu0 %v1823_v48  ;;  %v592_v48 = vld [vmem:[%s3547_s3 + $0x2b8] sm:$0xff] }
 0x19c   :  { %v1863_v56 = vpack.c.bf16 %v592_v48, %v590_v47  ;;  %v625_v47 = vld [vmem:[%s3547_s3 + $0x3c0] sm:$0xff]  ;;  %v627_v48 = vld [vmem:[%s3547_s3 + $0x3d0] sm:$0xff] }
 0x19d   :  { %v1901_v57 = vpack.c.bf16 %v627_v48, %v625_v47  ;;  %v1281_v48 = vld [vmem:[%s3552_s10 + $0x20] sm:$0xff] }
 0x19e   :  { %1826 = vmatpush1.bf16.msra.mxu0 %v1825_v62  ;;  %v594_v62 = vld [vmem:[%s3547_s3 + $0x2c8] sm:$0xff] }
 0x19f   :  { %1828 = vmatprep.subr.bf16.mxu0 %v1827_v63  ;;  %v596_v63 = vld [vmem:[%s3547_s3 + $0x2d8] sm:$0xff] }
 0x1a0   :  { %v1867_v2 = vpack.c.bf16 %v596_v63, %v594_v62  ;;  %v629_v62 = vld [vmem:[%s3547_s3 + $0x3e0] sm:$0xff]  ;;  %v631_v63 = vld [vmem:[%s3547_s3 + $0x3f0] sm:$0xff] }
 0x1a2   :  { %1830 = vmatpush1.bf16.msra.mxu0 %v1829_v5  ;;  %v598_v5 = vld [vmem:[%s3547_s3 + $0x2e8] sm:$0xff] }
 0x1a3   :  { %1832 = vmatprep.subr.bf16.mxu0 %v1831_v6  ;;  %v600_v6 = vld [vmem:[%s3547_s3 + $0x2f8] sm:$0xff] }
 0x1a4   :  { %v1871_v8 = vpack.c.bf16 %v600_v6, %v598_v5  ;;  %v1103_v5 = vld [vmem:[%s3548_s6 + $0xf0] sm:$0xff]  ;;  %v1104_v6 = vld [vmem:[%s3548_s6 + $0xf8] sm:$0xff] }
 0x1a5   :  { %v1935_v49 = vpack.c.bf16 %v1104_v6, %v1103_v5  ;;  %v1289_v5 = vld [vmem:[%s3552_s10 + $0x60] sm:$0xff]  ;;  %v1290_v6 = vld [vmem:[%s3552_s10 + $0x68] sm:$0xff] }
 0x1a6   :  { %1834 = vmatpush1.bf16.msra.mxu0 %v1833_v11  ;;  %v602_v11 = vld [vmem:[%s3547_s3 + $0x308] sm:$0xff] }
 0x1a7   :  { %1836 = vmatprep.subr.bf16.mxu0 %v1835_v12  ;;  %v604_v12 = vld [vmem:[%s3547_s3 + $0x318] sm:$0xff] }
 0x1a8   :  { %v1875_v14 = vpack.c.bf16 %v604_v12, %v602_v11  ;;  %v1062_v11 = vrot.slane %v1057_v10, %v179_v52  ;;  %v1066_v12 = vrot.slane %v1057_v10, %v183_v54  ;;  %v1186_v52 = vld [vmem:[%s3550_s8 + $0x18] sm:$0xff]  ;;  %v1382_v10 = vld [vmem:[%s3553_s9] ss:$0 sm:$0xff] }
 0x1a9   :  { %v1943_v54 = vpack.c.bf16 %v1186_v52, %v1185_v44 }
 0x1aa   :  { %1838 = vmatpush1.bf16.msra.mxu0 %v1837_v15  ;;  %v606_v15 = vld [vmem:[%s3547_s3 + $0x328] sm:$0xff] }
 0x1ab   :  { %1840 = vmatprep.subr.bf16.mxu0 %v1839_v16  ;;  %v608_v16 = vld [vmem:[%s3547_s3 + $0x338] sm:$0xff] }
 0x1ac   :  { %v1879_v18 = vpack.c.bf16 %v608_v16, %v606_v15  ;;  %v1184_v15 = vld [vmem:[%s3550_s8 + $0x8] sm:$0xff] }
 0x1ae   :  { %1842 = vmatpush1.bf16.msra.mxu0 %v1841_v22  ;;  %v610_v22 = vld [vmem:[%s3547_s3 + $0x348] sm:$0xff] }
 0x1af   :  { %1844 = vmatprep.subr.bf16.mxu0 %v1843_v23  ;;  %v612_v23 = vld [vmem:[%s3547_s3 + $0x358] sm:$0xff] }
 0x1b0   :  { %v1883_v25 = vpack.c.bf16 %v612_v23, %v610_v22  ;;  %v1188_v22 = vld [vmem:[%s3550_s8 + $0x28] sm:$0xff] }
 0x1b1   :  { %980 = vmatmul.mubr.f32.vlgmr.msra.gmra.mrb[0].mxu0 %v501_v61  ;;  %v584_v61 = vld [vmem:[%s3547_s3 + $0x278] sm:$0xff]  ;;  %v1946_v23 = vpack.c.bf16 %v1188_v22, %v1187_v21 }
 0x1b2   :  { %1846 = vmatpush1.bf16.msra.mxu0 %v1845_v28  ;;  %1050 = vmatprep.mubr.f32.mxu0 %v504_v53  ;;  %v1855_v53 = vpack.c.bf16 %v584_v61, %v582_v58  ;;  %v614_v28 = vld [vmem:[%s3547_s3 + $0x368] sm:$0xff]  ;;  %v617_v58 = vld [vmem:[%s3547_s3 + $0x380] sm:$0xff]  ;;  %v619_v61 = vld [vmem:[%s3547_s3 + $0x390] sm:$0xff] }
 0x1b3   :  { %1848 = vmatprep.subr.bf16.mxu0 %v1847_v29  ;;  %v616_v29 = vld [vmem:[%s3547_s3 + $0x378] sm:$0xff]  ;;  %v1893_v41 = vpack.c.bf16 %v619_v61, %v617_v58 }
 0x1b4   :  { %v1887_v32 = vpack.c.bf16 %v616_v29, %v614_v28  ;;  %v1192_v28 = vld [vmem:[%s3550_s8 + $0x48] sm:$0xff] }
 0x1b5   :  { %v1952_v29 = vpack.c.bf16 %v1192_v28, %v1191_v27 }
 0x1b6   :  { %1850 = vmatpush1.bf16.msra.mxu0 %v1849_v35  ;;  %v618_v35 = vld [vmem:[%s3547_s3 + $0x388] sm:$0xff] }
 0x1b7   :  { %1852 = vmatprep.subr.bf16.mxu0 %v1851_v36  ;;  %v620_v36 = vld [vmem:[%s3547_s3 + $0x398] sm:$0xff] }
 0x1b8   :  { %v1891_v38 = vpack.c.bf16 %v620_v36, %v618_v35  ;;  %v1196_v35 = vld [vmem:[%s3550_s8 + $0x68] sm:$0xff] }
 0x1b9   :  { %v1958_v36 = vpack.c.bf16 %v1196_v35, %v1195_v34 }
 0x1ba   :  { %1854 = vmatpush1.bf16.msra.mxu0 %v1853_v51  ;;  %v622_v51 = vld [vmem:[%s3547_s3 + $0x3a8] sm:$0xff] }
 0x1bb   :  { %1856 = vmatprep.subr.bf16.mxu0 %v1855_v53  ;;  %v624_v53 = vld [vmem:[%s3547_s3 + $0x3b8] sm:$0xff] }
 0x1bc   :  { %v1895_v39 = vpack.c.bf16 %v624_v53, %v622_v51  ;;  %v1381_v51 = vld [vmem:[%s3551_s7] ss:$0 sm:$0xff] }
 0x1be   :  { %1858 = vmatpush1.bf16.msra.mxu0 %v1857_v42  ;;  %v626_v42 = vld [vmem:[%s3547_s3 + $0x3c8] sm:$0xff] }
 0x1bf   :  { %1860 = vmatprep.subr.bf16.mxu0 %v1859_v43  ;;  %v628_v43 = vld [vmem:[%s3547_s3 + $0x3d8] sm:$0xff] }
 0x1c0   :  { %v1899_v46 = vpack.c.bf16 %v628_v43, %v626_v42 }
 0x1c2   :  { %1862 = vmatpush1.bf16.msra.mxu0 %v1861_v50  ;;  %v630_v50 = vld [vmem:[%s3547_s3 + $0x3e8] sm:$0xff] }
 0x1c3   :  { %1864 = vmatprep.subr.bf16.mxu0 %v1863_v56  ;;  %v632_v56 = vld [vmem:[%s3547_s3 + $0x3f8] sm:$0xff] }
 0x1c4   :  { %v1903_v59 = vpack.c.bf16 %v632_v56, %v630_v50  ;;  %v1282_v50 = vld [vmem:[%s3552_s10 + $0x28] sm:$0xff] }
 0x1c5   :  { %v1970_v56 = vpack.c.bf16 %v1282_v50, %v1281_v48 }
 0x1c6   :  { %1866 = vmatpush1.bf16.msra.mxu0 %v1865_v1  ;;  %v1905_v1 = vpack.c.bf16 %v631_v63, %v629_v62  ;;  %v1285_v62 = vld [vmem:[%s3552_s10 + $0x40] sm:$0xff]  ;;  %v1286_v63 = vld [vmem:[%s3552_s10 + $0x48] sm:$0xff] }
 0x1c7   :  { %1868 = vmatprep.subr.bf16.mxu0 %v1867_v2  ;;  %v1085_v2 = vld [vmem:[%s3548_s6 + $0x60] sm:$0xff] }
 0x1c8   :  { %v1933_v4 = vpack.c.bf16 %v1086_v3, %v1085_v2  ;;  %v1287_v2 = vld [vmem:[%s3552_s10 + $0x50] sm:$0xff]  ;;  %v1288_v3 = vld [vmem:[%s3552_s10 + $0x58] sm:$0xff] }
 0x1ca   :  { %1870 = vmatpush1.bf16.msra.mxu0 %v1869_v7  ;;  %1934 = vmatpush3.bf16.msra.mxu1 %v1933_v4  ;;  %v1088_v7 = vld [vmem:[%s3548_s6 + $0x78] sm:$0xff]  ;;  %v1979_v4 = vpack.c.bf16 %v1288_v3, %v1287_v2 }
 0x1cb   :  { %1872 = vmatprep.subr.bf16.mxu0 %v1871_v8  ;;  %1936 = vmatprep.subr.bf16.mxu1 %v1935_v49  ;;  %v1982_v49 = vpack.c.bf16 %v1290_v6, %v1289_v5 }
 0x1ce   :  { %1874 = vmatpush1.bf16.msra.mxu0 %v1873_v13 }
 0x1cf   :  { %1876 = vmatprep.subr.bf16.mxu0 %v1875_v14 }
 0x1d2   :  { %1878 = vmatpush1.bf16.msra.mxu0 %v1877_v17 }
 0x1d3   :  { %1880 = vmatprep.subr.bf16.mxu0 %v1879_v18  ;;  %v1940_v18 = vpack.c.bf16 %v1184_v15, %v1183_v0 }
 0x1d6   :  { %1882 = vmatpush1.bf16.msra.mxu0 %v1881_v24  ;;  %v1189_v24 = vld [vmem:[%s3550_s8 + $0x30] sm:$0xff] }
 0x1d7   :  { %1884 = vmatprep.subr.bf16.mxu0 %v1883_v25  ;;  %v1190_v25 = vld [vmem:[%s3550_s8 + $0x38] sm:$0xff] }
 0x1d8   :  { %v1949_v26 = vpack.c.bf16 %v1190_v25, %v1189_v24 }
 0x1da   :  { %1886 = vmatpush1.bf16.msra.mxu0 %v1885_v30  ;;  %v1193_v30 = vld [vmem:[%s3550_s8 + $0x50] sm:$0xff] }
 0x1db   :  { %1888 = vmatprep.subr.bf16.mxu0 %v1887_v32  ;;  %v1194_v32 = vld [vmem:[%s3550_s8 + $0x58] sm:$0xff] }
 0x1dc   :  { %v1955_v33 = vpack.c.bf16 %v1194_v32, %v1193_v30 }
 0x1de   :  { %1890 = vmatpush1.bf16.msra.mxu0 %v1889_v37  ;;  %v1197_v37 = vld [vmem:[%s3550_s8 + $0x70] sm:$0xff] }
 0x1df   :  { %1892 = vmatprep.subr.bf16.mxu0 %v1891_v38  ;;  %v1198_v38 = vld [vmem:[%s3550_s8 + $0x78] sm:$0xff] }
 0x1e0   :  { %v1961_v58 = vpack.c.bf16 %v1198_v38, %v1197_v37 }
 0x1e2   :  { %1894 = vmatpush1.bf16.msra.mxu0 %v1893_v41 }
 0x1e3   :  { %1896 = vmatprep.subr.bf16.mxu0 %v1895_v39  ;;  %v1277_v39 = vld [vmem:[%s3552_s10] sm:$0xff] }
 0x1e4   :  { %v1964_v42 = vpack.c.bf16 %v1278_v40, %v1277_v39 }
 0x1e6   :  { %1898 = vmatpush1.bf16.msra.mxu0 %v1897_v45  ;;  %v1279_v45 = vld [vmem:[%s3552_s10 + $0x10] sm:$0xff] }
 0x1e7   :  { %1900 = vmatprep.subr.bf16.mxu0 %v1899_v46  ;;  %v1280_v46 = vld [vmem:[%s3552_s10 + $0x18] sm:$0xff] }
 0x1e8   :  { %v1967_v47 = vpack.c.bf16 %v1280_v46, %v1279_v45 }
 0x1ea   :  { %1902 = vmatpush1.bf16.msra.mxu0 %v1901_v57  ;;  %v1283_v57 = vld [vmem:[%s3552_s10 + $0x30] sm:$0xff] }
 0x1eb   :  { %1904 = vmatprep.subr.bf16.mxu0 %v1903_v59 }
 0x1ee   :  { %1906 = vmatpush1.bf16.msra.mxu0 %v1905_v1  ;;  %v1976_v1 = vpack.c.bf16 %v1286_v63, %v1285_v62 }
 0x1f1   :  { %1051 = vmatmul.mubr.f32.vlgmr.msra.gmra.mrb[0].mxu0 %v503_v55  ;;  %v1087_v55 = vld [vmem:[%s3548_s6 + $0x70] sm:$0xff] }
 0x1f2   :  { %v1937_v8 = vpack.c.bf16 %v1088_v7, %v1087_v55  ;;  %v1291_v55 = vld [vmem:[%s3552_s10 + $0x70] sm:$0xff]  ;;  %v1292_v7 = vld [vmem:[%s3552_s10 + $0x78] sm:$0xff] }
 0x1f4   :  { %1938 = vmatpush3.bf16.msra.mxu1 %v1937_v8  ;;  %v1985_v8 = vpack.c.bf16 %v1292_v7, %v1291_v55 }
 0x1f5   :  { %1939 = vmatprep.subr.bf16.mxu1 %v2006_v9 }
 0x2c4   :  { %v1052_v13 = vpop.f32.mrb[0].mxu0 }
 0x2c5   :  { %v1069_v14 = vadd.f32 %v1062_v11, %v1052_v13  ;;  %v1054_v60 = vpop.f32.mrb[1].mxu0 }
 0x2c6   :  { %v1070_v16 = vadd.f32 %v1066_v12, %v1054_v60 }
 0x2c7   :  { %v1071_v19 = vmax.f32 %v1069_v14, 0.0 }
 0x2c8   :  { %v1072_v17 = vmax.f32 %v1070_v16, 0.0 }
 0x2ca   :  { %1176 = vmatprep.mubr.f32.mxu1 %v1072_v17 }
 0x2cb   :  { %1177 = vmatmul.mubr.f32.vlgmr.msra.gmra.mrb[4].mxu1 %v1071_v19 }
 0x2cc   :  { %1941 = vmatpush3.bf16.msra.mxu1 %v1940_v18  ;;  %1485 = vmatprep.mubr.msk.f32.mxu1 %vm2007_vm2, %v2005_v20 }
 0x2cd   :  { %1942 = vmatprep.subr.bf16.mxu1 %v2006_v9 }
 0x2d0   :  { %1944 = vmatpush3.bf16.msra.mxu1 %v1943_v54 }
 0x2d1   :  { %1945 = vmatprep.subr.bf16.mxu1 %v2006_v9 }
 0x2d4   :  { %1947 = vmatpush3.bf16.msra.mxu1 %v1946_v23 }
 0x2d5   :  { %1948 = vmatprep.subr.bf16.mxu1 %v2006_v9 }
 0x2d8   :  { %1950 = vmatpush3.bf16.msra.mxu1 %v1949_v26 }
 0x2d9   :  { %1951 = vmatprep.subr.bf16.mxu1 %v2006_v9 }
 0x2dc   :  { %1953 = vmatpush3.bf16.msra.mxu1 %v1952_v29 }
 0x2dd   :  { %1954 = vmatprep.subr.bf16.mxu1 %v2006_v9 }
 0x2e0   :  { %1956 = vmatpush3.bf16.msra.mxu1 %v1955_v33 }
 0x2e1   :  { %1957 = vmatprep.subr.bf16.mxu1 %v2006_v9 }
 0x2e4   :  { %1959 = vmatpush3.bf16.msra.mxu1 %v1958_v36 }
 0x2e5   :  { %1960 = vmatprep.subr.bf16.mxu1 %v2006_v9 }
 0x2e8   :  { %1962 = vmatpush3.bf16.msra.mxu1 %v1961_v58 }
 0x2e9   :  { %1963 = vmatprep.subr.bf16.mxu1 %v2006_v9 }
 0x39e   :  { %v1416_v61 = vpop.f32.mrb[4].mxu1 }
 0x39f   :  { %v1417_v53 = vpop.f32.mrb[5].mxu1 }
 0x3a0   :  { %v1418_v41 = vadd.f32 %v1417_v53, %v1416_v61 }
 0x3a2   :  { %v1179_v31 = vadd.f32 %v1418_v41, %v1381_v51 }
 0x3a4   :  { %v1182_v43 = vmax.f32 %v1179_v31, 0.0 }
 0x3a6   :  { %1486 = vmatmul.mubr.f32.vlgmr.msra.gmra.mrb[6].mxu1 %v1182_v43 }
 0x3a7   :  { %1965 = vmatpush3.bf16.msra.mxu1 %v1964_v42  ;;  %1520 = vmatprep.mubr.msk.f32.mxu1 %vm2007_vm2, %v2005_v20  ;;  %v1284_v20 = vld [vmem:[%s3552_s10 + $0x38] sm:$0xff] }
 0x3a8   :  { %1966 = vmatprep.subr.bf16.mxu1 %v2006_v9  ;;  %v1973_v59 = vpack.c.bf16 %v1284_v20, %v1283_v57 }
 0x3ab   :  { %1968 = vmatpush3.bf16.msra.mxu1 %v1967_v47 }
 0x3ac   :  { %1969 = vmatprep.subr.bf16.mxu1 %v2006_v9 }
 0x3af   :  { %1971 = vmatpush3.bf16.msra.mxu1 %v1970_v56 }
 0x3b0   :  { %1972 = vmatprep.subr.bf16.mxu1 %v2006_v9 }
 0x3b3   :  { %1974 = vmatpush3.bf16.msra.mxu1 %v1973_v59 }
 0x3b4   :  { %1975 = vmatprep.subr.bf16.mxu1 %v2006_v9 }
 0x3b7   :  { %1977 = vmatpush3.bf16.msra.mxu1 %v1976_v1 }
 0x3b8   :  { %1978 = vmatprep.subr.bf16.mxu1 %v2006_v9 }
 0x3bb   :  { %1980 = vmatpush3.bf16.msra.mxu1 %v1979_v4 }
 0x3bc   :  { %1981 = vmatprep.subr.bf16.mxu1 %v2006_v9 }
 0x3bf   :  { %1983 = vmatpush3.bf16.msra.mxu1 %v1982_v49 }
 0x3c0   :  { %1984 = vmatprep.subr.bf16.mxu1 %v2006_v9  ;;  %v1383_v9 = vld [vmem:[%s3554_s11] ss:$0 sm:$0xff] }
 0x3c3   :  { %1986 = vmatpush3.bf16.msra.mxu1 %v1985_v8 }
 0x479   :  { %v1272_v11 = vpop.f32.mrb[6].mxu1 }
 0x47a   :  { %v1273_v12 = vadd.f32 %v1382_v10, %v1272_v11  ;;  %v1487_v13 = vpop.f32.mrb[7].mxu1 }
 0x47c   :  { %v1276_v14 = vmax.f32 %v1273_v12, 0.0 }
 0x47e   :  { %1521 = vmatmul.mubr.f32.vlgmr.msra.gmra.mrb[8].mxu1 %v1276_v14 }
 0x551   :  { %v1366_v60 = vpop.f32.mrb[8].mxu1 }
 0x552   :  { %v1367_v0 = vadd.f32 %v1383_v9, %v1366_v60  ;;  %v1522_v15 = vpop.f32.mrb[9].mxu1 }
 0x554   :  { %1370 = vst [vmem:[%s3555_s12] sm:$0x3] %v1367_v0 }

</bundles_post_ra>
